<compile_context>
chip_gen: v6e
topology: v6e:2x2x1
jax: 0.10.0
libtpu: 0.0.40
codegen_flags: <defaults>
</compile_context>

<pallas_src>
import functools

import jax
import jax.numpy as jnp
import numpy as np
from jax.experimental import pallas as pl
from jax.experimental.pallas import tpu as pltpu

F32 = jnp.float32
BF16 = jnp.bfloat16
_S = 5                                   # SubSpectralNorm groups
_ALIGN = 16                              # row alignment inside packed slabs
_VMEM = pl.BlockSpec(memory_space=pltpu.MemorySpace.VMEM)

_BLOCK_NAMES = (("b1_1", "b1_2"),
                ("b3_1", "b3_2"),
                ("b5_1", "b5_2", "b6_1", "b6_2", "b6_3"))


def _align(n):
    return (n + _ALIGN - 1) // _ALIGN * _ALIGN


# ----------------------------------------------------------------------------
# Packed-slab layout bookkeeping (static Python; shared by packer and kernel).
# ----------------------------------------------------------------------------

class _Pack:
    """Ordered name -> (row_offset, rows, cols) layout of one 2-D slab."""

    def __init__(self, width):
        self.width = width
        self.rows = 0
        self.fields = {}

    def add(self, name, nrows, ncols):
        assert ncols <= self.width, (name, ncols, self.width)
        self.fields[name] = (self.rows, nrows, ncols)
        self.rows = _align(self.rows + nrows)

    def assemble(self, arrays, dtype, lib):
        """Place `arrays` (dict name -> 2-D array) into one (rows, width) slab."""
        pieces, cursor = [], 0
        for name, (off, nr, nc) in self.fields.items():
            a = arrays[name]
            assert a.shape == (nr, nc), (name, a.shape, (nr, nc))
            if off > cursor:
                pieces.append(lib.zeros((off - cursor, self.width), dtype))
            a = a.astype(dtype)
            if nc < self.width:
                a = lib.concatenate(
                    [a, lib.zeros((nr, self.width - nc), dtype)], axis=1)
            pieces.append(a)
            cursor = off + nr
        if self.rows > cursor:
            pieces.append(lib.zeros((self.rows - cursor, self.width), dtype))
        return lib.concatenate(pieces, axis=0)


def _geometry(nb, freq, time):
    # conv1: kernel 5, stride 2, pad 2
    h1 = (freq + 4 - 5) // 2 + 1
    w1 = (time + 4 - 5) // 2 + 1
    # Two MaxPool2d(2) stages + SubSpectralNorm (S=5) at every stage.
    assert h1 % (4 * _S) == 0 and w1 % 4 == 0, (h1, w1)
    stages, h, w = [], h1, w1
    for _ in range(3):
        stages.append((h, w, w * nb, h * w * nb))        # (H, W, SW, M)
        h, w = h // 2, w // 2
    return h1, w1, stages


def _build_layout(nb, freq, time, c=40, classes=4):
    h1, w1, geo = _geometry(nb, freq, time)
    chan = [
        [("t", 2 * c, c), ("b", c, c)],
        [("t", c, int(1.5 * c)), ("b", int(1.5 * c), int(1.5 * c))],
        [("t", int(1.5 * c), 2 * c), ("b", 2 * c, 2 * c),
         ("t", 2 * c, int(2.5 * c)), ("b", int(2.5 * c), int(2.5 * c)),
         ("b", int(2.5 * c), int(2.5 * c))],
    ]
    bpack = _Pack(geo[0][2])                             # width = largest SW
    stages = []
    for si in range(3):
        H, W, SW, M = geo[si]
        last = (si == 2)
        cmax = max(cout for _, _, cout in chan[si])
        cpack = _Pack(M)
        cpack.add("A", SW, M)                            # freq sum (0/1)
        cpack.add("Dt", SW, SW)                          # time shift -1
        cpack.add("Ut", SW, SW)                          # time shift +1
        if last:
            cpack.add("D", M, M)                         # freq shift -1 (tiny)
            cpack.add("U", M, M)                         # freq shift +1 (tiny)
            cpack.add("Q", nb, M)                        # global pool sum
        else:
            cpack.add("P0", M // 4, M)                   # pool select (even w)
            cpack.add("P1", M // 4, M)                   # pool select (odd w)
        blk = _Pack(cmax)
        for bi, (kind, cin, cout) in enumerate(chan[si]):
            if kind == "t":
                blk.add("%d_pw1" % bi, cin, cout)
                blk.add("%d_bn1" % bi, 2, cout)
                blk.add("%d_dwf" % bi, 3, cout)
                blk.add("%d_ssn_s" % bi, M, cout)
                blk.add("%d_ssn_b" % bi, M, cout)
                blk.add("%d_dwt" % bi, 3, cout)
                blk.add("%d_bn2" % bi, 2, cout)
                blk.add("%d_pw2" % bi, cout, cout)
            else:
                blk.add("%d_dwf" % bi, 3, cout)
                blk.add("%d_ssn_s" % bi, M, cout)
                blk.add("%d_ssn_b" % bi, M, cout)
                blk.add("%d_dwt" % bi, 3, cout)
                blk.add("%d_bn" % bi, 2, cout)
                blk.add("%d_pw" % bi, cout, cout)
        if last:
            blk.add("cls_w", int(2.5 * c), classes)
            blk.add("cls_b", 1, classes)
        bpack.add("B%d" % si, M, SW)                     # broadcast over freq
        stages.append(dict(H=H, W=W, SW=SW, M=M, cmax=cmax, last=last,
                           blocks=chan[si], names=_BLOCK_NAMES[si],
                           cpack=cpack, blk=blk))
    conv1 = _Pack(2 * c)
    conv1.add("w", 25, 2 * c)
    conv1.add("b", 1, 2 * c)
    return dict(nb=nb, h1=h1, w1=w1, classes=classes, c=c,
                stages=stages, bpack=bpack, conv1=conv1)


# ----------------------------------------------------------------------------
# Constant 0/1 operators (numpy at pack time; stored bf16 -> exact).
# Rows are ordered m = (h*W + w)*nb + n, SW = W*nb.
# ----------------------------------------------------------------------------

def _stage_constants(st, nb):
    H, W, SW, M = st["H"], st["W"], st["SW"], st["M"]
    r = np.arange(M)
    t = np.arange(SW)
    d = {
        "A": (t[:, None] == (r % SW)[None, :]).astype(np.float32),
        "Dt": (t[None, :] == t[:, None] - nb).astype(np.float32),
        "Ut": (t[None, :] == t[:, None] + nb).astype(np.float32),
    }
    if st["last"]:
        d["D"] = (r[None, :] == r[:, None] - SW).astype(np.float32)
        d["U"] = (r[None, :] == r[:, None] + SW).astype(np.float32)
        d["Q"] = (np.arange(nb)[:, None] == (r % nb)[None, :]).astype(np.float32)
    else:
        SW2 = (W // 2) * nb
        r2 = np.arange((H // 2) * SW2)
        h2, w2, n = r2 // SW2, (r2 % SW2) // nb, r2 % nb
        base = (2 * h2 * W + 2 * w2) * nb + n
        d["P0"] = (r[None, :] == base[:, None]).astype(np.float32)
        d["P1"] = (r[None, :] == (base + nb)[:, None]).astype(np.float32)
    return d


def _bcast_const(st):
    r = np.arange(st["M"])
    t = np.arange(st["SW"])
    return ((r % st["SW"])[:, None] == t[None, :]).astype(np.float32)


# ----------------------------------------------------------------------------
# The fused whole-network kernel (built per static layout).
# ----------------------------------------------------------------------------

def _make_kernel(L):
    stages, bpack, conv1 = L["stages"], L["bpack"], L["conv1"]

    def kernel(patches_ref, conv1_ref, cp0, cp1, cp2, bp_ref, bk0, bk1, bk2,
               out_ref):
        cp_refs = (cp0, cp1, cp2)
        bk_refs = (bk0, bk1, bk2)

        def mm(a, b):                                   # bf16 MXU, f32 accumulate
            return jnp.dot(a.astype(BF16), b.astype(BF16),
                           preferred_element_type=F32)

        def fld(ref, pack, name):                       # static, aligned slice
            off, nr, nc = pack.fields[name]
            return ref[off:off + nr, 0:nc]

        # conv1: Conv2d(1, 2c, 5, stride 2, pad 2) as an im2col matmul
        x = mm(patches_ref[...], fld(conv1_ref, conv1, "w")) \
            + fld(conv1_ref, conv1, "b")

        for si, st in enumerate(stages):
            cref, bref = cp_refs[si], bk_refs[si]
            cpk, bpk = st["cpack"], st["blk"]
            SW, M, H, W, last = st["SW"], st["M"], st["H"], st["W"], st["last"]

            A = fld(cref, cpk, "A")
            Dt = fld(cref, cpk, "Dt")
            Ut = fld(cref, cpk, "Ut")
            B = fld(bp_ref, bpack, "B%d" % si)
            if last:
                Dm = fld(cref, cpk, "D")
                Um = fld(cref, cpk, "U")

            def shift_next(v):          # out[m] = v[m + SW], zero rows at bottom
                pad = jnp.zeros((SW, v.shape[1]), F32)
                return jnp.concatenate([v[SW:, :], pad], axis=0)

            def shift_prev(v):          # out[m] = v[m - SW], zero rows at top
                pad = jnp.zeros((SW, v.shape[1]), F32)
                return jnp.concatenate([pad, v[:M - SW, :]], axis=0)

            def freq_branch(y, dwf, ssn_s, ssn_b):
                # depthwise (3,1) conv along freq (zero padded) + folded SSN,
                # one fused expression to keep few (M, C) slabs live.
                if last:
                    y_prev, y_next = mm(Dm, y), mm(Um, y)
                else:
                    y_prev, y_next = shift_prev(y), shift_next(y)
                return ((y_prev * dwf[0:1] + y * dwf[1:2] + y_next * dwf[2:3])
                        * ssn_s + ssn_b)

            def time_branch(aux, dwt, bn):
                # freq mean -> depthwise (1,3) conv along time -> BN -> SiLU
                f = mm(A, aux) * (1.0 / H)
                z = mm(Dt, f) * dwt[0:1] + f * dwt[1:2] + mm(Ut, f) * dwt[2:3]
                z = z * bn[0:1] + bn[1:2]
                return z * jax.nn.sigmoid(z)

            for bi, (kind, _cin, _cout) in enumerate(st["blocks"]):
                g = lambda name: fld(bref, bpk, "%d_%s" % (bi, name))
                if kind == "t":                         # TransitionBlock
                    bn1 = g("bn1")
                    y = mm(x, g("pw1"))
                    y = jnp.maximum(y * bn1[0:1] + bn1[1:2], 0.0)
                    aux = freq_branch(y, g("dwf"), g("ssn_s"), g("ssn_b"))
                    z = time_branch(aux, g("dwt"), g("bn2"))
                    z = mm(B, mm(z, g("pw2")))          # broadcast over freq
                    x = jnp.maximum(z + aux, 0.0)
                else:                                   # BroadcastedBlock
                    aux = freq_branch(x, g("dwf"), g("ssn_s"), g("ssn_b"))
                    z = time_branch(aux, g("dwt"), g("bn"))
                    z = mm(B, mm(z, g("pw")))
                    x = jnp.maximum(z + x + aux, 0.0)

            if not last:
                # MaxPool2d(2): aligned (h+1) shift + elementwise max, then two
                # row selections (even / odd w) and a final elementwise max.
                P0 = fld(cref, cpk, "P0")
                P1 = fld(cref, cpk, "P1")
                hmax = jnp.maximum(x, shift_next(x))
                x = jnp.maximum(mm(P0, hmax), mm(P1, hmax))
            else:
                # AdaptiveAvgPool2d((1,1)) (idempotent, applied once) then the
                # 1x1 classifier conv; pooling first is exact (conv is linear).
                Q = fld(cref, cpk, "Q")
                pooled = mm(Q, x) * (1.0 / (H * W))
                out_ref[...] = (mm(pooled, fld(bref, bpk, "cls_w"))
                                + fld(bref, bpk, "cls_b"))

    return kernel


# ----------------------------------------------------------------------------
# Deterministic synthetic parameters (inference-folded BN / SubSpectralNorm).
# ----------------------------------------------------------------------------

def _w(key, shape, scale=0.1):
    return scale * jax.random.normal(key, shape, dtype=F32)


def _bn_fold(key, n):
    k1, k2, k3, k4 = jax.random.split(key, 4)
    gamma = 1.0 + 0.1 * jax.random.normal(k1, (n,), F32)
    beta = 0.1 * jax.random.normal(k2, (n,), F32)
    mean = 0.1 * jax.random.normal(k3, (n,), F32)
    var = 1.0 + 0.5 * jax.random.uniform(k4, (n,), dtype=F32)
    s = gamma * jax.lax.rsqrt(var + 1e-5)
    return jnp.stack([s, beta - mean * s], axis=0)                 # (2, n)


def _ssn_param(key, c):
    # SubSpectralNorm (eval): BN over c*S sub-band channels, folded at init
    # into a (2, S, c) per-(group, channel) affine table.
    sb = _bn_fold(key, c * _S)                                     # (2, c*S)
    return sb.reshape(2, c, _S).transpose(0, 2, 1)                 # (2, S, c)


def init_transition(key, cin, cout):
    ks = jax.random.split(key, 7)
    return dict(pw1=_w(ks[0], (cin, cout)), bn1=_bn_fold(ks[1], cout),
                dwf=_w(ks[2], (3, cout)), ssn=_ssn_param(ks[3], cout),
                dwt=_w(ks[4], (3, cout)), bn2=_bn_fold(ks[5], cout),
                pw2=_w(ks[6], (cout, cout)))


def init_broadcasted(key, c):
    ks = jax.random.split(key, 5)
    return dict(dwf=_w(ks[0], (3, c)), ssn=_ssn_param(ks[1], c),
                dwt=_w(ks[2], (3, c)), bn=_bn_fold(ks[3], c),
                pw=_w(ks[4], (c, c)))


def init_params(key, classes_num=4):
    c = 40  # 10 * 4, as in the PyTorch module
    ks = jax.random.split(key, 13)
    return dict(
        conv1_w=_w(ks[0], (25, 2 * c)),            # (kh*kw, Cout); Cin == 1
        conv1_b=_w(ks[1], (1, 2 * c)),
        b1_1=init_transition(ks[2], 2 * c, c),
        b1_2=init_broadcasted(ks[3], c),
        b3_1=init_transition(ks[4], c, int(1.5 * c)),
        b3_2=init_broadcasted(ks[5], int(1.5 * c)),
        b5_1=init_transition(ks[6], int(1.5 * c), 2 * c),
        b5_2=init_broadcasted(ks[7], 2 * c),
        b6_1=init_transition(ks[8], 2 * c, int(2.5 * c)),
        b6_2=init_broadcasted(ks[9], int(2.5 * c)),
        b6_3=init_broadcasted(ks[10], int(2.5 * c)),
        w7=_w(ks[11], (int(2.5 * c), classes_num)),    # block7_1: 1x1 conv
        b7=_w(ks[12], (1, classes_num)),
        # TODO(synk): fc_audioset is defined in __init__ but unused in forward.
    )


def pack_params(params, nb, freq, time):
    """One-time packing of all weights + 0/1 operators into 9 operand slabs."""
    classes = params["w7"].shape[1]
    L = _build_layout(nb, freq, time, classes=classes)
    packed = {}
    for si, st in enumerate(L["stages"]):
        packed["cpack%d" % si] = jnp.asarray(
            st["cpack"].assemble(_stage_constants(st, nb), np.float32, np),
            dtype=BF16)
        arrs = {}
        rep = (st["H"] // _S) * st["SW"]          # rows per SSN group
        for bi, (kind, _cin, _cout) in enumerate(st["blocks"]):
            bp = params[st["names"][bi]]
            arrs["%d_dwf" % bi] = bp["dwf"]
            arrs["%d_ssn_s" % bi] = jnp.repeat(bp["ssn"][0], rep, axis=0)
            arrs["%d_ssn_b" % bi] = jnp.repeat(bp["ssn"][1], rep, axis=0)
            arrs["%d_dwt" % bi] = bp["dwt"]
            if kind == "t":
                arrs["%d_pw1" % bi] = bp["pw1"]
                arrs["%d_bn1" % bi] = bp["bn1"]
                arrs["%d_bn2" % bi] = bp["bn2"]
                arrs["%d_pw2" % bi] = bp["pw2"]
            else:
                arrs["%d_bn" % bi] = bp["bn"]
                arrs["%d_pw" % bi] = bp["pw"]
        if st["last"]:
            arrs["cls_w"] = params["w7"]
            arrs["cls_b"] = params["b7"]
        packed["blk%d" % si] = st["blk"].assemble(arrs, F32, jnp)
    b_arrs = {"B%d" % si: _bcast_const(st) for si, st in enumerate(L["stages"])}
    packed["bpack"] = jnp.asarray(
        L["bpack"].assemble(b_arrs, np.float32, np), dtype=BF16)
    packed["conv1"] = L["conv1"].assemble(
        {"w": params["conv1_w"], "b": params["conv1_b"]}, F32, jnp)
    return packed


# ----------------------------------------------------------------------------
# Full forward (single pallas_call).
# ----------------------------------------------------------------------------

@functools.partial(jax.jit, static_argnames=("classes",))
def bc_resnet_forward(x_nchw, packed, classes=4):
    nb, _cin, freq, time = x_nchw.shape
    L = _build_layout(nb, freq, time, classes=classes)
    h1, w1 = L["h1"], L["w1"]

    # conv1 im2col prologue (single input channel); rows ordered (freq, time,
    # batch) to match the kernel's row convention.
    # TODO(synk): fold this ~32 KiB prologue into the kernel if it ever matters.
    x = x_nchw[:, 0]
    xp = jnp.pad(x, ((0, 0), (2, 2), (2, 2)))
    cols = [xp[:, kh:kh + 2 * h1:2, kw:kw + 2 * w1:2]
            for kh in range(5) for kw in range(5)]
    patches = jnp.stack(cols, axis=-1)                              # (nb,h1,w1,25)
    patches = jnp.transpose(patches, (1, 2, 0, 3)).reshape(h1 * w1 * nb, 25)

    operands = [patches, packed["conv1"],
                packed["cpack0"], packed["cpack1"], packed["cpack2"],
                packed["bpack"],
                packed["blk0"], packed["blk1"], packed["blk2"]]
    clipwise = pl.pallas_call(
        _make_kernel(L),
        out_shape=jax.ShapeDtypeStruct((nb, classes), F32),
        in_specs=[_VMEM] * len(operands),
        out_specs=_VMEM,
        compiler_params=pltpu.CompilerParams(
            vmem_limit_bytes=16 * 1024 * 1024),
    )(*operands)
    embedding = clipwise.reshape(nb, classes, 1, 1)   # eval: dropout == identity
    return clipwise, embedding


if __name__ == "__main__":
    key = jax.random.PRNGKey(0)
    k_in, k_par = jax.random.split(key)
    # (batch, 1, freq, time): freq=40 -> 20 freq rows after conv1, so the
    # SubSpectralNorm group count (5) divides freq at every stage (20/10/5)
    # and both MaxPool2d(2) stages see even dims; time 16 -> 8 -> 4 -> 2.
    x = jax.random.normal(k_in, (2, 1, 40, 16), dtype=F32)
    params = init_params(k_par)
    packed = pack_params(params, nb=2, freq=40, time=16)
    clipwise, embedding = bc_resnet_forward(x, packed)
    clipwise = jax.block_until_ready(clipwise)
    embedding = jax.block_until_ready(embedding)
    assert clipwise.shape == (2, 4), clipwise.shape
    assert embedding.shape == (2, 4, 1, 1), embedding.shape
    assert bool(jnp.all(jnp.isfinite(clipwise)))
    assert bool(jnp.all(jnp.isfinite(embedding)))
    print("KERNEL_OK")
</pallas_src>

<mosaic_0001>
module attributes {stable_mosaic.version = 11 : i64} {
  func.func @kernel(%arg0: memref<320x25xf32, #tpu.memory_space<vmem>>, %arg1: memref<48x80xf32, #tpu.memory_space<vmem>>, %arg2: memref<208x320xbf16, #tpu.memory_space<vmem>>, %arg3: memref<112x80xbf16, #tpu.memory_space<vmem>>, %arg4: memref<128x20xbf16, #tpu.memory_space<vmem>>, %arg5: memref<432x16xbf16, #tpu.memory_space<vmem>>, %arg6: memref<1568x40xf32, #tpu.memory_space<vmem>>, %arg7: memref<608x60xf32, #tpu.memory_space<vmem>>, %arg8: memref<1360x100xf32, #tpu.memory_space<vmem>>, %arg9: memref<2x4xf32, #tpu.memory_space<vmem>>) attributes {dimension_semantics = [], scalar_prefetch = 0 : i64, scratch_operands = 0 : i64, tpu.core_type = #tpu.core_type<tc>} {
    %c0 = arith.constant 0 : index
    %c0_0 = arith.constant 0 : index
    %0 = vector.load %arg0[%c0, %c0_0] : memref<320x25xf32, #tpu.memory_space<vmem>>, vector<320x25xf32>
    %c0_1 = arith.constant 0 : index
    %c0_2 = arith.constant 0 : index
    %1 = vector.load %arg1[%c0_1, %c0_2] : memref<48x80xf32, #tpu.memory_space<vmem>>, vector<25x80xf32>
    %2 = arith.truncf %0 : vector<320x25xf32> to vector<320x25xbf16>
    %3 = arith.truncf %1 : vector<25x80xf32> to vector<25x80xbf16>
    %cst = arith.constant dense<0.000000e+00> : vector<320x80xf32>
    %4 = tpu.matmul %2, %3, %cst {dimension_numbers = #tpu.dot_dimension_numbers<[1], [0], [0], [1], [0, 0, 1, 1], [], []>} : vector<320x25xbf16>, vector<25x80xbf16>, vector<320x80xf32> -> vector<320x80xf32>
    %c32 = arith.constant 32 : index
    %c0_3 = arith.constant 0 : index
    %5 = vector.load %arg1[%c32, %c0_3] : memref<48x80xf32, #tpu.memory_space<vmem>>, vector<1x80xf32>
    %6 = vector.broadcast %5 : vector<1x80xf32> to vector<320x80xf32>
    %7 = arith.addf %4, %6 : vector<320x80xf32>
    %c0_4 = arith.constant 0 : index
    %c0_5 = arith.constant 0 : index
    %8 = vector.load %arg2[%c0_4, %c0_5] : memref<208x320xbf16, #tpu.memory_space<vmem>>, vector<16x320xbf16>
    %c16 = arith.constant 16 : index
    %c0_6 = arith.constant 0 : index
    %9 = vector.load %arg2[%c16, %c0_6] : memref<208x320xbf16, #tpu.memory_space<vmem>>, vector<16x16xbf16>
    %c32_7 = arith.constant 32 : index
    %c0_8 = arith.constant 0 : index
    %10 = vector.load %arg2[%c32_7, %c0_8] : memref<208x320xbf16, #tpu.memory_space<vmem>>, vector<16x16xbf16>
    %c0_9 = arith.constant 0 : index
    %c0_10 = arith.constant 0 : index
    %11 = vector.load %arg5[%c0_9, %c0_10] : memref<432x16xbf16, #tpu.memory_space<vmem>>, vector<320x16xbf16>
    %c80 = arith.constant 80 : index
    %c0_11 = arith.constant 0 : index
    %12 = vector.load %arg6[%c80, %c0_11] : memref<1568x40xf32, #tpu.memory_space<vmem>>, vector<2x40xf32>
    %c0_12 = arith.constant 0 : index
    %c0_13 = arith.constant 0 : index
    %13 = vector.load %arg6[%c0_12, %c0_13] : memref<1568x40xf32, #tpu.memory_space<vmem>>, vector<80x40xf32>
    %14 = arith.truncf %7 : vector<320x80xf32> to vector<320x80xbf16>
    %15 = arith.truncf %13 : vector<80x40xf32> to vector<80x40xbf16>
    %cst_14 = arith.constant dense<0.000000e+00> : vector<320x40xf32>
    %16 = tpu.matmul %14, %15, %cst_14 {dimension_numbers = #tpu.dot_dimension_numbers<[1], [0], [0], [1], [0, 0, 1, 1], [], []>} : vector<320x80xbf16>, vector<80x40xbf16>, vector<320x40xf32> -> vector<320x40xf32>
    %17 = vector.extract_strided_slice %12 {offsets = [0, 0], sizes = [1, 40], strides = [1, 1]} : vector<2x40xf32> to vector<1x40xf32>
    %18 = vector.broadcast %17 : vector<1x40xf32> to vector<320x40xf32>
    %19 = arith.mulf %16, %18 : vector<320x40xf32>
    %20 = vector.extract_strided_slice %12 {offsets = [1, 0], sizes = [1, 40], strides = [1, 1]} : vector<2x40xf32> to vector<1x40xf32>
    %21 = vector.broadcast %20 : vector<1x40xf32> to vector<320x40xf32>
    %22 = arith.addf %19, %21 : vector<320x40xf32>
    %cst_15 = arith.constant 0.000000e+00 : f32
    %23 = vector.broadcast %cst_15 : f32 to vector<320x40xf32>
    %24 = arith.maximumf %22, %23 : vector<320x40xf32>
    %c96 = arith.constant 96 : index
    %c0_16 = arith.constant 0 : index
    %25 = vector.load %arg6[%c96, %c0_16] : memref<1568x40xf32, #tpu.memory_space<vmem>>, vector<3x40xf32>
    %c112 = arith.constant 112 : index
    %c0_17 = arith.constant 0 : index
    %26 = vector.load %arg6[%c112, %c0_17] : memref<1568x40xf32, #tpu.memory_space<vmem>>, vector<320x40xf32>
    %c432 = arith.constant 432 : index
    %c0_18 = arith.constant 0 : index
    %27 = vector.load %arg6[%c432, %c0_18] : memref<1568x40xf32, #tpu.memory_space<vmem>>, vector<320x40xf32>
    %cst_19 = arith.constant 0.000000e+00 : f32
    %28 = vector.broadcast %cst_19 : f32 to vector<16x40xf32>
    %29 = vector.extract_strided_slice %24 {offsets = [0, 0], sizes = [304, 40], strides = [1, 1]} : vector<320x40xf32> to vector<304x40xf32>
    %30 = tpu.concatenate %28, %29 in 0 : vector<16x40xf32>, vector<304x40xf32> -> vector<320x40xf32>
    %cst_20 = arith.constant 0.000000e+00 : f32
    %31 = vector.broadcast %cst_20 : f32 to vector<16x40xf32>
    %32 = vector.extract_strided_slice %24 {offsets = [16, 0], sizes = [304, 40], strides = [1, 1]} : vector<320x40xf32> to vector<304x40xf32>
    %33 = tpu.concatenate %32, %31 in 0 : vector<304x40xf32>, vector<16x40xf32> -> vector<320x40xf32>
    %34 = vector.extract_strided_slice %25 {offsets = [0, 0], sizes = [1, 40], strides = [1, 1]} : vector<3x40xf32> to vector<1x40xf32>
    %35 = vector.broadcast %34 : vector<1x40xf32> to vector<320x40xf32>
    %36 = arith.mulf %30, %35 : vector<320x40xf32>
    %37 = vector.extract_strided_slice %25 {offsets = [1, 0], sizes = [1, 40], strides = [1, 1]} : vector<3x40xf32> to vector<1x40xf32>
    %38 = vector.broadcast %37 : vector<1x40xf32> to vector<320x40xf32>
    %39 = arith.mulf %24, %38 : vector<320x40xf32>
    %40 = arith.addf %36, %39 : vector<320x40xf32>
    %41 = vector.extract_strided_slice %25 {offsets = [2, 0], sizes = [1, 40], strides = [1, 1]} : vector<3x40xf32> to vector<1x40xf32>
    %42 = vector.broadcast %41 : vector<1x40xf32> to vector<320x40xf32>
    %43 = arith.mulf %33, %42 : vector<320x40xf32>
    %44 = arith.addf %40, %43 : vector<320x40xf32>
    %45 = arith.mulf %44, %26 : vector<320x40xf32>
    %46 = arith.addf %45, %27 : vector<320x40xf32>
    %c752 = arith.constant 752 : index
    %c0_21 = arith.constant 0 : index
    %47 = vector.load %arg6[%c752, %c0_21] : memref<1568x40xf32, #tpu.memory_space<vmem>>, vector<3x40xf32>
    %c768 = arith.constant 768 : index
    %c0_22 = arith.constant 0 : index
    %48 = vector.load %arg6[%c768, %c0_22] : memref<1568x40xf32, #tpu.memory_space<vmem>>, vector<2x40xf32>
    %49 = arith.truncf %46 : vector<320x40xf32> to vector<320x40xbf16>
    %cst_23 = arith.constant dense<0.000000e+00> : vector<16x40xf32>
    %50 = tpu.matmul %8, %49, %cst_23 {dimension_numbers = #tpu.dot_dimension_numbers<[1], [0], [0], [1], [0, 0, 1, 1], [], []>} : vector<16x320xbf16>, vector<320x40xbf16>, vector<16x40xf32> -> vector<16x40xf32>
    %cst_24 = arith.constant 5.000000e-02 : f32
    %51 = vector.broadcast %cst_24 : f32 to vector<16x40xf32>
    %52 = arith.mulf %50, %51 : vector<16x40xf32>
    %53 = arith.truncf %52 : vector<16x40xf32> to vector<16x40xbf16>
    %cst_25 = arith.constant dense<0.000000e+00> : vector<16x40xf32>
    %54 = tpu.matmul %9, %53, %cst_25 {dimension_numbers = #tpu.dot_dimension_numbers<[1], [0], [0], [1], [0, 0, 1, 1], [], []>} : vector<16x16xbf16>, vector<16x40xbf16>, vector<16x40xf32> -> vector<16x40xf32>
    %55 = vector.extract_strided_slice %47 {offsets = [0, 0], sizes = [1, 40], strides = [1, 1]} : vector<3x40xf32> to vector<1x40xf32>
    %56 = vector.broadcast %55 : vector<1x40xf32> to vector<16x40xf32>
    %57 = arith.mulf %54, %56 : vector<16x40xf32>
    %58 = vector.extract_strided_slice %47 {offsets = [1, 0], sizes = [1, 40], strides = [1, 1]} : vector<3x40xf32> to vector<1x40xf32>
    %59 = vector.broadcast %58 : vector<1x40xf32> to vector<16x40xf32>
    %60 = arith.mulf %52, %59 : vector<16x40xf32>
    %61 = arith.addf %57, %60 : vector<16x40xf32>
    %62 = arith.truncf %52 : vector<16x40xf32> to vector<16x40xbf16>
    %cst_26 = arith.constant dense<0.000000e+00> : vector<16x40xf32>
    %63 = tpu.matmul %10, %62, %cst_26 {dimension_numbers = #tpu.dot_dimension_numbers<[1], [0], [0], [1], [0, 0, 1, 1], [], []>} : vector<16x16xbf16>, vector<16x40xbf16>, vector<16x40xf32> -> vector<16x40xf32>
    %64 = vector.extract_strided_slice %47 {offsets = [2, 0], sizes = [1, 40], strides = [1, 1]} : vector<3x40xf32> to vector<1x40xf32>
    %65 = vector.broadcast %64 : vector<1x40xf32> to vector<16x40xf32>
    %66 = arith.mulf %63, %65 : vector<16x40xf32>
    %67 = arith.addf %61, %66 : vector<16x40xf32>
    %68 = vector.extract_strided_slice %48 {offsets = [0, 0], sizes = [1, 40], strides = [1, 1]} : vector<2x40xf32> to vector<1x40xf32>
    %69 = vector.broadcast %68 : vector<1x40xf32> to vector<16x40xf32>
    %70 = arith.mulf %67, %69 : vector<16x40xf32>
    %71 = vector.extract_strided_slice %48 {offsets = [1, 0], sizes = [1, 40], strides = [1, 1]} : vector<2x40xf32> to vector<1x40xf32>
    %72 = vector.broadcast %71 : vector<1x40xf32> to vector<16x40xf32>
    %73 = arith.addf %70, %72 : vector<16x40xf32>
    %74 = arith.negf %73 : vector<16x40xf32>
    %75 = math.exp %74 : vector<16x40xf32>
    %cst_27 = arith.constant 1.000000e+00 : f32
    %76 = vector.broadcast %cst_27 : f32 to vector<16x40xf32>
    %77 = arith.addf %76, %75 : vector<16x40xf32>
    %78 = arith.divf %76, %77 : vector<16x40xf32>
    %79 = arith.mulf %73, %78 : vector<16x40xf32>
    %c784 = arith.constant 784 : index
    %c0_28 = arith.constant 0 : index
    %80 = vector.load %arg6[%c784, %c0_28] : memref<1568x40xf32, #tpu.memory_space<vmem>>, vector<40x40xf32>
    %81 = arith.truncf %79 : vector<16x40xf32> to vector<16x40xbf16>
    %82 = arith.truncf %80 : vector<40x40xf32> to vector<40x40xbf16>
    %cst_29 = arith.constant dense<0.000000e+00> : vector<16x40xf32>
    %83 = tpu.matmul %81, %82, %cst_29 {dimension_numbers = #tpu.dot_dimension_numbers<[1], [0], [0], [1], [0, 0, 1, 1], [], []>} : vector<16x40xbf16>, vector<40x40xbf16>, vector<16x40xf32> -> vector<16x40xf32>
    %84 = arith.truncf %83 : vector<16x40xf32> to vector<16x40xbf16>
    %cst_30 = arith.constant dense<0.000000e+00> : vector<320x40xf32>
    %85 = tpu.matmul %11, %84, %cst_30 {dimension_numbers = #tpu.dot_dimension_numbers<[1], [0], [0], [1], [0, 0, 1, 1], [], []>} : vector<320x16xbf16>, vector<16x40xbf16>, vector<320x40xf32> -> vector<320x40xf32>
    %86 = arith.addf %85, %46 : vector<320x40xf32>
    %cst_31 = arith.constant 0.000000e+00 : f32
    %87 = vector.broadcast %cst_31 : f32 to vector<320x40xf32>
    %88 = arith.maximumf %86, %87 : vector<320x40xf32>
    %c832 = arith.constant 832 : index
    %c0_32 = arith.constant 0 : index
    %89 = vector.load %arg6[%c832, %c0_32] : memref<1568x40xf32, #tpu.memory_space<vmem>>, vector<3x40xf32>
    %c848 = arith.constant 848 : index
    %c0_33 = arith.constant 0 : index
    %90 = vector.load %arg6[%c848, %c0_33] : memref<1568x40xf32, #tpu.memory_space<vmem>>, vector<320x40xf32>
    %c1168 = arith.constant 1168 : index
    %c0_34 = arith.constant 0 : index
    %91 = vector.load %arg6[%c1168, %c0_34] : memref<1568x40xf32, #tpu.memory_space<vmem>>, vector<320x40xf32>
    %cst_35 = arith.constant 0.000000e+00 : f32
    %92 = vector.broadcast %cst_35 : f32 to vector<16x40xf32>
    %93 = vector.extract_strided_slice %88 {offsets = [0, 0], sizes = [304, 40], strides = [1, 1]} : vector<320x40xf32> to vector<304x40xf32>
    %94 = tpu.concatenate %92, %93 in 0 : vector<16x40xf32>, vector<304x40xf32> -> vector<320x40xf32>
    %cst_36 = arith.constant 0.000000e+00 : f32
    %95 = vector.broadcast %cst_36 : f32 to vector<16x40xf32>
    %96 = vector.extract_strided_slice %88 {offsets = [16, 0], sizes = [304, 40], strides = [1, 1]} : vector<320x40xf32> to vector<304x40xf32>
    %97 = tpu.concatenate %96, %95 in 0 : vector<304x40xf32>, vector<16x40xf32> -> vector<320x40xf32>
    %98 = vector.extract_strided_slice %89 {offsets = [0, 0], sizes = [1, 40], strides = [1, 1]} : vector<3x40xf32> to vector<1x40xf32>
    %99 = vector.broadcast %98 : vector<1x40xf32> to vector<320x40xf32>
    %100 = arith.mulf %94, %99 : vector<320x40xf32>
    %101 = vector.extract_strided_slice %89 {offsets = [1, 0], sizes = [1, 40], strides = [1, 1]} : vector<3x40xf32> to vector<1x40xf32>
    %102 = vector.broadcast %101 : vector<1x40xf32> to vector<320x40xf32>
    %103 = arith.mulf %88, %102 : vector<320x40xf32>
    %104 = arith.addf %100, %103 : vector<320x40xf32>
    %105 = vector.extract_strided_slice %89 {offsets = [2, 0], sizes = [1, 40], strides = [1, 1]} : vector<3x40xf32> to vector<1x40xf32>
    %106 = vector.broadcast %105 : vector<1x40xf32> to vector<320x40xf32>
    %107 = arith.mulf %97, %106 : vector<320x40xf32>
    %108 = arith.addf %104, %107 : vector<320x40xf32>
    %109 = arith.mulf %108, %90 : vector<320x40xf32>
    %110 = arith.addf %109, %91 : vector<320x40xf32>
    %c1488 = arith.constant 1488 : index
    %c0_37 = arith.constant 0 : index
    %111 = vector.load %arg6[%c1488, %c0_37] : memref<1568x40xf32, #tpu.memory_space<vmem>>, vector<3x40xf32>
    %c1504 = arith.constant 1504 : index
    %c0_38 = arith.constant 0 : index
    %112 = vector.load %arg6[%c1504, %c0_38] : memref<1568x40xf32, #tpu.memory_space<vmem>>, vector<2x40xf32>
    %113 = arith.truncf %110 : vector<320x40xf32> to vector<320x40xbf16>
    %cst_39 = arith.constant dense<0.000000e+00> : vector<16x40xf32>
    %114 = tpu.matmul %8, %113, %cst_39 {dimension_numbers = #tpu.dot_dimension_numbers<[1], [0], [0], [1], [0, 0, 1, 1], [], []>} : vector<16x320xbf16>, vector<320x40xbf16>, vector<16x40xf32> -> vector<16x40xf32>
    %cst_40 = arith.constant 5.000000e-02 : f32
    %115 = vector.broadcast %cst_40 : f32 to vector<16x40xf32>
    %116 = arith.mulf %114, %115 : vector<16x40xf32>
    %117 = arith.truncf %116 : vector<16x40xf32> to vector<16x40xbf16>
    %cst_41 = arith.constant dense<0.000000e+00> : vector<16x40xf32>
    %118 = tpu.matmul %9, %117, %cst_41 {dimension_numbers = #tpu.dot_dimension_numbers<[1], [0], [0], [1], [0, 0, 1, 1], [], []>} : vector<16x16xbf16>, vector<16x40xbf16>, vector<16x40xf32> -> vector<16x40xf32>
    %119 = vector.extract_strided_slice %111 {offsets = [0, 0], sizes = [1, 40], strides = [1, 1]} : vector<3x40xf32> to vector<1x40xf32>
    %120 = vector.broadcast %119 : vector<1x40xf32> to vector<16x40xf32>
    %121 = arith.mulf %118, %120 : vector<16x40xf32>
    %122 = vector.extract_strided_slice %111 {offsets = [1, 0], sizes = [1, 40], strides = [1, 1]} : vector<3x40xf32> to vector<1x40xf32>
    %123 = vector.broadcast %122 : vector<1x40xf32> to vector<16x40xf32>
    %124 = arith.mulf %116, %123 : vector<16x40xf32>
    %125 = arith.addf %121, %124 : vector<16x40xf32>
    %126 = arith.truncf %116 : vector<16x40xf32> to vector<16x40xbf16>
    %cst_42 = arith.constant dense<0.000000e+00> : vector<16x40xf32>
    %127 = tpu.matmul %10, %126, %cst_42 {dimension_numbers = #tpu.dot_dimension_numbers<[1], [0], [0], [1], [0, 0, 1, 1], [], []>} : vector<16x16xbf16>, vector<16x40xbf16>, vector<16x40xf32> -> vector<16x40xf32>
    %128 = vector.extract_strided_slice %111 {offsets = [2, 0], sizes = [1, 40], strides = [1, 1]} : vector<3x40xf32> to vector<1x40xf32>
    %129 = vector.broadcast %128 : vector<1x40xf32> to vector<16x40xf32>
    %130 = arith.mulf %127, %129 : vector<16x40xf32>
    %131 = arith.addf %125, %130 : vector<16x40xf32>
    %132 = vector.extract_strided_slice %112 {offsets = [0, 0], sizes = [1, 40], strides = [1, 1]} : vector<2x40xf32> to vector<1x40xf32>
    %133 = vector.broadcast %132 : vector<1x40xf32> to vector<16x40xf32>
    %134 = arith.mulf %131, %133 : vector<16x40xf32>
    %135 = vector.extract_strided_slice %112 {offsets = [1, 0], sizes = [1, 40], strides = [1, 1]} : vector<2x40xf32> to vector<1x40xf32>
    %136 = vector.broadcast %135 : vector<1x40xf32> to vector<16x40xf32>
    %137 = arith.addf %134, %136 : vector<16x40xf32>
    %138 = arith.negf %137 : vector<16x40xf32>
    %139 = math.exp %138 : vector<16x40xf32>
    %cst_43 = arith.constant 1.000000e+00 : f32
    %140 = vector.broadcast %cst_43 : f32 to vector<16x40xf32>
    %141 = arith.addf %140, %139 : vector<16x40xf32>
    %142 = arith.divf %140, %141 : vector<16x40xf32>
    %143 = arith.mulf %137, %142 : vector<16x40xf32>
    %c1520 = arith.constant 1520 : index
    %c0_44 = arith.constant 0 : index
    %144 = vector.load %arg6[%c1520, %c0_44] : memref<1568x40xf32, #tpu.memory_space<vmem>>, vector<40x40xf32>
    %145 = arith.truncf %143 : vector<16x40xf32> to vector<16x40xbf16>
    %146 = arith.truncf %144 : vector<40x40xf32> to vector<40x40xbf16>
    %cst_45 = arith.constant dense<0.000000e+00> : vector<16x40xf32>
    %147 = tpu.matmul %145, %146, %cst_45 {dimension_numbers = #tpu.dot_dimension_numbers<[1], [0], [0], [1], [0, 0, 1, 1], [], []>} : vector<16x40xbf16>, vector<40x40xbf16>, vector<16x40xf32> -> vector<16x40xf32>
    %148 = arith.truncf %147 : vector<16x40xf32> to vector<16x40xbf16>
    %cst_46 = arith.constant dense<0.000000e+00> : vector<320x40xf32>
    %149 = tpu.matmul %11, %148, %cst_46 {dimension_numbers = #tpu.dot_dimension_numbers<[1], [0], [0], [1], [0, 0, 1, 1], [], []>} : vector<320x16xbf16>, vector<16x40xbf16>, vector<320x40xf32> -> vector<320x40xf32>
    %150 = arith.addf %149, %88 : vector<320x40xf32>
    %151 = arith.addf %150, %110 : vector<320x40xf32>
    %cst_47 = arith.constant 0.000000e+00 : f32
    %152 = vector.broadcast %cst_47 : f32 to vector<320x40xf32>
    %153 = arith.maximumf %151, %152 : vector<320x40xf32>
    %c48 = arith.constant 48 : index
    %c0_48 = arith.constant 0 : index
    %154 = vector.load %arg2[%c48, %c0_48] : memref<208x320xbf16, #tpu.memory_space<vmem>>, vector<80x320xbf16>
    %c128 = arith.constant 128 : index
    %c0_49 = arith.constant 0 : index
    %155 = vector.load %arg2[%c128, %c0_49] : memref<208x320xbf16, #tpu.memory_space<vmem>>, vector<80x320xbf16>
    %cst_50 = arith.constant 0.000000e+00 : f32
    %156 = vector.broadcast %cst_50 : f32 to vector<16x40xf32>
    %157 = vector.extract_strided_slice %153 {offsets = [16, 0], sizes = [304, 40], strides = [1, 1]} : vector<320x40xf32> to vector<304x40xf32>
    %158 = tpu.concatenate %157, %156 in 0 : vector<304x40xf32>, vector<16x40xf32> -> vector<320x40xf32>
    %159 = arith.maximumf %153, %158 : vector<320x40xf32>
    %160 = arith.truncf %159 : vector<320x40xf32> to vector<320x40xbf16>
    %cst_51 = arith.constant dense<0.000000e+00> : vector<80x40xf32>
    %161 = tpu.matmul %154, %160, %cst_51 {dimension_numbers = #tpu.dot_dimension_numbers<[1], [0], [0], [1], [0, 0, 1, 1], [], []>} : vector<80x320xbf16>, vector<320x40xbf16>, vector<80x40xf32> -> vector<80x40xf32>
    %162 = arith.truncf %159 : vector<320x40xf32> to vector<320x40xbf16>
    %cst_52 = arith.constant dense<0.000000e+00> : vector<80x40xf32>
    %163 = tpu.matmul %155, %162, %cst_52 {dimension_numbers = #tpu.dot_dimension_numbers<[1], [0], [0], [1], [0, 0, 1, 1], [], []>} : vector<80x320xbf16>, vector<320x40xbf16>, vector<80x40xf32> -> vector<80x40xf32>
    %164 = arith.maximumf %161, %163 : vector<80x40xf32>
    %c0_53 = arith.constant 0 : index
    %c0_54 = arith.constant 0 : index
    %165 = vector.load %arg3[%c0_53, %c0_54] : memref<112x80xbf16, #tpu.memory_space<vmem>>, vector<8x80xbf16>
    %c16_55 = arith.constant 16 : index
    %c0_56 = arith.constant 0 : index
    %166 = vector.load %arg3[%c16_55, %c0_56] : memref<112x80xbf16, #tpu.memory_space<vmem>>, vector<8x8xbf16>
    %c32_57 = arith.constant 32 : index
    %c0_58 = arith.constant 0 : index
    %167 = vector.load %arg3[%c32_57, %c0_58] : memref<112x80xbf16, #tpu.memory_space<vmem>>, vector<8x8xbf16>
    %c320 = arith.constant 320 : index
    %c0_59 = arith.constant 0 : index
    %168 = vector.load %arg5[%c320, %c0_59] : memref<432x16xbf16, #tpu.memory_space<vmem>>, vector<80x8xbf16>
    %c48_60 = arith.constant 48 : index
    %c0_61 = arith.constant 0 : index
    %169 = vector.load %arg7[%c48_60, %c0_61] : memref<608x60xf32, #tpu.memory_space<vmem>>, vector<2x60xf32>
    %c0_62 = arith.constant 0 : index
    %c0_63 = arith.constant 0 : index
    %170 = vector.load %arg7[%c0_62, %c0_63] : memref<608x60xf32, #tpu.memory_space<vmem>>, vector<40x60xf32>
    %171 = arith.truncf %164 : vector<80x40xf32> to vector<80x40xbf16>
    %172 = arith.truncf %170 : vector<40x60xf32> to vector<40x60xbf16>
    %cst_64 = arith.constant dense<0.000000e+00> : vector<80x60xf32>
    %173 = tpu.matmul %171, %172, %cst_64 {dimension_numbers = #tpu.dot_dimension_numbers<[1], [0], [0], [1], [0, 0, 1, 1], [], []>} : vector<80x40xbf16>, vector<40x60xbf16>, vector<80x60xf32> -> vector<80x60xf32>
    %174 = vector.extract_strided_slice %169 {offsets = [0, 0], sizes = [1, 60], strides = [1, 1]} : vector<2x60xf32> to vector<1x60xf32>
    %175 = vector.broadcast %174 : vector<1x60xf32> to vector<80x60xf32>
    %176 = arith.mulf %173, %175 : vector<80x60xf32>
    %177 = vector.extract_strided_slice %169 {offsets = [1, 0], sizes = [1, 60], strides = [1, 1]} : vector<2x60xf32> to vector<1x60xf32>
    %178 = vector.broadcast %177 : vector<1x60xf32> to vector<80x60xf32>
    %179 = arith.addf %176, %178 : vector<80x60xf32>
    %cst_65 = arith.constant 0.000000e+00 : f32
    %180 = vector.broadcast %cst_65 : f32 to vector<80x60xf32>
    %181 = arith.maximumf %179, %180 : vector<80x60xf32>
    %c64 = arith.constant 64 : index
    %c0_66 = arith.constant 0 : index
    %182 = vector.load %arg7[%c64, %c0_66] : memref<608x60xf32, #tpu.memory_space<vmem>>, vector<3x60xf32>
    %c80_67 = arith.constant 80 : index
    %c0_68 = arith.constant 0 : index
    %183 = vector.load %arg7[%c80_67, %c0_68] : memref<608x60xf32, #tpu.memory_space<vmem>>, vector<80x60xf32>
    %c160 = arith.constant 160 : index
    %c0_69 = arith.constant 0 : index
    %184 = vector.load %arg7[%c160, %c0_69] : memref<608x60xf32, #tpu.memory_space<vmem>>, vector<80x60xf32>
    %cst_70 = arith.constant 0.000000e+00 : f32
    %185 = vector.broadcast %cst_70 : f32 to vector<8x60xf32>
    %186 = vector.extract_strided_slice %181 {offsets = [0, 0], sizes = [72, 60], strides = [1, 1]} : vector<80x60xf32> to vector<72x60xf32>
    %187 = tpu.concatenate %185, %186 in 0 : vector<8x60xf32>, vector<72x60xf32> -> vector<80x60xf32>
    %cst_71 = arith.constant 0.000000e+00 : f32
    %188 = vector.broadcast %cst_71 : f32 to vector<8x60xf32>
    %189 = vector.extract_strided_slice %181 {offsets = [8, 0], sizes = [72, 60], strides = [1, 1]} : vector<80x60xf32> to vector<72x60xf32>
    %190 = tpu.concatenate %189, %188 in 0 : vector<72x60xf32>, vector<8x60xf32> -> vector<80x60xf32>
    %191 = vector.extract_strided_slice %182 {offsets = [0, 0], sizes = [1, 60], strides = [1, 1]} : vector<3x60xf32> to vector<1x60xf32>
    %192 = vector.broadcast %191 : vector<1x60xf32> to vector<80x60xf32>
    %193 = arith.mulf %187, %192 : vector<80x60xf32>
    %194 = vector.extract_strided_slice %182 {offsets = [1, 0], sizes = [1, 60], strides = [1, 1]} : vector<3x60xf32> to vector<1x60xf32>
    %195 = vector.broadcast %194 : vector<1x60xf32> to vector<80x60xf32>
    %196 = arith.mulf %181, %195 : vector<80x60xf32>
    %197 = arith.addf %193, %196 : vector<80x60xf32>
    %198 = vector.extract_strided_slice %182 {offsets = [2, 0], sizes = [1, 60], strides = [1, 1]} : vector<3x60xf32> to vector<1x60xf32>
    %199 = vector.broadcast %198 : vector<1x60xf32> to vector<80x60xf32>
    %200 = arith.mulf %190, %199 : vector<80x60xf32>
    %201 = arith.addf %197, %200 : vector<80x60xf32>
    %202 = arith.mulf %201, %183 : vector<80x60xf32>
    %203 = arith.addf %202, %184 : vector<80x60xf32>
    %c240 = arith.constant 240 : index
    %c0_72 = arith.constant 0 : index
    %204 = vector.load %arg7[%c240, %c0_72] : memref<608x60xf32, #tpu.memory_space<vmem>>, vector<3x60xf32>
    %c256 = arith.constant 256 : index
    %c0_73 = arith.constant 0 : index
    %205 = vector.load %arg7[%c256, %c0_73] : memref<608x60xf32, #tpu.memory_space<vmem>>, vector<2x60xf32>
    %206 = arith.truncf %203 : vector<80x60xf32> to vector<80x60xbf16>
    %cst_74 = arith.constant dense<0.000000e+00> : vector<8x60xf32>
    %207 = tpu.matmul %165, %206, %cst_74 {dimension_numbers = #tpu.dot_dimension_numbers<[1], [0], [0], [1], [0, 0, 1, 1], [], []>} : vector<8x80xbf16>, vector<80x60xbf16>, vector<8x60xf32> -> vector<8x60xf32>
    %cst_75 = arith.constant 1.000000e-01 : f32
    %208 = vector.broadcast %cst_75 : f32 to vector<8x60xf32>
    %209 = arith.mulf %207, %208 : vector<8x60xf32>
    %210 = arith.truncf %209 : vector<8x60xf32> to vector<8x60xbf16>
    %cst_76 = arith.constant dense<0.000000e+00> : vector<8x60xf32>
    %211 = tpu.matmul %166, %210, %cst_76 {dimension_numbers = #tpu.dot_dimension_numbers<[1], [0], [0], [1], [0, 0, 1, 1], [], []>} : vector<8x8xbf16>, vector<8x60xbf16>, vector<8x60xf32> -> vector<8x60xf32>
    %212 = vector.extract_strided_slice %204 {offsets = [0, 0], sizes = [1, 60], strides = [1, 1]} : vector<3x60xf32> to vector<1x60xf32>
    %213 = vector.broadcast %212 : vector<1x60xf32> to vector<8x60xf32>
    %214 = arith.mulf %211, %213 : vector<8x60xf32>
    %215 = vector.extract_strided_slice %204 {offsets = [1, 0], sizes = [1, 60], strides = [1, 1]} : vector<3x60xf32> to vector<1x60xf32>
    %216 = vector.broadcast %215 : vector<1x60xf32> to vector<8x60xf32>
    %217 = arith.mulf %209, %216 : vector<8x60xf32>
    %218 = arith.addf %214, %217 : vector<8x60xf32>
    %219 = arith.truncf %209 : vector<8x60xf32> to vector<8x60xbf16>
    %cst_77 = arith.constant dense<0.000000e+00> : vector<8x60xf32>
    %220 = tpu.matmul %167, %219, %cst_77 {dimension_numbers = #tpu.dot_dimension_numbers<[1], [0], [0], [1], [0, 0, 1, 1], [], []>} : vector<8x8xbf16>, vector<8x60xbf16>, vector<8x60xf32> -> vector<8x60xf32>
    %221 = vector.extract_strided_slice %204 {offsets = [2, 0], sizes = [1, 60], strides = [1, 1]} : vector<3x60xf32> to vector<1x60xf32>
    %222 = vector.broadcast %221 : vector<1x60xf32> to vector<8x60xf32>
    %223 = arith.mulf %220, %222 : vector<8x60xf32>
    %224 = arith.addf %218, %223 : vector<8x60xf32>
    %225 = vector.extract_strided_slice %205 {offsets = [0, 0], sizes = [1, 60], strides = [1, 1]} : vector<2x60xf32> to vector<1x60xf32>
    %226 = vector.broadcast %225 : vector<1x60xf32> to vector<8x60xf32>
    %227 = arith.mulf %224, %226 : vector<8x60xf32>
    %228 = vector.extract_strided_slice %205 {offsets = [1, 0], sizes = [1, 60], strides = [1, 1]} : vector<2x60xf32> to vector<1x60xf32>
    %229 = vector.broadcast %228 : vector<1x60xf32> to vector<8x60xf32>
    %230 = arith.addf %227, %229 : vector<8x60xf32>
    %231 = arith.negf %230 : vector<8x60xf32>
    %232 = math.exp %231 : vector<8x60xf32>
    %cst_78 = arith.constant 1.000000e+00 : f32
    %233 = vector.broadcast %cst_78 : f32 to vector<8x60xf32>
    %234 = arith.addf %233, %232 : vector<8x60xf32>
    %235 = arith.divf %233, %234 : vector<8x60xf32>
    %236 = arith.mulf %230, %235 : vector<8x60xf32>
    %c272 = arith.constant 272 : index
    %c0_79 = arith.constant 0 : index
    %237 = vector.load %arg7[%c272, %c0_79] : memref<608x60xf32, #tpu.memory_space<vmem>>, vector<60x60xf32>
    %238 = arith.truncf %236 : vector<8x60xf32> to vector<8x60xbf16>
    %239 = arith.truncf %237 : vector<60x60xf32> to vector<60x60xbf16>
    %cst_80 = arith.constant dense<0.000000e+00> : vector<8x60xf32>
    %240 = tpu.matmul %238, %239, %cst_80 {dimension_numbers = #tpu.dot_dimension_numbers<[1], [0], [0], [1], [0, 0, 1, 1], [], []>} : vector<8x60xbf16>, vector<60x60xbf16>, vector<8x60xf32> -> vector<8x60xf32>
    %241 = arith.truncf %240 : vector<8x60xf32> to vector<8x60xbf16>
    %cst_81 = arith.constant dense<0.000000e+00> : vector<80x60xf32>
    %242 = tpu.matmul %168, %241, %cst_81 {dimension_numbers = #tpu.dot_dimension_numbers<[1], [0], [0], [1], [0, 0, 1, 1], [], []>} : vector<80x8xbf16>, vector<8x60xbf16>, vector<80x60xf32> -> vector<80x60xf32>
    %243 = arith.addf %242, %203 : vector<80x60xf32>
    %cst_82 = arith.constant 0.000000e+00 : f32
    %244 = vector.broadcast %cst_82 : f32 to vector<80x60xf32>
    %245 = arith.maximumf %243, %244 : vector<80x60xf32>
    %c336 = arith.constant 336 : index
    %c0_83 = arith.constant 0 : index
    %246 = vector.load %arg7[%c336, %c0_83] : memref<608x60xf32, #tpu.memory_space<vmem>>, vector<3x60xf32>
    %c352 = arith.constant 352 : index
    %c0_84 = arith.constant 0 : index
    %247 = vector.load %arg7[%c352, %c0_84] : memref<608x60xf32, #tpu.memory_space<vmem>>, vector<80x60xf32>
    %c432_85 = arith.constant 432 : index
    %c0_86 = arith.constant 0 : index
    %248 = vector.load %arg7[%c432_85, %c0_86] : memref<608x60xf32, #tpu.memory_space<vmem>>, vector<80x60xf32>
    %cst_87 = arith.constant 0.000000e+00 : f32
    %249 = vector.broadcast %cst_87 : f32 to vector<8x60xf32>
    %250 = vector.extract_strided_slice %245 {offsets = [0, 0], sizes = [72, 60], strides = [1, 1]} : vector<80x60xf32> to vector<72x60xf32>
    %251 = tpu.concatenate %249, %250 in 0 : vector<8x60xf32>, vector<72x60xf32> -> vector<80x60xf32>
    %cst_88 = arith.constant 0.000000e+00 : f32
    %252 = vector.broadcast %cst_88 : f32 to vector<8x60xf32>
    %253 = vector.extract_strided_slice %245 {offsets = [8, 0], sizes = [72, 60], strides = [1, 1]} : vector<80x60xf32> to vector<72x60xf32>
    %254 = tpu.concatenate %253, %252 in 0 : vector<72x60xf32>, vector<8x60xf32> -> vector<80x60xf32>
    %255 = vector.extract_strided_slice %246 {offsets = [0, 0], sizes = [1, 60], strides = [1, 1]} : vector<3x60xf32> to vector<1x60xf32>
    %256 = vector.broadcast %255 : vector<1x60xf32> to vector<80x60xf32>
    %257 = arith.mulf %251, %256 : vector<80x60xf32>
    %258 = vector.extract_strided_slice %246 {offsets = [1, 0], sizes = [1, 60], strides = [1, 1]} : vector<3x60xf32> to vector<1x60xf32>
    %259 = vector.broadcast %258 : vector<1x60xf32> to vector<80x60xf32>
    %260 = arith.mulf %245, %259 : vector<80x60xf32>
    %261 = arith.addf %257, %260 : vector<80x60xf32>
    %262 = vector.extract_strided_slice %246 {offsets = [2, 0], sizes = [1, 60], strides = [1, 1]} : vector<3x60xf32> to vector<1x60xf32>
    %263 = vector.broadcast %262 : vector<1x60xf32> to vector<80x60xf32>
    %264 = arith.mulf %254, %263 : vector<80x60xf32>
    %265 = arith.addf %261, %264 : vector<80x60xf32>
    %266 = arith.mulf %265, %247 : vector<80x60xf32>
    %267 = arith.addf %266, %248 : vector<80x60xf32>
    %c512 = arith.constant 512 : index
    %c0_89 = arith.constant 0 : index
    %268 = vector.load %arg7[%c512, %c0_89] : memref<608x60xf32, #tpu.memory_space<vmem>>, vector<3x60xf32>
    %c528 = arith.constant 528 : index
    %c0_90 = arith.constant 0 : index
    %269 = vector.load %arg7[%c528, %c0_90] : memref<608x60xf32, #tpu.memory_space<vmem>>, vector<2x60xf32>
    %270 = arith.truncf %267 : vector<80x60xf32> to vector<80x60xbf16>
    %cst_91 = arith.constant dense<0.000000e+00> : vector<8x60xf32>
    %271 = tpu.matmul %165, %270, %cst_91 {dimension_numbers = #tpu.dot_dimension_numbers<[1], [0], [0], [1], [0, 0, 1, 1], [], []>} : vector<8x80xbf16>, vector<80x60xbf16>, vector<8x60xf32> -> vector<8x60xf32>
    %cst_92 = arith.constant 1.000000e-01 : f32
    %272 = vector.broadcast %cst_92 : f32 to vector<8x60xf32>
    %273 = arith.mulf %271, %272 : vector<8x60xf32>
    %274 = arith.truncf %273 : vector<8x60xf32> to vector<8x60xbf16>
    %cst_93 = arith.constant dense<0.000000e+00> : vector<8x60xf32>
    %275 = tpu.matmul %166, %274, %cst_93 {dimension_numbers = #tpu.dot_dimension_numbers<[1], [0], [0], [1], [0, 0, 1, 1], [], []>} : vector<8x8xbf16>, vector<8x60xbf16>, vector<8x60xf32> -> vector<8x60xf32>
    %276 = vector.extract_strided_slice %268 {offsets = [0, 0], sizes = [1, 60], strides = [1, 1]} : vector<3x60xf32> to vector<1x60xf32>
    %277 = vector.broadcast %276 : vector<1x60xf32> to vector<8x60xf32>
    %278 = arith.mulf %275, %277 : vector<8x60xf32>
    %279 = vector.extract_strided_slice %268 {offsets = [1, 0], sizes = [1, 60], strides = [1, 1]} : vector<3x60xf32> to vector<1x60xf32>
    %280 = vector.broadcast %279 : vector<1x60xf32> to vector<8x60xf32>
    %281 = arith.mulf %273, %280 : vector<8x60xf32>
    %282 = arith.addf %278, %281 : vector<8x60xf32>
    %283 = arith.truncf %273 : vector<8x60xf32> to vector<8x60xbf16>
    %cst_94 = arith.constant dense<0.000000e+00> : vector<8x60xf32>
    %284 = tpu.matmul %167, %283, %cst_94 {dimension_numbers = #tpu.dot_dimension_numbers<[1], [0], [0], [1], [0, 0, 1, 1], [], []>} : vector<8x8xbf16>, vector<8x60xbf16>, vector<8x60xf32> -> vector<8x60xf32>
    %285 = vector.extract_strided_slice %268 {offsets = [2, 0], sizes = [1, 60], strides = [1, 1]} : vector<3x60xf32> to vector<1x60xf32>
    %286 = vector.broadcast %285 : vector<1x60xf32> to vector<8x60xf32>
    %287 = arith.mulf %284, %286 : vector<8x60xf32>
    %288 = arith.addf %282, %287 : vector<8x60xf32>
    %289 = vector.extract_strided_slice %269 {offsets = [0, 0], sizes = [1, 60], strides = [1, 1]} : vector<2x60xf32> to vector<1x60xf32>
    %290 = vector.broadcast %289 : vector<1x60xf32> to vector<8x60xf32>
    %291 = arith.mulf %288, %290 : vector<8x60xf32>
    %292 = vector.extract_strided_slice %269 {offsets = [1, 0], sizes = [1, 60], strides = [1, 1]} : vector<2x60xf32> to vector<1x60xf32>
    %293 = vector.broadcast %292 : vector<1x60xf32> to vector<8x60xf32>
    %294 = arith.addf %291, %293 : vector<8x60xf32>
    %295 = arith.negf %294 : vector<8x60xf32>
    %296 = math.exp %295 : vector<8x60xf32>
    %cst_95 = arith.constant 1.000000e+00 : f32
    %297 = vector.broadcast %cst_95 : f32 to vector<8x60xf32>
    %298 = arith.addf %297, %296 : vector<8x60xf32>
    %299 = arith.divf %297, %298 : vector<8x60xf32>
    %300 = arith.mulf %294, %299 : vector<8x60xf32>
    %c544 = arith.constant 544 : index
    %c0_96 = arith.constant 0 : index
    %301 = vector.load %arg7[%c544, %c0_96] : memref<608x60xf32, #tpu.memory_space<vmem>>, vector<60x60xf32>
    %302 = arith.truncf %300 : vector<8x60xf32> to vector<8x60xbf16>
    %303 = arith.truncf %301 : vector<60x60xf32> to vector<60x60xbf16>
    %cst_97 = arith.constant dense<0.000000e+00> : vector<8x60xf32>
    %304 = tpu.matmul %302, %303, %cst_97 {dimension_numbers = #tpu.dot_dimension_numbers<[1], [0], [0], [1], [0, 0, 1, 1], [], []>} : vector<8x60xbf16>, vector<60x60xbf16>, vector<8x60xf32> -> vector<8x60xf32>
    %305 = arith.truncf %304 : vector<8x60xf32> to vector<8x60xbf16>
    %cst_98 = arith.constant dense<0.000000e+00> : vector<80x60xf32>
    %306 = tpu.matmul %168, %305, %cst_98 {dimension_numbers = #tpu.dot_dimension_numbers<[1], [0], [0], [1], [0, 0, 1, 1], [], []>} : vector<80x8xbf16>, vector<8x60xbf16>, vector<80x60xf32> -> vector<80x60xf32>
    %307 = arith.addf %306, %245 : vector<80x60xf32>
    %308 = arith.addf %307, %267 : vector<80x60xf32>
    %cst_99 = arith.constant 0.000000e+00 : f32
    %309 = vector.broadcast %cst_99 : f32 to vector<80x60xf32>
    %310 = arith.maximumf %308, %309 : vector<80x60xf32>
    %c48_100 = arith.constant 48 : index
    %c0_101 = arith.constant 0 : index
    %311 = vector.load %arg3[%c48_100, %c0_101] : memref<112x80xbf16, #tpu.memory_space<vmem>>, vector<20x80xbf16>
    %c80_102 = arith.constant 80 : index
    %c0_103 = arith.constant 0 : index
    %312 = vector.load %arg3[%c80_102, %c0_103] : memref<112x80xbf16, #tpu.memory_space<vmem>>, vector<20x80xbf16>
    %cst_104 = arith.constant 0.000000e+00 : f32
    %313 = vector.broadcast %cst_104 : f32 to vector<8x60xf32>
    %314 = vector.extract_strided_slice %310 {offsets = [8, 0], sizes = [72, 60], strides = [1, 1]} : vector<80x60xf32> to vector<72x60xf32>
    %315 = tpu.concatenate %314, %313 in 0 : vector<72x60xf32>, vector<8x60xf32> -> vector<80x60xf32>
    %316 = arith.maximumf %310, %315 : vector<80x60xf32>
    %317 = arith.truncf %316 : vector<80x60xf32> to vector<80x60xbf16>
    %cst_105 = arith.constant dense<0.000000e+00> : vector<20x60xf32>
    %318 = tpu.matmul %311, %317, %cst_105 {dimension_numbers = #tpu.dot_dimension_numbers<[1], [0], [0], [1], [0, 0, 1, 1], [], []>} : vector<20x80xbf16>, vector<80x60xbf16>, vector<20x60xf32> -> vector<20x60xf32>
    %319 = arith.truncf %316 : vector<80x60xf32> to vector<80x60xbf16>
    %cst_106 = arith.constant dense<0.000000e+00> : vector<20x60xf32>
    %320 = tpu.matmul %312, %319, %cst_106 {dimension_numbers = #tpu.dot_dimension_numbers<[1], [0], [0], [1], [0, 0, 1, 1], [], []>} : vector<20x80xbf16>, vector<80x60xbf16>, vector<20x60xf32> -> vector<20x60xf32>
    %321 = arith.maximumf %318, %320 : vector<20x60xf32>
    %c0_107 = arith.constant 0 : index
    %c0_108 = arith.constant 0 : index
    %322 = vector.load %arg4[%c0_107, %c0_108] : memref<128x20xbf16, #tpu.memory_space<vmem>>, vector<4x20xbf16>
    %c16_109 = arith.constant 16 : index
    %c0_110 = arith.constant 0 : index
    %323 = vector.load %arg4[%c16_109, %c0_110] : memref<128x20xbf16, #tpu.memory_space<vmem>>, vector<4x4xbf16>
    %c32_111 = arith.constant 32 : index
    %c0_112 = arith.constant 0 : index
    %324 = vector.load %arg4[%c32_111, %c0_112] : memref<128x20xbf16, #tpu.memory_space<vmem>>, vector<4x4xbf16>
    %c400 = arith.constant 400 : index
    %c0_113 = arith.constant 0 : index
    %325 = vector.load %arg5[%c400, %c0_113] : memref<432x16xbf16, #tpu.memory_space<vmem>>, vector<20x4xbf16>
    %c48_114 = arith.constant 48 : index
    %c0_115 = arith.constant 0 : index
    %326 = vector.load %arg4[%c48_114, %c0_115] : memref<128x20xbf16, #tpu.memory_space<vmem>>, vector<20x20xbf16>
    %c80_116 = arith.constant 80 : index
    %c0_117 = arith.constant 0 : index
    %327 = vector.load %arg4[%c80_116, %c0_117] : memref<128x20xbf16, #tpu.memory_space<vmem>>, vector<20x20xbf16>
    %c64_118 = arith.constant 64 : index
    %c0_119 = arith.constant 0 : index
    %328 = vector.load %arg8[%c64_118, %c0_119] : memref<1360x100xf32, #tpu.memory_space<vmem>>, vector<2x80xf32>
    %c0_120 = arith.constant 0 : index
    %c0_121 = arith.constant 0 : index
    %329 = vector.load %arg8[%c0_120, %c0_121] : memref<1360x100xf32, #tpu.memory_space<vmem>>, vector<60x80xf32>
    %330 = arith.truncf %321 : vector<20x60xf32> to vector<20x60xbf16>
    %331 = arith.truncf %329 : vector<60x80xf32> to vector<60x80xbf16>
    %cst_122 = arith.constant dense<0.000000e+00> : vector<20x80xf32>
    %332 = tpu.matmul %330, %331, %cst_122 {dimension_numbers = #tpu.dot_dimension_numbers<[1], [0], [0], [1], [0, 0, 1, 1], [], []>} : vector<20x60xbf16>, vector<60x80xbf16>, vector<20x80xf32> -> vector<20x80xf32>
    %333 = vector.extract_strided_slice %328 {offsets = [0, 0], sizes = [1, 80], strides = [1, 1]} : vector<2x80xf32> to vector<1x80xf32>
    %334 = vector.broadcast %333 : vector<1x80xf32> to vector<20x80xf32>
    %335 = arith.mulf %332, %334 : vector<20x80xf32>
    %336 = vector.extract_strided_slice %328 {offsets = [1, 0], sizes = [1, 80], strides = [1, 1]} : vector<2x80xf32> to vector<1x80xf32>
    %337 = vector.broadcast %336 : vector<1x80xf32> to vector<20x80xf32>
    %338 = arith.addf %335, %337 : vector<20x80xf32>
    %cst_123 = arith.constant 0.000000e+00 : f32
    %339 = vector.broadcast %cst_123 : f32 to vector<20x80xf32>
    %340 = arith.maximumf %338, %339 : vector<20x80xf32>
    %c80_124 = arith.constant 80 : index
    %c0_125 = arith.constant 0 : index
    %341 = vector.load %arg8[%c80_124, %c0_125] : memref<1360x100xf32, #tpu.memory_space<vmem>>, vector<3x80xf32>
    %c96_126 = arith.constant 96 : index
    %c0_127 = arith.constant 0 : index
    %342 = vector.load %arg8[%c96_126, %c0_127] : memref<1360x100xf32, #tpu.memory_space<vmem>>, vector<20x80xf32>
    %c128_128 = arith.constant 128 : index
    %c0_129 = arith.constant 0 : index
    %343 = vector.load %arg8[%c128_128, %c0_129] : memref<1360x100xf32, #tpu.memory_space<vmem>>, vector<20x80xf32>
    %344 = arith.truncf %340 : vector<20x80xf32> to vector<20x80xbf16>
    %cst_130 = arith.constant dense<0.000000e+00> : vector<20x80xf32>
    %345 = tpu.matmul %326, %344, %cst_130 {dimension_numbers = #tpu.dot_dimension_numbers<[1], [0], [0], [1], [0, 0, 1, 1], [], []>} : vector<20x20xbf16>, vector<20x80xbf16>, vector<20x80xf32> -> vector<20x80xf32>
    %346 = arith.truncf %340 : vector<20x80xf32> to vector<20x80xbf16>
    %cst_131 = arith.constant dense<0.000000e+00> : vector<20x80xf32>
    %347 = tpu.matmul %327, %346, %cst_131 {dimension_numbers = #tpu.dot_dimension_numbers<[1], [0], [0], [1], [0, 0, 1, 1], [], []>} : vector<20x20xbf16>, vector<20x80xbf16>, vector<20x80xf32> -> vector<20x80xf32>
    %348 = vector.extract_strided_slice %341 {offsets = [0, 0], sizes = [1, 80], strides = [1, 1]} : vector<3x80xf32> to vector<1x80xf32>
    %349 = vector.broadcast %348 : vector<1x80xf32> to vector<20x80xf32>
    %350 = arith.mulf %345, %349 : vector<20x80xf32>
    %351 = vector.extract_strided_slice %341 {offsets = [1, 0], sizes = [1, 80], strides = [1, 1]} : vector<3x80xf32> to vector<1x80xf32>
    %352 = vector.broadcast %351 : vector<1x80xf32> to vector<20x80xf32>
    %353 = arith.mulf %340, %352 : vector<20x80xf32>
    %354 = arith.addf %350, %353 : vector<20x80xf32>
    %355 = vector.extract_strided_slice %341 {offsets = [2, 0], sizes = [1, 80], strides = [1, 1]} : vector<3x80xf32> to vector<1x80xf32>
    %356 = vector.broadcast %355 : vector<1x80xf32> to vector<20x80xf32>
    %357 = arith.mulf %347, %356 : vector<20x80xf32>
    %358 = arith.addf %354, %357 : vector<20x80xf32>
    %359 = arith.mulf %358, %342 : vector<20x80xf32>
    %360 = arith.addf %359, %343 : vector<20x80xf32>
    %c160_132 = arith.constant 160 : index
    %c0_133 = arith.constant 0 : index
    %361 = vector.load %arg8[%c160_132, %c0_133] : memref<1360x100xf32, #tpu.memory_space<vmem>>, vector<3x80xf32>
    %c176 = arith.constant 176 : index
    %c0_134 = arith.constant 0 : index
    %362 = vector.load %arg8[%c176, %c0_134] : memref<1360x100xf32, #tpu.memory_space<vmem>>, vector<2x80xf32>
    %363 = arith.truncf %360 : vector<20x80xf32> to vector<20x80xbf16>
    %cst_135 = arith.constant dense<0.000000e+00> : vector<4x80xf32>
    %364 = tpu.matmul %322, %363, %cst_135 {dimension_numbers = #tpu.dot_dimension_numbers<[1], [0], [0], [1], [0, 0, 1, 1], [], []>} : vector<4x20xbf16>, vector<20x80xbf16>, vector<4x80xf32> -> vector<4x80xf32>
    %cst_136 = arith.constant 2.000000e-01 : f32
    %365 = vector.broadcast %cst_136 : f32 to vector<4x80xf32>
    %366 = arith.mulf %364, %365 : vector<4x80xf32>
    %367 = arith.truncf %366 : vector<4x80xf32> to vector<4x80xbf16>
    %cst_137 = arith.constant dense<0.000000e+00> : vector<4x80xf32>
    %368 = tpu.matmul %323, %367, %cst_137 {dimension_numbers = #tpu.dot_dimension_numbers<[1], [0], [0], [1], [0, 0, 1, 1], [], []>} : vector<4x4xbf16>, vector<4x80xbf16>, vector<4x80xf32> -> vector<4x80xf32>
    %369 = vector.extract_strided_slice %361 {offsets = [0, 0], sizes = [1, 80], strides = [1, 1]} : vector<3x80xf32> to vector<1x80xf32>
    %370 = vector.broadcast %369 : vector<1x80xf32> to vector<4x80xf32>
    %371 = arith.mulf %368, %370 : vector<4x80xf32>
    %372 = vector.extract_strided_slice %361 {offsets = [1, 0], sizes = [1, 80], strides = [1, 1]} : vector<3x80xf32> to vector<1x80xf32>
    %373 = vector.broadcast %372 : vector<1x80xf32> to vector<4x80xf32>
    %374 = arith.mulf %366, %373 : vector<4x80xf32>
    %375 = arith.addf %371, %374 : vector<4x80xf32>
    %376 = arith.truncf %366 : vector<4x80xf32> to vector<4x80xbf16>
    %cst_138 = arith.constant dense<0.000000e+00> : vector<4x80xf32>
    %377 = tpu.matmul %324, %376, %cst_138 {dimension_numbers = #tpu.dot_dimension_numbers<[1], [0], [0], [1], [0, 0, 1, 1], [], []>} : vector<4x4xbf16>, vector<4x80xbf16>, vector<4x80xf32> -> vector<4x80xf32>
    %378 = vector.extract_strided_slice %361 {offsets = [2, 0], sizes = [1, 80], strides = [1, 1]} : vector<3x80xf32> to vector<1x80xf32>
    %379 = vector.broadcast %378 : vector<1x80xf32> to vector<4x80xf32>
    %380 = arith.mulf %377, %379 : vector<4x80xf32>
    %381 = arith.addf %375, %380 : vector<4x80xf32>
    %382 = vector.extract_strided_slice %362 {offsets = [0, 0], sizes = [1, 80], strides = [1, 1]} : vector<2x80xf32> to vector<1x80xf32>
    %383 = vector.broadcast %382 : vector<1x80xf32> to vector<4x80xf32>
    %384 = arith.mulf %381, %383 : vector<4x80xf32>
    %385 = vector.extract_strided_slice %362 {offsets = [1, 0], sizes = [1, 80], strides = [1, 1]} : vector<2x80xf32> to vector<1x80xf32>
    %386 = vector.broadcast %385 : vector<1x80xf32> to vector<4x80xf32>
    %387 = arith.addf %384, %386 : vector<4x80xf32>
    %388 = arith.negf %387 : vector<4x80xf32>
    %389 = math.exp %388 : vector<4x80xf32>
    %cst_139 = arith.constant 1.000000e+00 : f32
    %390 = vector.broadcast %cst_139 : f32 to vector<4x80xf32>
    %391 = arith.addf %390, %389 : vector<4x80xf32>
    %392 = arith.divf %390, %391 : vector<4x80xf32>
    %393 = arith.mulf %387, %392 : vector<4x80xf32>
    %c192 = arith.constant 192 : index
    %c0_140 = arith.constant 0 : index
    %394 = vector.load %arg8[%c192, %c0_140] : memref<1360x100xf32, #tpu.memory_space<vmem>>, vector<80x80xf32>
    %395 = arith.truncf %393 : vector<4x80xf32> to vector<4x80xbf16>
    %396 = arith.truncf %394 : vector<80x80xf32> to vector<80x80xbf16>
    %cst_141 = arith.constant dense<0.000000e+00> : vector<4x80xf32>
    %397 = tpu.matmul %395, %396, %cst_141 {dimension_numbers = #tpu.dot_dimension_numbers<[1], [0], [0], [1], [0, 0, 1, 1], [], []>} : vector<4x80xbf16>, vector<80x80xbf16>, vector<4x80xf32> -> vector<4x80xf32>
    %398 = arith.truncf %397 : vector<4x80xf32> to vector<4x80xbf16>
    %cst_142 = arith.constant dense<0.000000e+00> : vector<20x80xf32>
    %399 = tpu.matmul %325, %398, %cst_142 {dimension_numbers = #tpu.dot_dimension_numbers<[1], [0], [0], [1], [0, 0, 1, 1], [], []>} : vector<20x4xbf16>, vector<4x80xbf16>, vector<20x80xf32> -> vector<20x80xf32>
    %400 = arith.addf %399, %360 : vector<20x80xf32>
    %cst_143 = arith.constant 0.000000e+00 : f32
    %401 = vector.broadcast %cst_143 : f32 to vector<20x80xf32>
    %402 = arith.maximumf %400, %401 : vector<20x80xf32>
    %c272_144 = arith.constant 272 : index
    %c0_145 = arith.constant 0 : index
    %403 = vector.load %arg8[%c272_144, %c0_145] : memref<1360x100xf32, #tpu.memory_space<vmem>>, vector<3x80xf32>
    %c288 = arith.constant 288 : index
    %c0_146 = arith.constant 0 : index
    %404 = vector.load %arg8[%c288, %c0_146] : memref<1360x100xf32, #tpu.memory_space<vmem>>, vector<20x80xf32>
    %c320_147 = arith.constant 320 : index
    %c0_148 = arith.constant 0 : index
    %405 = vector.load %arg8[%c320_147, %c0_148] : memref<1360x100xf32, #tpu.memory_space<vmem>>, vector<20x80xf32>
    %406 = arith.truncf %402 : vector<20x80xf32> to vector<20x80xbf16>
    %cst_149 = arith.constant dense<0.000000e+00> : vector<20x80xf32>
    %407 = tpu.matmul %326, %406, %cst_149 {dimension_numbers = #tpu.dot_dimension_numbers<[1], [0], [0], [1], [0, 0, 1, 1], [], []>} : vector<20x20xbf16>, vector<20x80xbf16>, vector<20x80xf32> -> vector<20x80xf32>
    %408 = arith.truncf %402 : vector<20x80xf32> to vector<20x80xbf16>
    %cst_150 = arith.constant dense<0.000000e+00> : vector<20x80xf32>
    %409 = tpu.matmul %327, %408, %cst_150 {dimension_numbers = #tpu.dot_dimension_numbers<[1], [0], [0], [1], [0, 0, 1, 1], [], []>} : vector<20x20xbf16>, vector<20x80xbf16>, vector<20x80xf32> -> vector<20x80xf32>
    %410 = vector.extract_strided_slice %403 {offsets = [0, 0], sizes = [1, 80], strides = [1, 1]} : vector<3x80xf32> to vector<1x80xf32>
    %411 = vector.broadcast %410 : vector<1x80xf32> to vector<20x80xf32>
    %412 = arith.mulf %407, %411 : vector<20x80xf32>
    %413 = vector.extract_strided_slice %403 {offsets = [1, 0], sizes = [1, 80], strides = [1, 1]} : vector<3x80xf32> to vector<1x80xf32>
    %414 = vector.broadcast %413 : vector<1x80xf32> to vector<20x80xf32>
    %415 = arith.mulf %402, %414 : vector<20x80xf32>
    %416 = arith.addf %412, %415 : vector<20x80xf32>
    %417 = vector.extract_strided_slice %403 {offsets = [2, 0], sizes = [1, 80], strides = [1, 1]} : vector<3x80xf32> to vector<1x80xf32>
    %418 = vector.broadcast %417 : vector<1x80xf32> to vector<20x80xf32>
    %419 = arith.mulf %409, %418 : vector<20x80xf32>
    %420 = arith.addf %416, %419 : vector<20x80xf32>
    %421 = arith.mulf %420, %404 : vector<20x80xf32>
    %422 = arith.addf %421, %405 : vector<20x80xf32>
    %c352_151 = arith.constant 352 : index
    %c0_152 = arith.constant 0 : index
    %423 = vector.load %arg8[%c352_151, %c0_152] : memref<1360x100xf32, #tpu.memory_space<vmem>>, vector<3x80xf32>
    %c368 = arith.constant 368 : index
    %c0_153 = arith.constant 0 : index
    %424 = vector.load %arg8[%c368, %c0_153] : memref<1360x100xf32, #tpu.memory_space<vmem>>, vector<2x80xf32>
    %425 = arith.truncf %422 : vector<20x80xf32> to vector<20x80xbf16>
    %cst_154 = arith.constant dense<0.000000e+00> : vector<4x80xf32>
    %426 = tpu.matmul %322, %425, %cst_154 {dimension_numbers = #tpu.dot_dimension_numbers<[1], [0], [0], [1], [0, 0, 1, 1], [], []>} : vector<4x20xbf16>, vector<20x80xbf16>, vector<4x80xf32> -> vector<4x80xf32>
    %cst_155 = arith.constant 2.000000e-01 : f32
    %427 = vector.broadcast %cst_155 : f32 to vector<4x80xf32>
    %428 = arith.mulf %426, %427 : vector<4x80xf32>
    %429 = arith.truncf %428 : vector<4x80xf32> to vector<4x80xbf16>
    %cst_156 = arith.constant dense<0.000000e+00> : vector<4x80xf32>
    %430 = tpu.matmul %323, %429, %cst_156 {dimension_numbers = #tpu.dot_dimension_numbers<[1], [0], [0], [1], [0, 0, 1, 1], [], []>} : vector<4x4xbf16>, vector<4x80xbf16>, vector<4x80xf32> -> vector<4x80xf32>
    %431 = vector.extract_strided_slice %423 {offsets = [0, 0], sizes = [1, 80], strides = [1, 1]} : vector<3x80xf32> to vector<1x80xf32>
    %432 = vector.broadcast %431 : vector<1x80xf32> to vector<4x80xf32>
    %433 = arith.mulf %430, %432 : vector<4x80xf32>
    %434 = vector.extract_strided_slice %423 {offsets = [1, 0], sizes = [1, 80], strides = [1, 1]} : vector<3x80xf32> to vector<1x80xf32>
    %435 = vector.broadcast %434 : vector<1x80xf32> to vector<4x80xf32>
    %436 = arith.mulf %428, %435 : vector<4x80xf32>
    %437 = arith.addf %433, %436 : vector<4x80xf32>
    %438 = arith.truncf %428 : vector<4x80xf32> to vector<4x80xbf16>
    %cst_157 = arith.constant dense<0.000000e+00> : vector<4x80xf32>
    %439 = tpu.matmul %324, %438, %cst_157 {dimension_numbers = #tpu.dot_dimension_numbers<[1], [0], [0], [1], [0, 0, 1, 1], [], []>} : vector<4x4xbf16>, vector<4x80xbf16>, vector<4x80xf32> -> vector<4x80xf32>
    %440 = vector.extract_strided_slice %423 {offsets = [2, 0], sizes = [1, 80], strides = [1, 1]} : vector<3x80xf32> to vector<1x80xf32>
    %441 = vector.broadcast %440 : vector<1x80xf32> to vector<4x80xf32>
    %442 = arith.mulf %439, %441 : vector<4x80xf32>
    %443 = arith.addf %437, %442 : vector<4x80xf32>
    %444 = vector.extract_strided_slice %424 {offsets = [0, 0], sizes = [1, 80], strides = [1, 1]} : vector<2x80xf32> to vector<1x80xf32>
    %445 = vector.broadcast %444 : vector<1x80xf32> to vector<4x80xf32>
    %446 = arith.mulf %443, %445 : vector<4x80xf32>
    %447 = vector.extract_strided_slice %424 {offsets = [1, 0], sizes = [1, 80], strides = [1, 1]} : vector<2x80xf32> to vector<1x80xf32>
    %448 = vector.broadcast %447 : vector<1x80xf32> to vector<4x80xf32>
    %449 = arith.addf %446, %448 : vector<4x80xf32>
    %450 = arith.negf %449 : vector<4x80xf32>
    %451 = math.exp %450 : vector<4x80xf32>
    %cst_158 = arith.constant 1.000000e+00 : f32
    %452 = vector.broadcast %cst_158 : f32 to vector<4x80xf32>
    %453 = arith.addf %452, %451 : vector<4x80xf32>
    %454 = arith.divf %452, %453 : vector<4x80xf32>
    %455 = arith.mulf %449, %454 : vector<4x80xf32>
    %c384 = arith.constant 384 : index
    %c0_159 = arith.constant 0 : index
    %456 = vector.load %arg8[%c384, %c0_159] : memref<1360x100xf32, #tpu.memory_space<vmem>>, vector<80x80xf32>
    %457 = arith.truncf %455 : vector<4x80xf32> to vector<4x80xbf16>
    %458 = arith.truncf %456 : vector<80x80xf32> to vector<80x80xbf16>
    %cst_160 = arith.constant dense<0.000000e+00> : vector<4x80xf32>
    %459 = tpu.matmul %457, %458, %cst_160 {dimension_numbers = #tpu.dot_dimension_numbers<[1], [0], [0], [1], [0, 0, 1, 1], [], []>} : vector<4x80xbf16>, vector<80x80xbf16>, vector<4x80xf32> -> vector<4x80xf32>
    %460 = arith.truncf %459 : vector<4x80xf32> to vector<4x80xbf16>
    %cst_161 = arith.constant dense<0.000000e+00> : vector<20x80xf32>
    %461 = tpu.matmul %325, %460, %cst_161 {dimension_numbers = #tpu.dot_dimension_numbers<[1], [0], [0], [1], [0, 0, 1, 1], [], []>} : vector<20x4xbf16>, vector<4x80xbf16>, vector<20x80xf32> -> vector<20x80xf32>
    %462 = arith.addf %461, %402 : vector<20x80xf32>
    %463 = arith.addf %462, %422 : vector<20x80xf32>
    %cst_162 = arith.constant 0.000000e+00 : f32
    %464 = vector.broadcast %cst_162 : f32 to vector<20x80xf32>
    %465 = arith.maximumf %463, %464 : vector<20x80xf32>
    %c544_163 = arith.constant 544 : index
    %c0_164 = arith.constant 0 : index
    %466 = vector.load %arg8[%c544_163, %c0_164] : memref<1360x100xf32, #tpu.memory_space<vmem>>, vector<2x100xf32>
    %c464 = arith.constant 464 : index
    %c0_165 = arith.constant 0 : index
    %467 = vector.load %arg8[%c464, %c0_165] : memref<1360x100xf32, #tpu.memory_space<vmem>>, vector<80x100xf32>
    %468 = arith.truncf %465 : vector<20x80xf32> to vector<20x80xbf16>
    %469 = arith.truncf %467 : vector<80x100xf32> to vector<80x100xbf16>
    %cst_166 = arith.constant dense<0.000000e+00> : vector<20x100xf32>
    %470 = tpu.matmul %468, %469, %cst_166 {dimension_numbers = #tpu.dot_dimension_numbers<[1], [0], [0], [1], [0, 0, 1, 1], [], []>} : vector<20x80xbf16>, vector<80x100xbf16>, vector<20x100xf32> -> vector<20x100xf32>
    %471 = vector.extract_strided_slice %466 {offsets = [0, 0], sizes = [1, 100], strides = [1, 1]} : vector<2x100xf32> to vector<1x100xf32>
    %472 = vector.broadcast %471 : vector<1x100xf32> to vector<20x100xf32>
    %473 = arith.mulf %470, %472 : vector<20x100xf32>
    %474 = vector.extract_strided_slice %466 {offsets = [1, 0], sizes = [1, 100], strides = [1, 1]} : vector<2x100xf32> to vector<1x100xf32>
    %475 = vector.broadcast %474 : vector<1x100xf32> to vector<20x100xf32>
    %476 = arith.addf %473, %475 : vector<20x100xf32>
    %cst_167 = arith.constant 0.000000e+00 : f32
    %477 = vector.broadcast %cst_167 : f32 to vector<20x100xf32>
    %478 = arith.maximumf %476, %477 : vector<20x100xf32>
    %c560 = arith.constant 560 : index
    %c0_168 = arith.constant 0 : index
    %479 = vector.load %arg8[%c560, %c0_168] : memref<1360x100xf32, #tpu.memory_space<vmem>>, vector<3x100xf32>
    %c576 = arith.constant 576 : index
    %c0_169 = arith.constant 0 : index
    %480 = vector.load %arg8[%c576, %c0_169] : memref<1360x100xf32, #tpu.memory_space<vmem>>, vector<20x100xf32>
    %c608 = arith.constant 608 : index
    %c0_170 = arith.constant 0 : index
    %481 = vector.load %arg8[%c608, %c0_170] : memref<1360x100xf32, #tpu.memory_space<vmem>>, vector<20x100xf32>
    %482 = arith.truncf %478 : vector<20x100xf32> to vector<20x100xbf16>
    %cst_171 = arith.constant dense<0.000000e+00> : vector<20x100xf32>
    %483 = tpu.matmul %326, %482, %cst_171 {dimension_numbers = #tpu.dot_dimension_numbers<[1], [0], [0], [1], [0, 0, 1, 1], [], []>} : vector<20x20xbf16>, vector<20x100xbf16>, vector<20x100xf32> -> vector<20x100xf32>
    %484 = arith.truncf %478 : vector<20x100xf32> to vector<20x100xbf16>
    %cst_172 = arith.constant dense<0.000000e+00> : vector<20x100xf32>
    %485 = tpu.matmul %327, %484, %cst_172 {dimension_numbers = #tpu.dot_dimension_numbers<[1], [0], [0], [1], [0, 0, 1, 1], [], []>} : vector<20x20xbf16>, vector<20x100xbf16>, vector<20x100xf32> -> vector<20x100xf32>
    %486 = vector.extract_strided_slice %479 {offsets = [0, 0], sizes = [1, 100], strides = [1, 1]} : vector<3x100xf32> to vector<1x100xf32>
    %487 = vector.broadcast %486 : vector<1x100xf32> to vector<20x100xf32>
    %488 = arith.mulf %483, %487 : vector<20x100xf32>
    %489 = vector.extract_strided_slice %479 {offsets = [1, 0], sizes = [1, 100], strides = [1, 1]} : vector<3x100xf32> to vector<1x100xf32>
    %490 = vector.broadcast %489 : vector<1x100xf32> to vector<20x100xf32>
    %491 = arith.mulf %478, %490 : vector<20x100xf32>
    %492 = arith.addf %488, %491 : vector<20x100xf32>
    %493 = vector.extract_strided_slice %479 {offsets = [2, 0], sizes = [1, 100], strides = [1, 1]} : vector<3x100xf32> to vector<1x100xf32>
    %494 = vector.broadcast %493 : vector<1x100xf32> to vector<20x100xf32>
    %495 = arith.mulf %485, %494 : vector<20x100xf32>
    %496 = arith.addf %492, %495 : vector<20x100xf32>
    %497 = arith.mulf %496, %480 : vector<20x100xf32>
    %498 = arith.addf %497, %481 : vector<20x100xf32>
    %c640 = arith.constant 640 : index
    %c0_173 = arith.constant 0 : index
    %499 = vector.load %arg8[%c640, %c0_173] : memref<1360x100xf32, #tpu.memory_space<vmem>>, vector<3x100xf32>
    %c656 = arith.constant 656 : index
    %c0_174 = arith.constant 0 : index
    %500 = vector.load %arg8[%c656, %c0_174] : memref<1360x100xf32, #tpu.memory_space<vmem>>, vector<2x100xf32>
    %501 = arith.truncf %498 : vector<20x100xf32> to vector<20x100xbf16>
    %cst_175 = arith.constant dense<0.000000e+00> : vector<4x100xf32>
    %502 = tpu.matmul %322, %501, %cst_175 {dimension_numbers = #tpu.dot_dimension_numbers<[1], [0], [0], [1], [0, 0, 1, 1], [], []>} : vector<4x20xbf16>, vector<20x100xbf16>, vector<4x100xf32> -> vector<4x100xf32>
    %cst_176 = arith.constant 2.000000e-01 : f32
    %503 = vector.broadcast %cst_176 : f32 to vector<4x100xf32>
    %504 = arith.mulf %502, %503 : vector<4x100xf32>
    %505 = arith.truncf %504 : vector<4x100xf32> to vector<4x100xbf16>
    %cst_177 = arith.constant dense<0.000000e+00> : vector<4x100xf32>
    %506 = tpu.matmul %323, %505, %cst_177 {dimension_numbers = #tpu.dot_dimension_numbers<[1], [0], [0], [1], [0, 0, 1, 1], [], []>} : vector<4x4xbf16>, vector<4x100xbf16>, vector<4x100xf32> -> vector<4x100xf32>
    %507 = vector.extract_strided_slice %499 {offsets = [0, 0], sizes = [1, 100], strides = [1, 1]} : vector<3x100xf32> to vector<1x100xf32>
    %508 = vector.broadcast %507 : vector<1x100xf32> to vector<4x100xf32>
    %509 = arith.mulf %506, %508 : vector<4x100xf32>
    %510 = vector.extract_strided_slice %499 {offsets = [1, 0], sizes = [1, 100], strides = [1, 1]} : vector<3x100xf32> to vector<1x100xf32>
    %511 = vector.broadcast %510 : vector<1x100xf32> to vector<4x100xf32>
    %512 = arith.mulf %504, %511 : vector<4x100xf32>
    %513 = arith.addf %509, %512 : vector<4x100xf32>
    %514 = arith.truncf %504 : vector<4x100xf32> to vector<4x100xbf16>
    %cst_178 = arith.constant dense<0.000000e+00> : vector<4x100xf32>
    %515 = tpu.matmul %324, %514, %cst_178 {dimension_numbers = #tpu.dot_dimension_numbers<[1], [0], [0], [1], [0, 0, 1, 1], [], []>} : vector<4x4xbf16>, vector<4x100xbf16>, vector<4x100xf32> -> vector<4x100xf32>
    %516 = vector.extract_strided_slice %499 {offsets = [2, 0], sizes = [1, 100], strides = [1, 1]} : vector<3x100xf32> to vector<1x100xf32>
    %517 = vector.broadcast %516 : vector<1x100xf32> to vector<4x100xf32>
    %518 = arith.mulf %515, %517 : vector<4x100xf32>
    %519 = arith.addf %513, %518 : vector<4x100xf32>
    %520 = vector.extract_strided_slice %500 {offsets = [0, 0], sizes = [1, 100], strides = [1, 1]} : vector<2x100xf32> to vector<1x100xf32>
    %521 = vector.broadcast %520 : vector<1x100xf32> to vector<4x100xf32>
    %522 = arith.mulf %519, %521 : vector<4x100xf32>
    %523 = vector.extract_strided_slice %500 {offsets = [1, 0], sizes = [1, 100], strides = [1, 1]} : vector<2x100xf32> to vector<1x100xf32>
    %524 = vector.broadcast %523 : vector<1x100xf32> to vector<4x100xf32>
    %525 = arith.addf %522, %524 : vector<4x100xf32>
    %526 = arith.negf %525 : vector<4x100xf32>
    %527 = math.exp %526 : vector<4x100xf32>
    %cst_179 = arith.constant 1.000000e+00 : f32
    %528 = vector.broadcast %cst_179 : f32 to vector<4x100xf32>
    %529 = arith.addf %528, %527 : vector<4x100xf32>
    %530 = arith.divf %528, %529 : vector<4x100xf32>
    %531 = arith.mulf %525, %530 : vector<4x100xf32>
    %c672 = arith.constant 672 : index
    %c0_180 = arith.constant 0 : index
    %532 = vector.load %arg8[%c672, %c0_180] : memref<1360x100xf32, #tpu.memory_space<vmem>>, vector<100x100xf32>
    %533 = arith.truncf %531 : vector<4x100xf32> to vector<4x100xbf16>
    %534 = arith.truncf %532 : vector<100x100xf32> to vector<100x100xbf16>
    %cst_181 = arith.constant dense<0.000000e+00> : vector<4x100xf32>
    %535 = tpu.matmul %533, %534, %cst_181 {dimension_numbers = #tpu.dot_dimension_numbers<[1], [0], [0], [1], [0, 0, 1, 1], [], []>} : vector<4x100xbf16>, vector<100x100xbf16>, vector<4x100xf32> -> vector<4x100xf32>
    %536 = arith.truncf %535 : vector<4x100xf32> to vector<4x100xbf16>
    %cst_182 = arith.constant dense<0.000000e+00> : vector<20x100xf32>
    %537 = tpu.matmul %325, %536, %cst_182 {dimension_numbers = #tpu.dot_dimension_numbers<[1], [0], [0], [1], [0, 0, 1, 1], [], []>} : vector<20x4xbf16>, vector<4x100xbf16>, vector<20x100xf32> -> vector<20x100xf32>
    %538 = arith.addf %537, %498 : vector<20x100xf32>
    %cst_183 = arith.constant 0.000000e+00 : f32
    %539 = vector.broadcast %cst_183 : f32 to vector<20x100xf32>
    %540 = arith.maximumf %538, %539 : vector<20x100xf32>
    %c784_184 = arith.constant 784 : index
    %c0_185 = arith.constant 0 : index
    %541 = vector.load %arg8[%c784_184, %c0_185] : memref<1360x100xf32, #tpu.memory_space<vmem>>, vector<3x100xf32>
    %c800 = arith.constant 800 : index
    %c0_186 = arith.constant 0 : index
    %542 = vector.load %arg8[%c800, %c0_186] : memref<1360x100xf32, #tpu.memory_space<vmem>>, vector<20x100xf32>
    %c832_187 = arith.constant 832 : index
    %c0_188 = arith.constant 0 : index
    %543 = vector.load %arg8[%c832_187, %c0_188] : memref<1360x100xf32, #tpu.memory_space<vmem>>, vector<20x100xf32>
    %544 = arith.truncf %540 : vector<20x100xf32> to vector<20x100xbf16>
    %cst_189 = arith.constant dense<0.000000e+00> : vector<20x100xf32>
    %545 = tpu.matmul %326, %544, %cst_189 {dimension_numbers = #tpu.dot_dimension_numbers<[1], [0], [0], [1], [0, 0, 1, 1], [], []>} : vector<20x20xbf16>, vector<20x100xbf16>, vector<20x100xf32> -> vector<20x100xf32>
    %546 = arith.truncf %540 : vector<20x100xf32> to vector<20x100xbf16>
    %cst_190 = arith.constant dense<0.000000e+00> : vector<20x100xf32>
    %547 = tpu.matmul %327, %546, %cst_190 {dimension_numbers = #tpu.dot_dimension_numbers<[1], [0], [0], [1], [0, 0, 1, 1], [], []>} : vector<20x20xbf16>, vector<20x100xbf16>, vector<20x100xf32> -> vector<20x100xf32>
    %548 = vector.extract_strided_slice %541 {offsets = [0, 0], sizes = [1, 100], strides = [1, 1]} : vector<3x100xf32> to vector<1x100xf32>
    %549 = vector.broadcast %548 : vector<1x100xf32> to vector<20x100xf32>
    %550 = arith.mulf %545, %549 : vector<20x100xf32>
    %551 = vector.extract_strided_slice %541 {offsets = [1, 0], sizes = [1, 100], strides = [1, 1]} : vector<3x100xf32> to vector<1x100xf32>
    %552 = vector.broadcast %551 : vector<1x100xf32> to vector<20x100xf32>
    %553 = arith.mulf %540, %552 : vector<20x100xf32>
    %554 = arith.addf %550, %553 : vector<20x100xf32>
    %555 = vector.extract_strided_slice %541 {offsets = [2, 0], sizes = [1, 100], strides = [1, 1]} : vector<3x100xf32> to vector<1x100xf32>
    %556 = vector.broadcast %555 : vector<1x100xf32> to vector<20x100xf32>
    %557 = arith.mulf %547, %556 : vector<20x100xf32>
    %558 = arith.addf %554, %557 : vector<20x100xf32>
    %559 = arith.mulf %558, %542 : vector<20x100xf32>
    %560 = arith.addf %559, %543 : vector<20x100xf32>
    %c864 = arith.constant 864 : index
    %c0_191 = arith.constant 0 : index
    %561 = vector.load %arg8[%c864, %c0_191] : memref<1360x100xf32, #tpu.memory_space<vmem>>, vector<3x100xf32>
    %c880 = arith.constant 880 : index
    %c0_192 = arith.constant 0 : index
    %562 = vector.load %arg8[%c880, %c0_192] : memref<1360x100xf32, #tpu.memory_space<vmem>>, vector<2x100xf32>
    %563 = arith.truncf %560 : vector<20x100xf32> to vector<20x100xbf16>
    %cst_193 = arith.constant dense<0.000000e+00> : vector<4x100xf32>
    %564 = tpu.matmul %322, %563, %cst_193 {dimension_numbers = #tpu.dot_dimension_numbers<[1], [0], [0], [1], [0, 0, 1, 1], [], []>} : vector<4x20xbf16>, vector<20x100xbf16>, vector<4x100xf32> -> vector<4x100xf32>
    %cst_194 = arith.constant 2.000000e-01 : f32
    %565 = vector.broadcast %cst_194 : f32 to vector<4x100xf32>
    %566 = arith.mulf %564, %565 : vector<4x100xf32>
    %567 = arith.truncf %566 : vector<4x100xf32> to vector<4x100xbf16>
    %cst_195 = arith.constant dense<0.000000e+00> : vector<4x100xf32>
    %568 = tpu.matmul %323, %567, %cst_195 {dimension_numbers = #tpu.dot_dimension_numbers<[1], [0], [0], [1], [0, 0, 1, 1], [], []>} : vector<4x4xbf16>, vector<4x100xbf16>, vector<4x100xf32> -> vector<4x100xf32>
    %569 = vector.extract_strided_slice %561 {offsets = [0, 0], sizes = [1, 100], strides = [1, 1]} : vector<3x100xf32> to vector<1x100xf32>
    %570 = vector.broadcast %569 : vector<1x100xf32> to vector<4x100xf32>
    %571 = arith.mulf %568, %570 : vector<4x100xf32>
    %572 = vector.extract_strided_slice %561 {offsets = [1, 0], sizes = [1, 100], strides = [1, 1]} : vector<3x100xf32> to vector<1x100xf32>
    %573 = vector.broadcast %572 : vector<1x100xf32> to vector<4x100xf32>
    %574 = arith.mulf %566, %573 : vector<4x100xf32>
    %575 = arith.addf %571, %574 : vector<4x100xf32>
    %576 = arith.truncf %566 : vector<4x100xf32> to vector<4x100xbf16>
    %cst_196 = arith.constant dense<0.000000e+00> : vector<4x100xf32>
    %577 = tpu.matmul %324, %576, %cst_196 {dimension_numbers = #tpu.dot_dimension_numbers<[1], [0], [0], [1], [0, 0, 1, 1], [], []>} : vector<4x4xbf16>, vector<4x100xbf16>, vector<4x100xf32> -> vector<4x100xf32>
    %578 = vector.extract_strided_slice %561 {offsets = [2, 0], sizes = [1, 100], strides = [1, 1]} : vector<3x100xf32> to vector<1x100xf32>
    %579 = vector.broadcast %578 : vector<1x100xf32> to vector<4x100xf32>
    %580 = arith.mulf %577, %579 : vector<4x100xf32>
    %581 = arith.addf %575, %580 : vector<4x100xf32>
    %582 = vector.extract_strided_slice %562 {offsets = [0, 0], sizes = [1, 100], strides = [1, 1]} : vector<2x100xf32> to vector<1x100xf32>
    %583 = vector.broadcast %582 : vector<1x100xf32> to vector<4x100xf32>
    %584 = arith.mulf %581, %583 : vector<4x100xf32>
    %585 = vector.extract_strided_slice %562 {offsets = [1, 0], sizes = [1, 100], strides = [1, 1]} : vector<2x100xf32> to vector<1x100xf32>
    %586 = vector.broadcast %585 : vector<1x100xf32> to vector<4x100xf32>
    %587 = arith.addf %584, %586 : vector<4x100xf32>
    %588 = arith.negf %587 : vector<4x100xf32>
    %589 = math.exp %588 : vector<4x100xf32>
    %cst_197 = arith.constant 1.000000e+00 : f32
    %590 = vector.broadcast %cst_197 : f32 to vector<4x100xf32>
    %591 = arith.addf %590, %589 : vector<4x100xf32>
    %592 = arith.divf %590, %591 : vector<4x100xf32>
    %593 = arith.mulf %587, %592 : vector<4x100xf32>
    %c896 = arith.constant 896 : index
    %c0_198 = arith.constant 0 : index
    %594 = vector.load %arg8[%c896, %c0_198] : memref<1360x100xf32, #tpu.memory_space<vmem>>, vector<100x100xf32>
    %595 = arith.truncf %593 : vector<4x100xf32> to vector<4x100xbf16>
    %596 = arith.truncf %594 : vector<100x100xf32> to vector<100x100xbf16>
    %cst_199 = arith.constant dense<0.000000e+00> : vector<4x100xf32>
    %597 = tpu.matmul %595, %596, %cst_199 {dimension_numbers = #tpu.dot_dimension_numbers<[1], [0], [0], [1], [0, 0, 1, 1], [], []>} : vector<4x100xbf16>, vector<100x100xbf16>, vector<4x100xf32> -> vector<4x100xf32>
    %598 = arith.truncf %597 : vector<4x100xf32> to vector<4x100xbf16>
    %cst_200 = arith.constant dense<0.000000e+00> : vector<20x100xf32>
    %599 = tpu.matmul %325, %598, %cst_200 {dimension_numbers = #tpu.dot_dimension_numbers<[1], [0], [0], [1], [0, 0, 1, 1], [], []>} : vector<20x4xbf16>, vector<4x100xbf16>, vector<20x100xf32> -> vector<20x100xf32>
    %600 = arith.addf %599, %540 : vector<20x100xf32>
    %601 = arith.addf %600, %560 : vector<20x100xf32>
    %cst_201 = arith.constant 0.000000e+00 : f32
    %602 = vector.broadcast %cst_201 : f32 to vector<20x100xf32>
    %603 = arith.maximumf %601, %602 : vector<20x100xf32>
    %c1008 = arith.constant 1008 : index
    %c0_202 = arith.constant 0 : index
    %604 = vector.load %arg8[%c1008, %c0_202] : memref<1360x100xf32, #tpu.memory_space<vmem>>, vector<3x100xf32>
    %c1024 = arith.constant 1024 : index
    %c0_203 = arith.constant 0 : index
    %605 = vector.load %arg8[%c1024, %c0_203] : memref<1360x100xf32, #tpu.memory_space<vmem>>, vector<20x100xf32>
    %c1056 = arith.constant 1056 : index
    %c0_204 = arith.constant 0 : index
    %606 = vector.load %arg8[%c1056, %c0_204] : memref<1360x100xf32, #tpu.memory_space<vmem>>, vector<20x100xf32>
    %607 = arith.truncf %603 : vector<20x100xf32> to vector<20x100xbf16>
    %cst_205 = arith.constant dense<0.000000e+00> : vector<20x100xf32>
    %608 = tpu.matmul %326, %607, %cst_205 {dimension_numbers = #tpu.dot_dimension_numbers<[1], [0], [0], [1], [0, 0, 1, 1], [], []>} : vector<20x20xbf16>, vector<20x100xbf16>, vector<20x100xf32> -> vector<20x100xf32>
    %609 = arith.truncf %603 : vector<20x100xf32> to vector<20x100xbf16>
    %cst_206 = arith.constant dense<0.000000e+00> : vector<20x100xf32>
    %610 = tpu.matmul %327, %609, %cst_206 {dimension_numbers = #tpu.dot_dimension_numbers<[1], [0], [0], [1], [0, 0, 1, 1], [], []>} : vector<20x20xbf16>, vector<20x100xbf16>, vector<20x100xf32> -> vector<20x100xf32>
    %611 = vector.extract_strided_slice %604 {offsets = [0, 0], sizes = [1, 100], strides = [1, 1]} : vector<3x100xf32> to vector<1x100xf32>
    %612 = vector.broadcast %611 : vector<1x100xf32> to vector<20x100xf32>
    %613 = arith.mulf %608, %612 : vector<20x100xf32>
    %614 = vector.extract_strided_slice %604 {offsets = [1, 0], sizes = [1, 100], strides = [1, 1]} : vector<3x100xf32> to vector<1x100xf32>
    %615 = vector.broadcast %614 : vector<1x100xf32> to vector<20x100xf32>
    %616 = arith.mulf %603, %615 : vector<20x100xf32>
    %617 = arith.addf %613, %616 : vector<20x100xf32>
    %618 = vector.extract_strided_slice %604 {offsets = [2, 0], sizes = [1, 100], strides = [1, 1]} : vector<3x100xf32> to vector<1x100xf32>
    %619 = vector.broadcast %618 : vector<1x100xf32> to vector<20x100xf32>
    %620 = arith.mulf %610, %619 : vector<20x100xf32>
    %621 = arith.addf %617, %620 : vector<20x100xf32>
    %622 = arith.mulf %621, %605 : vector<20x100xf32>
    %623 = arith.addf %622, %606 : vector<20x100xf32>
    %c1088 = arith.constant 1088 : index
    %c0_207 = arith.constant 0 : index
    %624 = vector.load %arg8[%c1088, %c0_207] : memref<1360x100xf32, #tpu.memory_space<vmem>>, vector<3x100xf32>
    %c1104 = arith.constant 1104 : index
    %c0_208 = arith.constant 0 : index
    %625 = vector.load %arg8[%c1104, %c0_208] : memref<1360x100xf32, #tpu.memory_space<vmem>>, vector<2x100xf32>
    %626 = arith.truncf %623 : vector<20x100xf32> to vector<20x100xbf16>
    %cst_209 = arith.constant dense<0.000000e+00> : vector<4x100xf32>
    %627 = tpu.matmul %322, %626, %cst_209 {dimension_numbers = #tpu.dot_dimension_numbers<[1], [0], [0], [1], [0, 0, 1, 1], [], []>} : vector<4x20xbf16>, vector<20x100xbf16>, vector<4x100xf32> -> vector<4x100xf32>
    %cst_210 = arith.constant 2.000000e-01 : f32
    %628 = vector.broadcast %cst_210 : f32 to vector<4x100xf32>
    %629 = arith.mulf %627, %628 : vector<4x100xf32>
    %630 = arith.truncf %629 : vector<4x100xf32> to vector<4x100xbf16>
    %cst_211 = arith.constant dense<0.000000e+00> : vector<4x100xf32>
    %631 = tpu.matmul %323, %630, %cst_211 {dimension_numbers = #tpu.dot_dimension_numbers<[1], [0], [0], [1], [0, 0, 1, 1], [], []>} : vector<4x4xbf16>, vector<4x100xbf16>, vector<4x100xf32> -> vector<4x100xf32>
    %632 = vector.extract_strided_slice %624 {offsets = [0, 0], sizes = [1, 100], strides = [1, 1]} : vector<3x100xf32> to vector<1x100xf32>
    %633 = vector.broadcast %632 : vector<1x100xf32> to vector<4x100xf32>
    %634 = arith.mulf %631, %633 : vector<4x100xf32>
    %635 = vector.extract_strided_slice %624 {offsets = [1, 0], sizes = [1, 100], strides = [1, 1]} : vector<3x100xf32> to vector<1x100xf32>
    %636 = vector.broadcast %635 : vector<1x100xf32> to vector<4x100xf32>
    %637 = arith.mulf %629, %636 : vector<4x100xf32>
    %638 = arith.addf %634, %637 : vector<4x100xf32>
    %639 = arith.truncf %629 : vector<4x100xf32> to vector<4x100xbf16>
    %cst_212 = arith.constant dense<0.000000e+00> : vector<4x100xf32>
    %640 = tpu.matmul %324, %639, %cst_212 {dimension_numbers = #tpu.dot_dimension_numbers<[1], [0], [0], [1], [0, 0, 1, 1], [], []>} : vector<4x4xbf16>, vector<4x100xbf16>, vector<4x100xf32> -> vector<4x100xf32>
    %641 = vector.extract_strided_slice %624 {offsets = [2, 0], sizes = [1, 100], strides = [1, 1]} : vector<3x100xf32> to vector<1x100xf32>
    %642 = vector.broadcast %641 : vector<1x100xf32> to vector<4x100xf32>
    %643 = arith.mulf %640, %642 : vector<4x100xf32>
    %644 = arith.addf %638, %643 : vector<4x100xf32>
    %645 = vector.extract_strided_slice %625 {offsets = [0, 0], sizes = [1, 100], strides = [1, 1]} : vector<2x100xf32> to vector<1x100xf32>
    %646 = vector.broadcast %645 : vector<1x100xf32> to vector<4x100xf32>
    %647 = arith.mulf %644, %646 : vector<4x100xf32>
    %648 = vector.extract_strided_slice %625 {offsets = [1, 0], sizes = [1, 100], strides = [1, 1]} : vector<2x100xf32> to vector<1x100xf32>
    %649 = vector.broadcast %648 : vector<1x100xf32> to vector<4x100xf32>
    %650 = arith.addf %647, %649 : vector<4x100xf32>
    %651 = arith.negf %650 : vector<4x100xf32>
    %652 = math.exp %651 : vector<4x100xf32>
    %cst_213 = arith.constant 1.000000e+00 : f32
    %653 = vector.broadcast %cst_213 : f32 to vector<4x100xf32>
    %654 = arith.addf %653, %652 : vector<4x100xf32>
    %655 = arith.divf %653, %654 : vector<4x100xf32>
    %656 = arith.mulf %650, %655 : vector<4x100xf32>
    %c1120 = arith.constant 1120 : index
    %c0_214 = arith.constant 0 : index
    %657 = vector.load %arg8[%c1120, %c0_214] : memref<1360x100xf32, #tpu.memory_space<vmem>>, vector<100x100xf32>
    %658 = arith.truncf %656 : vector<4x100xf32> to vector<4x100xbf16>
    %659 = arith.truncf %657 : vector<100x100xf32> to vector<100x100xbf16>
    %cst_215 = arith.constant dense<0.000000e+00> : vector<4x100xf32>
    %660 = tpu.matmul %658, %659, %cst_215 {dimension_numbers = #tpu.dot_dimension_numbers<[1], [0], [0], [1], [0, 0, 1, 1], [], []>} : vector<4x100xbf16>, vector<100x100xbf16>, vector<4x100xf32> -> vector<4x100xf32>
    %661 = arith.truncf %660 : vector<4x100xf32> to vector<4x100xbf16>
    %cst_216 = arith.constant dense<0.000000e+00> : vector<20x100xf32>
    %662 = tpu.matmul %325, %661, %cst_216 {dimension_numbers = #tpu.dot_dimension_numbers<[1], [0], [0], [1], [0, 0, 1, 1], [], []>} : vector<20x4xbf16>, vector<4x100xbf16>, vector<20x100xf32> -> vector<20x100xf32>
    %663 = arith.addf %662, %603 : vector<20x100xf32>
    %664 = arith.addf %663, %623 : vector<20x100xf32>
    %cst_217 = arith.constant 0.000000e+00 : f32
    %665 = vector.broadcast %cst_217 : f32 to vector<20x100xf32>
    %666 = arith.maximumf %664, %665 : vector<20x100xf32>
    %c112_218 = arith.constant 112 : index
    %c0_219 = arith.constant 0 : index
    %667 = vector.load %arg4[%c112_218, %c0_219] : memref<128x20xbf16, #tpu.memory_space<vmem>>, vector<2x20xbf16>
    %668 = arith.truncf %666 : vector<20x100xf32> to vector<20x100xbf16>
    %cst_220 = arith.constant dense<0.000000e+00> : vector<2x100xf32>
    %669 = tpu.matmul %667, %668, %cst_220 {dimension_numbers = #tpu.dot_dimension_numbers<[1], [0], [0], [1], [0, 0, 1, 1], [], []>} : vector<2x20xbf16>, vector<20x100xbf16>, vector<2x100xf32> -> vector<2x100xf32>
    %cst_221 = arith.constant 1.000000e-01 : f32
    %670 = vector.broadcast %cst_221 : f32 to vector<2x100xf32>
    %671 = arith.mulf %669, %670 : vector<2x100xf32>
    %c1232 = arith.constant 1232 : index
    %c0_222 = arith.constant 0 : index
    %672 = vector.load %arg8[%c1232, %c0_222] : memref<1360x100xf32, #tpu.memory_space<vmem>>, vector<100x4xf32>
    %673 = arith.truncf %671 : vector<2x100xf32> to vector<2x100xbf16>
    %674 = arith.truncf %672 : vector<100x4xf32> to vector<100x4xbf16>
    %cst_223 = arith.constant dense<0.000000e+00> : vector<2x4xf32>
    %675 = tpu.matmul %673, %674, %cst_223 {dimension_numbers = #tpu.dot_dimension_numbers<[1], [0], [0], [1], [0, 0, 1, 1], [], []>} : vector<2x100xbf16>, vector<100x4xbf16>, vector<2x4xf32> -> vector<2x4xf32>
    %c1344 = arith.constant 1344 : index
    %c0_224 = arith.constant 0 : index
    %676 = vector.load %arg8[%c1344, %c0_224] : memref<1360x100xf32, #tpu.memory_space<vmem>>, vector<1x4xf32>
    %677 = vector.broadcast %676 : vector<1x4xf32> to vector<2x4xf32>
    %678 = arith.addf %675, %677 : vector<2x4xf32>
    %c0_225 = arith.constant 0 : index
    %c0_226 = arith.constant 0 : index
    %679 = vector.load %arg9[%c0_225, %c0_226] : memref<2x4xf32, #tpu.memory_space<vmem>>, vector<2x4xf32>
    tpu.vector_store %arg9[%c0_225, %c0_226], %678 {strides = array<i32>} : memref<2x4xf32, #tpu.memory_space<vmem>>, vector<2x4xf32>,
    return
  }
}

</mosaic_0001>

<bundles_post_ra>
// kernel: bc_resnet_forward.1
= control target key start
LH: loop header
LB: loop body
LE: loop exit
PB: predicated region body
PF: predicated region fallthrough
CT: control target
= control target key end

     0   :  { %vm165_vm0 = vcmask 1043456   ;;  %vm166_vm1 = vcmask 1044480   ;;  %v8899_v2 = vmov 65535   ;;  %vm104_vm2 = vcmask 203776   ;;  %s12928_s1 = inlined_call_operand.vmem [shape: f32[48,80], index: 1, kind: input, shape index: {}]   ;;  %s12929_s0 = inlined_call_operand.vmem [shape: f32[320,25], index: 0, kind: input, shape index: {}]   ;;  %s12930_s6 = inlined_call_operand.vmem [shape: f32[1568,40], index: 6, kind: input, shape index: {}]   ;;  %s12931_s2 = inlined_call_operand.vmem [shape: bf16[208,320], index: 2, kind: input, shape index: {}]   ;;  %s12932_s5 = inlined_call_operand.vmem [shape: bf16[432,16], index: 5, kind: input, shape index: {}]   ;;  %s12933_s7 = inlined_call_operand.vmem [shape: f32[608,60], index: 7, kind: input, shape index: {}]   ;;  %s12934_s3 = inlined_call_operand.vmem [shape: bf16[112,80], index: 3, kind: input, shape index: {}]   ;;  %s12935_s8 = inlined_call_operand.vmem [shape: f32[1360,100], index: 8, kind: input, shape index: {}]   ;;  %s12936_s4 = inlined_call_operand.vmem [shape: bf16[128,20], index: 4, kind: input, shape index: {}]   ;;  %s12937_s9 = inlined_call_operand.vmem [shape: f32[2,4], index: 9, kind: output, shape index: {}]  }
   0x1   :  { %v75_v0 = vld [vmem:[%s12928_s1 + $0x10] sm:$0xff]  ;;  %v76_v1 = vld [vmem:[%s12928_s1 + $0x18] sm:$0x1]  ;;  %v167_v3 = vsel %vm165_vm0, 4294967295, %v8899_v2  ;;  %v73_v6 = vld [vmem:[%s12928_s1] sm:$0xff]  ;;  %vm449_vm3 = vcmask 654336  }
   0x2   :  { %v98_v4 = vpack.c.bf16 %v76_v1, %v75_v0  ;;  %v168_v5 = vsel %vm166_vm1, %v167_v3, 0  ;;  %v74_v7 = vld [vmem:[%s12928_s1 + $0x8] sm:$0xff]  ;;  %v33_v8 = vld [vmem:[%s12929_s0] sm:$0xff]  ;;  %v35_v13 = vld [vmem:[%s12929_s0 + $0x10] sm:$0xff]  ;;  %vm8901_vm4 = vmmov 0   ;;  %vm1239_vm5 = vcmask 523264  }
   0x3   :  { %v34_v9 = vld [vmem:[%s12929_s0 + $0x8] sm:$0xff]  ;;  %v97_v11 = vpack.c.bf16 %v74_v7, %v73_v6  ;;  %v36_v14 = vld [vmem:[%s12929_s0 + $0x18] sm:$0xff]  ;;  %v37_v15 = vld [vmem:[%s12929_s0 + $0x20] sm:$0xff]  ;;  %vm1333_vm6 = vcmask 130048   ;;  %vm1484_vm7 = vcmask 326656   ;;  %vm3757_vm8 = vcmask 64512  }
   0x4   :  { %v170_v10 = vand.u32 %v168_v5, %v98_v4  ;;  %v77_v12 = vpack.c.bf16 %v34_v9, %v33_v8  ;;  %v38_v16 = vld [vmem:[%s12929_s0 + $0x28] sm:$0xff]  ;;  %v78_v17 = vpack.c.bf16 %v36_v14, %v35_v13  ;;  %v39_v19 = vld [vmem:[%s12929_s0 + $0x30] sm:$0xff]  ;;  %v40_v20 = vld [vmem:[%s12929_s0 + $0x38] sm:$0xff]  ;;  %vm3898_vm9 = vcmask 1045504  }
   0x5   :  { %v79_v18 = vpack.c.bf16 %v38_v16, %v37_v15  ;;  %v41_v21 = vld [vmem:[%s12929_s0 + $0x40] sm:$0xff]  ;;  %v42_v22 = vld [vmem:[%s12929_s0 + $0x48] sm:$0xff]  ;;  %v420_v25 = vld [vmem:[%s12930_s6 + $0x30] sm:$0xff]  ;;  %v80_v28 = vpack.c.bf16 %v40_v20, %v39_v19  ;;  %vm3894_vm10 = vcmask 490496   ;;  %vm4760_vm11 = vcmask 162816  }
   0x6   :  { %7900 = vmatprep.subr.bf16.mxu0 %v170_v10  ;;  %7904 = vmatprep.mubr.msk.bf16.mxu0 %vm104_vm2, %v77_v12  ;;  %v422_v23 = vld [vmem:[%s12930_s6 + $0x40] sm:$0xff]  ;;  %v423_v24 = vld [vmem:[%s12930_s6 + $0x48] sm:$0xff]  ;;  %v421_v27 = vld [vmem:[%s12930_s6 + $0x38] sm:$0xff]  ;;  %v81_v30 = vpack.c.bf16 %v42_v22, %v41_v21  ;;  %vm4767_vm12 = vcmask 1041408   ;;  %vm4966_vm13 = vcmask 31744   ;;  %vm6059_vm14 = vcmask 818176  }
   0x7   :  { %7901 = vmatpush3.bf16.msra.mxu0 %v170_v10  ;;  %v448_v26 = vpack.c.bf16 %v423_v24, %v422_v23  ;;  %v447_v29 = vpack.c.bf16 %v421_v27, %v420_v25  ;;  %v43_v31 = vld [vmem:[%s12929_s0 + $0x50] sm:$0xff]  ;;  %v44_v32 = vld [vmem:[%s12929_s0 + $0x58] sm:$0xff]  ;;  %v45_v33 = vld [vmem:[%s12929_s0 + $0x60] sm:$0xff]  ;;  %vm7147_vm15 = vcmask 25600  }
   0x8   :  { %7902 = vmatprep.subr.bf16.mxu0 %v97_v11  ;;  %v46_v34 = vld [vmem:[%s12929_s0 + $0x68] sm:$0xff]  ;;  %v82_v35 = vpack.c.bf16 %v44_v32, %v43_v31  ;;  %v47_v37 = vld [vmem:[%s12929_s0 + $0x70] sm:$0xff]  ;;  %v48_v38 = vld [vmem:[%s12929_s0 + $0x78] sm:$0xff] }
   0x9   :  { %7944 = vmatprep.subr.bf16.mxu1 %v448_v26  ;;  %v83_v36 = vpack.c.bf16 %v46_v34, %v45_v33  ;;  %v49_v39 = vld [vmem:[%s12929_s0 + $0x80] sm:$0xff]  ;;  %v50_v40 = vld [vmem:[%s12929_s0 + $0x88] sm:$0xff]  ;;  %v84_v41 = vpack.c.bf16 %v48_v38, %v47_v37  ;;  %v51_v43 = vld [vmem:[%s12929_s0 + $0x90] sm:$0xff] }
   0xa   :  { %7945 = vmatpush3.bf16.msra.mxu1 %v448_v26  ;;  %v85_v42 = vpack.c.bf16 %v50_v40, %v49_v39  ;;  %v52_v44 = vld [vmem:[%s12929_s0 + $0x98] sm:$0xff]  ;;  %v53_v45 = vld [vmem:[%s12929_s0 + $0xa0] sm:$0xff]  ;;  %v54_v46 = vld [vmem:[%s12929_s0 + $0xa8] sm:$0xff] }
   0xb   :  { %7903 = vmatpush3.bf16.msra.mxu0 %v97_v11  ;;  %7946 = vmatprep.subr.bf16.mxu1 %v447_v29  ;;  %v86_v47 = vpack.c.bf16 %v52_v44, %v51_v43  ;;  %v87_v48 = vpack.c.bf16 %v54_v46, %v53_v45  ;;  %v55_v49 = vld [vmem:[%s12929_s0 + $0xb0] sm:$0xff]  ;;  %v56_v50 = vld [vmem:[%s12929_s0 + $0xb8] sm:$0xff]  ;;  %v57_v51 = vld [vmem:[%s12929_s0 + $0xc0] sm:$0xff] }
   0xc   :  { %v58_v52 = vld [vmem:[%s12929_s0 + $0xc8] sm:$0xff]  ;;  %v88_v53 = vpack.c.bf16 %v56_v50, %v55_v49  ;;  %v59_v55 = vld [vmem:[%s12929_s0 + $0xd0] sm:$0xff]  ;;  %v60_v56 = vld [vmem:[%s12929_s0 + $0xd8] sm:$0xff] }
   0xd   :  { %v89_v54 = vpack.c.bf16 %v58_v52, %v57_v51  ;;  %v61_v57 = vld [vmem:[%s12929_s0 + $0xe0] sm:$0xff]  ;;  %v62_v58 = vld [vmem:[%s12929_s0 + $0xe8] sm:$0xff]  ;;  %v90_v59 = vpack.c.bf16 %v60_v56, %v59_v55  ;;  %v63_v61 = vld [vmem:[%s12929_s0 + $0xf0] sm:$0xff] }
   0xe   :  { %7905 = vmatmul.mubr.msk.bf16.vlgmr.msra.gmra.mxu0 %vm104_vm2, %v78_v17  ;;  %7947 = vmatpush3.bf16.msra.mxu1 %v447_v29  ;;  %v91_v60 = vpack.c.bf16 %v62_v58, %v61_v57  ;;  %v64_v62 = vld [vmem:[%s12929_s0 + $0xf8] sm:$0xff]  ;;  %v65_v63 = vld [vmem:[%s12929_s0 + $0x100] sm:$0xff]  ;;  %v66_v0 = vld [vmem:[%s12929_s0 + $0x108] sm:$0xff] }
   0xf   :  { %7908 = vmatprep.mubr.msk.bf16.mxu0 %vm104_vm2, %v79_v18  ;;  %v92_v1 = vpack.c.bf16 %v64_v62, %v63_v61  ;;  %v93_v2 = vpack.c.bf16 %v66_v0, %v65_v63  ;;  %v67_v3 = vld [vmem:[%s12929_s0 + $0x110] sm:$0xff]  ;;  %v68_v4 = vld [vmem:[%s12929_s0 + $0x118] sm:$0xff]  ;;  %v69_v5 = vld [vmem:[%s12929_s0 + $0x120] sm:$0xff] }
  0x10   :  { %v70_v6 = vld [vmem:[%s12929_s0 + $0x128] sm:$0xff]  ;;  %v94_v7 = vpack.c.bf16 %v68_v4, %v67_v3  ;;  %v418_v9 = vld [vmem:[%s12930_s6 + $0x20] sm:$0xff]  ;;  %v71_v12 = vld [vmem:[%s12929_s0 + $0x130] sm:$0xff] }
  0x11   :  { %v95_v8 = vpack.c.bf16 %v70_v6, %v69_v5  ;;  %v419_v10 = vld [vmem:[%s12930_s6 + $0x28] sm:$0xff]  ;;  %v72_v13 = vld [vmem:[%s12929_s0 + $0x138] sm:$0xff]  ;;  %v416_v14 = vld [vmem:[%s12930_s6 + $0x10] sm:$0xff] }
  0x12   :  { %v446_v11 = vpack.c.bf16 %v419_v10, %v418_v9  ;;  %v417_v15 = vld [vmem:[%s12930_s6 + $0x18] sm:$0xff]  ;;  %v96_v17 = vpack.c.bf16 %v72_v13, %v71_v12  ;;  %v414_v18 = vld [vmem:[%s12930_s6] sm:$0xff]  ;;  %v415_v19 = vld [vmem:[%s12930_s6 + $0x8] sm:$0xff] }
  0x13   :  { %v445_v16 = vpack.c.bf16 %v417_v15, %v416_v14  ;;  %v444_v20 = vpack.c.bf16 %v415_v19, %v414_v18  ;;  %v9138_v24 = vld [vmem:[%s12928_s1 + $0x20] ss:$0 sm:$0xff] }
  0x14   :  { %7948 = vmatprep.subr.bf16.mxu1 %v446_v11 }
  0x15   :  { %7949 = vmatpush3.bf16.msra.mxu1 %v446_v11 }
  0x16   :  { %7909 = vmatmul.mubr.msk.bf16.gmra.mxu0 %vm104_vm2, %v80_v28  ;;  %7950 = vmatprep.subr.bf16.mxu1 %v445_v16 }
  0x17   :  { %7912 = vmatprep.mubr.msk.bf16.mxu0 %vm104_vm2, %v81_v30 }
  0x19   :  { %7951 = vmatpush3.bf16.msra.mxu1 %v445_v16 }
  0x1a   :  { %7952 = vmatprep.subr.bf16.mxu1 %v444_v20 }
  0x1d   :  { %7953 = vmatpush3.bf16.msra.mxu1 %v444_v20 }
  0x1e   :  { %7913 = vmatmul.mubr.msk.bf16.gmra.mxu0 %vm104_vm2, %v82_v35 }
  0x1f   :  { %7916 = vmatprep.mubr.msk.bf16.mxu0 %vm104_vm2, %v83_v36 }
  0x26   :  { %7917 = vmatmul.mubr.msk.bf16.gmra.mxu0 %vm104_vm2, %v84_v41 }
  0x27   :  { %7920 = vmatprep.mubr.msk.bf16.mxu0 %vm104_vm2, %v85_v42 }
  0x2e   :  { %7921 = vmatmul.mubr.msk.bf16.gmra.mxu0 %vm104_vm2, %v86_v47 }
  0x2f   :  { %7924 = vmatprep.mubr.msk.bf16.mxu0 %vm104_vm2, %v87_v48 }
  0x36   :  { %7925 = vmatmul.mubr.msk.bf16.gmra.mxu0 %vm104_vm2, %v88_v53 }
  0x37   :  { %7928 = vmatprep.mubr.msk.bf16.mxu0 %vm104_vm2, %v89_v54 }
  0x3e   :  { %7929 = vmatmul.mubr.msk.bf16.gmra.mxu0 %vm104_vm2, %v90_v59 }
  0x3f   :  { %7932 = vmatprep.mubr.msk.bf16.mxu0 %vm104_vm2, %v91_v60 }
  0x46   :  { %7933 = vmatmul.mubr.msk.bf16.gmra.mxu0 %vm104_vm2, %v92_v1 }
  0x47   :  { %7936 = vmatprep.mubr.msk.bf16.mxu0 %vm104_vm2, %v93_v2 }
  0x4e   :  { %7937 = vmatmul.mubr.msk.bf16.gmra.mxu0 %vm104_vm2, %v94_v7 }
  0x4f   :  { %7940 = vmatprep.mubr.msk.bf16.mxu0 %vm104_vm2, %v95_v8 }
  0x56   :  { %7941 = vmatmul.mubr.msk.bf16.gmra.mxu0 %vm104_vm2, %v96_v17 }
  0xce   :  { %v7906_v21 = vpop.f32.mrf.mxu0 }
  0xcf   :  { %v215_v29 = vadd.f32 %v7906_v21, %v9138_v24 }
  0xd0   :  { %v206_v22 = vpop.f32.mrf.mxu0 }
  0xd1   :  { %v207_v27 = vadd.f32 %v9138_v24, %v206_v22 }
  0xd2   :  { %v7907_v23 = vpop.f32.mrf.mxu0 }
  0xd3   :  { %v218_v25 = vadd.f32 %v7907_v23, %v9138_v24 }
  0xd4   :  { %v209_v26 = vpop.f32.mrf.mxu0 }
  0xd5   :  { %v210_v28 = vadd.f32 %v9138_v24, %v209_v26  ;;  %v425_v32 = vpack.c.bf16 %v218_v25, %v215_v29 }
  0xd6   :  { %v7910_v30 = vpop.f32.mrf.mxu0 }
  0xd7   :  { %v424_v31 = vpack.c.bf16 %v210_v28, %v207_v27  ;;  %v231_v39 = vadd.f32 %v7910_v30, %v9138_v24 }
  0xd8   :  { %v222_v33 = vpop.f32.mrf.mxu0 }
  0xd9   :  { %7954 = vmatprep.mubr.msk.bf16.mxu1 %vm449_vm3, %v424_v31  ;;  %v223_v37 = vadd.f32 %v9138_v24, %v222_v33 }
  0xda   :  { %v7911_v34 = vpop.f32.mrf.mxu0  ;;  %7955 = vmatmul.mubr.msk.bf16.vlgmr.msra.gmra.mxu1 %vm449_vm3, %v425_v32 }
  0xdb   :  { %v234_v35 = vadd.f32 %v7911_v34, %v9138_v24 }
  0xdc   :  { %v225_v36 = vpop.f32.mrf.mxu0 }
  0xdd   :  { %v226_v38 = vadd.f32 %v9138_v24, %v225_v36  ;;  %v427_v42 = vpack.c.bf16 %v234_v35, %v231_v39 }
  0xde   :  { %v7914_v40 = vpop.f32.mrf.mxu0 }
  0xdf   :  { %v426_v41 = vpack.c.bf16 %v226_v38, %v223_v37  ;;  %v247_v49 = vadd.f32 %v7914_v40, %v9138_v24 }
  0xe0   :  { %v238_v43 = vpop.f32.mrf.mxu0 }
  0xe1   :  { %7958 = vmatprep.mubr.msk.bf16.mxu1 %vm449_vm3, %v426_v41  ;;  %v239_v47 = vadd.f32 %v9138_v24, %v238_v43 }
  0xe2   :  { %v7915_v44 = vpop.f32.mrf.mxu0  ;;  %7959 = vmatmul.mubr.msk.bf16.gmra.mxu1 %vm449_vm3, %v427_v42 }
  0xe3   :  { %v250_v45 = vadd.f32 %v7915_v44, %v9138_v24 }
  0xe4   :  { %v241_v46 = vpop.f32.mrf.mxu0 }
  0xe5   :  { %v242_v48 = vadd.f32 %v9138_v24, %v241_v46  ;;  %v429_v52 = vpack.c.bf16 %v250_v45, %v247_v49 }
  0xe6   :  { %v7918_v50 = vpop.f32.mrf.mxu0 }
  0xe7   :  { %v428_v51 = vpack.c.bf16 %v242_v48, %v239_v47  ;;  %v263_v59 = vadd.f32 %v7918_v50, %v9138_v24 }
  0xe8   :  { %v254_v53 = vpop.f32.mrf.mxu0 }
  0xe9   :  { %7962 = vmatprep.mubr.msk.bf16.mxu1 %vm449_vm3, %v428_v51  ;;  %v255_v57 = vadd.f32 %v9138_v24, %v254_v53 }
  0xea   :  { %v7919_v54 = vpop.f32.mrf.mxu0  ;;  %7963 = vmatmul.mubr.msk.bf16.gmra.mxu1 %vm449_vm3, %v429_v52 }
  0xeb   :  { %v266_v55 = vadd.f32 %v7919_v54, %v9138_v24 }
  0xec   :  { %v257_v56 = vpop.f32.mrf.mxu0 }
  0xed   :  { %v258_v58 = vadd.f32 %v9138_v24, %v257_v56  ;;  %v431_v62 = vpack.c.bf16 %v266_v55, %v263_v59  ;;  %v12938_v59 = vmov 0.0  }
  0xee   :  { %v7922_v60 = vpop.f32.mrf.mxu0  ;;  %7994 = vmatprep.subr.bf16.mxu1 %v12938_v59 }
  0xef   :  { %v430_v61 = vpack.c.bf16 %v258_v58, %v255_v57  ;;  %v279_v5 = vadd.f32 %v7922_v60, %v9138_v24  ;;  %v703_v60 = vlaneseq }
  0xf0   :  { %v270_v63 = vpop.f32.mrf.mxu0 }
  0xf1   :  { %7966 = vmatprep.mubr.msk.bf16.mxu1 %vm449_vm3, %v430_v61  ;;  %v271_v3 = vadd.f32 %v9138_v24, %v270_v63  ;;  %v704_v61 = vshrl.u32 %v703_v60, 7  ;;  %v413_v63 = vld [vmem:[%s12930_s6 + $0x50] sm:$0x3] }
  0xf2   :  { %v7923_v0 = vpop.f32.mrf.mxu0  ;;  %7967 = vmatmul.mubr.msk.bf16.gmra.mxu1 %vm449_vm3, %v431_v62 }
  0xf3   :  { %v282_v1 = vadd.f32 %v7923_v0, %v9138_v24  ;;  %v9201_v62 = vsub.s32 0, %v704_v61  ;;  %v8744_v0 = vld [vmem:[%s12931_s2 + $0x4] ss:$12 sps:$4 sm:$0xff]  }
  0xf4   :  { %v273_v2 = vpop.f32.mrf.mxu0  ;;  %1275 = vmatprep.mubr.bf16.mxu0 %v8744_v0 }
  0xf5   :  { %v274_v4 = vadd.f32 %v9138_v24, %v273_v2  ;;  %v433_v8 = vpack.c.bf16 %v282_v1, %v279_v5  ;;  %13023 = vst [vmem:[#allocation2_spill] sm:$0xff] %v9201_v62  ;;  %v9214_v1 = vrot.slane %v413_v63, %v9201_v62  ;;  %v9222_v5 = vsub.s32 2, %v704_v61 }
  0xf6   :  { %v7926_v6 = vpop.f32.mrf.mxu0 }
  0xf7   :  { %v432_v7 = vpack.c.bf16 %v274_v4, %v271_v3  ;;  %v295_v15 = vadd.f32 %v7926_v6, %v9138_v24  ;;  %v831_v4 = vld [vmem:[%s12930_s6 + $0x60] sm:$0x7]  ;;  %13025 = vst [vmem:[#allocation4_spill] sm:$0xff] %v9222_v5 }
  0xf8   :  { %v286_v9 = vpop.f32.mrf.mxu0 }
  0xf9   :  { %7970 = vmatprep.mubr.msk.bf16.mxu1 %vm449_vm3, %v432_v7  ;;  %v287_v13 = vadd.f32 %v9138_v24, %v286_v9 }
  0xfa   :  { %v7927_v10 = vpop.f32.mrf.mxu0  ;;  %7971 = vmatmul.mubr.msk.bf16.gmra.mxu1 %vm449_vm3, %v433_v8 }
  0xfb   :  { %v298_v11 = vadd.f32 %v7927_v10, %v9138_v24 }
  0xfc   :  { %v289_v12 = vpop.f32.mrf.mxu0 }
  0xfd   :  { %v290_v14 = vadd.f32 %v9138_v24, %v289_v12  ;;  %v435_v18 = vpack.c.bf16 %v298_v11, %v295_v15  ;;  %v9228_v12 = vrot.slane %v831_v4, %v9201_v62  ;;  %v9235_v15 = vrot.slane %v831_v4, %v9222_v5 }
  0xfe   :  { %v7930_v16 = vpop.f32.mrf.mxu0 }
  0xff   :  { %v434_v17 = vpack.c.bf16 %v290_v14, %v287_v13  ;;  %v311_v26 = vadd.f32 %v7930_v16, %v9138_v24 }
 0x100   :  { %v302_v19 = vpop.f32.mrf.mxu0 }
 0x101   :  { %7974 = vmatprep.mubr.msk.bf16.mxu1 %vm449_vm3, %v434_v17  ;;  %v303_v23 = vadd.f32 %v9138_v24, %v302_v19 }
 0x102   :  { %v7931_v20 = vpop.f32.mrf.mxu0  ;;  %7975 = vmatmul.mubr.msk.bf16.gmra.mxu1 %vm449_vm3, %v435_v18  ;;  %v916_v18 = vmul.f32 0.0, %v9228_v12 }
 0x103   :  { %v314_v21 = vadd.f32 %v7931_v20, %v9138_v24 }
 0x104   :  { %v305_v22 = vpop.f32.mrf.mxu0 }
 0x105   :  { %v306_v25 = vadd.f32 %v9138_v24, %v305_v22  ;;  %v437_v29 = vpack.c.bf16 %v314_v21, %v311_v26 }
 0x106   :  { %v7934_v27 = vpop.f32.mrf.mxu0 }
 0x107   :  { %v436_v28 = vpack.c.bf16 %v306_v25, %v303_v23  ;;  %v327_v36 = vadd.f32 %v7934_v27, %v9138_v24 }
 0x108   :  { %v318_v30 = vpop.f32.mrf.mxu0 }
 0x109   :  { %7978 = vmatprep.mubr.msk.bf16.mxu1 %vm449_vm3, %v436_v28  ;;  %v319_v34 = vadd.f32 %v9138_v24, %v318_v30 }
 0x10a   :  { %v7935_v31 = vpop.f32.mrf.mxu0  ;;  %7979 = vmatmul.mubr.msk.bf16.gmra.mxu1 %vm449_vm3, %v437_v29 }
 0x10b   :  { %v330_v32 = vadd.f32 %v7935_v31, %v9138_v24 }
 0x10c   :  { %v321_v33 = vpop.f32.mrf.mxu0 }
 0x10d   :  { %v322_v35 = vadd.f32 %v9138_v24, %v321_v33  ;;  %v439_v39 = vpack.c.bf16 %v330_v32, %v327_v36 }
 0x10e   :  { %v7938_v37 = vpop.f32.mrf.mxu0 }
 0x10f   :  { %v438_v38 = vpack.c.bf16 %v322_v35, %v319_v34  ;;  %v343_v46 = vadd.f32 %v7938_v37, %v9138_v24 }
 0x110   :  { %v334_v40 = vpop.f32.mrf.mxu0 }
 0x111   :  { %7982 = vmatprep.mubr.msk.bf16.mxu1 %vm449_vm3, %v438_v38  ;;  %v335_v44 = vadd.f32 %v9138_v24, %v334_v40 }
 0x112   :  { %v7939_v41 = vpop.f32.mrf.mxu0  ;;  %7983 = vmatmul.mubr.msk.bf16.gmra.mxu1 %vm449_vm3, %v439_v39 }
 0x113   :  { %v346_v42 = vadd.f32 %v7939_v41, %v9138_v24 }
 0x114   :  { %v337_v43 = vpop.f32.mrf.mxu0 }
 0x115   :  { %v338_v45 = vadd.f32 %v9138_v24, %v337_v43  ;;  %v441_v49 = vpack.c.bf16 %v346_v42, %v343_v46  ;;  %v9255_v43 = vmul.f32 0.0, %v9235_v15 }
 0x116   :  { %v7942_v47 = vpop.f32.mrf.mxu0 }
 0x117   :  { %v440_v48 = vpack.c.bf16 %v338_v45, %v335_v44  ;;  %v359_v51 = vadd.f32 %v7942_v47, %v9138_v24 }
 0x118   :  { %v350_v50 = vpop.f32.mrf.mxu0 }
 0x119   :  { %7986 = vmatprep.mubr.msk.bf16.mxu1 %vm449_vm3, %v440_v48  ;;  %v351_v53 = vadd.f32 %v9138_v24, %v350_v50 }
 0x11a   :  { %v7943_v52 = vpop.f32.mrf.mxu0  ;;  %7987 = vmatmul.mubr.msk.bf16.gmra.mxu1 %vm449_vm3, %v441_v49 }
 0x11b   :  { %v362_v54 = vadd.f32 %v7943_v52, %v9138_v24 }
 0x11c   :  { %v353_v55 = vpop.f32.mrf.mxu0 }
 0x11d   :  { %v354_v56 = vadd.f32 %v9138_v24, %v353_v55  ;;  %v443_v57 = vpack.c.bf16 %v362_v54, %v359_v51  ;;  %v9208_v24 = vsub.s32 1, %v704_v61 }
 0x11f   :  { %v442_v58 = vpack.c.bf16 %v354_v56, %v351_v53  ;;  %13024 = vst [vmem:[#allocation3_spill] sm:$0xff] %v9208_v24  ;;  %v9217_v2 = vrot.slane %v413_v63, %v9208_v24  ;;  %v9231_v13 = vrot.slane %v831_v4, %v9208_v24 }
 0x121   :  { %7990 = vmatprep.mubr.msk.bf16.mxu1 %vm449_vm3, %v442_v58 }
 0x122   :  { %7991 = vmatmul.mubr.msk.bf16.gmra.mxu1 %vm449_vm3, %v443_v57 }
 0x123   :  { %8002 = vmatprep.mubr.msk.bf16.mxu1 %vm8901_vm4, %v12938_v59 }
 0x19a   :  { %v7956_v3 = vpop.f32.mrf.mxu1 }
 0x19b   :  { %v709_v6 = vmul.f32 %v7956_v3, %v9214_v1 }
 0x19c   :  { %v544_v7 = vpop.f32.mrf.mxu1 }
 0x19d   :  { %v753_v8 = vadd.f32 %v9217_v2, %v709_v6  ;;  %v707_v9 = vmul.f32 %v9214_v1, %v544_v7 }
 0x19e   :  { %v7957_v10 = vpop.f32.mrf.mxu1 }
 0x19f   :  { %v793_v11 = vmax.f32 %v753_v8, 0.0  ;;  %v751_v14 = vadd.f32 %v9217_v2, %v707_v9  ;;  %v710_v19 = vmul.f32 %v7957_v10, %v9214_v1 }
 0x1a0   :  { %v547_v16 = vpop.f32.mrf.mxu1 }
 0x1a1   :  { %v791_v17 = vmax.f32 %v751_v14, 0.0  ;;  %v708_v20 = vmul.f32 %v9214_v1, %v547_v16  ;;  %v961_v22 = vmul.f32 %v9231_v13, %v793_v11  ;;  %v1043_v27 = vmul.f32 %v9235_v15, %v793_v11 }
 0x1a2   :  { %v7960_v21 = vpop.f32.mrf.mxu1  ;;  %v754_v34 = vadd.f32 %v9217_v2, %v710_v19  ;;  %v919_v44 = vmul.f32 %v9228_v12, %v793_v11 }
 0x1a3   :  { %v917_v23 = vmul.f32 %v9228_v12, %v791_v17  ;;  %v959_v25 = vmul.f32 %v9231_v13, %v791_v17  ;;  %v713_v26 = vmul.f32 %v7960_v21, %v9214_v1  ;;  %v752_v28 = vadd.f32 %v9217_v2, %v708_v20 }
 0x1a4   :  { %v560_v29 = vpop.f32.mrf.mxu1  ;;  %v794_v45 = vmax.f32 %v754_v34, 0.0 }
 0x1a5   :  { %v999_v30 = vadd.f32 %v959_v25, %v916_v18  ;;  %v1001_v31 = vadd.f32 %v961_v22, %v917_v23  ;;  %v757_v32 = vadd.f32 %v9217_v2, %v713_v26  ;;  %v711_v33 = vmul.f32 %v9214_v1, %v560_v29 }
 0x1a6   :  { %v792_v35 = vmax.f32 %v752_v28, 0.0  ;;  %v7961_v36 = vpop.f32.mrf.mxu1  ;;  %v920_v8 = vmul.f32 %v9228_v12, %v794_v45  ;;  %v962_v9 = vmul.f32 %v9231_v13, %v794_v45  ;;  %v1044_v10 = vmul.f32 %v9235_v15, %v794_v45 }
 0x1a7   :  { %v9249_v37 = vadd.f32 %v1043_v27, %v999_v30  ;;  %v797_v38 = vmax.f32 %v757_v32, 0.0  ;;  %v755_v39 = vadd.f32 %v9217_v2, %v711_v33  ;;  %v714_v40 = vmul.f32 %v7961_v36, %v9214_v1 }
 0x1a8   :  { %v563_v41 = vpop.f32.mrf.mxu1  ;;  %v960_v42 = vmul.f32 %v9231_v13, %v792_v35  ;;  %v918_v49 = vmul.f32 %v9228_v12, %v792_v35 }
 0x1a9   :  { %13026 = vst [vmem:[#allocation5_spill] sm:$0xff] %v9249_v37  ;;  %v795_v46 = vmax.f32 %v755_v39, 0.0  ;;  %v758_v47 = vadd.f32 %v9217_v2, %v714_v40  ;;  %v965_v50 = vmul.f32 %v9231_v13, %v797_v38  ;;  %v712_v51 = vmul.f32 %v9214_v1, %v563_v41 }
 0x1aa   :  { %v7964_v48 = vpop.f32.mrf.mxu1  ;;  %v1047_v53 = vmul.f32 %v9235_v15, %v797_v38  ;;  %v1000_v58 = vadd.f32 %v960_v42, %v916_v18  ;;  %v923_v14 = vmul.f32 %v9228_v12, %v797_v38  ;;  %v1002_v20 = vadd.f32 %v962_v9, %v918_v49 }
 0x1ab   :  { %v717_v52 = vmul.f32 %v7964_v48, %v9214_v1  ;;  %v921_v54 = vmul.f32 %v9228_v12, %v795_v46  ;;  %v963_v55 = vmul.f32 %v9231_v13, %v795_v46  ;;  %v1045_v56 = vmul.f32 %v9235_v15, %v795_v46 }
 0x1ac   :  { %v576_v57 = vpop.f32.mrf.mxu1  ;;  %v798_v60 = vmax.f32 %v758_v47, 0.0  ;;  %v756_v61 = vadd.f32 %v9217_v2, %v712_v51  ;;  %v9280_v21 = vadd.f32 %v1044_v10, %v1000_v58 }
 0x1ad   :  { %v715_v63 = vmul.f32 %v9214_v1, %v576_v57  ;;  %v1003_v0 = vadd.f32 %v963_v55, %v919_v44  ;;  %v1005_v3 = vadd.f32 %v965_v50, %v921_v54  ;;  %v9269_v4 = vadd.f32 %v1045_v56, %v1001_v31 }
 0x1ae   :  { %v761_v6 = vadd.f32 %v9217_v2, %v717_v52  ;;  %v7965_v7 = vpop.f32.mrf.mxu1  ;;  %v796_v11 = vmax.f32 %v756_v61, 0.0  ;;  %13029 = vst [vmem:[#allocation8_spill] sm:$0xff] %v9280_v21  ;;  %v924_v25 = vmul.f32 %v9228_v12, %v798_v60  ;;  %v1048_v26 = vmul.f32 %v9235_v15, %v798_v60 }
 0x1af   :  { %13027 = vst [vmem:[#allocation6_spill] sm:$0xff] %v9269_v4  ;;  %v9276_v16 = vadd.f32 %v1047_v53, %v1003_v0  ;;  %v759_v17 = vadd.f32 %v9217_v2, %v715_v63  ;;  %v718_v18 = vmul.f32 %v7965_v7, %v9214_v1  ;;  %v966_v40 = vmul.f32 %v9231_v13, %v798_v60 }
 0x1b0   :  { %v579_v19 = vpop.f32.mrf.mxu1  ;;  %v964_v22 = vmul.f32 %v9231_v13, %v796_v11  ;;  %v801_v27 = vmax.f32 %v761_v6, 0.0  ;;  %v922_v30 = vmul.f32 %v9228_v12, %v796_v11  ;;  %v1046_v32 = vmul.f32 %v9235_v15, %v796_v11 }
 0x1b1   :  { %13028 = vst [vmem:[#allocation7_spill] sm:$0xff] %v9276_v16  ;;  %v716_v23 = vmul.f32 %v9214_v1, %v579_v19  ;;  %v799_v28 = vmax.f32 %v759_v17, 0.0  ;;  %v762_v33 = vadd.f32 %v9217_v2, %v718_v18  ;;  %v840_v18 = vld [vmem:[%s12930_s6 + $0xb0] sm:$0xff] }
 0x1b2   :  { %v7968_v29 = vpop.f32.mrf.mxu1  ;;  %v1004_v31 = vadd.f32 %v964_v22, %v920_v8  ;;  %v969_v45 = vmul.f32 %v9231_v13, %v801_v27  ;;  %v1006_v50 = vadd.f32 %v966_v40, %v922_v30  ;;  %v927_v51 = vmul.f32 %v9228_v12, %v801_v27  ;;  %v841_v30 = vld [vmem:[%s12930_s6 + $0xb8] sm:$0xff] }
 0x1b3   :  { %v925_v34 = vmul.f32 %v9228_v12, %v799_v28  ;;  %v967_v35 = vmul.f32 %v9231_v13, %v799_v28  ;;  %v1049_v36 = vmul.f32 %v9235_v15, %v799_v28  ;;  %v760_v38 = vadd.f32 %v9217_v2, %v716_v23 }
 0x1b4   :  { %v592_v39 = vpop.f32.mrf.mxu1  ;;  %v9294_v41 = vadd.f32 %v1048_v26, %v1004_v31  ;;  %v721_v42 = vmul.f32 %v7968_v29, %v9214_v1  ;;  %v802_v47 = vmax.f32 %v762_v33, 0.0  ;;  %v1051_v52 = vmul.f32 %v9235_v15, %v801_v27 }
 0x1b5   :  { %v719_v44 = vmul.f32 %v9214_v1, %v592_v39  ;;  %v1007_v46 = vadd.f32 %v967_v35, %v923_v14  ;;  %v800_v48 = vmax.f32 %v760_v38, 0.0  ;;  %v9302_v54 = vadd.f32 %v1046_v32, %v1002_v20 }
 0x1b6   :  { %v7969_v49 = vpop.f32.mrf.mxu1  ;;  %v765_v53 = vadd.f32 %v9217_v2, %v721_v42  ;;  %v1009_v55 = vadd.f32 %v969_v45, %v925_v34  ;;  %v9304_v56 = vadd.f32 %v1049_v36, %v1005_v3  ;;  %v1052_v7 = vmul.f32 %v9235_v15, %v802_v47 }
 0x1b7   :  { %13030 = vst [vmem:[#allocation9_spill] sm:$0xff] %v9302_v54  ;;  %v968_v57 = vmul.f32 %v9231_v13, %v800_v48  ;;  %v926_v60 = vmul.f32 %v9228_v12, %v800_v48  ;;  %v763_v61 = vadd.f32 %v9217_v2, %v719_v44  ;;  %v722_v63 = vmul.f32 %v7969_v49, %v9214_v1 }
 0x1b8   :  { %v595_v58 = vpop.f32.mrf.mxu1  ;;  %v1090_v6 = vadd.f32 %v1051_v52, %v1007_v46  ;;  %v1050_v9 = vmul.f32 %v9235_v15, %v800_v48  ;;  %v928_v3 = vmul.f32 %v9228_v12, %v802_v47  ;;  %v970_v11 = vmul.f32 %v9231_v13, %v802_v47 }
 0x1b9   :  { %v720_v0 = vmul.f32 %v9214_v1, %v595_v58  ;;  %v1008_v8 = vadd.f32 %v968_v57, %v924_v25  ;;  %v805_v14 = vmax.f32 %v765_v53, 0.0  ;;  %v803_v17 = vmax.f32 %v763_v61, 0.0 }
 0x1ba   :  { %v7972_v10 = vpop.f32.mrf.mxu1  ;;  %v766_v20 = vadd.f32 %v9217_v2, %v722_v63  ;;  %v1010_v26 = vadd.f32 %v970_v11, %v926_v60  ;;  %v9327_v31 = vadd.f32 %v1050_v9, %v1006_v50  ;;  %v9330_v35 = vmul.f32 %v1090_v6, %v840_v18 }
 0x1bb   :  { %v1091_v19 = vadd.f32 %v1052_v7, %v1008_v8  ;;  %v764_v22 = vadd.f32 %v9217_v2, %v720_v0  ;;  %v725_v23 = vmul.f32 %v7972_v10, %v9214_v1  ;;  %v929_v27 = vmul.f32 %v9228_v12, %v803_v17 }
 0x1bc   :  { %v608_v25 = vpop.f32.mrf.mxu1  ;;  %v971_v28 = vmul.f32 %v9231_v13, %v803_v17  ;;  %v973_v36 = vmul.f32 %v9231_v13, %v805_v14  ;;  %v1053_v38 = vmul.f32 %v9235_v15, %v803_v17  ;;  %v806_v39 = vmax.f32 %v766_v20, 0.0 }
 0x1bd   :  { %v723_v29 = vmul.f32 %v9214_v1, %v608_v25  ;;  %v804_v32 = vmax.f32 %v764_v22, 0.0  ;;  %v769_v33 = vadd.f32 %v9217_v2, %v725_v23  ;;  %v931_v42 = vmul.f32 %v9228_v12, %v805_v14 }
 0x1be   :  { %v7973_v34 = vpop.f32.mrf.mxu1  ;;  %v1055_v44 = vmul.f32 %v9235_v15, %v805_v14  ;;  %v1011_v45 = vadd.f32 %v971_v28, %v927_v51  ;;  %v9337_v47 = vmul.f32 %v1091_v19, %v841_v30  ;;  %v1013_v48 = vadd.f32 %v973_v36, %v929_v27 }
 0x1bf   :  { %v767_v40 = vadd.f32 %v9217_v2, %v723_v29  ;;  %v930_v49 = vmul.f32 %v9228_v12, %v804_v32  ;;  %v972_v50 = vmul.f32 %v9231_v13, %v804_v32  ;;  %v1054_v52 = vmul.f32 %v9235_v15, %v804_v32 }
 0x1c0   :  { %v611_v46 = vpop.f32.mrf.mxu1  ;;  %v809_v53 = vmax.f32 %v769_v33, 0.0  ;;  %v726_v58 = vmul.f32 %v7973_v34, %v9214_v1  ;;  %v9344_v63 = vadd.f32 %v1053_v38, %v1009_v55  ;;  %v932_v51 = vmul.f32 %v9228_v12, %v806_v39 }
 0x1c1   :  { %v807_v57 = vmax.f32 %v767_v40, 0.0  ;;  %v724_v60 = vmul.f32 %v9214_v1, %v611_v46  ;;  %v974_v0 = vmul.f32 %v9231_v13, %v806_v39  ;;  %v1056_v6 = vmul.f32 %v9235_v15, %v806_v39  ;;  %v845_v46 = vld [vmem:[%s12930_s6 + $0xd8] sm:$0xff] }
 0x1c2   :  { %v7976_v61 = vpop.f32.mrf.mxu1  ;;  %v1094_v7 = vadd.f32 %v1055_v44, %v1011_v45  ;;  %v1012_v8 = vadd.f32 %v972_v50, %v928_v3  ;;  %v770_v17 = vadd.f32 %v9217_v2, %v726_v58  ;;  %v9355_v20 = vadd.f32 %v1054_v52, %v1010_v26  ;;  %v846_v44 = vld [vmem:[%s12930_s6 + $0xe0] sm:$0xff]  ;;  %v844_v45 = vld [vmem:[%s12930_s6 + $0xd0] sm:$0xff] }
 0x1c3   :  { %v933_v9 = vmul.f32 %v9228_v12, %v807_v57  ;;  %v1057_v10 = vmul.f32 %v9235_v15, %v807_v57  ;;  %v975_v14 = vmul.f32 %v9231_v13, %v807_v57  ;;  %v768_v55 = vadd.f32 %v9217_v2, %v724_v60 }
 0x1c4   :  { %v624_v11 = vpop.f32.mrf.mxu1  ;;  %v729_v18 = vmul.f32 %v7976_v61, %v9214_v1  ;;  %v1014_v19 = vadd.f32 %v974_v0, %v930_v49  ;;  %v977_v22 = vmul.f32 %v9231_v13, %v809_v53  ;;  %v9359_v25 = vmax.f32 %v770_v17, 0.0 }
 0x1c5   :  { %v727_v3 = vmul.f32 %v9214_v1, %v624_v11  ;;  %v808_v27 = vmax.f32 %v768_v55, 0.0  ;;  %v1095_v30 = vadd.f32 %v1056_v6, %v1012_v8  ;;  %v935_v32 = vmul.f32 %v9228_v12, %v809_v53 }
 0x1c6   :  { %v7977_v23 = vpop.f32.mrf.mxu1  ;;  %13031 = vst [vmem:[#allocation10_spill] sm:$0xff] %v9359_v25  ;;  %v773_v28 = vadd.f32 %v9217_v2, %v729_v18  ;;  %v1096_v33 = vadd.f32 %v1057_v10, %v1013_v48  ;;  %v9366_v36 = vmul.f32 %v9235_v15, %v809_v53  ;;  %v9368_v38 = vadd.f32 %v975_v14, %v931_v42 }
 0x1c7   :  { %v730_v29 = vmul.f32 %v7977_v23, %v9214_v1  ;;  %v771_v34 = vadd.f32 %v9217_v2, %v727_v3  ;;  %v1017_v39 = vadd.f32 %v977_v22, %v933_v9  ;;  %v934_v40 = vmul.f32 %v9228_v12, %v808_v27 }
 0x1c8   :  { %v627_v26 = vpop.f32.mrf.mxu1  ;;  %13032 = vst [vmem:[#allocation11_spill] sm:$0xff] %v9366_v36  ;;  %13033 = vst [vmem:[#allocation12_spill] sm:$0xff] %v9368_v38  ;;  %v978_v48 = vmul.f32 %v9231_v13, %v9359_v25  ;;  %v976_v42 = vmul.f32 %v9231_v13, %v808_v27  ;;  %v1058_v49 = vmul.f32 %v9235_v15, %v808_v27  ;;  %v813_v53 = vmax.f32 %v773_v28, 0.0 }
 0x1c9   :  { %v811_v50 = vmax.f32 %v771_v34, 0.0  ;;  %v774_v57 = vadd.f32 %v9217_v2, %v730_v29  ;;  %v728_v58 = vmul.f32 %v9214_v1, %v627_v26  ;;  %v936_v61 = vmul.f32 %v9228_v12, %v9359_v25 }
 0x1ca   :  { %v7980_v52 = vpop.f32.mrf.mxu1  ;;  %v9389_v6 = vmul.f32 %v1096_v33, %v846_v44  ;;  %v9391_v8 = vmul.f32 %v1094_v7, %v844_v45  ;;  %v9393_v9 = vmul.f32 %v1095_v30, %v845_v46  ;;  %v9395_v10 = vadd.f32 %v978_v48, %v934_v40  ;;  %v847_v46 = vld [vmem:[%s12930_s6 + $0xe8] sm:$0xff] }
 0x1cb   :  { %v733_v60 = vmul.f32 %v7980_v52, %v9214_v1  ;;  %v937_v11 = vmul.f32 %v9228_v12, %v811_v50  ;;  %v979_v14 = vmul.f32 %v9231_v13, %v811_v50  ;;  %v1061_v17 = vmul.f32 %v9235_v15, %v811_v50 }
 0x1cc   :  { %v640_v0 = vpop.f32.mrf.mxu1  ;;  %13034 = vst [vmem:[#allocation13_spill] sm:$0xff] %v9395_v10  ;;  %v814_v55 = vmax.f32 %v774_v57, 0.0  ;;  %v772_v18 = vadd.f32 %v9217_v2, %v728_v58  ;;  %v9403_v7 = vadd.f32 %v976_v42, %v932_v51  ;;  %v1097_v27 = vadd.f32 %v1058_v49, %v1014_v19 }
 0x1cd   :  { %v777_v22 = vadd.f32 %v9217_v2, %v733_v60  ;;  %v731_v3 = vmul.f32 %v9214_v1, %v640_v0  ;;  %v939_v28 = vmul.f32 %v9228_v12, %v813_v53  ;;  %v981_v30 = vmul.f32 %v9231_v13, %v813_v53 }
 0x1ce   :  { %v7981_v23 = vpop.f32.mrf.mxu1  ;;  %13035 = vst [vmem:[#allocation14_spill] sm:$0xff] %v9403_v7  ;;  %v9409_v33 = vmul.f32 %v9235_v15, %v813_v53  ;;  %v9411_v34 = vadd.f32 %v979_v14, %v935_v32  ;;  %v812_v26 = vmax.f32 %v772_v18, 0.0  ;;  %v9419_v42 = vadd.f32 %v1061_v17, %v1017_v39 }
 0x1cf   :  { %v734_v29 = vmul.f32 %v7981_v23, %v9214_v1  ;;  %v817_v44 = vmax.f32 %v777_v22, 0.0  ;;  %v775_v45 = vadd.f32 %v9217_v2, %v731_v3  ;;  %v1021_v48 = vadd.f32 %v981_v30, %v937_v11 }
 0x1d0   :  { %v643_v40 = vpop.f32.mrf.mxu1  ;;  %13036 = vst [vmem:[#allocation15_spill] sm:$0xff] %v9419_v42  ;;  %v940_v49 = vmul.f32 %v9228_v12, %v814_v55  ;;  %v982_v32 = vmul.f32 %v9231_v13, %v814_v55  ;;  %v9424_v52 = vmul.f32 %v9235_v15, %v814_v55  ;;  %v938_v53 = vmul.f32 %v9228_v12, %v812_v26 }
 0x1d1   :  { %v778_v51 = vadd.f32 %v9217_v2, %v734_v29  ;;  %v732_v19 = vmul.f32 %v9214_v1, %v643_v40  ;;  %v980_v57 = vmul.f32 %v9231_v13, %v812_v26  ;;  %v815_v58 = vmax.f32 %v775_v45, 0.0 }
 0x1d2   :  { %v7984_v50 = vpop.f32.mrf.mxu1  ;;  %v9429_v60 = vmul.f32 %v9235_v15, %v812_v26  ;;  %v1137_v14 = vmul.f32 %v1097_v27, %v847_v46  ;;  %v943_v17 = vmul.f32 %v9228_v12, %v817_v44  ;;  %v985_v18 = vmul.f32 %v9231_v13, %v817_v44 }
 0x1d3   :  { %v818_v0 = vmax.f32 %v778_v51, 0.0  ;;  %v776_v39 = vadd.f32 %v9217_v2, %v732_v19  ;;  %v9435_v55 = vmul.f32 %v9235_v15, %v817_v44  ;;  %v737_v22 = vmul.f32 %v7984_v50, %v9214_v1 }
 0x1d4   :  { %13037 = vst [vmem:[#allocation16_spill] sm:$0xff] %v9429_v60  ;;  %v656_v11 = vpop.f32.mrf.mxu1  ;;  %v941_v3 = vmul.f32 %v9228_v12, %v815_v58  ;;  %v983_v23 = vmul.f32 %v9231_v13, %v815_v58  ;;  %v1065_v29 = vmul.f32 %v9235_v15, %v815_v58  ;;  %v9441_v40 = vadd.f32 %v980_v57, %v936_v61  ;;  %v886_v61 = vld [vmem:[%s12930_s6 + $0x220] sm:$0xff] }
 0x1d5   :  { %v816_v30 = vmax.f32 %v776_v39, 0.0  ;;  %v9443_v27 = vadd.f32 %v982_v32, %v938_v53  ;;  %v944_v45 = vmul.f32 %v9228_v12, %v818_v0  ;;  %v781_v51 = vadd.f32 %v9217_v2, %v737_v22  ;;  %v887_v32 = vld [vmem:[%s12930_s6 + $0x228] sm:$0xff] }
 0x1d6   :  { %v7985_v26 = vpop.f32.mrf.mxu1  ;;  %v986_v44 = vmul.f32 %v9231_v13, %v818_v0  ;;  %v9449_v19 = vmul.f32 %v9235_v15, %v818_v0  ;;  %v735_v50 = vmul.f32 %v9214_v1, %v656_v11  ;;  %v9462_v22 = vadd.f32 %v983_v23, %v939_v28 }
 0x1d7   :  { %v984_v46 = vmul.f32 %v9231_v13, %v816_v30  ;;  %v942_v53 = vmul.f32 %v9228_v12, %v816_v30  ;;  %v821_v57 = vmax.f32 %v781_v51, 0.0  ;;  %v738_v39 = vmul.f32 %v7985_v26, %v9214_v1 }
 0x1d8   :  { %v659_v58 = vpop.f32.mrf.mxu1  ;;  %v1025_v59 = vadd.f32 %v985_v18, %v941_v3  ;;  %v9464_v11 = vadd.f32 %v1065_v29, %v1021_v48  ;;  %v779_v5 = vadd.f32 %v9217_v2, %v735_v50  ;;  %v9468_v62 = vmul.f32 %v9235_v15, %v816_v30 }
 0x1d9   :  { %v736_v0 = vmul.f32 %v9214_v1, %v659_v58  ;;  %v782_v37 = vadd.f32 %v9217_v2, %v738_v39  ;;  %v9472_v21 = vadd.f32 %v9389_v6, %v886_v61  ;;  %v9474_v51 = vadd.f32 %v1137_v14, %v887_v32  ;;  %v884_v6 = vld [vmem:[%s12930_s6 + $0x210] sm:$0xff] }
 0x1da   :  { %v7988_v24 = vpop.f32.mrf.mxu1  ;;  %v9476_v26 = vadd.f32 %v984_v46, %v940_v49  ;;  %v819_v28 = vmax.f32 %v779_v5, 0.0  ;;  %v9480_v23 = vadd.f32 %v986_v44, %v942_v53  ;;  %v947_v29 = vmul.f32 %v9228_v12, %v821_v57  ;;  %v885_v5 = vld [vmem:[%s12930_s6 + $0x218] sm:$0xff] }
 0x1db   :  { %v780_v18 = vadd.f32 %v9217_v2, %v736_v0  ;;  %v741_v48 = vmul.f32 %v7988_v24, %v9214_v1  ;;  %v822_v30 = vmax.f32 %v782_v37, 0.0  ;;  %v989_v49 = vmul.f32 %v9231_v13, %v821_v57 }
 0x1dc   :  { %v672_v3 = vpop.f32.mrf.mxu1  ;;  %v1071_v24 = vmul.f32 %v9235_v15, %v821_v57  ;;  %v987_v14 = vmul.f32 %v9231_v13, %v819_v28  ;;  %v945_v37 = vmul.f32 %v9228_v12, %v819_v28  ;;  %v1069_v58 = vmul.f32 %v9235_v15, %v819_v28 }
 0x1dd   :  { %v739_v50 = vmul.f32 %v9214_v1, %v672_v3  ;;  %v820_v44 = vmax.f32 %v780_v18, 0.0  ;;  %v785_v61 = vadd.f32 %v9217_v2, %v741_v48  ;;  %v9499_v39 = vmul.f32 %v9228_v12, %v822_v30 }
 0x1de   :  { %v7989_v46 = vpop.f32.mrf.mxu1  ;;  %v1027_v53 = vadd.f32 %v987_v14, %v943_v17  ;;  %v9502_v57 = vadd.f32 %v9391_v8, %v884_v6  ;;  %v9505_v18 = vadd.f32 %v9393_v9, %v885_v5  ;;  %v990_v32 = vmul.f32 %v9231_v13, %v822_v30 }
 0x1df   :  { %v946_v3 = vmul.f32 %v9228_v12, %v820_v44  ;;  %v988_v28 = vmul.f32 %v9231_v13, %v820_v44  ;;  %v825_v4 = vmax.f32 %v785_v61, 0.0  ;;  %v783_v48 = vadd.f32 %v9217_v2, %v739_v50 }
 0x1e0   :  { %v675_v0 = vpop.f32.mrf.mxu1  ;;  %v1072_v17 = vmul.f32 %v9235_v15, %v822_v30  ;;  %v742_v14 = vmul.f32 %v7989_v46, %v9214_v1  ;;  %v1029_v6 = vadd.f32 %v989_v49, %v945_v37  ;;  %v9514_v36 = vadd.f32 %v1069_v58, %v1025_v59  ;;  %v860_v59 = vld [vmem:[%s12930_s6 + $0x150] sm:$0xff] }
 0x1e1   :  { %v740_v7 = vmul.f32 %v9214_v1, %v675_v0  ;;  %v1028_v9 = vadd.f32 %v988_v28, %v944_v45  ;;  %v1110_v5 = vadd.f32 %v1071_v24, %v1027_v53  ;;  %v823_v38 = vmax.f32 %v783_v48, 0.0 }
 0x1e2   :  { %v7992_v8 = vpop.f32.mrf.mxu1  ;;  %v786_v54 = vadd.f32 %v9217_v2, %v742_v14  ;;  %v1030_v25 = vadd.f32 %v990_v32, %v946_v3  ;;  %v9520_v30 = vmul.f32 %v9235_v15, %v820_v44  ;;  %v993_v46 = vmul.f32 %v9231_v13, %v825_v4 }
 0x1e3   :  { %v784_v61 = vadd.f32 %v9217_v2, %v740_v7  ;;  %v745_v50 = vmul.f32 %v7992_v8, %v9214_v1  ;;  %v949_v45 = vmul.f32 %v9228_v12, %v823_v38  ;;  %v991_v24 = vmul.f32 %v9231_v13, %v823_v38 }
 0x1e4   :  { %v688_v42 = vpop.f32.mrf.mxu1  ;;  %v1073_v7 = vmul.f32 %v9235_v15, %v823_v38  ;;  %v826_v37 = vmax.f32 %v786_v54, 0.0  ;;  %v1075_v3 = vmul.f32 %v9235_v15, %v825_v4  ;;  %v1111_v48 = vadd.f32 %v1072_v17, %v1028_v9 }
 0x1e5   :  { %v743_v49 = vmul.f32 %v9214_v1, %v688_v42  ;;  %v824_v32 = vmax.f32 %v784_v61, 0.0  ;;  %v789_v44 = vadd.f32 %v9217_v2, %v745_v50  ;;  %v951_v42 = vmul.f32 %v9228_v12, %v825_v4 }
 0x1e6   :  { %v7993_v58 = vpop.f32.mrf.mxu1  ;;  %v1150_v14 = vmul.f32 %v1110_v5, %v860_v59  ;;  %v1031_v8 = vadd.f32 %v991_v24, %v947_v29  ;;  %v1033_v16 = vadd.f32 %v993_v46, %v949_v45  ;;  %v1112_v60 = vadd.f32 %v1073_v7, %v1029_v6  ;;  %v862_v29 = vld [vmem:[%s12930_s6 + $0x160] sm:$0xff]  ;;  %v863_v7 = vld [vmem:[%s12930_s6 + $0x168] sm:$0xff] }
 0x1e7   :  { %v787_v53 = vadd.f32 %v9217_v2, %v743_v49  ;;  %v746_v0 = vmul.f32 %v7993_v58, %v9214_v1  ;;  %v1210_v54 = vpack.c.bf16 %v9505_v18, %v9502_v57  ;;  %v952_v38 = vmul.f32 %v9228_v12, %v826_v37 }
 0x1e8   :  { %v691_v28 = vpop.f32.mrf.mxu1  ;;  %v1074_v61 = vmul.f32 %v9235_v15, %v824_v32  ;;  %v829_v50 = vmax.f32 %v789_v44, 0.0  ;;  %v950_v58 = vmul.f32 %v9228_v12, %v824_v32  ;;  %v992_v10 = vmul.f32 %v9231_v13, %v824_v32 }
 0x1e9   :  { %v827_v49 = vmax.f32 %v787_v53, 0.0  ;;  %v790_v4 = vadd.f32 %v9217_v2, %v746_v0  ;;  %v744_v17 = vmul.f32 %v9214_v1, %v691_v28  ;;  %v994_v6 = vmul.f32 %v9231_v13, %v826_v37  ;;  %v861_v28 = vld [vmem:[%s12930_s6 + $0x158] sm:$0xff] }
 0x1ea   :  { %v997_v9 = vmul.f32 %v9231_v13, %v829_v50  ;;  %v9551_v59 = vmul.f32 %v9235_v15, %v826_v37  ;;  %v9558_v32 = vadd.f32 %v1075_v3, %v1031_v8  ;;  %v1113_v53 = vadd.f32 %v1074_v61, %v1030_v25  ;;  %v903_v25 = vld [vmem:[%s12930_s6 + $0x2a8] sm:$0xff] }
 0x1eb   :  { %v953_v5 = vmul.f32 %v9228_v12, %v827_v49  ;;  %v995_v46 = vmul.f32 %v9231_v13, %v827_v49  ;;  %v1077_v45 = vmul.f32 %v9235_v15, %v827_v49  ;;  %v830_v24 = vmax.f32 %v790_v4, 0.0 }
 0x1ec   :  { %v788_v1 = vadd.f32 %v9217_v2, %v744_v17  ;;  %v1152_v0 = vmul.f32 %v1112_v60, %v862_v29  ;;  %v9564_v37 = vadd.f32 %v992_v10, %v9499_v39  ;;  %v1034_v49 = vadd.f32 %v994_v6, %v950_v58  ;;  %v902_v17 = vld [vmem:[%s12930_s6 + $0x2a0] sm:$0xff]  ;;  %v901_v10 = vld [vmem:[%s12930_s6 + $0x298] sm:$0xff]  ;;  %v900_v29 = vld [vmem:[%s12930_s6 + $0x290] sm:$0xff] }
 0x1ed   :  { %v1037_v44 = vadd.f32 %v997_v9, %v953_v5  ;;  %v1079_v4 = vmul.f32 %v9235_v15, %v829_v50  ;;  %v1035_v60 = vadd.f32 %v995_v46, %v951_v42  ;;  %v9573_v3 = vadd.f32 %v1077_v45, %v1033_v16  ;;  %v858_v16 = vld [vmem:[%s12930_s6 + $0x140] sm:$0xff]  ;;  %v859_v6 = vld [vmem:[%s12930_s6 + $0x148] sm:$0xff] }
 0x1ee   :  { %v828_v2 = vmax.f32 %v788_v1, 0.0  ;;  %v998_v8 = vmul.f32 %v9231_v13, %v830_v24  ;;  %v1153_v61 = vmul.f32 %v1113_v53, %v863_v7  ;;  %v1080_v39 = vmul.f32 %v9235_v15, %v830_v24  ;;  %v843_v46 = vld [vmem:[%s12930_s6 + $0xc8] sm:$0xff] }
 0x1ef   :  { %v1151_v42 = vmul.f32 %v1111_v48, %v861_v28  ;;  %v1120_v9 = vadd.f32 %v9255_v43, %v1037_v44  ;;  %v9592_v5 = vadd.f32 %v1152_v0, %v902_v17  ;;  %v842_v48 = vld [vmem:[%s12930_s6 + $0xc0] sm:$0xff]  ;;  %v899_v44 = vld [vmem:[%s12930_s6 + $0x288] sm:$0xff]  ;;  %v1148_v53 = vmul.f32 %v9514_v36, %v858_v16 }
 0x1f0   :  { %v954_v50 = vmul.f32 %v9228_v12, %v828_v2  ;;  %v996_v58 = vmul.f32 %v9231_v13, %v828_v2  ;;  %v9594_v12 = vadd.f32 %v1153_v61, %v903_v25  ;;  %v1109_v13 = vadd.f32 %v9520_v30, %v9480_v23  ;;  %v870_v28 = vld [vmem:[%s12930_s6 + $0x1a0] sm:$0xff]  ;;  %v856_v61 = vld [vmem:[%s12930_s6 + $0x130] sm:$0xff] }
 0x1f1   :  { %v1078_v1 = vmul.f32 %v9235_v15, %v828_v2  ;;  %v9605_v7 = vadd.f32 %v1151_v42, %v901_v10  ;;  %v9612_v30 = vadd.f32 %v1150_v14, %v900_v29  ;;  %v871_v2 = vld [vmem:[%s12930_s6 + $0x1a8] sm:$0xff]  ;;  %v1118_v17 = vadd.f32 %v1079_v4, %v1035_v60  ;;  %v898_v36 = vld [vmem:[%s12930_s6 + $0x280] sm:$0xff]  ;;  %v857_v10 = vld [vmem:[%s12930_s6 + $0x138] sm:$0xff] }
 0x1f2   :  { %v1036_v45 = vadd.f32 %v996_v58, %v952_v38  ;;  %v1038_v24 = vadd.f32 %v998_v8, %v954_v50  ;;  %v1219_v23 = vpack.c.bf16 %v9594_v12, %v9592_v5  ;;  %v1149_v0 = vmul.f32 %v1109_v13, %v859_v6  ;;  %v883_v38 = vld [vmem:[%s12930_s6 + $0x208] sm:$0xff]  ;;  %v910_v50 = vld [vmem:[%s12930_s6 + $0x2e0] sm:$0xff] }
 0x1f3   :  { %v1132_v14 = vmul.f32 %v9344_v63, %v842_v48  ;;  %v1133_v8 = vmul.f32 %v9355_v20, %v843_v46  ;;  %v882_v63 = vld [vmem:[%s12930_s6 + $0x200] sm:$0xff]  ;;  %v1106_v20 = vadd.f32 %v9435_v55, %v9462_v22  ;;  %v1107_v60 = vadd.f32 %v9449_v19, %v9476_v26  ;;  %v911_v58 = vld [vmem:[%s12930_s6 + $0x2e8] sm:$0xff]  ;;  %v896_v55 = vld [vmem:[%s12930_s6 + $0x270] sm:$0xff] }
 0x1f4   :  { %v1121_v25 = vadd.f32 %v9255_v43, %v1038_v24  ;;  %7464 = vmatprep.subr.bf16.mxu0 %v1219_v23  ;;  %v1218_v43 = vpack.c.bf16 %v9605_v7, %v9612_v30  ;;  %v9638_v4 = vadd.f32 %v1149_v0, %v899_v44  ;;  %v9653_v29 = vadd.f32 %v1078_v1, %v1034_v49  ;;  %v897_v19 = vld [vmem:[%s12930_s6 + $0x278] sm:$0xff]  ;;  %v855_v46 = vld [vmem:[%s12930_s6 + $0x128] sm:$0xff]  ;;  %v880_v23 = vld [vmem:[%s12930_s6 + $0x1f0] sm:$0xff] }
 0x1f5   :  { %v1119_v42 = vadd.f32 %v1080_v39, %v1036_v45  ;;  %v13038_v16 = vpack.c.bf16 %v9474_v51, %v9472_v21  ;;  %v1160_v22 = vmul.f32 %v1120_v9, %v870_v28  ;;  %v881_v49 = vld [vmem:[%s12930_s6 + $0x1f8] sm:$0xff]  ;;  %v9667_v39 = vadd.f32 %v1148_v53, %v898_v36  ;;  %v868_v9 = vld [vmem:[%s12930_s6 + $0x190] sm:$0xff]  ;;  %v854_v53 = vld [vmem:[%s12930_s6 + $0x120] sm:$0xff] }
 0x1f6   :  { %v1161_v26 = vmul.f32 %v1121_v25, %v871_v2  ;;  %v9669_v6 = vadd.f32 %v1133_v8, %v883_v38  ;;  %v1146_v13 = vmul.f32 %v1106_v20, %v856_v61  ;;  %v1147_v48 = vmul.f32 %v1107_v60, %v857_v10  ;;  %v869_v45 = vld [vmem:[%s12930_s6 + $0x198] sm:$0xff]  ;;  %v839_v38 = vld [vmem:[%s12930_s6 + $0xa8] sm:$0xff] }
 0x1f7   :  { %7465 = vmatpush3.bf16.msra.mxu0 %v13038_v16  ;;  %v9680_v24 = vadd.f32 %v1132_v14, %v882_v63  ;;  %v9682_v1 = vadd.f32 %v1160_v22, %v910_v50  ;;  %v1105_v0 = vadd.f32 %v9468_v62, %v9443_v27  ;;  %v1217_v28 = vpack.c.bf16 %v9638_v4, %v9667_v39  ;;  %v908_v14 = vld [vmem:[%s12930_s6 + $0x2d0] sm:$0xff]  ;;  %v909_v62 = vld [vmem:[%s12930_s6 + $0x2d8] sm:$0xff]  ;;  %v866_v63 = vld [vmem:[%s12930_s6 + $0x180] sm:$0xff] }
 0x1f8   :  { %7466 = vmatprep.subr.bf16.mxu0 %v1218_v43  ;;  %v9684_v44 = vadd.f32 %v1161_v26, %v911_v58  ;;  %v9699_v2 = vadd.f32 %v1146_v13, %v896_v55  ;;  %v9701_v25 = vadd.f32 %v1147_v48, %v897_v19  ;;  %v9704_v36 = vadd.f32 %v9337_v47, %v881_v49  ;;  %v895_v47 = vld [vmem:[%s12930_s6 + $0x268] sm:$0xff]  ;;  %v838_v43 = vld [vmem:[%s12930_s6 + $0xa0] sm:$0xff]  ;;  %v853_v55 = vld [vmem:[%s12930_s6 + $0x118] sm:$0xff] }
 0x1f9   :  { %13039 = vst [vmem:[#allocation17_spill] sm:$0xff] %v9682_v1  ;;  %v1145_v8 = vmul.f32 %v1105_v0, %v855_v46  ;;  %v1158_v61 = vmul.f32 %v1118_v17, %v868_v9  ;;  %v1159_v10 = vmul.f32 %v1119_v42, %v869_v45  ;;  %v9729_v20 = vadd.f32 %v9330_v35, %v880_v23  ;;  %v879_v17 = vld [vmem:[%s12930_s6 + $0x1e8] sm:$0xff]  ;;  %v894_v35 = vld [vmem:[%s12930_s6 + $0x260] sm:$0xff] }
 0x1fa   :  { %13040 = vst [vmem:[#allocation18_spill] sm:$0xff] %v9684_v44  ;;  %v1223_v27 = vpack.c.bf16 %v9684_v44, %v9682_v1  ;;  %v1144_v60 = vmul.f32 %v9464_v11, %v854_v53  ;;  %v1129_v50 = vmul.f32 %v9327_v31, %v839_v38  ;;  %v867_v58 = vld [vmem:[%s12930_s6 + $0x188] sm:$0xff]  ;;  %v1216_v42 = vpack.c.bf16 %v9701_v25, %v9699_v2  ;;  %v852_v31 = vld [vmem:[%s12930_s6 + $0x110] sm:$0xff]  ;;  %v906_v48 = vld [vmem:[%s12930_s6 + $0x2c0] sm:$0xff] }
 0x1fb   :  { %7467 = vmatpush3.bf16.msra.mxu0 %v1210_v54  ;;  %v1209_v54 = vpack.c.bf16 %v9669_v6, %v9680_v24  ;;  %v9744_v16 = vadd.f32 %v1158_v61, %v908_v14  ;;  %v9746_v11 = vadd.f32 %v1159_v10, %v909_v62  ;;  %v1102_v19 = vadd.f32 %v9409_v33, %v9411_v34  ;;  %v907_v46 = vld [vmem:[%s12930_s6 + $0x2c8] sm:$0xff]  ;;  %v837_v33 = vld [vmem:[%s12930_s6 + $0x98] sm:$0xff]  ;;  %v836_v38 = vld [vmem:[%s12930_s6 + $0x90] sm:$0xff] }
 0x1fc   :  { %7468 = vmatprep.subr.bf16.mxu0 %v1217_v28  ;;  %7995 = vmatpush3.bf16.msra.mxu1 %v1223_v27  ;;  %v13043_v22 = vmov 0.0   ;;  %v9757_v26 = vadd.f32 %v1145_v8, %v895_v47  ;;  %v1128_v49 = vmul.f32 %v9304_v56, %v838_v43  ;;  %v1103_v13 = vadd.f32 %v9424_v52, %v9441_v40  ;;  %v878_v40 = vld [vmem:[%s12930_s6 + $0x1e0] sm:$0xff]  ;;  %v851_v28 = vld [vmem:[%s12930_s6 + $0x108] sm:$0xff]  ;;  %v892_v14 = vld [vmem:[%s12930_s6 + $0x250] sm:$0xff] }
 0x1fd   :  { %13041 = vst [vmem:[#allocation19_spill] sm:$0xff] %v9744_v16  ;;  %13042 = vst [vmem:[#allocation20_spill] sm:$0xff] %v9746_v11  ;;  %7996 = vmatprep.subr.bf16.mxu1 %v13043_v22  ;;  %v1156_v9 = vmul.f32 %v9573_v3, %v866_v63  ;;  %v1115_v56 = vadd.f32 %v9551_v59, %v9564_v37  ;;  %v1208_v34 = vpack.c.bf16 %v9704_v36, %v9729_v20  ;;  %v893_v3 = vld [vmem:[%s12930_s6 + $0x258] sm:$0xff]  ;;  %v864_v59 = vld [vmem:[%s12930_s6 + $0x170] sm:$0xff] }
 0x1fe   :  { %v1222_v52 = vpack.c.bf16 %v9746_v11, %v9744_v16  ;;  %v1157_v45 = vmul.f32 %v9653_v29, %v867_v58  ;;  %v9788_v37 = vadd.f32 %v1144_v60, %v894_v35  ;;  %v9790_v23 = vadd.f32 %v1129_v50, %v879_v17  ;;  %v865_v29 = vld [vmem:[%s12930_s6 + $0x178] sm:$0xff]  ;;  %v850_v61 = vld [vmem:[%s12930_s6 + $0x100] sm:$0xff]  ;;  %v13047_v43 = vld [vmem:[#allocation16_spill] sm:$0xff] }
 0x1ff   :  { %7469 = vmatpush3.bf16.msra.mxu0 %v1209_v54  ;;  %v1142_v53 = vmul.f32 %v1102_v19, %v852_v31  ;;  %v1143_v0 = vmul.f32 %v1103_v13, %v853_v55  ;;  %v9804_v62 = vadd.f32 %v1156_v9, %v906_v48  ;;  %v877_v47 = vld [vmem:[%s12930_s6 + $0x1d8] sm:$0xff]  ;;  %v1127_v8 = vmul.f32 %v9294_v41, %v837_v33  ;;  %v904_v41 = vld [vmem:[%s12930_s6 + $0x2b0] sm:$0xff]  ;;  %v13048_v31 = vld [vmem:[#allocation7_spill] sm:$0xff] }
 0x200   :  { %7470 = vmatprep.subr.bf16.mxu0 %v1216_v42  ;;  %7997 = vmatpush3.bf16.msra.mxu1 %v1222_v52  ;;  %v9806_v27 = vadd.f32 %v1157_v45, %v907_v46  ;;  %v13046_v10 = vld [vmem:[#allocation13_spill] sm:$0xff]  ;;  %v1215_v54 = vpack.c.bf16 %v9757_v26, %v9788_v37  ;;  %v9819_v60 = vadd.f32 %v1128_v49, %v878_v40  ;;  %v835_v42 = vld [vmem:[%s12930_s6 + $0x88] sm:$0xff]  ;;  %v13049_v48 = vld [vmem:[#allocation10_spill] sm:$0xff] }
 0x201   :  { %13044 = vst [vmem:[#allocation21_spill] sm:$0xff] %v9804_v62  ;;  %v1101_v63 = vadd.f32 %v13047_v43, %v13046_v10  ;;  %7998 = vmatprep.subr.bf16.mxu1 %v13043_v22  ;;  %v9822_v17 = vadd.f32 %v1143_v0, %v893_v3  ;;  %v905_v50 = vld [vmem:[%s12930_s6 + $0x2b8] sm:$0xff]  ;;  %v1154_v58 = vmul.f32 %v9558_v32, %v864_v59  ;;  %v891_v19 = vld [vmem:[%s12930_s6 + $0x248] sm:$0xff]  ;;  %v876_v33 = vld [vmem:[%s12930_s6 + $0x1d0] sm:$0xff] }
 0x202   :  { %13045 = vst [vmem:[#allocation22_spill] sm:$0xff] %v9806_v27  ;;  %v1221_v35 = vpack.c.bf16 %v9806_v27, %v9804_v62  ;;  %v1126_v55 = vmul.f32 %v13048_v31, %v836_v38  ;;  %v1155_v13 = vmul.f32 %v1115_v56, %v865_v29  ;;  %v1060_v46 = vmul.f32 %v9235_v15, %v13049_v48  ;;  %v834_v40 = vld [vmem:[%s12930_s6 + $0x80] sm:$0xff]  ;;  %v13052_v59 = vld [vmem:[#allocation9_spill] sm:$0xff]  ;;  %v848_v0 = vld [vmem:[%s12930_s6 + $0xf0] sm:$0xff] }
 0x203   :  { %7471 = vmatpush3.bf16.msra.mxu0 %v1208_v34  ;;  %v1141_v49 = vmul.f32 %v1101_v63, %v851_v28  ;;  %v1207_v32 = vpack.c.bf16 %v9790_v23, %v9819_v60  ;;  %v9844_v9 = vadd.f32 %v1142_v53, %v892_v14  ;;  %v13050_v34 = vld [vmem:[#allocation15_spill] sm:$0xff]  ;;  %v9853_v56 = vadd.f32 %v1127_v8, %v877_v47  ;;  %v890_v15 = vld [vmem:[%s12930_s6 + $0x240] sm:$0xff]  ;;  %v849_v38 = vld [vmem:[%s12930_s6 + $0xf8] sm:$0xff] }
 0x204   :  { %7472 = vmatprep.subr.bf16.mxu0 %v1215_v54  ;;  %v1140_v52 = vmul.f32 %v13050_v34, %v850_v61  ;;  %7999 = vmatpush3.bf16.msra.mxu1 %v1221_v35  ;;  %v9858_v3 = vadd.f32 %v1154_v58, %v904_v41  ;;  %v9860_v45 = vadd.f32 %v1155_v13, %v905_v50  ;;  %v875_v14 = vld [vmem:[%s12930_s6 + $0x1c8] sm:$0xff]  ;;  %v13053_v47 = vld [vmem:[#allocation12_spill] sm:$0xff]  ;;  %v13055_v10 = vld [vmem:[#allocation14_spill] sm:$0xff] }
 0x205   :  { %v1125_v53 = vmul.f32 %v13052_v59, %v835_v42  ;;  %v1214_v28 = vpack.c.bf16 %v9822_v17, %v9844_v9  ;;  %8000 = vmatprep.subr.bf16.mxu1 %v13043_v22  ;;  %v9872_v29 = vadd.f32 %v1141_v49, %v891_v19  ;;  %v13054_v8 = vld [vmem:[#allocation11_spill] sm:$0xff]  ;;  %v1099_v43 = vadd.f32 %v1060_v46, %v13055_v10  ;;  %v833_v63 = vld [vmem:[%s12930_s6 + $0x78] sm:$0xff]  ;;  %v13056_v50 = vld [vmem:[#allocation6_spill] sm:$0xff] }
 0x206   :  { %13051 = vst [vmem:[#allocation13_spill] sm:$0xff] %v9860_v45  ;;  %v1098_v61 = vadd.f32 %v13054_v8, %v13053_v47  ;;  %v9883_v54 = vadd.f32 %v1126_v55, %v876_v33  ;;  %v1220_v41 = vpack.c.bf16 %v9860_v45, %v9858_v3  ;;  %v1124_v58 = vmul.f32 %v13056_v50, %v834_v40  ;;  %v889_v42 = vld [vmem:[%s12930_s6 + $0x238] sm:$0xff]  ;;  %v832_v35 = vld [vmem:[%s12930_s6 + $0x70] sm:$0xff]  ;;  %v874_v55 = vld [vmem:[%s12930_s6 + $0x1c0] sm:$0xff] }
 0x207   :  { %7473 = vmatpush3.bf16.msra.mxu0 %v1207_v32  ;;  %v9894_v31 = vadd.f32 %v1140_v52, %v890_v15  ;;  %v1139_v49 = vmul.f32 %v1099_v43, %v849_v38  ;;  %v8741_v13 = vld [vmem:[%s12931_s2 + $0x8] ss:$12 sps:$4 sm:$0xff]   ;;  %v9904_v46 = vadd.f32 %v1125_v53, %v875_v14  ;;  %v873_v15 = vld [vmem:[%s12930_s6 + $0x1b8] sm:$0xff]  ;;  %v8742_v43 = vld [vmem:[%s12931_s2] ss:$12 sps:$4 sm:$0xff]  }
 0x208   :  { %7474 = vmatprep.subr.bf16.mxu0 %v1214_v28  ;;  %v1138_v19 = vmul.f32 %v1098_v61, %v848_v0  ;;  %v1206_v48 = vpack.c.bf16 %v9853_v56, %v9883_v54  ;;  %8001 = vmatpush3.bf16.msra.mxu1 %v1220_v41  ;;  %v888_v32 = vld [vmem:[%s12930_s6 + $0x230] sm:$0xff]  ;;  %v13058_v59 = vld [vmem:[#allocation5_spill] sm:$0xff]  ;;  %v9919_v0 = vadd.f32 %v1124_v58, %v874_v55 }
 0x209   :  { %v13057_v33 = vld [vmem:[#allocation8_spill] sm:$0xff]  ;;  %v1213_v52 = vpack.c.bf16 %v9872_v29, %v9894_v31  ;;  %v9912_v40 = vadd.f32 %v1139_v49, %v889_v42  ;;  %8018 = vmatprep.subr.bf16.mxu1 %v13043_v22  ;;  %v1122_v53 = vmul.f32 %v13058_v59, %v832_v35 }
 0x20a   :  { %v1123_v34 = vmul.f32 %v13057_v33, %v833_v63  ;;  %v9921_v38 = vadd.f32 %v1138_v19, %v888_v32  ;;  %v872_v28 = vld [vmem:[%s12930_s6 + $0x1b0] sm:$0xff]  ;;  %v1205_v14 = vpack.c.bf16 %v9904_v46, %v9919_v0 }
 0x20b   :  { %7475 = vmatpush3.bf16.msra.mxu0 %v1206_v48  ;;  %8003 = vmatmul.mubr.msk.bf16.vlgmr.msra.gmra.mxu1 %vm1239_vm5, %v8741_v13  ;;  %v9935_v61 = vadd.f32 %v1122_v53, %v872_v28  ;;  %v8746_v59 = vld [vmem:[%s12931_s2 + $0x30] ss:$12 sps:$4 sm:$0xff]  }
 0x20c   :  { %7476 = vmatprep.subr.bf16.mxu0 %v1213_v52  ;;  %v9929_v47 = vadd.f32 %v1123_v34, %v873_v15  ;;  %8024 = vmatprep.mubr.msk.bf16.mxu1 %vm8901_vm4, %v13043_v22  ;;  %v1212_v8 = vpack.c.bf16 %v9912_v40, %v9921_v38  ;;  %v8745_v15 = vld [vmem:[%s12931_s2 + $0x18] ss:$12 sps:$4 sm:$0xff]   ;;  %v1479_v53 = vld [vmem:[%s12930_s6 + $0x330] sm:$0xff] }
 0x20d   :  { %v1483_v28 = vpack.c.bf16 %v1479_v53, %v1479_v53  ;;  %v1203_v53 = vld [vmem:[%s12930_s6 + $0x300] sm:$0x3] }
 0x20e   :  { %v1204_v10 = vpack.c.bf16 %v9929_v47, %v9935_v61 }
 0x20f   :  { %7477 = vmatpush3.bf16.msra.mxu0 %v1205_v14  ;;  %v1477_v14 = vld [vmem:[%s12930_s6 + $0x320] sm:$0xff] }
 0x210   :  { %7478 = vmatprep.subr.bf16.mxu0 %v1212_v8  ;;  %v1478_v8 = vld [vmem:[%s12930_s6 + $0x328] sm:$0xff] }
 0x213   :  { %7479 = vmatpush3.bf16.msra.mxu0 %v1204_v10  ;;  %v1489_v10 = vsel %vm165_vm0, %v1483_v28, 0 }
 0x214   :  { %8006 = vmatprep.subr.bf16.mxu0 %v13043_v22  ;;  %8019 = vmatpush3.bf16.msra.mxu1 %v1489_v10 }
 0x215   :  { %8020 = vmatprep.subr.bf16.mxu1 %v13043_v22 }
 0x216   :  { %1276 = vmatmul.mubr.bf16.vlgmr.msra.gmra.mxu0 %v8742_v43  ;;  %v1482_v43 = vpack.c.bf16 %v1478_v8, %v1477_v14 }
 0x217   :  { %8008 = vmatprep.mubr.msk.bf16.mxu0 %vm8901_vm4, %v13043_v22 }
 0x218   :  { %8021 = vmatpush3.bf16.msra.mxu1 %v1482_v43 }
 0x219   :  { %8022 = vmatprep.subr.bf16.mxu1 %v13043_v22 }
 0x2cb   :  { %v1318_v63 = vpop.f32.mrf.mxu1 }
 0x2cd   :  { %v8004_v41 = vpop.f32.mrf.mxu1 }
 0x2ce   :  { %v1476_v41 = vld [vmem:[%s12930_s6 + $0x318] sm:$0xff] }
 0x2cf   :  { %v1321_v50 = vpop.f32.mrf.mxu1 }
 0x2d1   :  { %v8005_v58 = vpop.f32.mrf.mxu1 }
 0x2d2   :  { %v1202_v58 = vld [vmem:[%s12930_s6 + $0x2f0] sm:$0x7] }
 0x2d6   :  { %v7480_v42 = vpop.f32.mrf.mxu0 }
 0x2d8   :  { %v7481_v35 = vpop.f32.mrf.mxu0 }
 0x2d9   :  { %v7482_v55 = vadd.f32 %v7481_v35, %v7480_v42  ;;  %v13059_v35 = vld [vmem:[#allocation2_spill] sm:$0xff] }
 0x2da   :  { %v7483_v19 = vpop.f32.mrf.mxu0 }
 0x2db   :  { %v1319_v13 = vadd.f32 %v7482_v55, %v1318_v63  ;;  %v1475_v63 = vld [vmem:[%s12930_s6 + $0x310] sm:$0xff]  ;;  %v1381_v55 = vrot.slane %v1202_v58, %v13059_v35 }
 0x2dc   :  { %v7484_v49 = vpop.f32.mrf.mxu0 }
 0x2dd   :  { %v7485_v48 = vadd.f32 %v7484_v49, %v7483_v19  ;;  %v1325_v33 = vmul.f32 0.05, %v1319_v13  ;;  %v13060_v49 = vld [vmem:[#allocation3_spill] sm:$0xff] }
 0x2de   :  { %v1387_v13 = vrot.slane %v1202_v58, %v13060_v49 }
 0x2df   :  { %v1322_v32 = vadd.f32 %v7485_v48, %v1321_v50  ;;  %v1481_v50 = vpack.c.bf16 %v1476_v41, %v1475_v63  ;;  %v1452_v63 = vrot.slane %v1203_v53, %v13059_v35 }
 0x2e0   :  { %v1388_v28 = vmul.f32 %v1387_v13, %v1325_v33 }
 0x2e1   :  { %v1326_v34 = vmul.f32 0.05, %v1322_v32  ;;  %8023 = vmatpush3.bf16.msra.mxu1 %v1481_v50 }
 0x2e3   :  { %v1327_v52 = vpack.c.bf16 %v1326_v34, %v1325_v33  ;;  %v1389_v50 = vmul.f32 %v1387_v13, %v1326_v34 }
 0x2e5   :  { %8007 = vmatpush3.bf16.msra.mxu0 %v1327_v52 }
 0x2e6   :  { %8012 = vmatprep.subr.bf16.mxu0 %v13043_v22 }
 0x2e8   :  { %8009 = vmatmul.mubr.msk.bf16.vlgmr.msra.gmra.mxu0 %vm1333_vm6, %v8745_v15 }
 0x2e9   :  { %8013 = vmatpush3.bf16.msra.mxu0 %v1327_v52  ;;  %8014 = vmatprep.mubr.msk.bf16.mxu0 %vm8901_vm4, %v13043_v22  ;;  %v13061_v52 = vld [vmem:[#allocation4_spill] sm:$0xff]  ;;  %v1458_v22 = vrot.slane %v1203_v53, %v13060_v49 }
 0x2ea   :  { %v1444_v15 = vrot.slane %v1202_v58, %v13061_v52 }
 0x2f0   :  { %8015 = vmatmul.mubr.msk.bf16.vlgmr.msra.gmra.mxu0 %vm1333_vm6, %v8746_v59 }
 0x3a8   :  { %v1371_v42 = vpop.f32.mrf.mxu0 }
 0x3a9   :  { %v1382_v32 = vmul.f32 %v1381_v55, %v1371_v42 }
 0x3aa   :  { %v8010_v19 = vpop.f32.mrf.mxu0 }
 0x3ab   :  { %v1390_v8 = vadd.f32 %v1388_v28, %v1382_v32 }
 0x3ac   :  { %v1374_v48 = vpop.f32.mrf.mxu0 }
 0x3ad   :  { %v1383_v10 = vmul.f32 %v1381_v55, %v1374_v48 }
 0x3ae   :  { %v8011_v59 = vpop.f32.mrf.mxu0 }
 0x3af   :  { %v1391_v27 = vadd.f32 %v1389_v50, %v1383_v10  ;;  %v8750_v50 = vld [vmem:[%s12932_s5 + $0x18] sm:$0xff]  }
 0x3b0   :  { %v1434_v14 = vpop.f32.mrf.mxu0 }
 0x3b1   :  { %v1445_v43 = vmul.f32 %v1444_v15, %v1434_v14 }
 0x3b2   :  { %v8016_v41 = vpop.f32.mrf.mxu0 }
 0x3b3   :  { %v1447_v19 = vadd.f32 %v1445_v43, %v1390_v8  ;;  %v8749_v41 = vld [vmem:[%s12932_s5 + $0x10] sm:$0xff]  }
 0x3b4   :  { %v1437_v42 = vpop.f32.mrf.mxu0 }
 0x3b5   :  { %v1453_v58 = vmul.f32 %v1452_v63, %v1447_v19  ;;  %v1446_v59 = vmul.f32 %v1444_v15, %v1437_v42  ;;  %v8751_v19 = vld [vmem:[%s12932_s5 + $0x20] sm:$0xff]   ;;  %v8752_v42 = vld [vmem:[%s12932_s5 + $0x28] sm:$0xff]  }
 0x3b6   :  { %v8017_v62 = vpop.f32.mrf.mxu0 }
 0x3b7   :  { %v1459_v1 = vadd.f32 %v1458_v22, %v1453_v58  ;;  %v1448_v44 = vadd.f32 %v1446_v59, %v1391_v27  ;;  %v8753_v58 = vld [vmem:[%s12932_s5 + $0x30] sm:$0xff]   ;;  %v8754_v59 = vld [vmem:[%s12932_s5 + $0x38] sm:$0xff]  }
 0x3b9   :  { %v7202_v16 = vmul.f32 -1.442695, %v1459_v1  ;;  %v1454_v33 = vmul.f32 %v1452_v63, %v1448_v44  ;;  %v8866_v44 = vld [vmem:[%s12931_s2 + $0x4] ss:$12 sps:$4 sm:$0xff]   ;;  %v8748_v63 = vld [vmem:[%s12932_s5 + $0x8] sm:$0xff]  }
 0x3bb   :  { %8822 = vpow2.f32 %v7202_v16  ;;  %v1460_v32 = vadd.f32 %v1458_v22, %v1454_v33  ;;  %v8747_v16 = vld [vmem:[%s12932_s5] sm:$0xff]  }
 0x3bc   :  { %8030 = vmatprep.mubr.msk.bf16.mxu0 %vm1333_vm6, %v8747_v16  ;;  %v8755_v33 = vld [vmem:[%s12932_s5 + $0x40] sm:$0xff]  }
 0x3bd   :  { %v7203_v55 = vmul.f32 -1.442695, %v1460_v32 }
 0x3bf   :  { %8824 = vpow2.f32 %v7203_v55  ;;  %v8757_v55 = vld [vmem:[%s12932_s5 + $0x50] sm:$0xff]  }
 0x3c8   :  { %v8823_v48 = vpop.eup %8822 }
 0x3c9   :  { %v1467_v28 = vadd.f32 1.0, %v8823_v48  ;;  %v8758_v48 = vld [vmem:[%s12932_s5 + $0x58] sm:$0xff]  }
 0x3cb   :  { %8826 = vrcp.f32 %v1467_v28  ;;  %v8759_v28 = vld [vmem:[%s12932_s5 + $0x60] sm:$0xff]  }
 0x3cc   :  { %v8825_v14 = vpop.eup %8824 }
 0x3cd   :  { %v1468_v34 = vadd.f32 1.0, %v8825_v14  ;;  %v8760_v14 = vld [vmem:[%s12932_s5 + $0x68] sm:$0xff]  }
 0x3cf   :  { %8828 = vrcp.f32 %v1468_v34  ;;  %v8761_v34 = vld [vmem:[%s12932_s5 + $0x70] sm:$0xff]  }
 0x3d8   :  { %v8827_v13 = vpop.eup %8826 }
 0x3d9   :  { %v1473_v8 = vmul.f32 %v8827_v13, %v1459_v1  ;;  %v8762_v13 = vld [vmem:[%s12932_s5 + $0x78] sm:$0xff]  }
 0x3dc   :  { %v8829_v53 = vpop.eup %8828 }
 0x3dd   :  { %v1474_v10 = vmul.f32 %v8829_v53, %v1460_v32  ;;  %v8756_v32 = vld [vmem:[%s12932_s5 + $0x48] sm:$0xff]   ;;  %v8763_v53 = vld [vmem:[%s12932_s5 + $0x80] sm:$0xff]  }
 0x3df   :  { %v1480_v62 = vpack.c.bf16 %v1474_v10, %v1473_v8  ;;  %v8764_v8 = vld [vmem:[%s12932_s5 + $0x88] sm:$0xff]   ;;  %v8765_v10 = vld [vmem:[%s12932_s5 + $0x90] sm:$0xff]  }
 0x3e1   :  { %8025 = vmatmul.mubr.msk.bf16.vlgmr.msra.gmra.mxu1 %vm1484_vm7, %v1480_v62  ;;  %v8766_v62 = vld [vmem:[%s12932_s5 + $0x98] sm:$0xff]  }
 0x3e2   :  { %2351 = vmatprep.mubr.bf16.mxu1 %v8866_v44 }
 0x4a1   :  { %v1525_v22 = vpop.f32.mrf.mxu1 }
 0x4a3   :  { %v8026_v27 = vpop.f32.mrf.mxu1 }
 0x4a5   :  { %v1528_v15 = vpop.f32.mrf.mxu1 }
 0x4a6   :  { %v1532_v1 = vpack.c.bf16 %v1528_v15, %v1525_v22 }
 0x4a7   :  { %v8027_v43 = vpop.f32.mrf.mxu1 }
 0x4a8   :  { %8028 = vmatprep.subr.bf16.mxu0 %v1532_v1 }
 0x4a9   :  { %8029 = vmatpush3.bf16.msra.mxu0 %v1532_v1 }
 0x4ac   :  { %8031 = vmatmul.mubr.msk.bf16.vlgmr.msra.gmra.mxu0 %vm1333_vm6, %v8748_v63 }
 0x4ad   :  { %8034 = vmatprep.mubr.msk.bf16.mxu0 %vm1333_vm6, %v8749_v41 }
 0x4b4   :  { %8035 = vmatmul.mubr.msk.bf16.gmra.mxu0 %vm1333_vm6, %v8750_v50 }
 0x4b5   :  { %8038 = vmatprep.mubr.msk.bf16.mxu0 %vm1333_vm6, %v8751_v19 }
 0x4bc   :  { %8039 = vmatmul.mubr.msk.bf16.gmra.mxu0 %vm1333_vm6, %v8752_v42 }
 0x4bd   :  { %8042 = vmatprep.mubr.msk.bf16.mxu0 %vm1333_vm6, %v8753_v58 }
 0x4c4   :  { %8043 = vmatmul.mubr.msk.bf16.gmra.mxu0 %vm1333_vm6, %v8754_v59 }
 0x4c5   :  { %8046 = vmatprep.mubr.msk.bf16.mxu0 %vm1333_vm6, %v8755_v33  ;;  %v1926_v33 = vld [vmem:[%s12930_s6 + $0x340] sm:$0x7] }
 0x4cc   :  { %8047 = vmatmul.mubr.msk.bf16.gmra.mxu0 %vm1333_vm6, %v8756_v32 }
 0x4cd   :  { %8050 = vmatprep.mubr.msk.bf16.mxu0 %vm1333_vm6, %v8757_v55 }
 0x4d4   :  { %8051 = vmatmul.mubr.msk.bf16.gmra.mxu0 %vm1333_vm6, %v8758_v48 }
 0x4d5   :  { %8054 = vmatprep.mubr.msk.bf16.mxu0 %vm1333_vm6, %v8759_v28  ;;  %v10081_v28 = vrot.slane %v1926_v33, %v13059_v35 }
 0x4dc   :  { %8055 = vmatmul.mubr.msk.bf16.gmra.mxu0 %vm1333_vm6, %v8760_v14 }
 0x4dd   :  { %8058 = vmatprep.mubr.msk.bf16.mxu0 %vm1333_vm6, %v8761_v34 }
 0x4e4   :  { %8059 = vmatmul.mubr.msk.bf16.gmra.mxu0 %vm1333_vm6, %v8762_v13  ;;  %v2011_v13 = vmul.f32 0.0, %v10081_v28 }
 0x4e5   :  { %8062 = vmatprep.mubr.msk.bf16.mxu0 %vm1333_vm6, %v8763_v53 }
 0x4ec   :  { %8063 = vmatmul.mubr.msk.bf16.gmra.mxu0 %vm1333_vm6, %v8764_v8 }
 0x4ed   :  { %8066 = vmatprep.mubr.msk.bf16.mxu0 %vm1333_vm6, %v8765_v10 }
 0x4f4   :  { %8067 = vmatmul.mubr.msk.bf16.gmra.mxu0 %vm1333_vm6, %v8766_v62  ;;  %v10098_v62 = vrot.slane %v1926_v33, %v13061_v52 }
 0x4f5   :  { %8106 = vmatprep.mubr.msk.bf16.mxu0 %vm1333_vm6, %v8747_v16 }
 0x56c   :  { %v8032_v44 = vpop.f32.mrf.mxu0 }
 0x56d   :  { %v1736_v55 = vadd.f32 %v8032_v44, %v9919_v0 }
 0x56e   :  { %v1727_v22 = vpop.f32.mrf.mxu0 }
 0x56f   :  { %v1728_v19 = vadd.f32 %v1727_v22, %v9935_v61  ;;  %v10084_v61 = vrot.slane %v1926_v33, %v13060_v49  ;;  %v10093_v8 = vmax.f32 %v1736_v55, 0.0  ;;  %v10117_v33 = vmul.f32 0.0, %v10098_v62 }
 0x570   :  { %v8033_v27 = vpop.f32.mrf.mxu0 }
 0x571   :  { %v10075_v16 = vmax.f32 %v1728_v19, 0.0  ;;  %13064 = vst [vmem:[#allocation10_spill] sm:$0xff] %v10093_v8  ;;  %13067 = vst [vmem:[#allocation12_spill] sm:$0xff] %v10117_v33  ;;  %v2056_v55 = vmul.f32 %v10084_v61, %v10093_v8 }
 0x572   :  { %v1730_v15 = vpop.f32.mrf.mxu0 }
 0x573   :  { %v1731_v58 = vadd.f32 %v1730_v15, %v9929_v47  ;;  %13062 = vst [vmem:[#allocation16_spill] sm:$0xff] %v10075_v16  ;;  %v1739_v47 = vadd.f32 %v8033_v27, %v9904_v46  ;;  %v2054_v53 = vmul.f32 %v10084_v61, %v10075_v16  ;;  %v2012_v15 = vmul.f32 %v10081_v28, %v10075_v16 }
 0x574   :  { %v8036_v1 = vpop.f32.mrf.mxu0 }
 0x575   :  { %v10078_v48 = vmax.f32 %v1731_v58, 0.0  ;;  %v1752_v44 = vadd.f32 %v8036_v1, %v9819_v60  ;;  %v10103_v46 = vmax.f32 %v1739_v47, 0.0  ;;  %v2014_v58 = vmul.f32 %v10081_v28, %v10093_v8 }
 0x576   :  { %v1743_v43 = vpop.f32.mrf.mxu0  ;;  %v2096_v16 = vadd.f32 %v2056_v55, %v2012_v15 }
 0x577   :  { %13063 = vst [vmem:[#allocation7_spill] sm:$0xff] %v10078_v48  ;;  %v1744_v34 = vadd.f32 %v1743_v43, %v9883_v54  ;;  %v2055_v10 = vmul.f32 %v10084_v61, %v10078_v48  ;;  %13065 = vst [vmem:[#allocation15_spill] sm:$0xff] %v10103_v46  ;;  %v2094_v43 = vadd.f32 %v2054_v53, %v2011_v13 }
 0x578   :  { %v8037_v63 = vpop.f32.mrf.mxu0  ;;  %v2013_v60 = vmul.f32 %v10081_v28, %v10078_v48  ;;  %v2057_v53 = vmul.f32 %v10084_v61, %v10103_v46 }
 0x579   :  { %v10105_v54 = vmax.f32 %v1744_v34, 0.0  ;;  %v2095_v1 = vadd.f32 %v2055_v10, %v2011_v13  ;;  %v1755_v47 = vadd.f32 %v8037_v63, %v9790_v23  ;;  %v2139_v13 = vmul.f32 %v10098_v62, %v10103_v46 }
 0x57a   :  { %v1746_v41 = vpop.f32.mrf.mxu0 }
 0x57b   :  { %13066 = vst [vmem:[#allocation9_spill] sm:$0xff] %v10105_v54  ;;  %v1747_v27 = vadd.f32 %v1746_v41, %v9853_v56  ;;  %v2138_v56 = vmul.f32 %v10098_v62, %v10093_v8  ;;  %v10123_v41 = vmax.f32 %v1752_v44, 0.0  ;;  %v2058_v10 = vmul.f32 %v10084_v61, %v10105_v54 }
 0x57c   :  { %v8040_v50 = vpop.f32.mrf.mxu0  ;;  %v2015_v44 = vmul.f32 %v10081_v28, %v10103_v46  ;;  %v2097_v8 = vadd.f32 %v2057_v53, %v2013_v60  ;;  %v2178_v49 = vadd.f32 %v2139_v13, %v2095_v1  ;;  %v2140_v35 = vmul.f32 %v10098_v62, %v10105_v54 }
 0x57d   :  { %13068 = vst [vmem:[#allocation11_spill] sm:$0xff] %v10123_v41  ;;  %v10134_v48 = vmax.f32 %v1747_v27, 0.0  ;;  %v2177_v52 = vadd.f32 %v2138_v56, %v2094_v43  ;;  %v1768_v33 = vadd.f32 %v8040_v50, %v9680_v24  ;;  %v2018_v27 = vmul.f32 %v10081_v28, %v10123_v41  ;;  %v1928_v24 = vld [vmem:[%s12930_s6 + $0x358] sm:$0xff] }
 0x57e   :  { %v1759_v42 = vpop.f32.mrf.mxu0  ;;  %v2060_v15 = vmul.f32 %v10084_v61, %v10123_v41  ;;  %v2016_v43 = vmul.f32 %v10081_v28, %v10105_v54  ;;  %v10150_v55 = vmax.f32 %v1755_v47, 0.0  ;;  %v2098_v50 = vadd.f32 %v2058_v10, %v2014_v58 }
 0x57f   :  { %13069 = vst [vmem:[#allocation14_spill] sm:$0xff] %v10134_v48  ;;  %v1760_v23 = vadd.f32 %v1759_v42, %v9729_v20  ;;  %v1927_v42 = vld [vmem:[%s12930_s6 + $0x350] sm:$0xff]  ;;  %v2059_v60 = vmul.f32 %v10084_v61, %v10134_v48  ;;  %v2141_v1 = vmul.f32 %v10098_v62, %v10134_v48  ;;  %v2142_v47 = vmul.f32 %v10098_v62, %v10123_v41 }
 0x580   :  { %v8041_v59 = vpop.f32.mrf.mxu0  ;;  %13070 = vst [vmem:[#allocation6_spill] sm:$0xff] %v10150_v55  ;;  %v2017_v53 = vmul.f32 %v10081_v28, %v10134_v48  ;;  %v2179_v58 = vadd.f32 %v2140_v35, %v2096_v16  ;;  %v10174_v10 = vmax.f32 %v1768_v33, 0.0  ;;  %v10176_v11 = vmul.f32 %v2177_v52, %v1927_v42 }
 0x581   :  { %v10169_v13 = vmax.f32 %v1760_v23, 0.0  ;;  %v1771_v54 = vadd.f32 %v8041_v59, %v9669_v6  ;;  %v10178_v45 = vmul.f32 %v2178_v49, %v1928_v24  ;;  %v2061_v48 = vmul.f32 %v10084_v61, %v10150_v55  ;;  %v1929_v6 = vld [vmem:[%s12930_s6 + $0x360] sm:$0xff] }
 0x582   :  { %v1762_v32 = vpop.f32.mrf.mxu0  ;;  %13072 = vst [vmem:[#allocation5_spill] sm:$0xff] %v10174_v10  ;;  %13073 = vst [vmem:[#allocation23_spill] sm:$0xff] %v10176_v11  ;;  %v2181_v35 = vadd.f32 %v2142_v47, %v2098_v50  ;;  %v2099_v52 = vadd.f32 %v2059_v60, %v2015_v44  ;;  %v2180_v59 = vadd.f32 %v2141_v1, %v2097_v8  ;;  %v1930_v8 = vld [vmem:[%s12930_s6 + $0x368] sm:$0xff] }
 0x583   :  { %v1763_v56 = vadd.f32 %v1762_v32, %v9704_v36  ;;  %13071 = vst [vmem:[#allocation8_spill] sm:$0xff] %v10169_v13  ;;  %13074 = vst [vmem:[#allocation24_spill] sm:$0xff] %v10178_v45  ;;  %v2100_v36 = vadd.f32 %v2060_v15, %v2016_v43  ;;  %v2019_v32 = vmul.f32 %v10081_v28, %v10150_v55  ;;  %v10196_v43 = vmax.f32 %v1771_v54, 0.0 }
 0x584   :  { %v10086_v14 = vpop.f32.mrf.mxu0  ;;  %v2143_v16 = vmul.f32 %v10098_v62, %v10150_v55  ;;  %v2101_v33 = vadd.f32 %v2061_v48, %v2017_v53  ;;  %v2062_v15 = vmul.f32 %v10084_v61, %v10169_v13  ;;  %v2022_v44 = vmul.f32 %v10081_v28, %v10174_v10 }
 0x585   :  { %v10190_v49 = vmax.f32 %v1763_v56, 0.0  ;;  %13076 = vst [vmem:[#allocation26_spill] sm:$0xff] %v10196_v43  ;;  %v2144_v48 = vmul.f32 %v10098_v62, %v10169_v13  ;;  %v1784_v54 = vadd.f32 %v10086_v14, %v9472_v21  ;;  %v10212_v42 = vmul.f32 %v2179_v58, %v1929_v6 }
 0x586   :  { %v1775_v0 = vpop.f32.mrf.mxu0  ;;  %v2064_v24 = vmul.f32 %v10084_v61, %v10174_v10  ;;  %v2146_v50 = vmul.f32 %v10098_v62, %v10174_v10  ;;  %v10226_v53 = vadd.f32 %v2143_v16, %v2099_v52  ;;  %v10230_v14 = vmul.f32 %v2180_v59, %v1930_v8 }
 0x587   :  { %v1776_v23 = vadd.f32 %v1775_v0, %v9502_v57  ;;  %13075 = vst [vmem:[#allocation25_spill] sm:$0xff] %v10190_v49  ;;  %v1931_v0 = vld [vmem:[%s12930_s6 + $0x370] sm:$0xff]  ;;  %13077 = vst [vmem:[#allocation27_spill] sm:$0xff] %v10212_v42  ;;  %v2063_v47 = vmul.f32 %v10084_v61, %v10190_v49  ;;  %v2020_v58 = vmul.f32 %v10081_v28, %v10169_v13  ;;  %v10244_v59 = vmax.f32 %v1784_v54, 0.0 }
 0x588   :  { %v10101_v22 = vpop.f32.mrf.mxu0  ;;  %v10228_v21 = vmul.f32 %v2181_v35, %v1931_v0  ;;  %13080 = vst [vmem:[#allocation30_spill] sm:$0xff] %v10230_v14  ;;  %v2102_v6 = vadd.f32 %v2062_v15, %v2018_v27  ;;  %v2183_v10 = vadd.f32 %v2144_v48, %v2100_v36  ;;  %v2021_v52 = vmul.f32 %v10081_v28, %v10190_v49  ;;  %v1933_v15 = vld [vmem:[%s12930_s6 + $0x380] sm:$0xff] }
 0x589   :  { %v10218_v60 = vmax.f32 %v1776_v23, 0.0  ;;  %v2023_v23 = vmul.f32 %v10081_v28, %v10196_v43  ;;  %v2145_v35 = vmul.f32 %v10098_v62, %v10190_v49  ;;  %13081 = vst [vmem:[#allocation31_spill] sm:$0xff] %v10244_v59  ;;  %v2065_v27 = vmul.f32 %v10084_v61, %v10196_v43 }
 0x58a   :  { %v10110_v19 = vpop.f32.mrf.mxu0  ;;  %13079 = vst [vmem:[#allocation29_spill] sm:$0xff] %v10228_v21  ;;  %v2147_v0 = vmul.f32 %v10098_v62, %v10196_v43  ;;  %v2103_v8 = vadd.f32 %v2063_v47, %v2019_v32  ;;  %v2104_v49 = vadd.f32 %v2064_v24, %v2020_v58  ;;  %v2185_v13 = vadd.f32 %v2146_v50, %v2102_v6  ;;  %v1935_v47 = vld [vmem:[%s12930_s6 + $0x390] sm:$0xff]  ;;  %v1958_v21 = vld [vmem:[%s12930_s6 + $0x448] sm:$0xff] }
 0x58b   :  { %13078 = vst [vmem:[#allocation28_spill] sm:$0xff] %v10218_v60  ;;  %v1779_v1 = vadd.f32 %v10110_v19, %v9505_v18  ;;  %v1787_v18 = vadd.f32 %v10101_v22, %v9474_v51  ;;  %v2066_v16 = vmul.f32 %v10084_v61, %v10218_v60  ;;  %v2148_v51 = vmul.f32 %v10098_v62, %v10218_v60 }
 0x58c   :  { %v10126_v34 = vpop.f32.mrf.mxu0  ;;  %v2024_v48 = vmul.f32 %v10081_v28, %v10218_v60  ;;  %v2105_v14 = vadd.f32 %v2065_v27, %v2021_v52  ;;  %v2184_v42 = vadd.f32 %v2145_v35, %v2101_v33  ;;  %v2068_v32 = vmul.f32 %v10084_v61, %v10244_v59  ;;  %v1936_v35 = vld [vmem:[%s12930_s6 + $0x398] sm:$0xff] }
 0x58d   :  { %v10252_v22 = vmax.f32 %v1779_v1, 0.0  ;;  %v10265_v1 = vmax.f32 %v1787_v18, 0.0  ;;  %v1800_v55 = vadd.f32 %v10126_v34, %v9894_v31  ;;  %v10276_v43 = vmul.f32 %v2183_v10, %v1933_v15  ;;  %v1937_v10 = vld [vmem:[%s12930_s6 + $0x3a0] sm:$0xff] }
 0x58e   :  { %v10139_v63 = vpop.f32.mrf.mxu0  ;;  %v2187_v24 = vadd.f32 %v2148_v51, %v2104_v49  ;;  %v2150_v33 = vmul.f32 %v10098_v62, %v10244_v59  ;;  %v2108_v50 = vadd.f32 %v2068_v32, %v2024_v48  ;;  %v2186_v6 = vadd.f32 %v2147_v0, %v2103_v8 }
 0x58f   :  { %13082 = vst [vmem:[#allocation32_spill] sm:$0xff] %v10252_v22  ;;  %v1792_v54 = vadd.f32 %v10139_v63, %v9921_v38  ;;  %13083 = vst [vmem:[#allocation33_spill] sm:$0xff] %v10265_v1  ;;  %v2026_v38 = vmul.f32 %v10081_v28, %v10244_v59  ;;  %v2106_v63 = vadd.f32 %v2066_v16, %v2022_v44  ;;  %v10293_v49 = vmax.f32 %v1800_v55, 0.0 }
 0x590   :  { %v10152_v20 = vpop.f32.mrf.mxu0  ;;  %v2067_v31 = vmul.f32 %v10084_v61, %v10252_v22  ;;  %v10291_v18 = vmul.f32 %v10081_v28, %v10265_v1  ;;  %v2225_v27 = vmul.f32 %v2185_v13, %v1935_v47  ;;  %v2069_v16 = vmul.f32 %v10084_v61, %v10265_v1  ;;  %v1939_v47 = vld [vmem:[%s12930_s6 + $0x3b0] sm:$0xff] }
 0x591   :  { %v10284_v58 = vmax.f32 %v1792_v54, 0.0  ;;  %13085 = vst [vmem:[#allocation35_spill] sm:$0xff] %v10293_v49  ;;  %v1803_v44 = vadd.f32 %v10152_v20, %v9872_v29  ;;  %v2151_v51 = vmul.f32 %v10098_v62, %v10265_v1  ;;  %v2025_v15 = vmul.f32 %v10081_v28, %v10252_v22  ;;  %v1975_v29 = vld [vmem:[%s12930_s6 + $0x4d0] sm:$0xff]  ;;  %v1934_v20 = vld [vmem:[%s12930_s6 + $0x388] sm:$0xff] }
 0x592   :  { %v10172_v46 = vpop.f32.mrf.mxu0  ;;  %v2189_v13 = vadd.f32 %v2150_v33, %v2106_v63  ;;  %v2107_v0 = vadd.f32 %v2067_v31, %v2023_v23  ;;  %v2149_v8 = vmul.f32 %v10098_v62, %v10252_v22  ;;  %v10316_v54 = vmul.f32 %v2187_v24, %v1937_v10 }
 0x593   :  { %13084 = vst [vmem:[#allocation34_spill] sm:$0xff] %v10284_v58  ;;  %v1795_v55 = vadd.f32 %v10172_v46, %v9912_v40  ;;  %v2028_v32 = vmul.f32 %v10081_v28, %v10284_v58  ;;  %v2070_v40 = vmul.f32 %v10084_v61, %v10284_v58  ;;  %v2152_v46 = vmul.f32 %v10098_v62, %v10284_v58 }
 0x594   :  { %v10185_v41 = vpop.f32.mrf.mxu0  ;;  %v10327_v23 = vmul.f32 %v2186_v6, %v1936_v35  ;;  %v10331_v63 = vmul.f32 %v10081_v28, %v10293_v49  ;;  %v10333_v24 = vmax.f32 %v1803_v44, 0.0  ;;  %v10335_v33 = vadd.f32 %v2225_v27, %v1975_v29 }
 0x595   :  { %v10337_v10 = vmul.f32 %v2184_v42, %v1934_v20  ;;  %v2109_v22 = vadd.f32 %v2069_v16, %v2025_v15  ;;  %v2072_v60 = vmul.f32 %v10084_v61, %v10293_v49  ;;  %v10343_v58 = vmul.f32 %v10098_v62, %v10293_v49 }
 0x596   :  { %v10198_v57 = vpop.f32.mrf.mxu0  ;;  %13086 = vst [vmem:[#allocation36_spill] sm:$0xff] %v10333_v24  ;;  %v10345_v6 = vmax.f32 %v1795_v55, 0.0  ;;  %v2188_v35 = vadd.f32 %v2149_v8, %v2105_v14  ;;  %v1816_v44 = vadd.f32 %v10185_v41, %v9788_v37  ;;  %v2190_v59 = vadd.f32 %v2151_v51, %v2107_v0 }
 0x597   :  { %13087 = vst [vmem:[#allocation37_spill] sm:$0xff] %v10343_v58  ;;  %v2229_v27 = vmul.f32 %v2189_v13, %v1939_v47  ;;  %v10349_v29 = vadd.f32 %v2070_v40, %v2026_v38  ;;  %v10351_v42 = vadd.f32 %v2072_v60, %v2028_v32  ;;  %v2191_v16 = vadd.f32 %v2152_v46, %v2108_v50  ;;  %v1941_v60 = vld [vmem:[%s12930_s6 + $0x3c0] sm:$0xff]  ;;  %v1940_v32 = vld [vmem:[%s12930_s6 + $0x3b8] sm:$0xff]  ;;  %v1979_v40 = vld [vmem:[%s12930_s6 + $0x4f0] sm:$0xff] }
 0x598   :  { %v10222_v56 = vpop.f32.mrf.mxu0  ;;  %13088 = vst [vmem:[#allocation38_spill] sm:$0xff] %v10345_v6  ;;  %v10356_v20 = vmul.f32 %v10081_v28, %v10333_v24  ;;  %v10360_v14 = vmul.f32 %v10084_v61, %v10333_v24  ;;  %v10364_v37 = vmul.f32 %v10098_v62, %v10333_v24  ;;  %v10376_v50 = vmul.f32 %v10084_v61, %v10345_v6 }
 0x599   :  { %v2153_v51 = vmul.f32 %v10098_v62, %v10345_v6 }
 0x59a   :  { %v10238_v19 = vpop.f32.mrf.mxu0 }
 0x59c   :  { %v10254_v36 = vpop.f32.mrf.mxu0 }
 0x59d   :  { %v1832_v55 = vadd.f32 %v10254_v36, %v9667_v39 }
 0x59e   :  { %v10269_v45 = vpop.f32.mrf.mxu0 }
 0x59f   :  { %v1824_v39 = vadd.f32 %v10269_v45, %v9699_v2  ;;  %v10413_v45 = vmax.f32 %v1832_v55, 0.0 }
 0x5a0   :  { %v8057_v34 = vpop.f32.mrf.mxu0 }
 0x5a1   :  { %v1835_v41 = vadd.f32 %v8057_v34, %v9638_v4  ;;  %v10382_v4 = vmax.f32 %v1816_v44, 0.0  ;;  %v1808_v34 = vadd.f32 %v10198_v57, %v9844_v9  ;;  %v1819_v57 = vadd.f32 %v10222_v56, %v9757_v26  ;;  %13092 = vst [vmem:[#allocation42_spill] sm:$0xff] %v10413_v45 }
 0x5a2   :  { %v1826_v52 = vpop.f32.mrf.mxu0  ;;  %v2192_v44 = vadd.f32 %v2153_v51, %v2109_v22  ;;  %v2080_v24 = vmul.f32 %v10084_v61, %v10413_v45 }
 0x5a3   :  { %v1827_v36 = vadd.f32 %v1826_v52, %v9701_v25  ;;  %v10416_v52 = vmul.f32 %v2190_v59, %v1940_v32  ;;  %v2034_v22 = vmul.f32 %v10081_v28, %v10382_v4  ;;  %v10447_v51 = vmax.f32 %v1808_v34, 0.0 }
 0x5a4   :  { %v8060_v48 = vpop.f32.mrf.mxu0  ;;  %v10449_v55 = vmax.f32 %v1819_v57, 0.0 }
 0x5a5   :  { %v1848_v13 = vadd.f32 %v8060_v48, %v9592_v5  ;;  %v10401_v5 = vmul.f32 %v2191_v16, %v1941_v60  ;;  %v10408_v48 = vmax.f32 %v1835_v41, 0.0  ;;  %v1942_v60 = vld [vmem:[%s12930_s6 + $0x3c8] sm:$0xff]  ;;  %13097 = vst [vmem:[#allocation47_spill] sm:$0xff] %v10447_v51 }
 0x5a6   :  { %v1839_v31 = vpop.f32.mrf.mxu0 }
 0x5a7   :  { %v1840_v15 = vadd.f32 %v1839_v31, %v9612_v30  ;;  %v10372_v30 = vmul.f32 %v10081_v28, %v10345_v6  ;;  %13090 = vst [vmem:[#allocation40_spill] sm:$0xff] %v10408_v48  ;;  %v10418_v31 = vadd.f32 %v2229_v27, %v1979_v40  ;;  %v10420_v16 = vmax.f32 %v1848_v13, 0.0 }
 0x5a8   :  { %v8061_v1 = vpop.f32.mrf.mxu0  ;;  %v2039_v27 = vmul.f32 %v10081_v28, %v10408_v48  ;;  %v1811_v13 = vadd.f32 %v10238_v19, %v9822_v17  ;;  %v2232_v17 = vmul.f32 %v2192_v44, %v1942_v60  ;;  %v2163_v58 = vmul.f32 %v10098_v62, %v10408_v48 }
 0x5a9   :  { %v10399_v9 = vmax.f32 %v1840_v15, 0.0  ;;  %v1851_v46 = vadd.f32 %v8061_v1, %v9594_v12  ;;  %13093 = vst [vmem:[#allocation43_spill] sm:$0xff] %v10420_v16  ;;  %v10428_v1 = vmax.f32 %v1824_v39, 0.0  ;;  %v10430_v15 = vmax.f32 %v1827_v36, 0.0  ;;  %v13098_v39 = vld [vmem:[#allocation13_spill] sm:$0xff] }
 0x5aa   :  { %v1842_v38 = vpop.f32.mrf.mxu0  ;;  %v2084_v32 = vmul.f32 %v10084_v61, %v10420_v16 }
 0x5ab   :  { %v1843_v0 = vadd.f32 %v1842_v38, %v9605_v7  ;;  %13089 = vst [vmem:[#allocation39_spill] sm:$0xff] %v10399_v9  ;;  %v1938_v7 = vld [vmem:[%s12930_s6 + $0x3a8] sm:$0xff]  ;;  %13094 = vst [vmem:[#allocation44_spill] sm:$0xff] %v10430_v15  ;;  %v2040_v41 = vmul.f32 %v10081_v28, %v10399_v9  ;;  %v2036_v34 = vmul.f32 %v10081_v28, %v10428_v1 }
 0x5ac   :  { %v10388_v8 = vpop.f32.mrf.mxu0  ;;  %v10426_v12 = vmul.f32 %v2188_v35, %v1938_v7  ;;  %v10442_v35 = vmax.f32 %v1851_v46, 0.0  ;;  %v2037_v57 = vmul.f32 %v10081_v28, %v10430_v15  ;;  %v2078_v6 = vmul.f32 %v10084_v61, %v10428_v1 }
 0x5ad   :  { %v10411_v47 = vmax.f32 %v1843_v0, 0.0  ;;  %v2038_v0 = vmul.f32 %v10081_v28, %v10413_v45  ;;  %v2124_v19 = vadd.f32 %v2084_v32, %v2040_v41 }
 0x5ae   :  { %v1855_v2 = vpop.f32.mrf.mxu0  ;;  %13096 = vst [vmem:[#allocation46_spill] sm:$0xff] %v10442_v35  ;;  %v2085_v44 = vmul.f32 %v10084_v61, %v10442_v35 }
 0x5af   :  { %13091 = vst [vmem:[#allocation41_spill] sm:$0xff] %v10411_v47  ;;  %v1856_v25 = vadd.f32 %v1855_v2, %v9858_v3  ;;  %v2083_v26 = vmul.f32 %v10084_v61, %v10411_v47  ;;  %v2082_v3 = vmul.f32 %v10084_v61, %v10399_v9  ;;  %v2167_v2 = vmul.f32 %v10098_v62, %v10442_v35 }
 0x5b0   :  { %v10424_v56 = vpop.f32.mrf.mxu0  ;;  %v2076_v35 = vmul.f32 %v10084_v61, %v10382_v4 }
 0x5b1   :  { %v10434_v59 = vmax.f32 %v1856_v25, 0.0  ;;  %v2123_v7 = vadd.f32 %v2083_v26, %v2039_v27  ;;  %v2122_v46 = vadd.f32 %v2082_v3, %v2038_v0  ;;  %v2041_v25 = vmul.f32 %v10081_v28, %v10411_v47 }
 0x5b2   :  { %v1858_v38 = vpop.f32.mrf.mxu0  ;;  %v2081_v26 = vmul.f32 %v10084_v61, %v10408_v48  ;;  %v2079_v27 = vmul.f32 %v10084_v61, %v10430_v15  ;;  %v2165_v3 = vmul.f32 %v10098_v62, %v10411_v47  ;;  %v1957_v47 = vld [vmem:[%s12930_s6 + $0x440] sm:$0xff]  ;;  %v2160_v48 = vmul.f32 %v10098_v62, %v10428_v1 }
 0x5b3   :  { %13095 = vst [vmem:[#allocation45_spill] sm:$0xff] %v10434_v59  ;;  %v2168_v40 = vmul.f32 %v10098_v62, %v10434_v59  ;;  %v1859_v36 = vadd.f32 %v1858_v38, %v13098_v39  ;;  %v2166_v38 = vmul.f32 %v10098_v62, %v10420_v16  ;;  %v2206_v32 = vadd.f32 %v2167_v2, %v2123_v7 }
 0x5b4   :  { %v10482_v60 = vpop.f32.mrf.mxu0  ;;  %v2035_v39 = vmul.f32 %v10081_v28, %v10449_v55  ;;  %v2164_v7 = vmul.f32 %v10098_v62, %v10399_v9  ;;  %v2121_v16 = vadd.f32 %v2081_v26, %v2037_v57  ;;  %v2120_v59 = vadd.f32 %v2080_v24, %v2036_v34  ;;  %v1997_v57 = vld [vmem:[%s12930_s6 + $0x580] sm:$0xff] }
 0x5b5   :  { %v10468_v49 = vmax.f32 %v1859_v36, 0.0  ;;  %v2207_v0 = vadd.f32 %v2168_v40, %v2124_v19  ;;  %v10486_v36 = vmax.f32 %v1811_v13, 0.0  ;;  %v1956_v40 = vld [vmem:[%s12930_s6 + $0x438] sm:$0xff]  ;;  %v2125_v19 = vadd.f32 %v2085_v44, %v2041_v25  ;;  %v1982_v13 = vld [vmem:[%s12930_s6 + $0x508] sm:$0xff]  ;;  %v1955_v25 = vld [vmem:[%s12930_s6 + $0x430] sm:$0xff] }
 0x5b6   :  { %v2205_v2 = vadd.f32 %v2166_v38, %v2122_v46  ;;  %v2119_v44 = vadd.f32 %v2079_v27, %v2035_v39  ;;  %v10513_v9 = vpop.f32.mrf.mxu0  ;;  %v2246_v38 = vmul.f32 %v2206_v32, %v1956_v40  ;;  %v2204_v11 = vadd.f32 %v2165_v3, %v2121_v16  ;;  %v1998_v27 = vld [vmem:[%s12930_s6 + $0x588] sm:$0xff] }
 0x5b7   :  { %13099 = vst [vmem:[#allocation13_spill] sm:$0xff] %v10468_v49  ;;  %v2169_v41 = vmul.f32 %v10098_v62, %v10468_v49  ;;  %13100 = vst [vmem:[#allocation48_spill] sm:$0xff] %v10486_v36  ;;  %v2032_v49 = vmul.f32 %v10081_v28, %v10447_v51  ;;  %v2247_v26 = vmul.f32 %v2207_v0, %v1957_v47  ;;  %v1996_v47 = vld [vmem:[%s12930_s6 + $0x578] sm:$0xff]  ;;  %v1954_v16 = vld [vmem:[%s12930_s6 + $0x428] sm:$0xff] }
 0x5b8   :  { %v2077_v24 = vmul.f32 %v10084_v61, %v10449_v55  ;;  %v2033_v34 = vmul.f32 %v10081_v28, %v10486_v36  ;;  %v10527_v39 = vadd.f32 %v2232_v17, %v1982_v13  ;;  %v2118_v3 = vadd.f32 %v2078_v6, %v2034_v22  ;;  %v1981_v0 = vld [vmem:[%s12930_s6 + $0x500] sm:$0xff]  ;;  %v1995_v6 = vld [vmem:[%s12930_s6 + $0x570] sm:$0xff] }
 0x5b9   :  { %v2208_v46 = vadd.f32 %v2169_v41, %v2125_v19  ;;  %v2245_v32 = vmul.f32 %v2205_v2, %v1955_v25  ;;  %v2203_v40 = vadd.f32 %v2164_v7, %v2120_v59  ;;  %v2075_v17 = vmul.f32 %v10084_v61, %v10486_v36  ;;  %v8069_v2 = vpop.f32.mrf.mxu0 }
 0x5ba   :  { %v2162_v19 = vmul.f32 %v10098_v62, %v10413_v45  ;;  %v2161_v13 = vmul.f32 %v10098_v62, %v10430_v15  ;;  %v2202_v22 = vadd.f32 %v2163_v58, %v2119_v44  ;;  %v10550_v59 = vadd.f32 %v2247_v26, %v1997_v57  ;;  %v1994_v44 = vld [vmem:[%s12930_s6 + $0x568] sm:$0xff]  ;;  %v1952_v57 = vld [vmem:[%s12930_s6 + $0x418] sm:$0xff] }
 0x5bb   :  { %v2248_v41 = vmul.f32 %v2208_v46, %v1958_v21  ;;  %v1953_v21 = vld [vmem:[%s12930_s6 + $0x420] sm:$0xff]  ;;  %v10554_v25 = vadd.f32 %v2246_v38, %v1996_v47  ;;  %v1980_v46 = vld [vmem:[%s12930_s6 + $0x4f8] sm:$0xff]  ;;  %v2244_v15 = vmul.f32 %v2204_v11, %v1954_v16  ;;  %v2074_v45 = vmul.f32 %v10084_v61, %v10447_v51  ;;  %v1978_v47 = vld [vmem:[%s12930_s6 + $0x4e8] sm:$0xff] }
 0x5bc   :  { %v10564_v58 = vadd.f32 %v10401_v5, %v1981_v0  ;;  %v2117_v26 = vadd.f32 %v2077_v24, %v2033_v34  ;;  %v10574_v38 = vadd.f32 %v2245_v32, %v1995_v6  ;;  %v1977_v5 = vld [vmem:[%s12930_s6 + $0x4e0] sm:$0xff]  ;;  %v2201_v16 = vadd.f32 %v2162_v19, %v2118_v3  ;;  %v1951_v32 = vld [vmem:[%s12930_s6 + $0x410] sm:$0xff]  ;;  %v1874_v6 = vpop.f32.mrf.mxu0 }
 0x5bd   :  { %v10552_v7 = vadd.f32 %v2248_v41, %v1998_v27  ;;  %v2243_v27 = vmul.f32 %v2203_v40, %v1953_v21  ;;  %v2116_v41 = vadd.f32 %v2076_v35, %v2032_v49  ;;  %v10585_v24 = vadd.f32 %v10416_v52, %v1980_v46  ;;  %v1993_v34 = vld [vmem:[%s12930_s6 + $0x560] sm:$0xff]  ;;  %v1950_v52 = vld [vmem:[%s12930_s6 + $0x408] sm:$0xff] }
 0x5be   :  { %v2306_v0 = vpack.c.bf16 %v10527_v39, %v10564_v58  ;;  %v2200_v40 = vadd.f32 %v2161_v13, %v2117_v26  ;;  %v2313_v49 = vpack.c.bf16 %v10554_v25, %v10574_v38  ;;  %v10595_v35 = vadd.f32 %v2244_v15, %v1994_v44  ;;  %v1992_v15 = vld [vmem:[%s12930_s6 + $0x558] sm:$0xff]  ;;  %v13101_v26 = vld [vmem:[#allocation20_spill] sm:$0xff] }
 0x5bf   :  { %v2314_v11 = vpack.c.bf16 %v10552_v7, %v10550_v59  ;;  %v2242_v3 = vmul.f32 %v2202_v22, %v1952_v57  ;;  %v2115_v19 = vadd.f32 %v2075_v17, %v10356_v20  ;;  %v2158_v21 = vmul.f32 %v10098_v62, %v10382_v4 }
 0x5c0   :  { %v10604_v13 = vadd.f32 %v10316_v54, %v1977_v5  ;;  %v10607_v46 = vadd.f32 %v10426_v12, %v1978_v47  ;;  %v2199_v22 = vadd.f32 %v2160_v48, %v2116_v41  ;;  %v2114_v44 = vadd.f32 %v2074_v45, %v10331_v63  ;;  %v1949_v54 = vld [vmem:[%s12930_s6 + $0x400] sm:$0xff]  ;;  %v1991_v63 = vld [vmem:[%s12930_s6 + $0x550] sm:$0xff]  ;;  %v1990_v41 = vld [vmem:[%s12930_s6 + $0x548] sm:$0xff] }
 0x5c1   :  { %7520 = vmatprep.subr.bf16.mxu1 %v2314_v11  ;;  %v2159_v20 = vmul.f32 %v10098_v62, %v10449_v55  ;;  %v10615_v17 = vadd.f32 %v2243_v27, %v1993_v34  ;;  %v2241_v57 = vmul.f32 %v2201_v16, %v1951_v32  ;;  %v2156_v12 = vmul.f32 %v10098_v62, %v10447_v51  ;;  %v1976_v16 = vld [vmem:[%s12930_s6 + $0x4d8] sm:$0xff]  ;;  %v13102_v32 = vld [vmem:[#allocation19_spill] sm:$0xff] }
 0x5c2   :  { %7521 = vmatpush3.bf16.msra.mxu1 %v2306_v0  ;;  %v1875_v11 = vadd.f32 %v1874_v6, %v13101_v26  ;;  %v2305_v48 = vpack.c.bf16 %v10585_v24, %v10418_v31  ;;  %v2240_v45 = vmul.f32 %v2200_v40, %v1950_v52  ;;  %v2157_v27 = vmul.f32 %v10098_v62, %v10486_v36  ;;  %v1973_v0 = vld [vmem:[%s12930_s6 + $0x4c0] sm:$0xff]  ;;  %v13104_v26 = vld [vmem:[#allocation17_spill] sm:$0xff] }
 0x5c3   :  { %7522 = vmatprep.subr.bf16.mxu1 %v2313_v49  ;;  %v2312_v5 = vpack.c.bf16 %v10595_v35, %v10615_v17  ;;  %v10632_v47 = vadd.f32 %v2242_v3, %v1992_v15  ;;  %v2198_v34 = vadd.f32 %v2159_v20, %v2115_v19  ;;  %v1872_v40 = vadd.f32 %v10513_v9, %v13102_v32  ;;  %v13103_v6 = vld [vmem:[#allocation18_spill] sm:$0xff]  ;;  %v1948_v15 = vld [vmem:[%s12930_s6 + $0x3f8] sm:$0xff] }
 0x5c4   :  { %v1883_v49 = vadd.f32 %v8069_v2, %v13103_v6  ;;  %v2304_v3 = vpack.c.bf16 %v10607_v46, %v10604_v13  ;;  %v2239_v52 = vmul.f32 %v2199_v22, %v1949_v54  ;;  %v1880_v51 = vadd.f32 %v10482_v60, %v13104_v26  ;;  %v1989_v22 = vld [vmem:[%s12930_s6 + $0x540] sm:$0xff] }
 0x5c5   :  { %v10653_v36 = vadd.f32 %v2241_v57, %v1991_v63  ;;  %v2197_v19 = vadd.f32 %v2158_v21, %v2114_v44  ;;  %v2113_v9 = vadd.f32 %v10360_v14, %v10372_v30  ;;  %v10657_v2 = vmax.f32 %v1875_v11, 0.0  ;;  %v1947_v21 = vld [vmem:[%s12930_s6 + $0x3f0] sm:$0xff]  ;;  %v1932_v44 = vld [vmem:[%s12930_s6 + $0x378] sm:$0xff]  ;;  %v13108_v63 = vld [vmem:[#allocation22_spill] sm:$0xff] }
 0x5c6   :  { %7523 = vmatpush3.bf16.msra.mxu1 %v2305_v48  ;;  %v10660_v20 = vadd.f32 %v10327_v23, %v1976_v16  ;;  %v10665_v54 = vadd.f32 %v2240_v45, %v1990_v41  ;;  %v10668_v60 = vadd.f32 %v10276_v43, %v1973_v0  ;;  %v1974_v23 = vld [vmem:[%s12930_s6 + $0x4c8] sm:$0xff]  ;;  %v2238_v30 = vmul.f32 %v2198_v34, %v1948_v15  ;;  %v13107_v11 = vld [vmem:[#allocation21_spill] sm:$0xff]  ;;  %v1945_v6 = vld [vmem:[%s12930_s6 + $0x3e0] sm:$0xff] }
 0x5c7   :  { %7524 = vmatprep.subr.bf16.mxu1 %v2312_v5  ;;  %13105 = vst [vmem:[#allocation20_spill] sm:$0xff] %v10657_v2  ;;  %v2311_v14 = vpack.c.bf16 %v10632_v47, %v10653_v36  ;;  %v2196_v57 = vadd.f32 %v2157_v27, %v2113_v9  ;;  %v2111_v43 = vadd.f32 %v10376_v50, %v10291_v18  ;;  %v10687_v5 = vmax.f32 %v1872_v40, 0.0  ;;  %v1988_v41 = vld [vmem:[%s12930_s6 + $0x538] sm:$0xff]  ;;  %v1946_v27 = vld [vmem:[%s12930_s6 + $0x3e8] sm:$0xff] }
 0x5c8   :  { %13106 = vst [vmem:[#allocation19_spill] sm:$0xff] %v10665_v54  ;;  %v1864_v48 = vadd.f32 %v10388_v8, %v13107_v11  ;;  %v1867_v45 = vadd.f32 %v10424_v56, %v13108_v63  ;;  %v10689_v16 = vmax.f32 %v1883_v49, 0.0  ;;  %v10697_v18 = vmax.f32 %v1880_v51, 0.0  ;;  %v1987_v51 = vld [vmem:[%s12930_s6 + $0x530] sm:$0xff]  ;;  %v1944_v9 = vld [vmem:[%s12930_s6 + $0x3d8] sm:$0xff]  ;;  %v1985_v63 = vld [vmem:[%s12930_s6 + $0x520] sm:$0xff] }
 0x5c9   :  { %13109 = vst [vmem:[#allocation18_spill] sm:$0xff] %v10687_v5  ;;  %v10699_v50 = vadd.f32 %v2239_v52, %v1989_v22  ;;  %v2237_v8 = vmul.f32 %v2197_v19, %v1947_v21  ;;  %v2195_v56 = vadd.f32 %v2156_v12, %v10351_v42  ;;  %v2049_v0 = vmul.f32 %v10081_v28, %v10657_v2  ;;  %v1986_v19 = vld [vmem:[%s12930_s6 + $0x528] sm:$0xff] }
 0x5ca   :  { %13110 = vst [vmem:[#allocation17_spill] sm:$0xff] %v10689_v16  ;;  %7525 = vmatpush3.bf16.msra.mxu1 %v2304_v3  ;;  %13111 = vst [vmem:[#allocation21_spill] sm:$0xff] %v10697_v18  ;;  %v2303_v34 = vpack.c.bf16 %v10660_v20, %v10335_v33  ;;  %v10707_v32 = vadd.f32 %v10337_v10, %v1974_v23  ;;  %v2222_v40 = vmul.f32 %v10226_v53, %v1932_v44  ;;  %v1972_v10 = vld [vmem:[%s12930_s6 + $0x4b8] sm:$0xff] }
 0x5cb   :  { %7526 = vmatprep.subr.bf16.mxu1 %v2311_v14  ;;  %13112 = vst [vmem:[#allocation22_spill] sm:$0xff] %v10699_v50  ;;  %v2310_v42 = vpack.c.bf16 %v10665_v54, %v10699_v50  ;;  %v10718_v12 = vadd.f32 %v2238_v30, %v1988_v41  ;;  %v2236_v49 = vmul.f32 %v2196_v57, %v1946_v27  ;;  %v10724_v52 = vmax.f32 %v1864_v48, 0.0  ;;  %v1971_v14 = vld [vmem:[%s12930_s6 + $0x4b0] sm:$0xff]  ;;  %v13117_v30 = vld [vmem:[#allocation37_spill] sm:$0xff]  ;;  %v2005_v54 = vld [vmem:[%s12930_s6 + $0x5c0] sm:$0xff] }
 0x5cc   :  { %v2194_v3 = vadd.f32 %v10364_v37, %v2111_v43  ;;  %v10726_v15 = vmax.f32 %v1867_v45, 0.0  ;;  %v2048_v53 = vmul.f32 %v10081_v28, %v10687_v5  ;;  %v2093_v26 = vmul.f32 %v10084_v61, %v10689_v16  ;;  %v1967_v37 = vld [vmem:[%s12930_s6 + $0x490] sm:$0xff]  ;;  %v1969_v45 = vld [vmem:[%s12930_s6 + $0x4a0] sm:$0xff] }
 0x5cd   :  { %13113 = vst [vmem:[#allocation49_spill] sm:$0xff] %v10718_v12  ;;  %13114 = vst [vmem:[#allocation50_spill] sm:$0xff] %v10724_v52  ;;  %v2092_v22 = vmul.f32 %v10084_v61, %v10697_v18  ;;  %v10743_v21 = vadd.f32 %v2237_v8, %v1987_v51  ;;  %v2235_v23 = vmul.f32 %v2195_v56, %v1945_v6  ;;  %v1970_v8 = vld [vmem:[%s12930_s6 + $0x4a8] sm:$0xff] }
 0x5ce   :  { %13115 = vst [vmem:[#allocation51_spill] sm:$0xff] %v10726_v15  ;;  %7527 = vmatpush3.bf16.msra.mxu1 %v2303_v34  ;;  %v2193_v44 = vadd.f32 %v13117_v30, %v10349_v29  ;;  %v2091_v57 = vmul.f32 %v10084_v61, %v10657_v2  ;;  %v2133_v43 = vadd.f32 %v2093_v26, %v2049_v0  ;;  %v1943_v29 = vld [vmem:[%s12930_s6 + $0x3d0] sm:$0xff]  ;;  %v13119_v0 = vld [vmem:[#allocation23_spill] sm:$0xff]  ;;  %v13123_v30 = vld [vmem:[#allocation30_spill] sm:$0xff] }
 0x5cf   :  { %7528 = vmatprep.subr.bf16.mxu1 %v2310_v42  ;;  %13116 = vst [vmem:[#allocation52_spill] sm:$0xff] %v10743_v21  ;;  %v2302_v11 = vpack.c.bf16 %v10707_v32, %v10668_v60  ;;  %v10754_v48 = vadd.f32 %v2222_v40, %v1972_v10  ;;  %v2309_v41 = vpack.c.bf16 %v10718_v12, %v10743_v21  ;;  %v13120_v42 = vld [vmem:[#allocation29_spill] sm:$0xff] }
 0x5d0   :  { %v10767_v27 = vadd.f32 %v2236_v49, %v1986_v19  ;;  %v2234_v56 = vmul.f32 %v2194_v3, %v1944_v9  ;;  %v10773_v34 = vadd.f32 %v13119_v0, %v1967_v37  ;;  %v2047_v51 = vmul.f32 %v10081_v28, %v10726_v15  ;;  %v1984_v49 = vld [vmem:[%s12930_s6 + $0x518] sm:$0xff]  ;;  %v13122_v9 = vld [vmem:[#allocation27_spill] sm:$0xff]  ;;  %v1983_v0 = vld [vmem:[%s12930_s6 + $0x510] sm:$0xff] }
 0x5d1   :  { %v2090_v40 = vmul.f32 %v10084_v61, %v10687_v5  ;;  %v2132_v6 = vadd.f32 %v2092_v22, %v2048_v53  ;;  %v10780_v10 = vadd.f32 %v13120_v42, %v1971_v14  ;;  %v1968_v3 = vld [vmem:[%s12930_s6 + $0x498] sm:$0xff]  ;;  %v2046_v26 = vmul.f32 %v10081_v28, %v10724_v52  ;;  %v13124_v42 = vld [vmem:[#allocation12_spill] sm:$0xff] }
 0x5d2   :  { %13118 = vst [vmem:[#allocation37_spill] sm:$0xff] %v10767_v27  ;;  %7529 = vmatpush3.bf16.msra.mxu1 %v2302_v11  ;;  %v10790_v19 = vadd.f32 %v2235_v23, %v1985_v63  ;;  %v10793_v53 = vadd.f32 %v13122_v9, %v1969_v45  ;;  %v2233_v37 = vmul.f32 %v2193_v44, %v1943_v29  ;;  %v1966_v29 = vld [vmem:[%s12930_s6 + $0x488] sm:$0xff] }
 0x5d3   :  { %7530 = vmatprep.subr.bf16.mxu1 %v2309_v41  ;;  %v2131_v22 = vadd.f32 %v2091_v57, %v2047_v51  ;;  %v2301_v14 = vpack.c.bf16 %v10754_v48, %v10780_v10  ;;  %v10798_v11 = vadd.f32 %v13123_v30, %v1970_v8  ;;  %v2216_v21 = vadd.f32 %v13124_v42, %v2133_v43  ;;  %v13125_v41 = vld [vmem:[#allocation45_spill] sm:$0xff]  ;;  %v13126_v57 = vld [vmem:[#allocation24_spill] sm:$0xff] }
 0x5d4   :  { %13121 = vst [vmem:[#allocation23_spill] sm:$0xff] %v10790_v19  ;;  %v2044_v23 = vmul.f32 %v10081_v28, %v13125_v41  ;;  %v2308_v63 = vpack.c.bf16 %v10767_v27, %v10790_v19  ;;  %v10808_v44 = vadd.f32 %v2234_v56, %v1984_v49  ;;  %v10811_v45 = vadd.f32 %v13126_v57, %v1968_v3  ;;  %v13127_v8 = vld [vmem:[#allocation13_spill] sm:$0xff]  ;;  %v13129_v27 = vld [vmem:[#allocation43_spill] sm:$0xff] }
 0x5d5   :  { %v2045_v51 = vmul.f32 %v10081_v28, %v13127_v8  ;;  %v2130_v9 = vadd.f32 %v2090_v40, %v2046_v26  ;;  %v2215_v43 = vadd.f32 %v13124_v42, %v2132_v6  ;;  %v2175_v30 = vmul.f32 %v10098_v62, %v10689_v16  ;;  %v1965_v40 = vld [vmem:[%s12930_s6 + $0x480] sm:$0xff] }
 0x5d6   :  { %7531 = vmatpush3.bf16.msra.mxu1 %v2301_v14  ;;  %v2089_v56 = vmul.f32 %v10084_v61, %v10726_v15  ;;  %v2087_v49 = vmul.f32 %v10084_v61, %v13127_v8  ;;  %v2174_v3 = vmul.f32 %v10098_v62, %v10697_v18  ;;  %v10827_v57 = vadd.f32 %v2233_v37, %v1983_v0  ;;  %v13128_v16 = vld [vmem:[#allocation46_spill] sm:$0xff] }
 0x5d7   :  { %7532 = vmatprep.subr.bf16.mxu1 %v2308_v63  ;;  %v2173_v6 = vmul.f32 %v10098_v62, %v10657_v2  ;;  %v2300_v26 = vpack.c.bf16 %v10798_v11, %v10793_v53  ;;  %v2256_v14 = vmul.f32 %v2216_v21, %v1966_v29  ;;  %v2214_v42 = vadd.f32 %v2175_v30, %v2131_v22  ;;  %v2006_v2 = vld [vmem:[%s12930_s6 + $0x5c8] sm:$0xff]  ;;  %v1964_v21 = vld [vmem:[%s12930_s6 + $0x478] sm:$0xff] }
 0x5d8   :  { %v2043_v19 = vmul.f32 %v10081_v28, %v13128_v16  ;;  %v2088_v63 = vmul.f32 %v10084_v61, %v10724_v52  ;;  %v2086_v37 = vmul.f32 %v10084_v61, %v13125_v41  ;;  %v2307_v0 = vpack.c.bf16 %v10808_v44, %v10827_v57 }
 0x5d9   :  { %v2129_v22 = vadd.f32 %v2089_v56, %v2045_v51  ;;  %v2172_v29 = vmul.f32 %v10098_v62, %v10687_v5  ;;  %v2213_v30 = vadd.f32 %v2174_v3, %v2130_v9  ;;  %v2255_v18 = vmul.f32 %v2215_v43, %v1965_v40  ;;  %v1963_v51 = vld [vmem:[%s12930_s6 + $0x470] sm:$0xff] }
 0x5da   :  { %7533 = vmatpush3.bf16.msra.mxu1 %v2300_v26  ;;  %v2042_v61 = vmul.f32 %v10081_v28, %v13129_v27  ;;  %v2128_v12 = vadd.f32 %v2088_v63, %v2044_v23  ;;  %v2127_v50 = vadd.f32 %v2087_v49, %v2043_v19  ;;  %v2299_v9 = vpack.c.bf16 %v10811_v45, %v10773_v34  ;;  %v2004_v28 = vld [vmem:[%s12930_s6 + $0x5b8] sm:$0xff]  ;;  %v1962_v19 = vld [vmem:[%s12930_s6 + $0x468] sm:$0xff]  ;;  %v1961_v63 = vld [vmem:[%s12930_s6 + $0x460] sm:$0xff] }
 0x5db   :  { %7534 = vmatprep.subr.bf16.mxu1 %v2307_v0  ;;  %v2212_v56 = vadd.f32 %v2173_v6, %v2129_v22  ;;  %v10862_v3 = vadd.f32 %v2256_v14, %v2006_v2  ;;  %v2254_v43 = vmul.f32 %v2214_v42, %v1964_v21  ;;  %v2171_v23 = vmul.f32 %v10098_v62, %v10726_v15  ;;  %v2003_v42 = vld [vmem:[%s12930_s6 + $0x5b0] sm:$0xff]  ;;  %v2002_v0 = vld [vmem:[%s12930_s6 + $0x5a8] sm:$0xff]  ;;  %v1960_v21 = vld [vmem:[%s12930_s6 + $0x458] sm:$0xff] }
 0x5dc   :  { %v2126_v40 = vadd.f32 %v2086_v37, %v2042_v61  ;;  %v2211_v49 = vadd.f32 %v2172_v29, %v2128_v12  ;;  %v10872_v6 = vadd.f32 %v2255_v18, %v2005_v54  ;;  %v2253_v26 = vmul.f32 %v2213_v30, %v1963_v51  ;;  %v1959_v61 = vld [vmem:[%s12930_s6 + $0x450] sm:$0xff] }
 0x5dd   :  { %13130 = vst [vmem:[#allocation29_spill] sm:$0xff] %v10862_v3  ;;  %v2170_v2 = vmul.f32 %v10098_v62, %v10724_v52  ;;  %v13132_v14 = vmov 0.0   ;;  %v10885_v37 = vadd.f32 %v2254_v43, %v2004_v28  ;;  %v2252_v54 = vmul.f32 %v2212_v56, %v1962_v19  ;;  %v8867_v62 = vld [vmem:[%s12931_s2] ss:$12 sps:$4 sm:$0xff]   ;;  %v2000_v43 = vld [vmem:[%s12930_s6 + $0x598] sm:$0xff]  ;;  %v1999_v19 = vld [vmem:[%s12930_s6 + $0x590] sm:$0xff] }
 0x5de   :  { %7535 = vmatpush3.bf16.msra.mxu1 %v2299_v9  ;;  %13131 = vst [vmem:[#allocation27_spill] sm:$0xff] %v10872_v6  ;;  %v2318_v12 = vpack.c.bf16 %v10862_v3, %v10872_v6  ;;  %v2210_v18 = vadd.f32 %v2171_v23, %v2127_v50  ;;  %v10896_v29 = vadd.f32 %v2253_v26, %v2003_v42  ;;  %v2001_v50 = vld [vmem:[%s12930_s6 + $0x5a0] sm:$0xff]  ;;  %v8868_v42 = vld [vmem:[%s12931_s2 + $0x8] ss:$12 sps:$4 sm:$0xff]  }
 0x5df   :  { %8070 = vmatprep.subr.bf16.mxu1 %v13132_v14  ;;  %13133 = vst [vmem:[#allocation30_spill] sm:$0xff] %v10885_v37  ;;  %v2209_v22 = vadd.f32 %v2170_v2, %v2126_v40  ;;  %v2251_v30 = vmul.f32 %v2211_v49, %v1961_v63  ;;  %v10909_v56 = vadd.f32 %v2252_v54, %v2002_v0 }
 0x5e0   :  { %13134 = vst [vmem:[#allocation12_spill] sm:$0xff] %v10896_v29  ;;  %v2317_v51 = vpack.c.bf16 %v10885_v37, %v10896_v29  ;;  %v2250_v9 = vmul.f32 %v2210_v18, %v1960_v21 }
 0x5e1   :  { %2352 = vmatmul.mubr.bf16.vlgmr.msra.gmra.mxu1 %v8867_v62  ;;  %13135 = vst [vmem:[#allocation45_spill] sm:$0xff] %v10909_v56  ;;  %v10914_v40 = vadd.f32 %v2251_v30, %v2001_v50  ;;  %v2249_v28 = vmul.f32 %v2209_v22, %v1959_v61 }
 0x5e2   :  { %8071 = vmatpush3.bf16.msra.mxu1 %v2318_v12  ;;  %8078 = vmatprep.mubr.msk.bf16.mxu1 %vm8901_vm4, %v13132_v14  ;;  %v10922_v49 = vadd.f32 %v2250_v9, %v2000_v43 }
 0x5e3   :  { %8072 = vmatprep.subr.bf16.mxu1 %v13132_v14  ;;  %13136 = vst [vmem:[#allocation24_spill] sm:$0xff] %v10914_v40  ;;  %v2316_v23 = vpack.c.bf16 %v10909_v56, %v10914_v40  ;;  %v10924_v26 = vadd.f32 %v2249_v28, %v1999_v19  ;;  %v8869_v19 = vld [vmem:[%s12931_s2 + $0x18] ss:$12 sps:$4 sm:$0xff]  }
 0x5e5   :  { %v2315_v2 = vpack.c.bf16 %v10922_v49, %v10924_v26 }
 0x5e6   :  { %8073 = vmatpush3.bf16.msra.mxu1 %v2317_v51 }
 0x5e7   :  { %8074 = vmatprep.subr.bf16.mxu1 %v13132_v14 }
 0x5ea   :  { %8075 = vmatpush3.bf16.msra.mxu1 %v2316_v23  ;;  %v8870_v23 = vld [vmem:[%s12931_s2 + $0x30] ss:$12 sps:$4 sm:$0xff]  }
 0x5eb   :  { %8076 = vmatprep.subr.bf16.mxu1 %v13132_v14 }
 0x5ee   :  { %8077 = vmatpush3.bf16.msra.mxu1 %v2315_v2  ;;  %v2538_v2 = vld [vmem:[%s12930_s6 + $0x610] sm:$0xff] }
 0x5ef   :  { %8082 = vmatprep.subr.bf16.mxu1 %v13132_v14 }
 0x5f1   :  { %8079 = vmatmul.mubr.msk.bf16.vlgmr.msra.gmra.mxu1 %vm1239_vm5, %v8868_v42  ;;  %v2542_v42 = vpack.c.bf16 %v2538_v2, %v2538_v2 }
 0x5f2   :  { %8084 = vmatprep.mubr.msk.bf16.mxu1 %vm8901_vm4, %v13132_v14 }
 0x6a1   :  { %v7536_v63 = vpop.f32.mrf.mxu1 }
 0x6a3   :  { %v7537_v12 = vpop.f32.mrf.mxu1 }
 0x6a4   :  { %v7538_v0 = vadd.f32 %v7537_v12, %v7536_v63  ;;  %v2536_v63 = vld [vmem:[%s12930_s6 + $0x600] sm:$0xff]  ;;  %v2537_v12 = vld [vmem:[%s12930_s6 + $0x608] sm:$0xff] }
 0x6a5   :  { %v7539_v54 = vpop.f32.mrf.mxu1 }
 0x6a7   :  { %v7540_v18 = vpop.f32.mrf.mxu1 }
 0x6a8   :  { %v7541_v22 = vadd.f32 %v7540_v18, %v7539_v54  ;;  %v2547_v54 = vsel %vm165_vm0, %v2542_v42, 0  ;;  %v2541_v18 = vpack.c.bf16 %v2537_v12, %v2536_v63  ;;  %v13139_v42 = vld [vmem:[#allocation4_spill] sm:$0xff] }
 0x6b1   :  { %v2394_v62 = vpop.f32.mrf.mxu1 }
 0x6b2   :  { %v2395_v30 = vadd.f32 %v7538_v0, %v2394_v62  ;;  %v2534_v62 = vld [vmem:[%s12930_s6 + $0x5f0] sm:$0xff]  ;;  %v2535_v0 = vld [vmem:[%s12930_s6 + $0x5f8] sm:$0xff] }
 0x6b3   :  { %v8080_v21 = vpop.f32.mrf.mxu1 }
 0x6b4   :  { %v2401_v9 = vmul.f32 0.05, %v2395_v30  ;;  %v2540_v21 = vpack.c.bf16 %v2535_v0, %v2534_v62 }
 0x6b5   :  { %v2397_v50 = vpop.f32.mrf.mxu1 }
 0x6b6   :  { %v2398_v61 = vadd.f32 %v7541_v22, %v2397_v50  ;;  %v2297_v22 = vld [vmem:[%s12930_s6 + $0x5d0] sm:$0x7]  ;;  %v13137_v50 = vld [vmem:[#allocation2_spill] sm:$0xff] }
 0x6b7   :  { %v8081_v51 = vpop.f32.mrf.mxu1  ;;  %v2503_v63 = vrot.slane %v2297_v22, %v13139_v42 }
 0x6b8   :  { %v2402_v43 = vmul.f32 0.05, %v2398_v61  ;;  %v2448_v61 = vrot.slane %v2297_v22, %v13137_v50 }
 0x6ba   :  { %v2403_v28 = vpack.c.bf16 %v2402_v43, %v2401_v9 }
 0x6bc   :  { %8083 = vmatpush3.bf16.msra.mxu1 %v2403_v28 }
 0x6bd   :  { %8088 = vmatprep.subr.bf16.mxu1 %v13132_v14 }
 0x6bf   :  { %8085 = vmatmul.mubr.msk.bf16.vlgmr.msra.gmra.mxu1 %vm1333_vm6, %v8869_v19 }
 0x6c0   :  { %8089 = vmatpush3.bf16.msra.mxu1 %v2403_v28  ;;  %8090 = vmatprep.mubr.msk.bf16.mxu1 %vm8901_vm4, %v13132_v14  ;;  %v13138_v28 = vld [vmem:[#allocation3_spill] sm:$0xff] }
 0x6c1   :  { %8094 = vmatprep.subr.bf16.mxu1 %v13132_v14  ;;  %v2454_v19 = vrot.slane %v2297_v22, %v13138_v28 }
 0x6c7   :  { %8091 = vmatmul.mubr.msk.bf16.vlgmr.msra.gmra.mxu1 %vm1333_vm6, %v8870_v23 }
 0x6c8   :  { %8100 = vmatprep.mubr.msk.bf16.mxu1 %vm8901_vm4, %v13132_v14  ;;  %8095 = vmatpush3.bf16.msra.mxu1 %v2547_v54  ;;  %v2298_v54 = vld [vmem:[%s12930_s6 + $0x5e0] sm:$0x3] }
 0x6c9   :  { %8096 = vmatprep.subr.bf16.mxu1 %v13132_v14  ;;  %v2517_v29 = vrot.slane %v2298_v54, %v13138_v28  ;;  %v13161_v28 = vld [vmem:[#allocation31_spill] sm:$0xff] }
 0x6cc   :  { %8097 = vmatpush3.bf16.msra.mxu1 %v2541_v18  ;;  %v2455_v18 = vmul.f32 %v2454_v19, %v2401_v9 }
 0x6cd   :  { %8098 = vmatprep.subr.bf16.mxu1 %v13132_v14  ;;  %v2511_v14 = vrot.slane %v2298_v54, %v13137_v50 }
 0x6d0   :  { %8099 = vmatpush3.bf16.msra.mxu1 %v2540_v21 }
 0x77f   :  { %v2438_v30 = vpop.f32.mrf.mxu1 }
 0x780   :  { %v2449_v2 = vmul.f32 %v2448_v61, %v2438_v30 }
 0x781   :  { %v8086_v51 = vpop.f32.mrf.mxu1 }
 0x782   :  { %v2457_v0 = vadd.f32 %v2455_v18, %v2449_v2  ;;  %v2456_v51 = vmul.f32 %v2454_v19, %v2402_v43 }
 0x783   :  { %v2441_v23 = vpop.f32.mrf.mxu1 }
 0x784   :  { %v2450_v21 = vmul.f32 %v2448_v61, %v2441_v23 }
 0x785   :  { %v8087_v12 = vpop.f32.mrf.mxu1 }
 0x786   :  { %v2458_v15 = vadd.f32 %v2456_v51, %v2450_v21  ;;  %v8875_v21 = vld [vmem:[%s12932_s5 + $0x28] sm:$0xff]   ;;  %v8876_v51 = vld [vmem:[%s12932_s5 + $0x30] sm:$0xff]  }
 0x787   :  { %v2493_v62 = vpop.f32.mrf.mxu1 }
 0x788   :  { %v2504_v40 = vmul.f32 %v2503_v63, %v2493_v62  ;;  %v8873_v62 = vld [vmem:[%s12932_s5 + $0x18] sm:$0xff]  }
 0x789   :  { %v8092_v56 = vpop.f32.mrf.mxu1 }
 0x78a   :  { %v2506_v52 = vadd.f32 %v2504_v40, %v2457_v0  ;;  %v8874_v0 = vld [vmem:[%s12932_s5 + $0x20] sm:$0xff]  }
 0x78b   :  { %v2496_v30 = vpop.f32.mrf.mxu1 }
 0x78c   :  { %v2512_v22 = vmul.f32 %v2511_v14, %v2506_v52  ;;  %v2505_v12 = vmul.f32 %v2503_v63, %v2496_v30  ;;  %v8877_v30 = vld [vmem:[%s12932_s5 + $0x38] sm:$0xff]  }
 0x78d   :  { %v8093_v42 = vpop.f32.mrf.mxu1 }
 0x78e   :  { %v2518_v37 = vadd.f32 %v2517_v29, %v2512_v22  ;;  %v2507_v5 = vadd.f32 %v2505_v12, %v2458_v15  ;;  %v8878_v22 = vld [vmem:[%s12932_s5 + $0x40] sm:$0xff]   ;;  %v8879_v12 = vld [vmem:[%s12932_s5 + $0x48] sm:$0xff]  }
 0x790   :  { %v7248_v6 = vmul.f32 -1.442695, %v2518_v37  ;;  %v2513_v9 = vmul.f32 %v2511_v14, %v2507_v5 }
 0x792   :  { %8830 = vpow2.f32 %v7248_v6  ;;  %v2519_v2 = vadd.f32 %v2517_v29, %v2513_v9  ;;  %v8871_v29 = vld [vmem:[%s12932_s5 + $0x8] sm:$0xff]   ;;  %v8880_v9 = vld [vmem:[%s12932_s5 + $0x50] sm:$0xff]  }
 0x794   :  { %v7249_v61 = vmul.f32 -1.442695, %v2519_v2 }
 0x796   :  { %8832 = vpow2.f32 %v7249_v61  ;;  %v8882_v61 = vld [vmem:[%s12932_s5 + $0x60] sm:$0xff]  }
 0x79f   :  { %v8831_v23 = vpop.eup %8830 }
 0x7a0   :  { %v2526_v18 = vadd.f32 1.0, %v8831_v23  ;;  %v8883_v23 = vld [vmem:[%s12932_s5 + $0x68] sm:$0xff]  }
 0x7a2   :  { %8834 = vrcp.f32 %v2526_v18  ;;  %v8884_v18 = vld [vmem:[%s12932_s5 + $0x70] sm:$0xff]  }
 0x7a3   :  { %v8833_v56 = vpop.eup %8832 }
 0x7a4   :  { %v2527_v40 = vadd.f32 1.0, %v8833_v56  ;;  %v8885_v56 = vld [vmem:[%s12932_s5 + $0x78] sm:$0xff]  }
 0x7a6   :  { %8836 = vrcp.f32 %v2527_v40  ;;  %v8886_v40 = vld [vmem:[%s12932_s5 + $0x80] sm:$0xff]  }
 0x7af   :  { %v8835_v43 = vpop.eup %8834 }
 0x7b0   :  { %v2532_v54 = vmul.f32 %v8835_v43, %v2518_v37  ;;  %v8872_v37 = vld [vmem:[%s12932_s5 + $0x10] sm:$0xff]   ;;  %v8887_v43 = vld [vmem:[%s12932_s5 + $0x88] sm:$0xff]  }
 0x7b3   :  { %v8837_v19 = vpop.eup %8836 }
 0x7b4   :  { %v2533_v52 = vmul.f32 %v8837_v19, %v2519_v2  ;;  %v8881_v2 = vld [vmem:[%s12932_s5 + $0x58] sm:$0xff]   ;;  %v8888_v19 = vld [vmem:[%s12932_s5 + $0x90] sm:$0xff]  }
 0x7b6   :  { %v2539_v63 = vpack.c.bf16 %v2533_v52, %v2532_v54  ;;  %v8889_v54 = vld [vmem:[%s12932_s5 + $0x98] sm:$0xff]  }
 0x7b7   :  { %v8769_v52 = vld [vmem:[%s12931_s2 + $0x4c] ss:$12 sps:$4 sm:$0xff]  }
 0x7b8   :  { %8101 = vmatmul.mubr.msk.bf16.vlgmr.msra.gmra.mxu1 %vm1484_vm7, %v2539_v63 }
 0x7b9   :  { %3086 = vmatprep.mubr.bf16.mxu1 %v8769_v52 }
 0x878   :  { %v2583_v15 = vpop.f32.mrf.mxu1 }
 0x87a   :  { %v8102_v42 = vpop.f32.mrf.mxu1 }
 0x87c   :  { %v2586_v5 = vpop.f32.mrf.mxu1 }
 0x87d   :  { %v2590_v6 = vpack.c.bf16 %v2586_v5, %v2583_v15  ;;  %v13140_v15 = vld [vmem:[#allocation10_spill] sm:$0xff] }
 0x87e   :  { %v8103_v14 = vpop.f32.mrf.mxu1 }
 0x87f   :  { %8104 = vmatprep.subr.bf16.mxu0 %v2590_v6  ;;  %v13141_v14 = vld [vmem:[#allocation16_spill] sm:$0xff] }
 0x880   :  { %8105 = vmatpush3.bf16.msra.mxu0 %v2590_v6 }
 0x883   :  { %8107 = vmatmul.mubr.msk.bf16.vlgmr.msra.gmra.mxu0 %vm1333_vm6, %v8871_v29 }
 0x884   :  { %8110 = vmatprep.mubr.msk.bf16.mxu0 %vm1333_vm6, %v8872_v37 }
 0x88b   :  { %8111 = vmatmul.mubr.msk.bf16.gmra.mxu0 %vm1333_vm6, %v8873_v62 }
 0x88c   :  { %8114 = vmatprep.mubr.msk.bf16.mxu0 %vm1333_vm6, %v8874_v0  ;;  %v13142_v0 = vld [vmem:[#allocation15_spill] sm:$0xff] }
 0x893   :  { %8115 = vmatmul.mubr.msk.bf16.gmra.mxu0 %vm1333_vm6, %v8875_v21 }
 0x894   :  { %8118 = vmatprep.mubr.msk.bf16.mxu0 %vm1333_vm6, %v8876_v51 }
 0x89b   :  { %8119 = vmatmul.mubr.msk.bf16.gmra.mxu0 %vm1333_vm6, %v8877_v30 }
 0x89c   :  { %8122 = vmatprep.mubr.msk.bf16.mxu0 %vm1333_vm6, %v8878_v22 }
 0x8a3   :  { %8123 = vmatmul.mubr.msk.bf16.gmra.mxu0 %vm1333_vm6, %v8879_v12 }
 0x8a4   :  { %8126 = vmatprep.mubr.msk.bf16.mxu0 %vm1333_vm6, %v8880_v9  ;;  %v13143_v9 = vld [vmem:[#allocation7_spill] sm:$0xff] }
 0x8ab   :  { %8127 = vmatmul.mubr.msk.bf16.gmra.mxu0 %vm1333_vm6, %v8881_v2 }
 0x8ac   :  { %8130 = vmatprep.mubr.msk.bf16.mxu0 %vm1333_vm6, %v8882_v61 }
 0x8b3   :  { %8131 = vmatmul.mubr.msk.bf16.gmra.mxu0 %vm1333_vm6, %v8883_v23 }
 0x8b4   :  { %8134 = vmatprep.mubr.msk.bf16.mxu0 %vm1333_vm6, %v8884_v18 }
 0x8bb   :  { %8135 = vmatmul.mubr.msk.bf16.gmra.mxu0 %vm1333_vm6, %v8885_v56  ;;  %v13144_v56 = vld [vmem:[#allocation11_spill] sm:$0xff] }
 0x8bc   :  { %8138 = vmatprep.mubr.msk.bf16.mxu0 %vm1333_vm6, %v8886_v40 }
 0x8c3   :  { %8139 = vmatmul.mubr.msk.bf16.gmra.mxu0 %vm1333_vm6, %v8887_v43 }
 0x8c4   :  { %8142 = vmatprep.mubr.msk.bf16.mxu0 %vm1333_vm6, %v8888_v19 }
 0x8cb   :  { %8143 = vmatmul.mubr.msk.bf16.gmra.mxu0 %vm1333_vm6, %v8889_v54  ;;  %v13145_v54 = vld [vmem:[#allocation9_spill] sm:$0xff] }
 0x943   :  { %v8108_v63 = vpop.f32.mrf.mxu0 }
 0x944   :  { %v2634_v42 = vadd.f32 %v8108_v63, %v13140_v15 }
 0x945   :  { %v2625_v5 = vpop.f32.mrf.mxu0 }
 0x946   :  { %v2786_v6 = vadd.f32 %v2634_v42, %v10793_v53  ;;  %v2626_v29 = vadd.f32 %v2625_v5, %v13141_v14 }
 0x947   :  { %v8109_v37 = vpop.f32.mrf.mxu0 }
 0x948   :  { %v2784_v62 = vadd.f32 %v2626_v29, %v10773_v34  ;;  %v2637_v21 = vadd.f32 %v8109_v37, %v13142_v0  ;;  %v2826_v30 = vmax.f32 %v2786_v6, 0.0  ;;  %v13147_v37 = vld [vmem:[#allocation14_spill] sm:$0xff] }
 0x949   :  { %v2628_v51 = vpop.f32.mrf.mxu0 }
 0x94a   :  { %v2824_v22 = vmax.f32 %v2784_v62, 0.0  ;;  %v2787_v12 = vadd.f32 %v2637_v21, %v10798_v11  ;;  %v2629_v2 = vadd.f32 %v2628_v51, %v13143_v9  ;;  %v13146_v11 = vld [vmem:[#allocation6_spill] sm:$0xff] }
 0x94b   :  { %v8112_v61 = vpop.f32.mrf.mxu0 }
 0x94c   :  { %v2904_v23 = vmax.f32 %v2824_v22, %v2826_v30  ;;  %v2785_v18 = vadd.f32 %v2629_v2, %v10811_v45  ;;  %v2650_v53 = vadd.f32 %v8112_v61, %v13144_v56  ;;  %v2827_v43 = vmax.f32 %v2787_v12, 0.0 }
 0x94d   :  { %v2641_v40 = vpop.f32.mrf.mxu0 }
 0x94e   :  { %v2825_v19 = vmax.f32 %v2785_v18, 0.0  ;;  %v2790_v34 = vadd.f32 %v2650_v53, %v10668_v60  ;;  %v2642_v52 = vadd.f32 %v2641_v40, %v13145_v54 }
 0x94f   :  { %v8113_v63 = vpop.f32.mrf.mxu0 }
 0x950   :  { %v2905_v15 = vmax.f32 %v2825_v19, %v2827_v43  ;;  %v2788_v42 = vadd.f32 %v2642_v52, %v10780_v10  ;;  %v2653_v5 = vadd.f32 %v8113_v63, %v13146_v11  ;;  %v2830_v6 = vmax.f32 %v2790_v34, 0.0  ;;  %v13149_v10 = vld [vmem:[#allocation8_spill] sm:$0xff]  ;;  %v13151_v19 = vld [vmem:[#allocation25_spill] sm:$0xff] }
 0x951   :  { %v2644_v14 = vpop.f32.mrf.mxu0 }
 0x952   :  { %v2828_v29 = vmax.f32 %v2788_v42, 0.0  ;;  %v2791_v45 = vadd.f32 %v2653_v5, %v10707_v32  ;;  %v2645_v62 = vadd.f32 %v2644_v14, %v13147_v37  ;;  %v11074_v0 = vpack.c.bf16 %v2905_v15, %v2904_v23 }
 0x953   :  { %v8116_v21 = vpop.f32.mrf.mxu0 }
 0x954   :  { %13148 = vst [vmem:[#allocation13_spill] sm:$0xff] %v11074_v0  ;;  %v2906_v51 = vmax.f32 %v2826_v30, %v2828_v29  ;;  %v2908_v60 = vmax.f32 %v2828_v29, %v2830_v6  ;;  %v2789_v22 = vadd.f32 %v2645_v62, %v10754_v48  ;;  %v2831_v9 = vmax.f32 %v2791_v45, 0.0  ;;  %v13162_v0 = vld [vmem:[#allocation33_spill] sm:$0xff] }
 0x955   :  { %v2657_v12 = vpop.f32.mrf.mxu0 }
 0x956   :  { %v2829_v2 = vmax.f32 %v2789_v22, 0.0  ;;  %v2658_v61 = vadd.f32 %v2657_v12, %v13149_v10  ;;  %v8789_v10 = vld [vmem:[%s12931_s2 + $0xc4] ss:$12 sps:$4 sm:$0xff]  }
 0x957   :  { %v8117_v18 = vpop.f32.mrf.mxu0  ;;  %3322 = vmatprep.mubr.bf16.mxu0 %v8789_v10  ;;  %v13164_v10 = vld [vmem:[#allocation39_spill] sm:$0xff] }
 0x958   :  { %v2907_v56 = vmax.f32 %v2827_v43, %v2829_v2  ;;  %v2909_v53 = vmax.f32 %v2829_v2, %v2831_v9  ;;  %v11079_v40 = vadd.f32 %v2658_v61, %v10335_v33 }
 0x959   :  { %v2660_v32 = vpop.f32.mrf.mxu0 }
 0x95a   :  { %13150 = vst [vmem:[#allocation46_spill] sm:$0xff] %v11079_v40  ;;  %v13012_v23 = vmax.f32 %v11079_v40, 0.0  ;;  %v2661_v34 = vadd.f32 %v2660_v32, %v13151_v19  ;;  %v11083_v30 = vpack.c.bf16 %v2909_v53, %v2908_v60  ;;  %v11085_v48 = vpack.c.bf16 %v2907_v56, %v2906_v51  ;;  %v13157_v32 = vld [vmem:[#allocation38_spill] sm:$0xff] }
 0x95b   :  { %v8120_v54 = vpop.f32.mrf.mxu0 }
 0x95c   :  { %13152 = vst [vmem:[#allocation43_spill] sm:$0xff] %v11083_v30  ;;  %13153 = vst [vmem:[#allocation10_spill] sm:$0xff] %v11085_v48  ;;  %v2910_v52 = vmax.f32 %v2830_v6, %v13012_v23  ;;  %v11090_v63 = vadd.f32 %v2661_v34, %v10660_v20  ;;  %v13160_v23 = vld [vmem:[#allocation41_spill] sm:$0xff]  ;;  %v2682_v50 = vadd.f32 %v8120_v54, %v13161_v28  ;;  %v13163_v30 = vld [vmem:[#allocation34_spill] sm:$0xff] }
 0x95d   :  { %v2673_v43 = vpop.f32.mrf.mxu0 }
 0x95e   :  { %13154 = vst [vmem:[#allocation16_spill] sm:$0xff] %v11090_v63  ;;  %v13013_v33 = vmax.f32 %v11090_v63, 0.0 }
 0x95f   :  { %v8121_v15 = vpop.f32.mrf.mxu0 }
 0x960   :  { %v2911_v42 = vmax.f32 %v2831_v9, %v13013_v33  ;;  %v2685_v48 = vadd.f32 %v8121_v15, %v13162_v0 }
 0x961   :  { %v2676_v11 = vpop.f32.mrf.mxu0 }
 0x962   :  { %v11097_v14 = vpack.c.bf16 %v2911_v42, %v2910_v52  ;;  %v13159_v52 = vld [vmem:[#allocation5_spill] sm:$0xff] }
 0x963   :  { %v11095_v5 = vpop.f32.mrf.mxu0  ;;  %v2666_v42 = vadd.f32 %v8116_v21, %v13159_v52  ;;  %v13166_v21 = vld [vmem:[#allocation32_spill] sm:$0xff] }
 0x964   :  { %13155 = vst [vmem:[#allocation15_spill] sm:$0xff] %v11095_v5  ;;  %13156 = vst [vmem:[#allocation7_spill] sm:$0xff] %v11097_v14  ;;  %v2677_v52 = vadd.f32 %v2676_v11, %v13166_v21  ;;  %v13171_v21 = vld [vmem:[#allocation48_spill] sm:$0xff] }
 0x965   :  { %v2689_v29 = vpop.f32.mrf.mxu0  ;;  %v11132_v0 = vadd.f32 %v2666_v42, %v10604_v13 }
 0x966   :  { %v2690_v3 = vadd.f32 %v2689_v29, %v13163_v30  ;;  %v13167_v30 = vld [vmem:[#allocation26_spill] sm:$0xff] }
 0x967   :  { %v11099_v45 = vpop.f32.mrf.mxu0 }
 0x968   :  { %v11142_v15 = vadd.f32 %v2690_v3, %v10827_v57  ;;  %v13170_v3 = vld [vmem:[#allocation44_spill] sm:$0xff] }
 0x969   :  { %v2692_v37 = vpop.f32.mrf.mxu0 }
 0x96a   :  { %v2693_v19 = vadd.f32 %v2692_v37, %v13157_v32  ;;  %v13165_v32 = vld [vmem:[#allocation28_spill] sm:$0xff] }
 0x96b   :  { %v11101_v6 = vpop.f32.mrf.mxu0 }
 0x96d   :  { %v11103_v20 = vpop.f32.mrf.mxu0 }
 0x96f   :  { %v11105_v62 = vpop.f32.mrf.mxu0 }
 0x971   :  { %v11107_v51 = vpop.f32.mrf.mxu0 }
 0x973   :  { %v8132_v60 = vpop.f32.mrf.mxu0 }
 0x975   :  { %v2721_v22 = vpop.f32.mrf.mxu0 }
 0x977   :  { %v8133_v12 = vpop.f32.mrf.mxu0 }
 0x979   :  { %v2724_v9 = vpop.f32.mrf.mxu0 }
 0x97b   :  { %v8136_v2 = vpop.f32.mrf.mxu0 }
 0x97c   :  { %v2746_v40 = vadd.f32 %v8136_v2, %v13129_v27  ;;  %v2669_v27 = vadd.f32 %v8117_v18, %v13167_v30 }
 0x97d   :  { %v2737_v61 = vpop.f32.mrf.mxu0 }
 0x97e   :  { %v2738_v5 = vadd.f32 %v2737_v61, %v13164_v10  ;;  %v2814_v13 = vadd.f32 %v2746_v40, %v10550_v59 }
 0x97f   :  { %v8137_v56 = vpop.f32.mrf.mxu0 }
 0x980   :  { %v2749_v63 = vadd.f32 %v8137_v56, %v13128_v16  ;;  %v2812_v29 = vadd.f32 %v2738_v5, %v10574_v38 }
 0x981   :  { %v2740_v53 = vpop.f32.mrf.mxu0 }
 0x982   :  { %v2741_v33 = vadd.f32 %v2740_v53, %v13160_v23  ;;  %v11127_v23 = vadd.f32 %v2693_v19, %v10808_v44  ;;  %v13168_v44 = vld [vmem:[#allocation40_spill] sm:$0xff]  ;;  %v2815_v18 = vadd.f32 %v2749_v63, %v10552_v7  ;;  %v2840_v7 = vmax.f32 %v11142_v15, 0.0  ;;  %v13198_v15 = vld [vmem:[#allocation50_spill] sm:$0xff] }
 0x983   :  { %v11113_v34 = vpop.f32.mrf.mxu0  ;;  %v2733_v11 = vadd.f32 %v8133_v12, %v13168_v44  ;;  %v2852_v40 = vmax.f32 %v2812_v29, 0.0  ;;  %v13173_v44 = vld [vmem:[#allocation19_spill] sm:$0xff]  ;;  %v13174_v29 = vld [vmem:[#allocation22_spill] sm:$0xff] }
 0x984   :  { %13158 = vst [vmem:[#allocation11_spill] sm:$0xff] %v11113_v34  ;;  %v2674_v34 = vadd.f32 %v2673_v43, %v13165_v32  ;;  %v2813_v54 = vadd.f32 %v2741_v33, %v10554_v25  ;;  %v2799_v43 = vadd.f32 %v2685_v48, %v10527_v39  ;;  %v2841_v39 = vmax.f32 %v11127_v23, 0.0 }
 0x985   :  { %v2753_v14 = vpop.f32.mrf.mxu0  ;;  %v2725_v48 = vadd.f32 %v2724_v9, %v13170_v3  ;;  %v2855_v63 = vmax.f32 %v2815_v18, 0.0  ;;  %v2714_v32 = vadd.f32 %v11101_v6, %v10382_v4 }
 0x986   :  { %v2754_v37 = vadd.f32 %v2753_v14, %v13125_v41  ;;  %v2798_v41 = vadd.f32 %v2682_v50, %v10564_v58  ;;  %v2797_v58 = vadd.f32 %v2677_v52, %v10585_v24  ;;  %v13169_v50 = vld [vmem:[#allocation42_spill] sm:$0xff]  ;;  %v2853_v33 = vmax.f32 %v2813_v54, 0.0 }
 0x987   :  { %v11129_v28 = vpop.f32.mrf.mxu0  ;;  %v2730_v57 = vadd.f32 %v8132_v60, %v13169_v50  ;;  %v2839_v38 = vmax.f32 %v2799_v43, 0.0  ;;  %v2854_v24 = vmax.f32 %v2814_v13, 0.0  ;;  %v2809_v61 = vadd.f32 %v2725_v48, %v10632_v47 }
 0x988   :  { %v11137_v16 = vadd.f32 %v2754_v37, %v10924_v26  ;;  %v2796_v26 = vadd.f32 %v2674_v34, %v10418_v31  ;;  %v2811_v31 = vadd.f32 %v2733_v11, %v10595_v35  ;;  %v2838_v60 = vmax.f32 %v2798_v41, 0.0 }
 0x989   :  { %v2756_v14 = vpop.f32.mrf.mxu0  ;;  %v2837_v9 = vmax.f32 %v2797_v58, 0.0  ;;  %v2919_v2 = vmax.f32 %v2839_v38, %v2841_v39  ;;  %v2933_v35 = vmax.f32 %v2853_v33, %v2855_v63  ;;  %v2717_v34 = vadd.f32 %v11105_v62, %v10449_v55 }
 0x98a   :  { %v2757_v25 = vadd.f32 %v2756_v14, %v13127_v8  ;;  %v2856_v12 = vmax.f32 %v11137_v16, 0.0  ;;  %v2722_v8 = vadd.f32 %v2721_v22, %v10428_v1  ;;  %v2795_v22 = vadd.f32 %v2669_v27, %v10607_v46  ;;  %v8776_v16 = vld [vmem:[%s12931_s2 + $0x94] ss:$12 sps:$4 sm:$0xff]  }
 0x98b   :  { %v2836_v53 = vmax.f32 %v2796_v26, 0.0  ;;  %v2918_v19 = vmax.f32 %v2838_v60, %v2840_v7  ;;  %v2851_v42 = vmax.f32 %v2811_v31, 0.0  ;;  %v2932_v47 = vmax.f32 %v2852_v40, %v2854_v24  ;;  %v8144_v58 = vpop.f32.mrf.mxu0 }
 0x98c   :  { %v11156_v59 = vadd.f32 %v2757_v25, %v10922_v49  ;;  %v2810_v49 = vadd.f32 %v2730_v57, %v10615_v17  ;;  %v2934_v56 = vmax.f32 %v2854_v24, %v2856_v12  ;;  %v2808_v17 = vadd.f32 %v2722_v8, %v10653_v36  ;;  %v13172_v36 = vld [vmem:[#allocation47_spill] sm:$0xff]  ;;  %v13175_v25 = vld [vmem:[#allocation49_spill] sm:$0xff] }
 0x98d   :  { %v2917_v37 = vmax.f32 %v2837_v9, %v2839_v38  ;;  %v2709_v52 = vadd.f32 %v11107_v51, %v13171_v21  ;;  %v2951_v46 = vpack.c.bf16 %v2919_v2, %v2918_v19  ;;  %v2849_v27 = vmax.f32 %v2809_v61, 0.0  ;;  %v13184_v19 = vld [vmem:[#allocation37_spill] sm:$0xff] }
 0x98e   :  { %v2857_v5 = vmax.f32 %v11156_v59, 0.0  ;;  %v2850_v30 = vmax.f32 %v2810_v49, 0.0  ;;  %v2958_v54 = vpack.c.bf16 %v2933_v35, %v2932_v47  ;;  %v2931_v41 = vmax.f32 %v2851_v42, %v2853_v33  ;;  %v13177_v33 = vld [vmem:[#allocation52_spill] sm:$0xff] }
 0x98f   :  { %v2835_v55 = vmax.f32 %v2795_v22, 0.0  ;;  %v2916_v62 = vmax.f32 %v2836_v53, %v2838_v60  ;;  %v2706_v43 = vadd.f32 %v11103_v20, %v13172_v36  ;;  %v2807_v11 = vadd.f32 %v2717_v34, %v13173_v44  ;;  %v13176_v20 = vld [vmem:[#allocation36_spill] sm:$0xff]  ;;  %v13181_v60 = vld [vmem:[#allocation15_spill] sm:$0xff]  ;;  %v13182_v22 = vld [vmem:[#allocation46_spill] sm:$0xff] }
 0x990   :  { %v2935_v1 = vmax.f32 %v2855_v63, %v2857_v5  ;;  %v2848_v4 = vmax.f32 %v2808_v17, 0.0  ;;  %v2930_v6 = vmax.f32 %v2850_v30, %v2852_v40  ;;  %v2834_v51 = vmax.f32 %v11132_v0, 0.0  ;;  %v13178_v0 = vld [vmem:[#allocation16_spill] sm:$0xff]  ;;  %v13180_v63 = vld [vmem:[#allocation35_spill] sm:$0xff] }
 0x991   :  { %v2915_v14 = vmax.f32 %v2835_v55, %v2837_v9  ;;  %v2950_v13 = vpack.c.bf16 %v2917_v37, %v2916_v62  ;;  %v2806_v18 = vadd.f32 %v2714_v32, %v13174_v29  ;;  %v2805_v26 = vadd.f32 %v2709_v52, %v13175_v25  ;;  %v13191_v25 = vld [vmem:[#allocation27_spill] sm:$0xff]  ;;  %v8795_v59 = vld [vmem:[%s12931_s2 + $0xf0] ss:$12 sps:$4 sm:$0xff]  }
 0x992   :  { %v2959_v10 = vpack.c.bf16 %v2935_v1, %v2934_v56  ;;  %v2957_v50 = vpack.c.bf16 %v2931_v41, %v2930_v6  ;;  %v2929_v57 = vmax.f32 %v2849_v27, %v2851_v42  ;;  %v2914_v3 = vmax.f32 %v2834_v51, %v2836_v53  ;;  %v2769_v56 = vpop.f32.mrf.mxu0  ;;  %v13189_v6 = vld [vmem:[#allocation29_spill] sm:$0xff] }
 0x993   :  { %v2701_v48 = vadd.f32 %v11099_v45, %v13176_v20  ;;  %v2804_v38 = vadd.f32 %v2706_v43, %v13177_v33  ;;  %v2847_v8 = vmax.f32 %v2807_v11, 0.0  ;;  %v2928_v31 = vmax.f32 %v2848_v4, %v2850_v30  ;;  %v13187_v43 = vld [vmem:[#allocation21_spill] sm:$0xff]  ;;  %v13188_v11 = vld [vmem:[#allocation7_spill] sm:$0xff] }
 0x994   :  { %7576 = vmatprep.subr.bf16.mxu1 %v2959_v10  ;;  %7631 = vmatprep.subr.bf16.mxu0 %v2959_v10  ;;  %v13179_v24 = vmax.f32 %v13178_v0, 0.0  ;;  %v2698_v9 = vadd.f32 %v13181_v60, %v13180_v63  ;;  %v2949_v2 = vpack.c.bf16 %v2915_v14, %v2914_v3  ;;  %v2846_v49 = vmax.f32 %v2806_v18, 0.0  ;;  %v13185_v10 = vld [vmem:[#allocation23_spill] sm:$0xff]  ;;  %v8145_v32 = vpop.f32.mrf.mxu0  ;;  %v13190_v14 = vld [vmem:[#allocation20_spill] sm:$0xff] }
 0x995   :  { %7577 = vmatpush3.bf16.msra.mxu1 %v2951_v46  ;;  %7632 = vmatpush3.bf16.msra.mxu0 %v2951_v46  ;;  %v2845_v61 = vmax.f32 %v2805_v26, 0.0  ;;  %v2956_v1 = vpack.c.bf16 %v2929_v57, %v2928_v31  ;;  %v2927_v35 = vmax.f32 %v2847_v8, %v2849_v27  ;;  %v13183_v45 = vmax.f32 %v13182_v22, 0.0  ;;  %v13186_v27 = vld [vmem:[#allocation17_spill] sm:$0xff]  ;;  %v13196_v31 = vld [vmem:[#allocation12_spill] sm:$0xff] }
 0x996   :  { %7578 = vmatprep.subr.bf16.mxu1 %v2958_v54  ;;  %7633 = vmatprep.subr.bf16.mxu0 %v2958_v54  ;;  %v2913_v40 = vmax.f32 %v13179_v24, %v2835_v55  ;;  %v2803_v34 = vadd.f32 %v2701_v48, %v13184_v19  ;;  %v2844_v17 = vmax.f32 %v2804_v38, 0.0  ;;  %v2926_v42 = vmax.f32 %v2846_v49, %v2848_v4  ;;  %v2772_v55 = vpop.f32.mrf.mxu0  ;;  %v13194_v48 = vld [vmem:[#allocation30_spill] sm:$0xff] }
 0x997   :  { %v2912_v53 = vmax.f32 %v13183_v45, %v2834_v51  ;;  %v2802_v37 = vadd.f32 %v2698_v9, %v13185_v10  ;;  %v2925_v52 = vmax.f32 %v2845_v61, %v2847_v8  ;;  %v2781_v54 = vadd.f32 %v8145_v32, %v13186_v27  ;;  %v13195_v8 = vld [vmem:[#allocation51_spill] sm:$0xff]  ;;  %v13197_v24 = vld [vmem:[#allocation10_spill] sm:$0xff] }
 0x998   :  { %v2955_v21 = vpack.c.bf16 %v2927_v35, %v2926_v42  ;;  %v2843_v46 = vmax.f32 %v2803_v34, 0.0  ;;  %v2924_v30 = vmax.f32 %v2844_v17, %v2846_v49  ;;  %v2778_v44 = vadd.f32 %v8144_v58, %v13187_v43  ;;  %v13193_v58 = vld [vmem:[#allocation43_spill] sm:$0xff]  ;;  %v8770_v35 = vld [vmem:[%s12931_s2 + $0x64] ss:$12 sps:$4 sm:$0xff]   ;;  %v8797_v27 = vld [vmem:[%s12931_s2 + $0xf4] ss:$12 sps:$4 sm:$0xff]  }
 0x999   :  { %7579 = vmatpush3.bf16.msra.mxu1 %v2950_v13  ;;  %7634 = vmatpush3.bf16.msra.mxu0 %v2950_v13  ;;  %v2948_v47 = vpack.c.bf16 %v2913_v40, %v2912_v53  ;;  %v2842_v41 = vmax.f32 %v2802_v37, 0.0  ;;  %v2823_v51 = vadd.f32 %v2781_v54, %v13189_v6  ;;  %v2773_v13 = vadd.f32 %v2772_v55, %v13190_v14  ;;  %v8767_v9 = vld [vmem:[%s12931_s2 + $0x48] ss:$12 sps:$4 sm:$0xff]   ;;  %v8803_v6 = vld [vmem:[%s12931_s2 + $0x120] ss:$12 sps:$4 sm:$0xff]  }
 0x99a   :  { %7580 = vmatprep.subr.bf16.mxu1 %v2957_v50  ;;  %7635 = vmatprep.subr.bf16.mxu0 %v2957_v50  ;;  %v2954_v62 = vpack.c.bf16 %v2925_v52, %v2924_v30  ;;  %v2923_v36 = vmax.f32 %v2843_v46, %v2845_v61  ;;  %v2921_v18 = vmax.f32 %v2841_v39, %v2843_v46  ;;  %v13192_v50 = vld [vmem:[#allocation18_spill] sm:$0xff]  ;;  %v13202_v22 = vmov 0.0   ;;  %v8793_v45 = vld [vmem:[%s12931_s2 + $0xdc] ss:$12 sps:$4 sm:$0xff]   ;;  %v13203_v53 = vld [vmem:[#allocation24_spill] sm:$0xff] }
 0x99b   :  { %v2922_v4 = vmax.f32 %v2842_v41, %v2844_v17  ;;  %v2822_v26 = vadd.f32 %v2778_v44, %v13191_v25  ;;  %v2770_v57 = vadd.f32 %v2769_v56, %v13192_v50  ;;  %v2920_v3 = vmax.f32 %v2840_v7, %v2842_v41  ;;  %v13199_v7 = vld [vmem:[#allocation11_spill] sm:$0xff]  ;;  %v8791_v52 = vld [vmem:[%s12931_s2 + $0xd8] ss:$12 sps:$4 sm:$0xff]  }
 0x99c   :  { %v2863_v20 = vmax.f32 %v2823_v51, 0.0  ;;  %v2821_v33 = vadd.f32 %v2773_v13, %v13194_v48  ;;  %v2765_v23 = vadd.f32 %v11129_v28, %v13195_v8  ;;  %v2762_v40 = vadd.f32 %v13199_v7, %v13198_v15  ;;  %v8787_v28 = vld [vmem:[%s12931_s2 + $0xc0] ss:$12 sps:$4 sm:$0xff]   ;;  %v8773_v30 = vld [vmem:[%s12931_s2 + $0x7c] ss:$12 sps:$4 sm:$0xff]  }
 0x99d   :  { %7581 = vmatpush3.bf16.msra.mxu1 %v2949_v2  ;;  %7636 = vmatpush3.bf16.msra.mxu0 %v2949_v2  ;;  %v2953_v29 = vpack.c.bf16 %v2923_v36, %v2922_v4  ;;  %v2952_v38 = vpack.c.bf16 %v2921_v18, %v2920_v3  ;;  %v2862_v39 = vmax.f32 %v2822_v26, 0.0  ;;  %v2820_v0 = vadd.f32 %v2770_v57, %v13196_v31  ;;  %v13200_v2 = vld [vmem:[#allocation45_spill] sm:$0xff]  ;;  %v8799_v43 = vld [vmem:[%s12931_s2 + $0x108] ss:$12 sps:$4 sm:$0xff]   ;;  %v8784_v13 = vld [vmem:[%s12931_s2 + $0x80] ss:$12 sps:$4 sm:$0xff]  }
 0x99e   :  { %7582 = vmatprep.subr.bf16.mxu1 %v2956_v1  ;;  %7637 = vmatprep.subr.bf16.mxu0 %v2956_v1  ;;  %v2943_v63 = vmax.f32 %v2863_v20, 0.0  ;;  %v2861_v60 = vmax.f32 %v2821_v33, 0.0  ;;  %v2819_v49 = vadd.f32 %v2765_v23, %v13200_v2  ;;  %v13201_v1 = vld [vmem:[#allocation13_spill] sm:$0xff]  ;;  %v2818_v19 = vadd.f32 %v2762_v40, %v13203_v53  ;;  %v8781_v4 = vld [vmem:[%s12931_s2 + $0xa8] ss:$12 sps:$4 sm:$0xff]   ;;  %v3464_v3 = vld [vmem:[%s12933_s7 + $0x20] sm:$0xff] }
 0x99f   :  { %v2942_v61 = vmax.f32 %v2862_v39, 0.0  ;;  %v2860_v56 = vmax.f32 %v2820_v0, 0.0  ;;  %v8775_v36 = vld [vmem:[%s12931_s2 + $0x78] ss:$12 sps:$4 sm:$0xff]   ;;  %v8782_v51 = vld [vmem:[%s12931_s2 + $0x50] ss:$12 sps:$4 sm:$0xff]  }
 0x9a0   :  { %v2941_v17 = vmax.f32 %v2861_v60, %v2863_v20  ;;  %v2859_v42 = vmax.f32 %v2819_v49, 0.0  ;;  %v2858_v10 = vmax.f32 %v2818_v19, 0.0  ;;  %v8779_v44 = vld [vmem:[%s12931_s2 + $0xac] ss:$12 sps:$4 sm:$0xff]   ;;  %v8783_v14 = vld [vmem:[%s12931_s2 + $0x68] ss:$12 sps:$4 sm:$0xff]   ;;  %v3472_v20 = vpack.c.bf16 %v3464_v3, %v3464_v3 }
 0x9a1   :  { %7583 = vmatpush3.bf16.msra.mxu1 %v2948_v47  ;;  %7638 = vmatpush3.bf16.msra.mxu0 %v2948_v47  ;;  %v2963_v34 = vpack.c.bf16 %v2943_v63, %v2942_v61  ;;  %v2940_v47 = vmax.f32 %v2860_v56, %v2862_v39  ;;  %v8786_v18 = vld [vmem:[%s12931_s2 + $0xb0] ss:$12 sps:$4 sm:$0xff]   ;;  %v8790_v25 = vld [vmem:[%s12931_s2 + $0xc8] ss:$12 sps:$4 sm:$0xff]   ;;  %v8794_v26 = vld [vmem:[%s12931_s2 + $0xe0] ss:$12 sps:$4 sm:$0xff]  }
 0x9a2   :  { %7584 = vmatprep.subr.bf16.mxu1 %v2955_v21  ;;  %7639 = vmatprep.subr.bf16.mxu0 %v2955_v21  ;;  %v2939_v37 = vmax.f32 %v2859_v42, %v2861_v60  ;;  %v8772_v21 = vld [vmem:[%s12931_s2 + $0x60] ss:$12 sps:$4 sm:$0xff]   ;;  %v2938_v46 = vmax.f32 %v2858_v10, %v2860_v56  ;;  %v2937_v54 = vmax.f32 %v2857_v5, %v2859_v42  ;;  %v8778_v5 = vld [vmem:[%s12931_s2 + $0x90] ss:$12 sps:$4 sm:$0xff]   ;;  %v8798_v50 = vld [vmem:[%s12931_s2 + $0xf8] ss:$12 sps:$4 sm:$0xff]  }
 0x9a3   :  { %v2962_v32 = vpack.c.bf16 %v2941_v17, %v2940_v47  ;;  %v2936_v55 = vmax.f32 %v2856_v12, %v2858_v10  ;;  %v8801_v12 = vld [vmem:[%s12931_s2 + $0x10c] ss:$12 sps:$4 sm:$0xff]   ;;  %v8802_v57 = vld [vmem:[%s12931_s2 + $0x110] ss:$12 sps:$4 sm:$0xff]   ;;  %v3489_v48 = vsel %vm165_vm0, %v3472_v20, 0  ;;  %v3460_v23 = vld [vmem:[%s12933_s7] sm:$0xff] }
 0x9a4   :  { %v2961_v41 = vpack.c.bf16 %v2939_v37, %v2938_v46  ;;  %v3462_v33 = vld [vmem:[%s12933_s7 + $0x10] sm:$0xff]  ;;  %v3461_v39 = vld [vmem:[%s12933_s7 + $0x8] sm:$0xff] }
 0x9a5   :  { %7585 = vmatpush3.bf16.msra.mxu1 %v13188_v11  ;;  %7640 = vmatpush3.bf16.msra.mxu0 %v13188_v11  ;;  %v8805_v11 = vld [vmem:[%s12931_s2 + $0x124] ss:$12 sps:$4 sm:$0xff]   ;;  %v3470_v31 = vpack.c.bf16 %v3461_v39, %v3460_v23 }
 0x9a6   :  { %7586 = vmatprep.subr.bf16.mxu1 %v2954_v62  ;;  %7641 = vmatprep.subr.bf16.mxu0 %v2954_v62  ;;  %v2960_v62 = vpack.c.bf16 %v2937_v54, %v2936_v55 }
 0x9a9   :  { %7587 = vmatpush3.bf16.msra.mxu1 %v13193_v58  ;;  %7642 = vmatpush3.bf16.msra.mxu0 %v13193_v58  ;;  %v8806_v58 = vld [vmem:[%s12931_s2 + $0x128] ss:$12 sps:$4 sm:$0xff]  }
 0x9aa   :  { %7588 = vmatprep.subr.bf16.mxu1 %v2953_v29  ;;  %7643 = vmatprep.subr.bf16.mxu0 %v2953_v29  ;;  %v8785_v29 = vld [vmem:[%s12931_s2 + $0x98] ss:$12 sps:$4 sm:$0xff]  }
 0x9ad   :  { %7589 = vmatpush3.bf16.msra.mxu1 %v13197_v24  ;;  %7644 = vmatpush3.bf16.msra.mxu0 %v13197_v24 }
 0x9ae   :  { %7590 = vmatprep.subr.bf16.mxu1 %v2952_v38  ;;  %7645 = vmatprep.subr.bf16.mxu0 %v2952_v38  ;;  %v3463_v38 = vld [vmem:[%s12933_s7 + $0x18] sm:$0xff] }
 0x9af   :  { %v3471_v8 = vpack.c.bf16 %v3463_v38, %v3462_v33 }
 0x9b1   :  { %7591 = vmatpush3.bf16.msra.mxu1 %v13201_v1  ;;  %7646 = vmatpush3.bf16.msra.mxu0 %v13201_v1 }
 0x9b2   :  { %8146 = vmatprep.subr.bf16.mxu1 %v13202_v22  ;;  %8202 = vmatprep.subr.bf16.mxu0 %v13202_v22 }
 0x9b4   :  { %3087 = vmatmul.mubr.bf16.vlgmr.msra.gmra.mxu1 %v8767_v9  ;;  %3323 = vmatmul.mubr.bf16.vlgmr.msra.gmra.mxu0 %v8787_v28 }
 0x9b5   :  { %8147 = vmatpush3.bf16.msra.mxu1 %v2963_v34  ;;  %3094 = vmatprep.mubr.bf16.mxu1 %v8770_v35 }
 0x9b6   :  { %8148 = vmatprep.subr.bf16.mxu1 %v13202_v22  ;;  %3330 = vmatprep.mubr.bf16.mxu0 %v8793_v45 }
 0x9b7   :  { %8203 = vmatpush3.bf16.msra.mxu0 %v3489_v48 }
 0x9b8   :  { %8204 = vmatprep.subr.bf16.mxu0 %v13202_v22 }
 0x9b9   :  { %8149 = vmatpush3.bf16.msra.mxu1 %v2962_v32 }
 0x9ba   :  { %8150 = vmatprep.subr.bf16.mxu1 %v13202_v22 }
 0x9bb   :  { %8205 = vmatpush3.bf16.msra.mxu0 %v3471_v8 }
 0x9bc   :  { %3095 = vmatmul.mubr.bf16.gmra.mxu1 %v8772_v21  ;;  %3331 = vmatmul.mubr.bf16.gmra.mxu0 %v8791_v52 }
 0x9bd   :  { %8151 = vmatpush3.bf16.msra.mxu1 %v2961_v41  ;;  %3102 = vmatprep.mubr.bf16.mxu1 %v8773_v30 }
 0x9be   :  { %8152 = vmatprep.subr.bf16.mxu1 %v13202_v22  ;;  %3338 = vmatprep.mubr.bf16.mxu0 %v8797_v27 }
 0x9bf   :  { %8206 = vmatprep.subr.bf16.mxu0 %v13202_v22 }
 0x9c0   :  { %8207 = vmatpush3.bf16.msra.mxu0 %v3470_v31 }
 0x9c1   :  { %8153 = vmatpush3.bf16.msra.mxu1 %v2960_v62  ;;  %8248 = vmatprep.subr.bf16.mxu0 %v13202_v22 }
 0x9c2   :  { %8174 = vmatprep.subr.bf16.mxu1 %v13202_v22 }
 0x9c4   :  { %3103 = vmatmul.mubr.bf16.gmra.mxu1 %v8775_v36  ;;  %3339 = vmatmul.mubr.bf16.gmra.mxu0 %v8795_v59 }
 0x9c5   :  { %3110 = vmatprep.mubr.bf16.mxu1 %v8776_v16  ;;  %3346 = vmatprep.mubr.bf16.mxu0 %v8801_v12 }
 0x9cc   :  { %3111 = vmatmul.mubr.bf16.gmra.mxu1 %v8778_v5  ;;  %3347 = vmatmul.mubr.bf16.gmra.mxu0 %v8799_v43 }
 0x9cd   :  { %3118 = vmatprep.mubr.bf16.mxu1 %v8779_v44  ;;  %3354 = vmatprep.mubr.bf16.mxu0 %v8805_v11 }
 0x9d4   :  { %3119 = vmatmul.mubr.bf16.gmra.mxu1 %v8781_v4  ;;  %3355 = vmatmul.mubr.bf16.gmra.mxu0 %v8803_v6 }
 0x9d5   :  { %8154 = vmatprep.mubr.msk.bf16.mxu1 %vm8901_vm4, %v13202_v22  ;;  %8208 = vmatprep.mubr.msk.bf16.mxu0 %vm8901_vm4, %v13202_v22 }
 0x9dc   :  { %8155 = vmatmul.mubr.msk.bf16.vlgmr.msra.gmra.mxu1 %vm1239_vm5, %v8782_v51 }
 0x9dd   :  { %8175 = vmatpush3.bf16.msra.mxu1 %v2963_v34  ;;  %8158 = vmatprep.mubr.msk.bf16.mxu1 %vm8901_vm4, %v13202_v22 }
 0x9de   :  { %8176 = vmatprep.subr.bf16.mxu1 %v13202_v22 }
 0x9e1   :  { %8177 = vmatpush3.bf16.msra.mxu1 %v2962_v32 }
 0x9e2   :  { %8178 = vmatprep.subr.bf16.mxu1 %v13202_v22 }
 0x9e4   :  { %8159 = vmatmul.mubr.msk.bf16.gmra.mxu1 %vm1239_vm5, %v8783_v14 }
 0x9e5   :  { %8179 = vmatpush3.bf16.msra.mxu1 %v2961_v41  ;;  %8162 = vmatprep.mubr.msk.bf16.mxu1 %vm8901_vm4, %v13202_v22 }
 0x9e6   :  { %8180 = vmatprep.subr.bf16.mxu1 %v13202_v22 }
 0x9e9   :  { %8181 = vmatpush3.bf16.msra.mxu1 %v2960_v62 }
 0x9ea   :  { %8228 = vmatprep.subr.bf16.mxu1 %v13202_v22 }
 0x9ec   :  { %8163 = vmatmul.mubr.msk.bf16.gmra.mxu1 %vm1239_vm5, %v8784_v13 }
 0x9ed   :  { %8166 = vmatprep.mubr.msk.bf16.mxu1 %vm8901_vm4, %v13202_v22 }
 0x9f4   :  { %8167 = vmatmul.mubr.msk.bf16.gmra.mxu1 %vm1239_vm5, %v8785_v29 }
 0x9f5   :  { %8170 = vmatprep.mubr.msk.bf16.mxu1 %vm8901_vm4, %v13202_v22 }
 0x9fc   :  { %8171 = vmatmul.mubr.msk.bf16.gmra.mxu1 %vm1239_vm5, %v8786_v18 }
 0x9fd   :  { %8182 = vmatprep.mubr.msk.bf16.mxu1 %vm8901_vm4, %v13202_v22 }
 0xa04   :  { %8183 = vmatmul.mubr.msk.bf16.vlgmr.msra.gmra.mxu1 %vm1239_vm5, %v8790_v25 }
 0xa05   :  { %8186 = vmatprep.mubr.msk.bf16.mxu1 %vm8901_vm4, %v13202_v22 }
 0xa0c   :  { %8187 = vmatmul.mubr.msk.bf16.gmra.mxu1 %vm1239_vm5, %v8794_v26 }
 0xa0d   :  { %8190 = vmatprep.mubr.msk.bf16.mxu1 %vm8901_vm4, %v13202_v22 }
 0xa14   :  { %8191 = vmatmul.mubr.msk.bf16.gmra.mxu1 %vm1239_vm5, %v8798_v50 }
 0xa15   :  { %8194 = vmatprep.mubr.msk.bf16.mxu1 %vm8901_vm4, %v13202_v22 }
 0xa1c   :  { %8195 = vmatmul.mubr.msk.bf16.gmra.mxu1 %vm1239_vm5, %v8802_v57 }
 0xa1d   :  { %8198 = vmatprep.mubr.msk.bf16.mxu1 %vm8901_vm4, %v13202_v22 }
 0xa24   :  { %8199 = vmatmul.mubr.msk.bf16.gmra.mxu1 %vm1239_vm5, %v8806_v58 }
 0xa25   :  { %8238 = vmatprep.mubr.msk.bf16.mxu1 %vm8901_vm4, %v13202_v22 }
 0xa74   :  { %v7592_v0 = vpop.f32.mrf.mxu1  ;;  %v7647_v32 = vpop.f32.mrf.mxu0 }
 0xa76   :  { %v7593_v24 = vpop.f32.mrf.mxu1  ;;  %v7648_v46 = vpop.f32.mrf.mxu0 }
 0xa77   :  { %v11374_v15 = vadd.f32 %v7593_v24, %v7592_v0  ;;  %v7649_v38 = vadd.f32 %v7648_v46, %v7647_v32 }
 0xa78   :  { %v7595_v7 = vpop.f32.mrf.mxu1  ;;  %v7650_v54 = vpop.f32.mrf.mxu0 }
 0xa7a   :  { %v7596_v40 = vpop.f32.mrf.mxu1  ;;  %v7651_v62 = vpop.f32.mrf.mxu0 }
 0xa7b   :  { %v7597_v23 = vadd.f32 %v7596_v40, %v7595_v7  ;;  %v7652_v31 = vadd.f32 %v7651_v62, %v7650_v54 }
 0xa7c   :  { %v7598_v63 = vpop.f32.mrf.mxu1  ;;  %v7653_v16 = vpop.f32.mrf.mxu0 }
 0xa7e   :  { %v7599_v60 = vpop.f32.mrf.mxu1  ;;  %v7654_v43 = vpop.f32.mrf.mxu0 }
 0xa7f   :  { %v11376_v9 = vadd.f32 %v7599_v60, %v7598_v63 }
 0xa80   :  { %v11378_v28 = vpop.f32.mrf.mxu1  ;;  %v7656_v4 = vpop.f32.mrf.mxu0 }
 0xa82   :  { %v11380_v2 = vpop.f32.mrf.mxu1  ;;  %v7657_v14 = vpop.f32.mrf.mxu0 }
 0xa83   :  { %v7603_v32 = vadd.f32 %v11380_v2, %v11378_v28  ;;  %v7658_v40 = vadd.f32 %v7657_v14, %v7656_v4 }
 0xa84   :  { %v7604_v49 = vpop.f32.mrf.mxu1  ;;  %v7659_v18 = vpop.f32.mrf.mxu0 }
 0xa86   :  { %v7605_v61 = vpop.f32.mrf.mxu1  ;;  %v7660_v50 = vpop.f32.mrf.mxu0 }
 0xa87   :  { %v11382_v56 = vadd.f32 %v7605_v61, %v7604_v49  ;;  %v7661_v28 = vadd.f32 %v7660_v50, %v7659_v18 }
 0xa88   :  { %v11384_v1 = vpop.f32.mrf.mxu1  ;;  %v7662_v3 = vpop.f32.mrf.mxu0 }
 0xa8a   :  { %v11386_v35 = vpop.f32.mrf.mxu1  ;;  %v7663_v33 = vpop.f32.mrf.mxu0 }
 0xa8b   :  { %v7609_v4 = vadd.f32 %v11386_v35, %v11384_v1 }
 0xa8c   :  { %v7610_v45 = vpop.f32.mrf.mxu1  ;;  %v7665_v24 = vpop.f32.mrf.mxu0 }
 0xa8e   :  { %v7611_v53 = vpop.f32.mrf.mxu1 }
 0xa8f   :  { %v11388_v19 = vadd.f32 %v7611_v53, %v7610_v45 }
 0xa90   :  { %v11390_v34 = vpop.f32.mrf.mxu1 }
 0xa92   :  { %v11392_v17 = vpop.f32.mrf.mxu1 }
 0xa94   :  { %v7616_v42 = vpop.f32.mrf.mxu1 }
 0xa96   :  { %v7617_v47 = vpop.f32.mrf.mxu1 }
 0xa97   :  { %v11394_v10 = vadd.f32 %v7617_v47, %v7616_v42  ;;  %v7666_v47 = vpop.f32.mrf.mxu0 }
 0xa98   :  { %v11396_v37 = vpop.f32.mrf.mxu1  ;;  %v7667_v35 = vadd.f32 %v7666_v47, %v7665_v24 }
 0xa9a   :  { %v11398_v21 = vpop.f32.mrf.mxu1 }
 0xa9c   :  { %v3161_v52 = vpop.f32.mrf.mxu1 }
 0xa9d   :  { %v3162_v63 = vadd.f32 %v11374_v15, %v3161_v52  ;;  %v7668_v15 = vpop.f32.mrf.mxu0 }
 0xa9e   :  { %v8156_v30 = vpop.f32.mrf.mxu1 }
 0xaa0   :  { %v3164_v27 = vpop.f32.mrf.mxu1 }
 0xaa1   :  { %v3165_v60 = vadd.f32 %v7597_v23, %v3164_v27 }
 0xaa2   :  { %v8157_v41 = vpop.f32.mrf.mxu1 }
 0xaa3   :  { %v7655_v41 = vadd.f32 %v7654_v43, %v7653_v16 }
 0xaa4   :  { %v3169_v55 = vpop.f32.mrf.mxu1 }
 0xaa5   :  { %v3170_v52 = vadd.f32 %v11376_v9, %v3169_v55 }
 0xaa6   :  { %v8160_v36 = vpop.f32.mrf.mxu1 }
 0xaa8   :  { %v3172_v59 = vpop.f32.mrf.mxu1 }
 0xaa9   :  { %v3173_v27 = vadd.f32 %v7603_v32, %v3172_v59 }
 0xaaa   :  { %v8161_v12 = vpop.f32.mrf.mxu1 }
 0xaac   :  { %v11400_v5 = vpop.f32.mrf.mxu1 }
 0xaad   :  { %v3178_v55 = vadd.f32 %v11382_v56, %v11400_v5 }
 0xaae   :  { %v8164_v44 = vpop.f32.mrf.mxu1 }
 0xaaf   :  { %v7669_v44 = vpop.f32.mrf.mxu0 }
 0xab0   :  { %v3180_v11 = vpop.f32.mrf.mxu1  ;;  %v7670_v23 = vadd.f32 %v7669_v44, %v7668_v15 }
 0xab1   :  { %v7671_v9 = vpop.f32.mrf.mxu0  ;;  %v3181_v59 = vadd.f32 %v7609_v4, %v3180_v11 }
 0xab2   :  { %v8165_v6 = vpop.f32.mrf.mxu1 }
 0xab4   :  { %v11402_v51 = vpop.f32.mrf.mxu1 }
 0xab5   :  { %v3186_v56 = vadd.f32 %v11388_v19, %v11402_v51 }
 0xab6   :  { %v8168_v13 = vpop.f32.mrf.mxu1 }
 0xab7   :  { %v7664_v13 = vadd.f32 %v7663_v33, %v7662_v3  ;;  %v7615_v33 = vadd.f32 %v11392_v17, %v11390_v34 }
 0xab8   :  { %v11404_v29 = vpop.f32.mrf.mxu1 }
 0xab9   :  { %v3189_v5 = vadd.f32 %v7615_v33, %v11404_v29 }
 0xaba   :  { %v8169_v25 = vpop.f32.mrf.mxu1 }
 0xabc   :  { %v11406_v26 = vpop.f32.mrf.mxu1 }
 0xabd   :  { %v3194_v19 = vadd.f32 %v11394_v10, %v11406_v26 }
 0xabe   :  { %v8172_v57 = vpop.f32.mrf.mxu1 }
 0xac0   :  { %v11408_v58 = vpop.f32.mrf.mxu1 }
 0xac2   :  { %v8173_v20 = vpop.f32.mrf.mxu1 }
 0xac4   :  { %v3397_v48 = vpop.f32.mrf.mxu1 }
 0xac5   :  { %v3398_v39 = vadd.f32 %v7649_v38, %v3397_v48  ;;  %v7672_v38 = vpop.f32.mrf.mxu0 }
 0xac6   :  { %v8184_v8 = vpop.f32.mrf.mxu1 }
 0xac7   :  { %v3436_v45 = vmax.f32 %v3162_v63, %v3398_v39 }
 0xac8   :  { %v3400_v0 = vpop.f32.mrf.mxu1 }
 0xac9   :  { %v3401_v49 = vadd.f32 %v7652_v31, %v3400_v0  ;;  %v7674_v31 = vpop.f32.mrf.mxu0 }
 0xaca   :  { %v8185_v61 = vpop.f32.mrf.mxu1 }
 0xacb   :  { %v3437_v53 = vmax.f32 %v3165_v60, %v3401_v49  ;;  %v7675_v34 = vpop.f32.mrf.mxu0  ;;  %v7673_v49 = vadd.f32 %v7672_v38, %v7671_v9  ;;  %v3602_v9 = vld [vmem:[%s12933_s7 + $0x40] sm:$0x7] }
 0xacc   :  { %v3405_v42 = vpop.f32.mrf.mxu1 }
 0xacd   :  { %v3465_v30 = vpack.c.bf16 %v3437_v53, %v3436_v45  ;;  %v3406_v7 = vadd.f32 %v7655_v41, %v3405_v42  ;;  %v7621_v45 = vadd.f32 %v11398_v21, %v11396_v37  ;;  %v7676_v42 = vadd.f32 %v7675_v34, %v7674_v31 }
 0xace   :  { %v8188_v36 = vpop.f32.mrf.mxu1 }
 0xacf   :  { %8209 = vmatmul.mubr.msk.bf16.vlgmr.msra.gmra.mxu0 %vm1484_vm7, %v3465_v30  ;;  %v3438_v12 = vmax.f32 %v3170_v52, %v3406_v7  ;;  %v3197_v51 = vadd.f32 %v7621_v45, %v11408_v58 }
 0xad0   :  { %v3408_v46 = vpop.f32.mrf.mxu1  ;;  %8212 = vmatprep.mubr.msk.bf16.mxu0 %vm8901_vm4, %v13202_v22 }
 0xad1   :  { %v3409_v54 = vadd.f32 %v7658_v40, %v3408_v46 }
 0xad2   :  { %v8189_v62 = vpop.f32.mrf.mxu1 }
 0xad3   :  { %v3439_v16 = vmax.f32 %v3173_v27, %v3409_v54  ;;  %v3459_v62 = vld [vmem:[%s12933_s7 + $0x30] sm:$0x3] }
 0xad4   :  { %v3413_v43 = vpop.f32.mrf.mxu1 }
 0xad5   :  { %v3466_v6 = vpack.c.bf16 %v3439_v16, %v3438_v12  ;;  %v3414_v14 = vadd.f32 %v7661_v28, %v3413_v43  ;;  %v13204_v16 = vld [vmem:[#allocation2_spill] sm:$0xff] }
 0xad6   :  { %v8192_v2 = vpop.f32.mrf.mxu1  ;;  %v3567_v43 = vrot.slane %v3459_v62, %v13204_v16 }
 0xad7   :  { %8213 = vmatmul.mubr.msk.bf16.gmra.mxu0 %vm1484_vm7, %v3466_v6  ;;  %v3440_v18 = vmax.f32 %v3178_v55, %v3414_v14  ;;  %v13205_v2 = vld [vmem:[#allocation3_spill] sm:$0xff] }
 0xad8   :  { %v3416_v25 = vpop.f32.mrf.mxu1  ;;  %8216 = vmatprep.mubr.msk.bf16.mxu0 %vm8901_vm4, %v13202_v22  ;;  %v3581_v4 = vrot.slane %v3459_v62, %v13205_v2  ;;  %v11455_v38 = vrot.slane %v3602_v9, %v13205_v2 }
 0xad9   :  { %v3417_v57 = vadd.f32 %v7664_v13, %v3416_v25 }
 0xada   :  { %v8193_v20 = vpop.f32.mrf.mxu1 }
 0xadb   :  { %v3441_v50 = vmax.f32 %v3181_v59, %v3417_v57 }
 0xadc   :  { %v3421_v48 = vpop.f32.mrf.mxu1 }
 0xadd   :  { %v3467_v1 = vpack.c.bf16 %v3441_v50, %v3440_v18  ;;  %v3422_v8 = vadd.f32 %v7667_v35, %v3421_v48  ;;  %v11452_v48 = vrot.slane %v3602_v9, %v13204_v16 }
 0xade   :  { %v8196_v3 = vpop.f32.mrf.mxu1 }
 0xadf   :  { %8217 = vmatmul.mubr.msk.bf16.gmra.mxu0 %vm1484_vm7, %v3467_v1  ;;  %v3442_v24 = vmax.f32 %v3186_v56, %v3422_v8  ;;  %v11461_v34 = vmul.f32 0.0, %v11452_v48 }
 0xae0   :  { %v3424_v39 = vpop.f32.mrf.mxu1  ;;  %8220 = vmatprep.mubr.msk.bf16.mxu0 %vm8901_vm4, %v13202_v22 }
 0xae1   :  { %v3425_v11 = vadd.f32 %v7670_v23, %v3424_v39  ;;  %v13206_v23 = vld [vmem:[#allocation4_spill] sm:$0xff] }
 0xae2   :  { %v8197_v0 = vpop.f32.mrf.mxu1  ;;  %v11458_v39 = vrot.slane %v3602_v9, %v13206_v23 }
 0xae3   :  { %v3443_v63 = vmax.f32 %v3189_v5, %v3425_v11 }
 0xae4   :  { %v3429_v60 = vpop.f32.mrf.mxu1 }
 0xae5   :  { %v3468_v17 = vpack.c.bf16 %v3443_v63, %v3442_v24  ;;  %v3430_v53 = vadd.f32 %v7673_v49, %v3429_v60 }
 0xae6   :  { %v8200_v61 = vpop.f32.mrf.mxu1 }
 0xae7   :  { %8221 = vmatmul.mubr.msk.bf16.gmra.mxu0 %vm1484_vm7, %v3468_v17  ;;  %v3444_v41 = vmax.f32 %v3194_v19, %v3430_v53  ;;  %v3674_v61 = vmul.f32 0.0, %v11458_v39 }
 0xae8   :  { %v3432_v47 = vpop.f32.mrf.mxu1  ;;  %8224 = vmatprep.mubr.msk.bf16.mxu0 %vm8901_vm4, %v13202_v22 }
 0xae9   :  { %v3433_v29 = vadd.f32 %v7676_v42, %v3432_v47 }
 0xaea   :  { %v8201_v30 = vpop.f32.mrf.mxu1 }
 0xaeb   :  { %v3445_v36 = vmax.f32 %v3197_v51, %v3433_v29 }
 0xaed   :  { %v3469_v32 = vpack.c.bf16 %v3445_v36, %v3444_v41 }
 0xaef   :  { %8225 = vmatmul.mubr.msk.bf16.gmra.mxu0 %vm1484_vm7, %v3469_v32 }
 0xaf0   :  { %8250 = vmatprep.mubr.msk.bf16.mxu0 %vm8901_vm4, %v13202_v22 }
 0xb8f   :  { %v3525_v37 = vpop.f32.mrf.mxu0 }
 0xb90   :  { %v3568_v33 = vmul.f32 %v3567_v43, %v3525_v37 }
 0xb91   :  { %v8210_v21 = vpop.f32.mrf.mxu0 }
 0xb92   :  { %v3582_v53 = vadd.f32 %v3581_v4, %v3568_v33 }
 0xb93   :  { %v3528_v7 = vpop.f32.mrf.mxu0 }
 0xb94   :  { %v3569_v8 = vmul.f32 %v3567_v43, %v3528_v7 }
 0xb95   :  { %v8211_v40 = vpop.f32.mrf.mxu0 }
 0xb96   :  { %v3583_v42 = vadd.f32 %v3581_v4, %v3569_v8  ;;  %v3621_v8 = vld [vmem:[%s12933_s7 + $0xe0] sm:$0xff] }
 0xb97   :  { %v3533_v46 = vpop.f32.mrf.mxu0 }
 0xb98   :  { %v3570_v56 = vmul.f32 %v3567_v43, %v3533_v46 }
 0xb99   :  { %v8214_v15 = vpop.f32.mrf.mxu0 }
 0xb9a   :  { %v3584_v51 = vadd.f32 %v3581_v4, %v3570_v56  ;;  %v3609_v56 = vld [vmem:[%s12933_s7 + $0x80] sm:$0xff] }
 0xb9b   :  { %v3536_v52 = vpop.f32.mrf.mxu0 }
 0xb9c   :  { %v3571_v59 = vmul.f32 %v3567_v43, %v3536_v52 }
 0xb9d   :  { %v8215_v10 = vpop.f32.mrf.mxu0 }
 0xb9e   :  { %v3585_v5 = vadd.f32 %v3581_v4, %v3571_v59  ;;  %v3610_v59 = vld [vmem:[%s12933_s7 + $0x88] sm:$0xff] }
 0xb9f   :  { %v3541_v26 = vpop.f32.mrf.mxu0 }
 0xba0   :  { %v3572_v57 = vmul.f32 %v3567_v43, %v3541_v26  ;;  %v3595_v29 = vmax.f32 %v3585_v5, 0.0 }
 0xba1   :  { %v8218_v58 = vpop.f32.mrf.mxu0 }
 0xba2   :  { %v3586_v11 = vadd.f32 %v3581_v4, %v3572_v57 }
 0xba3   :  { %v3544_v27 = vpop.f32.mrf.mxu0 }
 0xba4   :  { %v3573_v13 = vmul.f32 %v3567_v43, %v3544_v27  ;;  %v3596_v30 = vmax.f32 %v3586_v11, 0.0  ;;  %v3594_v27 = vmax.f32 %v3584_v51, 0.0 }
 0xba5   :  { %v8219_v54 = vpop.f32.mrf.mxu0 }
 0xba6   :  { %v3587_v1 = vadd.f32 %v3581_v4, %v3573_v13  ;;  %v3632_v54 = vmul.f32 %v11452_v48, %v3596_v30  ;;  %v3645_v62 = vmul.f32 %v11455_v38, %v3596_v30  ;;  %v3631_v13 = vmul.f32 %v11452_v48, %v3595_v29 }
 0xba7   :  { %v3549_v12 = vpop.f32.mrf.mxu0  ;;  %v3668_v33 = vmul.f32 %v11458_v39, %v3596_v30 }
 0xba8   :  { %v3574_v6 = vmul.f32 %v3567_v43, %v3549_v12  ;;  %v3597_v17 = vmax.f32 %v3587_v1, 0.0  ;;  %v3592_v1 = vmax.f32 %v3582_v53, 0.0  ;;  %v3655_v5 = vadd.f32 %v3645_v62, %v3631_v13  ;;  %v3603_v13 = vld [vmem:[%s12933_s7 + $0x50] sm:$0xff] }
 0xba9   :  { %v8222_v44 = vpop.f32.mrf.mxu0 }
 0xbaa   :  { %v3588_v20 = vadd.f32 %v3581_v4, %v3574_v6  ;;  %v3633_v7 = vmul.f32 %v11452_v48, %v3597_v17  ;;  %v3646_v40 = vmul.f32 %v11455_v38, %v3597_v17  ;;  %v3669_v9 = vmul.f32 %v11458_v39, %v3597_v17 }
 0xbab   :  { %v3552_v28 = vpop.f32.mrf.mxu0  ;;  %v3628_v51 = vmul.f32 %v11452_v48, %v3592_v1  ;;  %v3641_v30 = vmul.f32 %v11455_v38, %v3592_v1 }
 0xbac   :  { %v3575_v14 = vmul.f32 %v3567_v43, %v3552_v28  ;;  %v3598_v0 = vmax.f32 %v3588_v20, 0.0  ;;  %v3656_v57 = vadd.f32 %v3646_v40, %v3632_v54  ;;  %v3679_v53 = vadd.f32 %v3669_v9, %v3655_v5  ;;  %v3618_v40 = vld [vmem:[%s12933_s7 + $0xc8] sm:$0xff] }
 0xbad   :  { %v8223_v25 = vpop.f32.mrf.mxu0 }
 0xbae   :  { %v3589_v55 = vadd.f32 %v3581_v4, %v3575_v14  ;;  %v3634_v41 = vmul.f32 %v11452_v48, %v3598_v0  ;;  %v3647_v36 = vmul.f32 %v11455_v38, %v3598_v0  ;;  %v3670_v12 = vmul.f32 %v11458_v39, %v3598_v0 }
 0xbaf   :  { %v3557_v18 = vpop.f32.mrf.mxu0  ;;  %v3593_v14 = vmax.f32 %v3583_v42, 0.0  ;;  %v3644_v25 = vmul.f32 %v11455_v38, %v3595_v29 }
 0xbb0   :  { %v3576_v50 = vmul.f32 %v3567_v43, %v3557_v18  ;;  %v3599_v35 = vmax.f32 %v3589_v55, 0.0  ;;  %v3657_v44 = vadd.f32 %v3647_v36, %v3633_v7  ;;  %v3612_v55 = vld [vmem:[%s12933_s7 + $0x98] sm:$0xff]  ;;  %v3680_v11 = vadd.f32 %v3670_v12, %v3656_v57  ;;  %v3619_v36 = vld [vmem:[%s12933_s7 + $0xd0] sm:$0xff] }
 0xbb1   :  { %v8226_v3 = vpop.f32.mrf.mxu0 }
 0xbb2   :  { %v3590_v31 = vadd.f32 %v3581_v4, %v3576_v50  ;;  %v3648_v49 = vmul.f32 %v11455_v38, %v3599_v35  ;;  %v3635_v32 = vmul.f32 %v11452_v48, %v3599_v35  ;;  %v3671_v15 = vmul.f32 %v11458_v39, %v3599_v35 }
 0xbb3   :  { %v3560_v24 = vpop.f32.mrf.mxu0  ;;  %v3630_v35 = vmul.f32 %v11452_v48, %v3594_v27  ;;  %v3643_v3 = vmul.f32 %v11455_v38, %v3594_v27 }
 0xbb4   :  { %v3600_v63 = vmax.f32 %v3590_v31, 0.0  ;;  %v3577_v60 = vmul.f32 %v3567_v43, %v3560_v24  ;;  %v3658_v46 = vadd.f32 %v3648_v49, %v3634_v41  ;;  %v3611_v43 = vld [vmem:[%s12933_s7 + $0x90] sm:$0xff]  ;;  %v3681_v20 = vadd.f32 %v3671_v15, %v3657_v44  ;;  %v3622_v31 = vld [vmem:[%s12933_s7 + $0xe8] sm:$0xff]  ;;  %v3604_v44 = vld [vmem:[%s12933_s7 + $0x58] sm:$0xff] }
 0xbb5   :  { %v8227_v45 = vpop.f32.mrf.mxu0  ;;  %v3654_v17 = vadd.f32 %v3644_v25, %v3630_v35  ;;  %v3667_v49 = vmul.f32 %v11458_v39, %v3595_v29  ;;  %v3666_v29 = vmul.f32 %v11458_v39, %v3594_v27  ;;  %v3605_v27 = vld [vmem:[%s12933_s7 + $0x60] sm:$0xff] }
 0xbb6   :  { %v3649_v47 = vmul.f32 %v11455_v38, %v3600_v63  ;;  %v3591_v19 = vadd.f32 %v3581_v4, %v3577_v60  ;;  %v3672_v37 = vmul.f32 %v11458_v39, %v3600_v63  ;;  %v3636_v52 = vmul.f32 %v11452_v48, %v3600_v63  ;;  %v3608_v45 = vld [vmem:[%s12933_s7 + $0x78] sm:$0xff] }
 0xbb7   :  { %v3629_v63 = vmul.f32 %v11452_v48, %v3593_v14  ;;  %v3642_v60 = vmul.f32 %v11455_v38, %v3593_v14  ;;  %v3690_v48 = vmul.f32 %v3680_v11, %v3608_v45  ;;  %v3885_v45 = vld [vmem:[%s12933_s7 + $0x130] sm:$0xff] }
 0xbb8   :  { %v3601_v21 = vmax.f32 %v3591_v19, 0.0  ;;  %v3659_v26 = vadd.f32 %v3649_v47, %v3635_v32  ;;  %v3682_v6 = vadd.f32 %v3672_v37, %v3658_v46  ;;  %v3691_v19 = vmul.f32 %v3681_v20, %v3609_v56  ;;  %v3607_v32 = vld [vmem:[%s12933_s7 + $0x70] sm:$0xff]  ;;  %v3606_v46 = vld [vmem:[%s12933_s7 + $0x68] sm:$0xff] }
 0xbb9   :  { %v3653_v41 = vadd.f32 %v3643_v3, %v3629_v63  ;;  %v3678_v37 = vadd.f32 %v3668_v33, %v3654_v17  ;;  %v3652_v15 = vadd.f32 %v3642_v60, %v3628_v51  ;;  %v11548_v12 = vadd.f32 %v3690_v48, %v3618_v40  ;;  %v11590_v33 = vld [vmem:[%s12934_s3] sm:$0xf]  ;;  %v11606_v63 = vld [vmem:[%s12934_s3 + $0x10] sm:$0xf] }
 0xbba   :  { %v3650_v10 = vmul.f32 %v11455_v38, %v3601_v21  ;;  %v3673_v58 = vmul.f32 %v11458_v39, %v3601_v21  ;;  %v3692_v24 = vmul.f32 %v3682_v6, %v3610_v59  ;;  %v3665_v38 = vmul.f32 %v11458_v39, %v3593_v14  ;;  %v3617_v39 = vld [vmem:[%s12933_s7 + $0xc0] sm:$0xff]  ;;  %v3615_v14 = vld [vmem:[%s12933_s7 + $0xb0] sm:$0xff]  ;;  %v3614_v59 = vld [vmem:[%s12933_s7 + $0xa8] sm:$0xff] }
 0xbbb   :  { %v3676_v54 = vadd.f32 %v3666_v29, %v3652_v15  ;;  %v3887_v17 = vld [vmem:[%s12933_s7 + $0x140] sm:$0xff] }
 0xbbc   :  { %v3660_v28 = vadd.f32 %v3650_v10, %v3636_v52  ;;  %v3683_v4 = vadd.f32 %v3673_v58, %v3659_v26  ;;  %v3677_v52 = vadd.f32 %v3667_v49, %v3653_v41  ;;  %v11536_v10 = vadd.f32 %v3691_v19, %v3619_v36  ;;  %v3888_v49 = vld [vmem:[%s12933_s7 + $0x148] sm:$0xf]  ;;  %v3881_v36 = vld [vmem:[%s12933_s7 + $0x110] sm:$0xff]  ;;  %v3706_v15 = vld [vmem:[%s12933_s7 + $0x100] sm:$0x3] }
 0xbbd   :  { %v3689_v26 = vmul.f32 %v3679_v53, %v3607_v32  ;;  %v3651_v58 = vadd.f32 %v3641_v30, %v11461_v34  ;;  %v3616_v34 = vld [vmem:[%s12933_s7 + $0xb8] sm:$0xff]  ;;  %v3883_v30 = vld [vmem:[%s12933_s7 + $0x120] sm:$0xff]  ;;  %v3884_v41 = vld [vmem:[%s12933_s7 + $0x128] sm:$0xff] }
 0xbbe   :  { %v3684_v18 = vadd.f32 %v3674_v61, %v3660_v28  ;;  %v3693_v50 = vmul.f32 %v3683_v4, %v3611_v43  ;;  %v3620_v61 = vld [vmem:[%s12933_s7 + $0xd8] sm:$0xff]  ;;  %v3688_v43 = vmul.f32 %v3678_v37, %v3606_v46  ;;  %v3687_v4 = vmul.f32 %v3677_v52, %v3605_v27 }
 0xbbf   :  { %v11527_v7 = vadd.f32 %v3692_v24, %v3620_v61  ;;  %v3675_v6 = vadd.f32 %v3665_v38, %v3651_v58  ;;  %v11556_v28 = vadd.f32 %v3689_v26, %v3617_v39  ;;  %v11601_v24 = vld [vmem:[%s12934_s3 + $0x8] sm:$0xf]  ;;  %v3893_v61 = vpack.c.bf16 %v3888_v49, %v3887_v17  ;;  %v3886_v53 = vld [vmem:[%s12933_s7 + $0x138] sm:$0xff] }
 0xbc0   :  { %v3694_v0 = vmul.f32 %v3684_v18, %v3612_v55  ;;  %v11512_v42 = vadd.f32 %v3693_v50, %v3621_v8  ;;  %v11567_v9 = vadd.f32 %v3688_v43, %v3616_v34  ;;  %v3686_v55 = vmul.f32 %v3676_v54, %v3604_v44  ;;  %v3613_v18 = vld [vmem:[%s12933_s7 + $0xa0] sm:$0xff]  ;;  %v3882_v32 = vld [vmem:[%s12933_s7 + $0x118] sm:$0xff]  ;;  %v11675_v49 = vld [vmem:[%s12932_s5 + $0xa8] sm:$0xff]  }
 0xbc1   :  { %v3710_v62 = vpack.c.bf16 %v11527_v7, %v11536_v10  ;;  %v3709_v25 = vpack.c.bf16 %v11548_v12, %v11556_v28  ;;  %v11572_v57 = vadd.f32 %v3687_v4, %v3615_v14  ;;  %v3685_v20 = vmul.f32 %v3675_v6, %v3603_v13 }
 0xbc2   :  { %v11514_v47 = vadd.f32 %v3694_v0, %v3622_v31  ;;  %v11580_v1 = vadd.f32 %v3686_v55, %v3614_v59  ;;  %v3900_v19 = vsel %vm3898_vm9, %v3893_v61, 0  ;;  %v3892_v51 = vpack.c.bf16 %v3886_v53, %v3885_v45  ;;  %v11684_v61 = vld [vmem:[%s12932_s5 + $0xb0] sm:$0xff]   ;;  %v11693_v45 = vld [vmem:[%s12932_s5 + $0xb8] sm:$0xff]   ;;  %v11702_v53 = vld [vmem:[%s12932_s5 + $0xc0] sm:$0xff]  }
 0xbc3   :  { %v3708_v50 = vpack.c.bf16 %v11567_v9, %v11572_v57  ;;  %v11582_v35 = vadd.f32 %v3685_v20, %v3613_v18  ;;  %v3891_v29 = vpack.c.bf16 %v3884_v41, %v3883_v30  ;;  %v3890_v37 = vpack.c.bf16 %v3882_v32, %v3881_v36 }
 0xbc4   :  { %v3711_v21 = vpack.c.bf16 %v11514_v47, %v11512_v42  ;;  %v3867_v43 = vrot.slane %v3706_v15, %v13204_v16  ;;  %v3872_v4 = vrot.slane %v3706_v15, %v13205_v2 }
 0xbc5   :  { %v3707_v3 = vpack.c.bf16 %v11580_v1, %v11582_v35 }
 0xbc6   :  { %8229 = vmatpush3.bf16.msra.mxu1 %v3711_v21  ;;  %v3705_v21 = vld [vmem:[%s12933_s7 + $0xf0] sm:$0x7] }
 0xbc7   :  { %8230 = vmatprep.subr.bf16.mxu1 %v13202_v22  ;;  %v3812_v48 = vrot.slane %v3705_v21, %v13205_v2  ;;  %v3807_v38 = vrot.slane %v3705_v21, %v13204_v16  ;;  %v3861_v40 = vrot.slane %v3705_v21, %v13206_v23 }
 0xbca   :  { %8231 = vmatpush3.bf16.msra.mxu1 %v3710_v62 }
 0xbcb   :  { %8232 = vmatprep.subr.bf16.mxu1 %v13202_v22 }
 0xbce   :  { %8233 = vmatpush3.bf16.msra.mxu1 %v3709_v25 }
 0xbcf   :  { %8234 = vmatprep.subr.bf16.mxu1 %v13202_v22 }
 0xbd2   :  { %8235 = vmatpush3.bf16.msra.mxu1 %v3708_v50 }
 0xbd3   :  { %8236 = vmatprep.subr.bf16.mxu1 %v13202_v22 }
 0xbd6   :  { %8237 = vmatpush3.bf16.msra.mxu1 %v3707_v3 }
 0xbd7   :  { %8242 = vmatprep.subr.bf16.mxu1 %v13202_v22 }
 0xbd9   :  { %8239 = vmatmul.mubr.msk.bf16.vlgmr.msra.gmra.mxu1 %vm449_vm3, %v11590_v33 }
 0xbda   :  { %8244 = vmatprep.mubr.msk.bf16.mxu1 %vm8901_vm4, %v13202_v22 }
 0xc99   :  { %v3749_v8 = vpop.f32.mrf.mxu1 }
 0xc9a   :  { %v3755_v31 = vmul.f32 0.1, %v3749_v8 }
 0xc9b   :  { %v8240_v56 = vpop.f32.mrf.mxu1 }
 0xc9c   :  { %v3756_v5 = vpack.c.bf16 %v3755_v31, %v3755_v31  ;;  %v3813_v26 = vmul.f32 %v3812_v48, %v3755_v31 }
 0xc9d   :  { %v3752_v11 = vpop.f32.mrf.mxu1 }
 0xc9e   :  { %v3762_v0 = vsel %vm165_vm0, %v3756_v5, 0 }
 0xc9f   :  { %8243 = vmatpush3.bf16.msra.mxu1 %v3762_v0  ;;  %8249 = vmatpush3.bf16.msra.mxu0 %v3762_v0  ;;  %v8241_v60 = vpop.f32.mrf.mxu1  ;;  %v11665_v0 = vld [vmem:[%s12932_s5 + $0xa0] sm:$0xff]  }
 0xca0   :  { %8254 = vmatprep.subr.bf16.mxu1 %v13202_v22  ;;  %8266 = vmatprep.subr.bf16.mxu0 %v13202_v22 }
 0xca2   :  { %8245 = vmatmul.mubr.msk.bf16.vlgmr.msra.gmra.mxu1 %vm3757_vm8, %v11601_v24  ;;  %8251 = vmatmul.mubr.msk.bf16.vlgmr.msra.gmra.mxu0 %vm3757_vm8, %v11606_v63 }
 0xca3   :  { %8262 = vmatprep.mubr.msk.bf16.mxu1 %vm8901_vm4, %v13202_v22  ;;  %8268 = vmatprep.mubr.msk.bf16.mxu0 %vm8901_vm4, %v13202_v22 }
 0xca4   :  { %8255 = vmatpush3.bf16.msra.mxu1 %v3900_v19 }
 0xca5   :  { %8256 = vmatprep.subr.bf16.mxu1 %v13202_v22 }
 0xca8   :  { %8257 = vmatpush3.bf16.msra.mxu1 %v3892_v51 }
 0xca9   :  { %8258 = vmatprep.subr.bf16.mxu1 %v13202_v22 }
 0xcac   :  { %8259 = vmatpush3.bf16.msra.mxu1 %v3891_v29 }
 0xcad   :  { %8260 = vmatprep.subr.bf16.mxu1 %v13202_v22 }
 0xcb0   :  { %8261 = vmatpush3.bf16.msra.mxu1 %v3890_v37 }
 0xcb1   :  { %8288 = vmatprep.subr.bf16.mxu1 %v13202_v22 }
 0xd62   :  { %v3798_v46 = vpop.f32.mrf.mxu1  ;;  %v3852_v52 = vpop.f32.mrf.mxu0 }
 0xd63   :  { %v3808_v58 = vmul.f32 %v3807_v38, %v3798_v46  ;;  %v3862_v39 = vmul.f32 %v3861_v40, %v3852_v52 }
 0xd64   :  { %v8246_v27 = vpop.f32.mrf.mxu1  ;;  %v8252_v54 = vpop.f32.mrf.mxu0 }
 0xd65   :  { %v3814_v62 = vadd.f32 %v3813_v26, %v3808_v58  ;;  %v4069_v26 = vld [vmem:[%s12933_s7 + $0x150] sm:$0x7] }
 0xd66   :  { %v3801_v34 = vpop.f32.mrf.mxu1  ;;  %v3855_v44 = vpop.f32.mrf.mxu0  ;;  %v11714_v54 = vrot.slane %v4069_v26, %v13204_v16 }
 0xd67   :  { %v3863_v6 = vadd.f32 %v3862_v39, %v3814_v62  ;;  %v11720_v44 = vrot.slane %v4069_v26, %v13205_v2 }
 0xd68   :  { %v8247_v14 = vpop.f32.mrf.mxu1  ;;  %v8253_v13 = vpop.f32.mrf.mxu0 }
 0xd69   :  { %v3868_v25 = vmul.f32 %v3867_v43, %v3863_v6 }
 0xd6b   :  { %v3873_v55 = vadd.f32 %v3872_v4, %v3868_v25  ;;  %v11724_v4 = vrot.slane %v4069_v26, %v13206_v23 }
 0xd6d   :  { %v7319_v59 = vmul.f32 -1.442695, %v3873_v55 }
 0xd6f   :  { %8838 = vpow2.f32 %v7319_v59 }
 0xd7c   :  { %v8839_v20 = vpop.eup %8838 }
 0xd7d   :  { %v3877_v18 = vadd.f32 1.0, %v8839_v20  ;;  %v4141_v20 = vmul.f32 0.0, %v11724_v4 }
 0xd7f   :  { %8840 = vrcp.f32 %v3877_v18 }
 0xd8c   :  { %v8841_v50 = vpop.eup %8840 }
 0xd8d   :  { %v3880_v3 = vmul.f32 %v8841_v50, %v3873_v55 }
 0xd8f   :  { %v3889_v8 = vpack.c.bf16 %v3880_v3, %v3880_v3 }
 0xd91   :  { %8263 = vmatmul.mubr.msk.bf16.vlgmr.msra.gmra.mxu1 %vm3894_vm10, %v3889_v8 }
 0xd92   :  { %8298 = vmatprep.mubr.msk.bf16.mxu1 %vm8901_vm4, %v13202_v22 }
 0xe51   :  { %v3936_v31 = vpop.f32.mrf.mxu1 }
 0xe52   :  { %v3942_v56 = vpack.c.bf16 %v3936_v31, %v3936_v31 }
 0xe53   :  { %v8264_v5 = vpop.f32.mrf.mxu1 }
 0xe54   :  { %v3984_v11 = vsel %vm165_vm0, %v3942_v56, 0 }
 0xe55   :  { %v3939_v60 = vpop.f32.mrf.mxu1  ;;  %8267 = vmatpush3.bf16.msra.mxu0 %v3984_v11 }
 0xe56   :  { %8308 = vmatprep.subr.bf16.mxu0 %v13202_v22 }
 0xe57   :  { %v8265_v17 = vpop.f32.mrf.mxu1 }
 0xe58   :  { %8269 = vmatmul.mubr.msk.bf16.vlgmr.msra.gmra.mxu0 %vm3757_vm8, %v11665_v0 }
 0xe59   :  { %8272 = vmatprep.mubr.msk.bf16.mxu0 %vm8901_vm4, %v13202_v22 }
 0xe60   :  { %8273 = vmatmul.mubr.msk.bf16.gmra.mxu0 %vm3757_vm8, %v11675_v49 }
 0xe61   :  { %8276 = vmatprep.mubr.msk.bf16.mxu0 %vm8901_vm4, %v13202_v22 }
 0xe68   :  { %8277 = vmatmul.mubr.msk.bf16.gmra.mxu0 %vm3757_vm8, %v11684_v61 }
 0xe69   :  { %8280 = vmatprep.mubr.msk.bf16.mxu0 %vm8901_vm4, %v13202_v22 }
 0xe70   :  { %8281 = vmatmul.mubr.msk.bf16.gmra.mxu0 %vm3757_vm8, %v11693_v45 }
 0xe71   :  { %8284 = vmatprep.mubr.msk.bf16.mxu0 %vm8901_vm4, %v13202_v22 }
 0xe78   :  { %8285 = vmatmul.mubr.msk.bf16.gmra.mxu0 %vm3757_vm8, %v11702_v53 }
 0xe79   :  { %8310 = vmatprep.mubr.msk.bf16.mxu0 %vm8901_vm4, %v13202_v22 }
 0xf18   :  { %v4020_v19 = vpop.f32.mrf.mxu0 }
 0xf1a   :  { %v8270_v51 = vpop.f32.mrf.mxu0 }
 0xf1c   :  { %v4023_v30 = vpop.f32.mrf.mxu0 }
 0xf1e   :  { %v8271_v41 = vpop.f32.mrf.mxu0 }
 0xf20   :  { %v4028_v29 = vpop.f32.mrf.mxu0 }
 0xf21   :  { %v4029_v3 = vadd.f32 %v4028_v29, %v11572_v57 }
 0xf22   :  { %v8274_v36 = vpop.f32.mrf.mxu0 }
 0xf23   :  { %v11772_v36 = vmax.f32 %v4029_v3, 0.0 }
 0xf24   :  { %v4031_v32 = vpop.f32.mrf.mxu0 }
 0xf26   :  { %v8275_v37 = vpop.f32.mrf.mxu0 }
 0xf28   :  { %v4036_v21 = vpop.f32.mrf.mxu0 }
 0xf2a   :  { %v8278_v48 = vpop.f32.mrf.mxu0 }
 0xf2b   :  { %v4078_v48 = vld [vmem:[%s12933_s7 + $0x1a0] sm:$0xff] }
 0xf2c   :  { %v4039_v38 = vpop.f32.mrf.mxu0 }
 0xf2d   :  { %v4040_v62 = vadd.f32 %v4039_v38, %v11548_v12  ;;  %v11733_v12 = vmul.f32 0.0, %v11714_v54 }
 0xf2e   :  { %v8279_v40 = vpop.f32.mrf.mxu0 }
 0xf2f   :  { %v11735_v55 = vmax.f32 %v4040_v62, 0.0  ;;  %v4077_v62 = vld [vmem:[%s12933_s7 + $0x198] sm:$0xff] }
 0xf30   :  { %v4044_v46 = vpop.f32.mrf.mxu0 }
 0xf31   :  { %v4045_v39 = vadd.f32 %v4044_v46, %v11536_v10  ;;  %v4037_v10 = vadd.f32 %v4036_v21, %v11556_v28  ;;  %v4024_v28 = vadd.f32 %v4023_v30, %v11580_v1  ;;  %v4100_v57 = vmul.f32 %v11714_v54, %v11735_v55 }
 0xf32   :  { %v8282_v15 = vpop.f32.mrf.mxu0  ;;  %v4113_v60 = vmul.f32 %v11720_v44, %v11735_v55 }
 0xf33   :  { %v11728_v14 = vmax.f32 %v4045_v39, 0.0  ;;  %v11748_v31 = vmax.f32 %v4037_v10, 0.0  ;;  %v4136_v39 = vmul.f32 %v11724_v4, %v11735_v55 }
 0xf34   :  { %v4047_v52 = vpop.f32.mrf.mxu0 }
 0xf35   :  { %v4048_v58 = vadd.f32 %v4047_v52, %v11527_v7  ;;  %v4032_v7 = vadd.f32 %v4031_v32, %v11567_v9  ;;  %v4021_v9 = vadd.f32 %v4020_v19, %v11582_v35  ;;  %v4101_v56 = vmul.f32 %v11714_v54, %v11728_v14 }
 0xf36   :  { %v8283_v27 = vpop.f32.mrf.mxu0  ;;  %v4114_v35 = vmul.f32 %v11720_v44, %v11728_v14  ;;  %v4099_v32 = vmul.f32 %v11714_v54, %v11748_v31  ;;  %v4112_v37 = vmul.f32 %v11720_v44, %v11748_v31  ;;  %v4137_v21 = vmul.f32 %v11724_v4, %v11728_v14 }
 0xf37   :  { %v11717_v43 = vmax.f32 %v4048_v58, 0.0  ;;  %v11746_v8 = vmax.f32 %v4032_v7, 0.0  ;;  %v11783_v52 = vmax.f32 %v4024_v28, 0.0  ;;  %v4079_v27 = vld [vmem:[%s12933_s7 + $0x1a8] sm:$0xff]  ;;  %v4135_v28 = vmul.f32 %v11724_v4, %v11748_v31 }
 0xf38   :  { %v4052_v34 = vpop.f32.mrf.mxu0  ;;  %v4124_v38 = vadd.f32 %v4114_v35, %v4100_v57 }
 0xf39   :  { %v4053_v6 = vadd.f32 %v4052_v34, %v11512_v42  ;;  %v4115_v42 = vmul.f32 %v11720_v44, %v11717_v43  ;;  %v4102_v1 = vmul.f32 %v11714_v54, %v11717_v43  ;;  %v4138_v19 = vmul.f32 %v11724_v4, %v11717_v43 }
 0xf3a   :  { %v8286_v13 = vpop.f32.mrf.mxu0  ;;  %v4098_v26 = vmul.f32 %v11714_v54, %v11746_v8  ;;  %v4111_v58 = vmul.f32 %v11720_v44, %v11746_v8  ;;  %v4123_v34 = vadd.f32 %v4113_v60, %v4099_v32  ;;  %v4096_v35 = vmul.f32 %v11714_v54, %v11783_v52  ;;  %v4087_v60 = vld [vmem:[%s12933_s7 + $0x1e8] sm:$0xff] }
 0xf3b   :  { %v11730_v25 = vmax.f32 %v4053_v6, 0.0  ;;  %v4125_v17 = vadd.f32 %v4115_v42, %v4101_v56  ;;  %v4148_v6 = vadd.f32 %v4138_v19, %v4124_v38  ;;  %v11797_v13 = vmax.f32 %v4021_v9, 0.0  ;;  %v4076_v9 = vld [vmem:[%s12933_s7 + $0x190] sm:$0xff]  ;;  %v4074_v38 = vld [vmem:[%s12933_s7 + $0x180] sm:$0xff] }
 0xf3c   :  { %v4055_v59 = vpop.f32.mrf.mxu0  ;;  %v4097_v42 = vmul.f32 %v11714_v54, %v11772_v36  ;;  %v4147_v3 = vadd.f32 %v4137_v21, %v4123_v34  ;;  %v4134_v57 = vmul.f32 %v11724_v4, %v11746_v8  ;;  %v4133_v21 = vmul.f32 %v11724_v4, %v11772_v36 }
 0xf3d   :  { %v4116_v18 = vmul.f32 %v11720_v44, %v11730_v25  ;;  %v4056_v50 = vadd.f32 %v4055_v59, %v11514_v47  ;;  %v4139_v11 = vmul.f32 %v11724_v4, %v11730_v25  ;;  %v4103_v51 = vmul.f32 %v11714_v54, %v11730_v25 }
 0xf3e   :  { %v8287_v5 = vpop.f32.mrf.mxu0  ;;  %v4110_v59 = vmul.f32 %v11720_v44, %v11772_v36  ;;  %v4108_v32 = vmul.f32 %v11720_v44, %v11797_v13 }
 0xf3f   :  { %v11758_v47 = vmax.f32 %v4056_v50, 0.0  ;;  %v4126_v41 = vadd.f32 %v4116_v18, %v4102_v1  ;;  %v4149_v40 = vadd.f32 %v4139_v11, %v4125_v17  ;;  %v4088_v18 = vld [vmem:[%s12933_s7 + $0x1f0] sm:$0xff]  ;;  %v4122_v50 = vadd.f32 %v4112_v37, %v4098_v26  ;;  %v4075_v17 = vld [vmem:[%s12933_s7 + $0x188] sm:$0xff]  ;;  %v4085_v26 = vld [vmem:[%s12933_s7 + $0x1d8] sm:$0xff] }
 0xf40   :  { %v4109_v1 = vmul.f32 %v11720_v44, %v11783_v52  ;;  %v4121_v11 = vadd.f32 %v4111_v58, %v4097_v42  ;;  %v4120_v37 = vadd.f32 %v4110_v59, %v4096_v35  ;;  %v4073_v58 = vld [vmem:[%s12933_s7 + $0x178] sm:$0xff] }
 0xf41   :  { %v4117_v30 = vmul.f32 %v11720_v44, %v11758_v47  ;;  %v4140_v29 = vmul.f32 %v11724_v4, %v11758_v47  ;;  %v4159_v5 = vmul.f32 %v4149_v40, %v4077_v62  ;;  %v4146_v19 = vadd.f32 %v4136_v39, %v4122_v50 }
 0xf42   :  { %v4145_v40 = vadd.f32 %v4135_v28, %v4121_v11  ;;  %v4132_v44 = vmul.f32 %v11724_v4, %v11783_v52  ;;  %v4084_v4 = vld [vmem:[%s12933_s7 + $0x1d0] sm:$0xff]  ;;  %v4081_v11 = vld [vmem:[%s12933_s7 + $0x1b8] sm:$0xff] }
 0xf43   :  { %v4127_v46 = vadd.f32 %v4117_v30, %v4103_v51  ;;  %v4150_v15 = vadd.f32 %v4140_v29, %v4126_v41  ;;  %v4158_v41 = vmul.f32 %v4148_v6, %v4076_v9  ;;  %v4095_v29 = vmul.f32 %v11714_v54, %v11797_v13 }
 0xf44   :  { %v11844_v54 = vadd.f32 %v4159_v5, %v4087_v60  ;;  %v4156_v34 = vmul.f32 %v4146_v19, %v4074_v38  ;;  %v4118_v6 = vadd.f32 %v4108_v32, %v11733_v12  ;;  %v4155_v28 = vmul.f32 %v4145_v40, %v4073_v58  ;;  %v4083_v12 = vld [vmem:[%s12933_s7 + $0x1c8] sm:$0xff] }
 0xf45   :  { %v4151_v7 = vadd.f32 %v4141_v20, %v4127_v46  ;;  %v4160_v10 = vmul.f32 %v4150_v15, %v4078_v48  ;;  %v4089_v20 = vld [vmem:[%s12933_s7 + $0x1f8] sm:$0xff]  ;;  %v4086_v48 = vld [vmem:[%s12933_s7 + $0x1e0] sm:$0xff]  ;;  %v4157_v15 = vmul.f32 %v4147_v3, %v4075_v17  ;;  %v4119_v39 = vadd.f32 %v4109_v1, %v4095_v29  ;;  %v4080_v17 = vld [vmem:[%s12933_s7 + $0x1b0] sm:$0xff] }
 0xf46   :  { %v11854_v62 = vadd.f32 %v4158_v41, %v4086_v48  ;;  %v11874_v9 = vadd.f32 %v4156_v34, %v4084_v4  ;;  %v4082_v3 = vld [vmem:[%s12933_s7 + $0x1c0] sm:$0xff]  ;;  %v11885_v35 = vadd.f32 %v4155_v28, %v4083_v12  ;;  %v4341_v34 = vld [vmem:[%s12933_s7 + $0x238] sm:$0xff] }
 0xf47   :  { %v4161_v56 = vmul.f32 %v4151_v7, %v4079_v27  ;;  %v11826_v51 = vadd.f32 %v4160_v10, %v4088_v18  ;;  %v4144_v27 = vadd.f32 %v4134_v57, %v4120_v37  ;;  %v4072_v7 = vld [vmem:[%s12933_s7 + $0x170] sm:$0xff]  ;;  %v4143_v10 = vadd.f32 %v4133_v21, %v4119_v39  ;;  %v4071_v18 = vld [vmem:[%s12933_s7 + $0x168] sm:$0xff]  ;;  %v4338_v4 = vld [vmem:[%s12933_s7 + $0x220] sm:$0xff] }
 0xf48   :  { %v4177_v42 = vpack.c.bf16 %v11844_v54, %v11854_v62  ;;  %v11866_v59 = vadd.f32 %v4157_v15, %v4085_v26 }
 0xf49   :  { %v11828_v30 = vadd.f32 %v4161_v56, %v4089_v20  ;;  %v4142_v20 = vadd.f32 %v4132_v44, %v4118_v6  ;;  %v4154_v50 = vmul.f32 %v4144_v27, %v4072_v7  ;;  %v4070_v56 = vld [vmem:[%s12933_s7 + $0x160] sm:$0xff]  ;;  %v4153_v1 = vmul.f32 %v4143_v10, %v4071_v18  ;;  %v4345_v44 = vld [vmem:[%s12933_s7 + $0x258] sm:$0xf]  ;;  %v4340_v27 = vld [vmem:[%s12933_s7 + $0x230] sm:$0xff] }
 0xf4a   :  { %v4176_v5 = vpack.c.bf16 %v11866_v59, %v11874_v9  ;;  %v4348_v6 = vpack.c.bf16 %v4341_v34, %v4340_v27  ;;  %v4339_v7 = vld [vmem:[%s12933_s7 + $0x228] sm:$0xff] }
 0xf4b   :  { %v4178_v46 = vpack.c.bf16 %v11828_v30, %v11826_v51  ;;  %v11890_v57 = vadd.f32 %v4154_v50, %v4082_v3  ;;  %v4152_v60 = vmul.f32 %v4142_v20, %v4070_v56  ;;  %v11898_v41 = vadd.f32 %v4153_v1, %v4081_v11  ;;  %v4173_v50 = vld [vmem:[%s12933_s7 + $0x210] sm:$0x3] }
 0xf4c   :  { %v4347_v10 = vpack.c.bf16 %v4339_v7, %v4338_v4 }
 0xf4d   :  { %8289 = vmatpush3.bf16.msra.mxu1 %v4178_v46  ;;  %v4175_v19 = vpack.c.bf16 %v11885_v35, %v11890_v57  ;;  %v11900_v29 = vadd.f32 %v4152_v60, %v4080_v17 }
 0xf4e   :  { %8290 = vmatprep.subr.bf16.mxu1 %v13202_v22 }
 0xf4f   :  { %v4174_v32 = vpack.c.bf16 %v11898_v41, %v11900_v29 }
 0xf51   :  { %8291 = vmatpush3.bf16.msra.mxu1 %v4177_v42  ;;  %v4172_v42 = vld [vmem:[%s12933_s7 + $0x200] sm:$0x7] }
 0xf52   :  { %8292 = vmatprep.subr.bf16.mxu1 %v13202_v22  ;;  %v4272_v28 = vrot.slane %v4172_v42, %v13205_v2  ;;  %v4267_v12 = vrot.slane %v4172_v42, %v13204_v16  ;;  %v4318_v18 = vrot.slane %v4172_v42, %v13206_v23 }
 0xf55   :  { %8293 = vmatpush3.bf16.msra.mxu1 %v4176_v5 }
 0xf56   :  { %8294 = vmatprep.subr.bf16.mxu1 %v13202_v22 }
 0xf59   :  { %8295 = vmatpush3.bf16.msra.mxu1 %v4175_v19  ;;  %v4324_v19 = vrot.slane %v4173_v50, %v13204_v16 }
 0xf5a   :  { %8296 = vmatprep.subr.bf16.mxu1 %v13202_v22 }
 0xf5d   :  { %8297 = vmatpush3.bf16.msra.mxu1 %v4174_v32 }
 0xf5e   :  { %8302 = vmatprep.subr.bf16.mxu1 %v13202_v22 }
 0xf60   :  { %8299 = vmatmul.mubr.msk.bf16.vlgmr.msra.gmra.mxu1 %vm449_vm3, %v11590_v33  ;;  %v4344_v33 = vld [vmem:[%s12933_s7 + $0x250] sm:$0xff] }
 0xf61   :  { %8304 = vmatprep.mubr.msk.bf16.mxu1 %vm8901_vm4, %v13202_v22  ;;  %v4350_v26 = vpack.c.bf16 %v4345_v44, %v4344_v33 }
 0xf63   :  { %v4355_v58 = vsel %vm3898_vm9, %v4350_v26, 0 }
0x1020   :  { %v4213_v37 = vpop.f32.mrf.mxu1 }
0x1021   :  { %v4219_v21 = vmul.f32 0.1, %v4213_v37 }
0x1022   :  { %v8300_v48 = vpop.f32.mrf.mxu1 }
0x1023   :  { %v4220_v38 = vpack.c.bf16 %v4219_v21, %v4219_v21  ;;  %v4273_v56 = vmul.f32 %v4272_v28, %v4219_v21 }
0x1024   :  { %v4216_v40 = vpop.f32.mrf.mxu1 }
0x1025   :  { %v4222_v46 = vsel %vm165_vm0, %v4220_v38, 0  ;;  %v4329_v38 = vrot.slane %v4173_v50, %v13205_v2 }
0x1026   :  { %8303 = vmatpush3.bf16.msra.mxu1 %v4222_v46  ;;  %8309 = vmatpush3.bf16.msra.mxu0 %v4222_v46  ;;  %v8301_v15 = vpop.f32.mrf.mxu1 }
0x1027   :  { %8314 = vmatprep.subr.bf16.mxu1 %v13202_v22  ;;  %8326 = vmatprep.subr.bf16.mxu0 %v13202_v22 }
0x1029   :  { %8305 = vmatmul.mubr.msk.bf16.vlgmr.msra.gmra.mxu1 %vm3757_vm8, %v11601_v24  ;;  %8311 = vmatmul.mubr.msk.bf16.vlgmr.msra.gmra.mxu0 %vm3757_vm8, %v11606_v63  ;;  %v4342_v24 = vld [vmem:[%s12933_s7 + $0x240] sm:$0xff]  ;;  %v4343_v63 = vld [vmem:[%s12933_s7 + $0x248] sm:$0xff] }
0x102a   :  { %8322 = vmatprep.mubr.msk.bf16.mxu1 %vm8901_vm4, %v13202_v22  ;;  %8328 = vmatprep.mubr.msk.bf16.mxu0 %vm8901_vm4, %v13202_v22  ;;  %v4349_v39 = vpack.c.bf16 %v4343_v63, %v4342_v24 }
0x102b   :  { %8315 = vmatpush3.bf16.msra.mxu1 %v4355_v58 }
0x102c   :  { %8316 = vmatprep.subr.bf16.mxu1 %v13202_v22 }
0x102f   :  { %8317 = vmatpush3.bf16.msra.mxu1 %v4349_v39 }
0x1030   :  { %8318 = vmatprep.subr.bf16.mxu1 %v13202_v22 }
0x1033   :  { %8319 = vmatpush3.bf16.msra.mxu1 %v4348_v6 }
0x1034   :  { %8320 = vmatprep.subr.bf16.mxu1 %v13202_v22 }
0x1037   :  { %8321 = vmatpush3.bf16.msra.mxu1 %v4347_v10 }
0x1038   :  { %8720 = vmatprep.subr.bf16.mxu1 %v13202_v22 }
0x10e9   :  { %v4258_v20 = vpop.f32.mrf.mxu1  ;;  %v4309_v3 = vpop.f32.mrf.mxu0 }
0x10ea   :  { %v4268_v5 = vmul.f32 %v4267_v12, %v4258_v20  ;;  %v4319_v1 = vmul.f32 %v4318_v18, %v4309_v3 }
0x10eb   :  { %v8306_v11 = vpop.f32.mrf.mxu1  ;;  %v8312_v60 = vpop.f32.mrf.mxu0 }
0x10ec   :  { %v4274_v17 = vadd.f32 %v4273_v56, %v4268_v5 }
0x10ed   :  { %v4261_v32 = vpop.f32.mrf.mxu1  ;;  %v4312_v37 = vpop.f32.mrf.mxu0 }
0x10ee   :  { %v4320_v48 = vadd.f32 %v4319_v1, %v4274_v17 }
0x10ef   :  { %v8307_v40 = vpop.f32.mrf.mxu1  ;;  %v8313_v46 = vpop.f32.mrf.mxu0 }
0x10f0   :  { %v4325_v15 = vmul.f32 %v4324_v19, %v4320_v48 }
0x10f2   :  { %v4330_v33 = vadd.f32 %v4329_v38, %v4325_v15 }
0x10f4   :  { %v7334_v44 = vmul.f32 -1.442695, %v4330_v33 }
0x10f6   :  { %8842 = vpow2.f32 %v7334_v44 }
0x1103   :  { %v8843_v26 = vpop.eup %8842 }
0x1104   :  { %v4334_v21 = vadd.f32 1.0, %v8843_v26 }
0x1106   :  { %8844 = vrcp.f32 %v4334_v21 }
0x1113   :  { %v8845_v24 = vpop.eup %8844 }
0x1114   :  { %v4337_v63 = vmul.f32 %v8845_v24, %v4330_v33 }
0x1116   :  { %v4346_v58 = vpack.c.bf16 %v4337_v63, %v4337_v63 }
0x1118   :  { %8323 = vmatmul.mubr.msk.bf16.vlgmr.msra.gmra.mxu1 %vm3894_vm10, %v4346_v58 }
0x1119   :  { %8340 = vmatprep.mubr.msk.bf16.mxu1 %vm8901_vm4, %v13202_v22 }
0x11d8   :  { %v4391_v39 = vpop.f32.mrf.mxu1 }
0x11d9   :  { %v4397_v27 = vpack.c.bf16 %v4391_v39, %v4391_v39 }
0x11da   :  { %v8324_v34 = vpop.f32.mrf.mxu1 }
0x11db   :  { %v4399_v6 = vsel %vm165_vm0, %v4397_v27, 0 }
0x11dc   :  { %v4394_v4 = vpop.f32.mrf.mxu1  ;;  %8327 = vmatpush3.bf16.msra.mxu0 %v4399_v6  ;;  %8721 = vmatpush3.bf16.msra.mxu1 %v4399_v6 }
0x11de   :  { %v8325_v7 = vpop.f32.mrf.mxu1 }
0x11df   :  { %8329 = vmatmul.mubr.msk.bf16.vlgmr.msra.gmra.mxu0 %vm3757_vm8, %v11665_v0  ;;  %8341 = vmatmul.mubr.msk.bf16.vlgmr.msra.gmra.mxu1 %vm3757_vm8, %v11693_v45  ;;  %v8812_v0 = vld [vmem:[%s12934_s3 + $0x18] sm:$0xff]   ;;  %v8813_v45 = vld [vmem:[%s12934_s3 + $0x28] sm:$0xff]  }
0x11e0   :  { %8332 = vmatprep.mubr.msk.bf16.mxu0 %vm8901_vm4, %v13202_v22  ;;  %8344 = vmatprep.mubr.msk.bf16.mxu1 %vm8901_vm4, %v13202_v22 }
0x11e7   :  { %8333 = vmatmul.mubr.msk.bf16.gmra.mxu0 %vm3757_vm8, %v11675_v49  ;;  %8345 = vmatmul.mubr.msk.bf16.gmra.mxu1 %vm3757_vm8, %v11702_v53 }
0x11e8   :  { %8336 = vmatprep.mubr.msk.bf16.mxu0 %vm8901_vm4, %v13202_v22  ;;  %8358 = vmatprep.mubr.msk.bf16.mxu1 %vm449_vm3, %v8812_v0 }
0x11ef   :  { %8337 = vmatmul.mubr.msk.bf16.gmra.mxu0 %vm3757_vm8, %v11684_v61 }
0x11f0   :  { %8372 = vmatprep.mubr.msk.bf16.mxu0 %vm449_vm3, %v8813_v45 }
0x129f   :  { %v4435_v49 = vpop.f32.mrf.mxu0  ;;  %v4459_v53 = vpop.f32.mrf.mxu1 }
0x12a0   :  { %v4460_v5 = vadd.f32 %v4459_v53, %v11728_v14  ;;  %v4436_v34 = vadd.f32 %v4435_v49, %v11797_v13 }
0x12a1   :  { %v8330_v10 = vpop.f32.mrf.mxu0  ;;  %v8342_v42 = vpop.f32.mrf.mxu1 }
0x12a2   :  { %v4480_v48 = vadd.f32 %v4460_v5, %v11854_v62  ;;  %v4660_v5 = vld [vmem:[%s12935_s8 + $0x28] sm:$0xff] }
0x12a3   :  { %v4438_v28 = vpop.f32.mrf.mxu0  ;;  %v4462_v12 = vpop.f32.mrf.mxu1 }
0x12a4   :  { %v4463_v3 = vadd.f32 %v4462_v12, %v11717_v43  ;;  %v4490_v44 = vmax.f32 %v4480_v48, 0.0  ;;  %v4439_v62 = vadd.f32 %v4438_v28, %v11783_v52  ;;  %v4662_v12 = vld [vmem:[%s12935_s8 + $0x38] sm:$0xf] }
0x12a5   :  { %v8331_v18 = vpop.f32.mrf.mxu0  ;;  %v8343_v61 = vpop.f32.mrf.mxu1 }
0x12a6   :  { %v4481_v32 = vadd.f32 %v4463_v3, %v11844_v54  ;;  %v4475_v52 = vadd.f32 %v4439_v62, %v11898_v41 }
0x12a7   :  { %v4443_v20 = vpop.f32.mrf.mxu0  ;;  %v4467_v50 = vpop.f32.mrf.mxu1 }
0x12a8   :  { %v4468_v56 = vadd.f32 %v4467_v50, %v11730_v25  ;;  %v4491_v15 = vmax.f32 %v4481_v32, 0.0  ;;  %v4444_v54 = vadd.f32 %v4443_v20, %v11772_v36  ;;  %v4485_v49 = vmax.f32 %v4475_v52, 0.0  ;;  %v8814_v20 = vld [vmem:[%s12934_s3 + $0x20] ss:$0 sps:$4 sm:$0x33]   ;;  %v4656_v32 = vld [vmem:[%s12935_s8 + $0x8] sm:$0xff] }
0x12a9   :  { %v8334_v1 = vpop.f32.mrf.mxu0  ;;  %v8346_v11 = vpop.f32.mrf.mxu1  ;;  %v8815_v50 = vld [vmem:[%s12934_s3 + $0x30] ss:$0 sps:$4 sm:$0x33]  }
0x12aa   :  { %v4482_v60 = vadd.f32 %v4468_v56, %v11826_v51  ;;  %v4476_v6 = vadd.f32 %v4444_v54, %v11890_v57  ;;  %v4659_v56 = vld [vmem:[%s12935_s8 + $0x20] sm:$0xff]  ;;  %v4657_v11 = vld [vmem:[%s12935_s8 + $0x10] sm:$0xff] }
0x12ab   :  { %v4446_v17 = vpop.f32.mrf.mxu0  ;;  %v4470_v19 = vpop.f32.mrf.mxu1  ;;  %v4667_v1 = vpack.c.bf16 %v4660_v5, %v4659_v56 }
0x12ac   :  { %v4471_v37 = vadd.f32 %v4470_v19, %v11758_v47  ;;  %v4492_v46 = vmax.f32 %v4482_v60, 0.0  ;;  %v4447_v14 = vadd.f32 %v4446_v17, %v11746_v8  ;;  %v4486_v13 = vmax.f32 %v4476_v6, 0.0  ;;  %v4658_v60 = vld [vmem:[%s12935_s8 + $0x18] sm:$0xff]  ;;  %v4655_v19 = vld [vmem:[%s12935_s8] sm:$0xff] }
0x12ad   :  { %v8335_v38 = vpop.f32.mrf.mxu0  ;;  %v8347_v40 = vpop.f32.mrf.mxu1  ;;  %v4666_v17 = vpack.c.bf16 %v4658_v60, %v4657_v11 }
0x12ae   :  { %v4483_v43 = vadd.f32 %v4471_v37, %v11828_v30  ;;  %v4507_v21 = vmax.f32 %v4491_v15, %v4492_v46  ;;  %v4506_v30 = vmax.f32 %v4490_v44, %v4491_v15  ;;  %v4477_v39 = vadd.f32 %v4447_v14, %v11885_v35 }
0x12af   :  { %v4451_v25 = vpop.f32.mrf.mxu0  ;;  %v4501_v42 = vmax.f32 %v4485_v49, %v4486_v13  ;;  %v4665_v37 = vpack.c.bf16 %v4656_v32, %v4655_v19 }
0x12b0   :  { %v4493_v33 = vmax.f32 %v4483_v43, 0.0  ;;  %v4452_v51 = vadd.f32 %v4451_v25, %v11748_v31  ;;  %v4513_v36 = vpack.c.bf16 %v4507_v21, %v4506_v30  ;;  %v12048_v21 = vld [vmem:[%s12936_s4 + $0x18] sm:$0xff]  }
0x12b1   :  { %v8338_v26 = vpop.f32.mrf.mxu0 }
0x12b2   :  { %v4508_v47 = vmax.f32 %v4492_v46, %v4493_v33  ;;  %v4509_v24 = vmax.f32 %v4493_v33, 0.0  ;;  %v4478_v63 = vadd.f32 %v4452_v51, %v11874_v9  ;;  %v4487_v9 = vmax.f32 %v4477_v39, 0.0 }
0x12b3   :  { %v4454_v58 = vpop.f32.mrf.mxu0 }
0x12b4   :  { %v4514_v27 = vpack.c.bf16 %v4509_v24, %v4508_v47  ;;  %v4455_v8 = vadd.f32 %v4454_v58, %v11735_v55  ;;  %v4488_v4 = vmax.f32 %v4478_v63, 0.0  ;;  %v4474_v55 = vadd.f32 %v4436_v34, %v11900_v29  ;;  %v4661_v29 = vld [vmem:[%s12935_s8 + $0x30] sm:$0xff]  ;;  %v12055_v47 = vld [vmem:[%s12936_s4 + $0x28] sm:$0xff]   ;;  %v4654_v24 = vld [vmem:[%s12935_s8 + $0x40] sm:$0x3] }
0x12b5   :  { %v8339_v31 = vpop.f32.mrf.mxu0  ;;  %v4668_v61 = vpack.c.bf16 %v4662_v12, %v4661_v29  ;;  %v4729_v62 = vrot.slane %v4654_v24, %v13204_v16  ;;  %v4736_v63 = vrot.slane %v4654_v24, %v13205_v2 }
0x12b6   :  { %v4479_v7 = vadd.f32 %v4455_v8, %v11866_v59  ;;  %8348 = vmatprep.subr.bf16.mxu1 %v4514_v27  ;;  %8362 = vmatprep.subr.bf16.mxu0 %v4514_v27  ;;  %v4503_v0 = vmax.f32 %v4487_v9, %v4488_v4  ;;  %v4502_v59 = vmax.f32 %v4486_v13, %v4487_v9  ;;  %v4484_v10 = vmax.f32 %v4474_v55, 0.0 }
0x12b7   :  { %8349 = vmatpush3.bf16.msra.mxu1 %v4514_v27  ;;  %8363 = vmatpush3.bf16.msra.mxu0 %v4514_v27  ;;  %v4676_v3 = vsel %vm3898_vm9, %v4668_v61, 0 }
0x12b8   :  { %v4489_v35 = vmax.f32 %v4479_v7, 0.0  ;;  %8350 = vmatprep.subr.bf16.mxu1 %v4513_v36  ;;  %8364 = vmatprep.subr.bf16.mxu0 %v4513_v36  ;;  %v4511_v28 = vpack.c.bf16 %v4503_v0, %v4502_v59  ;;  %v4500_v41 = vmax.f32 %v4484_v10, %v4485_v49  ;;  %v12070_v0 = vld [vmem:[%s12936_s4 + $0x20] ss:$0 sps:$4 sm:$0x33]  }
0x12ba   :  { %v4504_v45 = vmax.f32 %v4488_v4, %v4489_v35  ;;  %v4505_v57 = vmax.f32 %v4489_v35, %v4490_v44  ;;  %v4510_v18 = vpack.c.bf16 %v4501_v42, %v4500_v41 }
0x12bb   :  { %8351 = vmatpush3.bf16.msra.mxu1 %v4513_v36  ;;  %8365 = vmatpush3.bf16.msra.mxu0 %v4513_v36 }
0x12bc   :  { %v4512_v53 = vpack.c.bf16 %v4505_v57, %v4504_v45  ;;  %v12075_v45 = vld [vmem:[%s12936_s4 + $0x30] ss:$0 sps:$4 sm:$0x33]  }
0x12bd   :  { %v4743_v57 = vld [vmem:[%s12935_s8 + $0x50] sm:$0x7] }
0x12be   :  { %8352 = vmatprep.subr.bf16.mxu1 %v4512_v53  ;;  %8366 = vmatprep.subr.bf16.mxu0 %v4512_v53  ;;  %v4884_v49 = vrot.slane %v4743_v57, %v13204_v16  ;;  %v4891_v59 = vrot.slane %v4743_v57, %v13205_v2 }
0x12bf   :  { %8353 = vmatpush3.bf16.msra.mxu1 %v4512_v53  ;;  %8367 = vmatpush3.bf16.msra.mxu0 %v4512_v53  ;;  %v4901_v53 = vrot.slane %v4743_v57, %v13206_v23  ;;  %v5097_v57 = vld [vmem:[%s12935_s8 + $0xf8] sm:$0xff] }
0x12c0   :  { %8354 = vmatprep.subr.bf16.mxu1 %v4511_v28  ;;  %8368 = vmatprep.subr.bf16.mxu0 %v4511_v28 }
0x12c3   :  { %8355 = vmatpush3.bf16.msra.mxu1 %v4511_v28  ;;  %8369 = vmatpush3.bf16.msra.mxu0 %v4511_v28 }
0x12c4   :  { %8356 = vmatprep.subr.bf16.mxu1 %v4510_v18  ;;  %8370 = vmatprep.subr.bf16.mxu0 %v4510_v18 }
0x12c7   :  { %8357 = vmatpush3.bf16.msra.mxu1 %v4510_v18  ;;  %8371 = vmatpush3.bf16.msra.mxu0 %v4510_v18 }
0x12c8   :  { %8722 = vmatprep.subr.msk.bf16.mxu1 %vm3898_vm9, %v4668_v61 }
0x12ca   :  { %8359 = vmatmul.mubr.msk.bf16.vlgmr.msra.gmra.mxu1 %vm449_vm3, %v8814_v20  ;;  %8373 = vmatmul.mubr.msk.bf16.vlgmr.msra.gmra.mxu0 %vm449_vm3, %v8815_v50 }
0x12cb   :  { %8377 = vmatpush3.bf16.msra.mxu1 %v4676_v3  ;;  %8400 = vmatprep.mubr.msk.bf16.mxu0 %vm4760_vm11, %v12055_v47  ;;  %v4746_v3 = vld [vmem:[%s12935_s8 + $0x70] sm:$0xf] }
0x12cc   :  { %8378 = vmatprep.subr.bf16.mxu1 %v4667_v1 }
0x12cf   :  { %8379 = vmatpush3.bf16.msra.mxu1 %v4667_v1 }
0x12d0   :  { %8380 = vmatprep.subr.bf16.mxu1 %v4666_v17 }
0x12d3   :  { %8381 = vmatpush3.bf16.msra.mxu1 %v4666_v17  ;;  %v4749_v17 = vld [vmem:[%s12935_s8 + $0x90] sm:$0xf] }
0x12d4   :  { %8382 = vmatprep.subr.bf16.mxu1 %v4665_v37 }
0x12d7   :  { %8383 = vmatpush3.bf16.msra.mxu1 %v4665_v37 }
0x138a   :  { %v8360_v48 = vpop.f32.mrf.mxu1  ;;  %v8374_v38 = vpop.f32.mrf.mxu0 }
0x138b   :  { %v4641_v15 = vmax.f32 %v8360_v48, %v8374_v38 }
0x138c   :  { %v4563_v40 = vpop.f32.mrf.mxu1  ;;  %v4625_v46 = vpop.f32.mrf.mxu0 }
0x138d   :  { %v4639_v44 = vmax.f32 %v4563_v40, %v4625_v46  ;;  %v4664_v54 = vpack.c.bf16 %v4641_v15, %v4641_v15  ;;  %v4744_v46 = vld [vmem:[%s12935_s8 + $0x60] sm:$0xff] }
0x138e   :  { %v8361_v43 = vpop.f32.mrf.mxu1  ;;  %v8375_v25 = vpop.f32.mrf.mxu0 }
0x1390   :  { %v4566_v14 = vpop.f32.mrf.mxu1  ;;  %v4628_v33 = vpop.f32.mrf.mxu0 }
0x1391   :  { %v4640_v51 = vmax.f32 %v4566_v14, %v4628_v33  ;;  %v4745_v14 = vld [vmem:[%s12935_s8 + $0x68] sm:$0xff] }
0x1393   :  { %v4663_v26 = vpack.c.bf16 %v4640_v51, %v4639_v44 }
0x1395   :  { %8384 = vmatprep.mubr.msk.bf16.mxu1 %vm3894_vm10, %v4663_v26  ;;  %v4747_v26 = vld [vmem:[%s12935_s8 + $0x80] sm:$0xff] }
0x1396   :  { %8385 = vmatmul.mubr.msk.bf16.vlgmr.msra.gmra.mxu1 %vm3894_vm10, %v4664_v54  ;;  %v4748_v54 = vld [vmem:[%s12935_s8 + $0x88] sm:$0xff] }
0x1397   :  { %8392 = vmatprep.mubr.msk.bf16.mxu1 %vm4760_vm11, %v12048_v21 }
0x1456   :  { %v8386_v58 = vpop.f32.mrf.mxu1 }
0x1457   :  { %v4732_v30 = vmul.f32 %v8386_v58, %v4729_v62 }
0x1458   :  { %v4712_v39 = vpop.f32.mrf.mxu1 }
0x1459   :  { %v4739_v27 = vadd.f32 %v4736_v63, %v4732_v30  ;;  %v4730_v8 = vmul.f32 %v4729_v62, %v4712_v39  ;;  %v12126_v39 = vld [vmem:[%s12936_s4] sm:$0x3] }
0x145a   :  { %v8387_v34 = vpop.f32.mrf.mxu1 }
0x145b   :  { %v4742_v31 = vmax.f32 %v4739_v27, 0.0  ;;  %v4737_v4 = vadd.f32 %v4736_v63, %v4730_v8 }
0x145c   :  { %v4715_v6 = vpop.f32.mrf.mxu1 }
0x145d   :  { %v4751_v36 = vpack.c.bf16 %v4742_v31, %v4742_v31  ;;  %v4731_v7 = vmul.f32 %v4729_v62, %v4715_v6  ;;  %v4740_v35 = vmax.f32 %v4737_v4, 0.0  ;;  %v4894_v41 = vmul.f32 %v4891_v59, %v4742_v31  ;;  %v12137_v4 = vld [vmem:[%s12936_s4 + $0x8] sm:$0x3] }
0x145f   :  { %v4738_v52 = vadd.f32 %v4736_v63, %v4731_v7  ;;  %8723 = vmatprep.subr.msk.bf16.mxu1 %vm4767_vm12, %v4751_v36  ;;  %v4769_v9 = vsel %vm4767_vm12, %v4751_v36, 0  ;;  %8724 = vmatprep.subr.msk.bf16.mxu0 %vm4767_vm12, %v4751_v36  ;;  %v4892_v50 = vmul.f32 %v4891_v59, %v4740_v35  ;;  %v12142_v7 = vld [vmem:[%s12936_s4 + $0x10] sm:$0x3] }
0x1460   :  { %8389 = vmatpush3.bf16.msra.mxu1 %v4769_v9  ;;  %8397 = vmatpush3.bf16.msra.mxu0 %v4769_v9  ;;  %v5098_v9 = vld [vmem:[%s12935_s8 + $0x100] sm:$0xff] }
0x1461   :  { %v4741_v55 = vmax.f32 %v4738_v52, 0.0 }
0x1463   :  { %v4750_v13 = vpack.c.bf16 %v4741_v55, %v4740_v35  ;;  %v4893_v40 = vmul.f32 %v4891_v59, %v4741_v55  ;;  %v5099_v35 = vld [vmem:[%s12935_s8 + $0x108] sm:$0xff]  ;;  %v5096_v55 = vld [vmem:[%s12935_s8 + $0xf0] sm:$0xff]  ;;  %v5094_v59 = vld [vmem:[%s12935_s8 + $0xe0] sm:$0xff] }
0x1465   :  { %8390 = vmatprep.subr.bf16.mxu1 %v4750_v13  ;;  %8398 = vmatprep.subr.bf16.mxu0 %v4750_v13 }
0x1466   :  { %8391 = vmatpush3.bf16.msra.mxu1 %v4750_v13  ;;  %8399 = vmatpush3.bf16.msra.mxu0 %v4750_v13  ;;  %v5105_v13 = vpack.c.bf16 %v5099_v35, %v5098_v9 }
0x1467   :  { %8404 = vmatprep.subr.bf16.mxu1 %v13202_v22  ;;  %8412 = vmatprep.subr.bf16.mxu0 %v13202_v22 }
0x1469   :  { %8393 = vmatmul.mubr.msk.bf16.vlgmr.msra.gmra.mxu1 %vm4760_vm11, %v12070_v0  ;;  %8401 = vmatmul.mubr.msk.bf16.vlgmr.msra.gmra.mxu0 %vm4760_vm11, %v12075_v45 }
0x146a   :  { %8408 = vmatprep.mubr.msk.bf16.mxu1 %vm8901_vm4, %v13202_v22  ;;  %8414 = vmatprep.mubr.msk.bf16.mxu0 %vm8901_vm4, %v13202_v22 }
0x1529   :  { %v8394_v10 = vpop.f32.mrf.mxu1  ;;  %v8402_v42 = vpop.f32.mrf.mxu0 }
0x152a   :  { %v4887_v28 = vmul.f32 %v8394_v10, %v4884_v49  ;;  %v4904_v29 = vmul.f32 %v8402_v42, %v4901_v53  ;;  %v5092_v42 = vld [vmem:[%s12935_s8 + $0xd0] sm:$0xff] }
0x152b   :  { %v4805_v12 = vpop.f32.mrf.mxu1  ;;  %v4867_v18 = vpop.f32.mrf.mxu0 }
0x152c   :  { %v4897_v61 = vadd.f32 %v4894_v41, %v4887_v28  ;;  %v4885_v20 = vmul.f32 %v4884_v49, %v4805_v12  ;;  %v4902_v60 = vmul.f32 %v4901_v53, %v4867_v18  ;;  %v5093_v28 = vld [vmem:[%s12935_s8 + $0xd8] sm:$0xff]  ;;  %v5091_v12 = vld [vmem:[%s12935_s8 + $0xc8] sm:$0xff] }
0x152d   :  { %v8395_v56 = vpop.f32.mrf.mxu1  ;;  %v8403_v5 = vpop.f32.mrf.mxu0  ;;  %v5102_v41 = vpack.c.bf16 %v5093_v28, %v5092_v42 }
0x152e   :  { %v4895_v1 = vadd.f32 %v4892_v50, %v4885_v20  ;;  %v4907_v11 = vadd.f32 %v4904_v29, %v4897_v61  ;;  %v5090_v29 = vld [vmem:[%s12935_s8 + $0xc0] sm:$0xff]  ;;  %v4915_v5 = vld [vmem:[%s12935_s8 + $0xb0] sm:$0x3] }
0x152f   :  { %v4808_v19 = vpop.f32.mrf.mxu1  ;;  %v4870_v32 = vpop.f32.mrf.mxu0  ;;  %v5101_v18 = vpack.c.bf16 %v5091_v12, %v5090_v29  ;;  %v4914_v61 = vld [vmem:[%s12935_s8 + $0xa0] sm:$0x7] }
0x1530   :  { %v4910_v37 = vmul.f32 %v4907_v11, %v4746_v3  ;;  %v4905_v48 = vadd.f32 %v4902_v60, %v4895_v1  ;;  %v4886_v38 = vmul.f32 %v4884_v49, %v4808_v19  ;;  %v4903_v15 = vmul.f32 %v4901_v53, %v4870_v32  ;;  %v5095_v53 = vld [vmem:[%s12935_s8 + $0xe8] sm:$0xff] }
0x1531   :  { %v5104_v49 = vpack.c.bf16 %v5097_v57, %v5096_v55  ;;  %v5103_v10 = vpack.c.bf16 %v5095_v53, %v5094_v59  ;;  %v5021_v20 = vrot.slane %v4914_v61, %v13205_v2  ;;  %v5016_v50 = vrot.slane %v4914_v61, %v13204_v16 }
0x1532   :  { %v12102_v43 = vadd.f32 %v4910_v37, %v4749_v17  ;;  %v4896_v25 = vadd.f32 %v4893_v40, %v4886_v38  ;;  %v4908_v33 = vmul.f32 %v4905_v48, %v4744_v46  ;;  %v5070_v3 = vrot.slane %v4914_v61, %v13206_v23 }
0x1533   :  { %v5076_v48 = vrot.slane %v4915_v5, %v13204_v16 }
0x1534   :  { %v4906_v44 = vadd.f32 %v4903_v15, %v4896_v25  ;;  %v4917_v51 = vpack.c.bf16 %v12102_v43, %v12102_v43  ;;  %v12116_v63 = vadd.f32 %v4908_v33, %v4747_v26  ;;  %v5081_v25 = vrot.slane %v4915_v5, %v13205_v2 }
0x1536   :  { %v4909_v24 = vmul.f32 %v4906_v44, %v4745_v14  ;;  %v4922_v62 = vsel %vm4767_vm12, %v4917_v51, 0 }
0x1537   :  { %8405 = vmatpush3.bf16.msra.mxu1 %v4922_v62 }
0x1538   :  { %v12118_v58 = vadd.f32 %v4909_v24, %v4748_v54  ;;  %8406 = vmatprep.subr.bf16.mxu1 %v13202_v22 }
0x153a   :  { %v4916_v30 = vpack.c.bf16 %v12118_v58, %v12116_v63 }
0x153c   :  { %8407 = vmatpush3.bf16.msra.mxu1 %v4916_v30 }
0x153d   :  { %8418 = vmatprep.subr.bf16.mxu1 %v13202_v22 }
0x153f   :  { %8409 = vmatmul.mubr.msk.bf16.vlgmr.msra.gmra.mxu1 %vm4760_vm11, %v12126_v39 }
0x1540   :  { %8420 = vmatprep.mubr.msk.bf16.mxu1 %vm8901_vm4, %v13202_v22 }
0x15ff   :  { %v4958_v27 = vpop.f32.mrf.mxu1 }
0x1600   :  { %v4964_v8 = vmul.f32 0.2, %v4958_v27  ;;  %v12202_v27 = vld [vmem:[%s12932_s5 + $0xc8] sm:$0xff]  }
0x1601   :  { %v8410_v34 = vpop.f32.mrf.mxu1 }
0x1602   :  { %v4965_v31 = vpack.c.bf16 %v4964_v8, %v4964_v8  ;;  %v5022_v11 = vmul.f32 %v5021_v20, %v4964_v8 }
0x1603   :  { %v4961_v6 = vpop.f32.mrf.mxu1 }
0x1604   :  { %v4971_v36 = vsel %vm4767_vm12, %v4965_v31, 0 }
0x1605   :  { %8413 = vmatpush3.bf16.msra.mxu0 %v4971_v36  ;;  %8419 = vmatpush3.bf16.msra.mxu1 %v4971_v36  ;;  %v8411_v52 = vpop.f32.mrf.mxu1  ;;  %v12211_v36 = vld [vmem:[%s12932_s5 + $0xd0] ss:$0 sps:$4 sm:$0x33]  }
0x1606   :  { %8424 = vmatprep.subr.bf16.mxu0 %v13202_v22 }
0x1608   :  { %8415 = vmatmul.mubr.msk.bf16.vlgmr.msra.gmra.mxu0 %vm4966_vm13, %v12137_v4  ;;  %8421 = vmatmul.mubr.msk.bf16.vlgmr.msra.gmra.mxu1 %vm4966_vm13, %v12142_v7 }
0x1609   :  { %8434 = vmatprep.mubr.msk.bf16.mxu0 %vm8901_vm4, %v13202_v22  ;;  %8425 = vmatpush3.bf16.msra.mxu0 %v5105_v13 }
0x160a   :  { %8426 = vmatprep.subr.bf16.mxu0 %v13202_v22  ;;  %8440 = vmatprep.mubr.msk.bf16.mxu1 %vm4966_vm13, %v12202_v27 }
0x160d   :  { %8427 = vmatpush3.bf16.msra.mxu0 %v5104_v49 }
0x160e   :  { %8428 = vmatprep.subr.bf16.mxu0 %v13202_v22 }
0x1611   :  { %8429 = vmatpush3.bf16.msra.mxu0 %v5103_v10 }
0x1612   :  { %8430 = vmatprep.subr.bf16.mxu0 %v13202_v22 }
0x1615   :  { %8431 = vmatpush3.bf16.msra.mxu0 %v5102_v41 }
0x1616   :  { %8432 = vmatprep.subr.bf16.mxu0 %v13202_v22 }
0x1619   :  { %8433 = vmatpush3.bf16.msra.mxu0 %v5101_v18 }
0x16c8   :  { %v5007_v56 = vpop.f32.mrf.mxu0  ;;  %v5061_v1 = vpop.f32.mrf.mxu1 }
0x16c9   :  { %v5017_v60 = vmul.f32 %v5016_v50, %v5007_v56  ;;  %v5071_v17 = vmul.f32 %v5070_v3, %v5061_v1 }
0x16ca   :  { %v8416_v19 = vpop.f32.mrf.mxu0  ;;  %v8422_v32 = vpop.f32.mrf.mxu1 }
0x16cb   :  { %v5023_v37 = vadd.f32 %v5022_v11, %v5017_v60  ;;  %v5221_v19 = vld [vmem:[%s12935_s8 + $0x130] sm:$0xf] }
0x16cc   :  { %v5010_v38 = vpop.f32.mrf.mxu0  ;;  %v5064_v40 = vpop.f32.mrf.mxu1 }
0x16cd   :  { %v5072_v46 = vadd.f32 %v5071_v17, %v5023_v37 }
0x16ce   :  { %v8417_v15 = vpop.f32.mrf.mxu0  ;;  %v8423_v14 = vpop.f32.mrf.mxu1 }
0x16cf   :  { %v5077_v33 = vmul.f32 %v5076_v48, %v5072_v46  ;;  %v5224_v46 = vld [vmem:[%s12935_s8 + $0x150] sm:$0xf] }
0x16d1   :  { %v5082_v44 = vadd.f32 %v5081_v25, %v5077_v33 }
0x16d3   :  { %v7362_v51 = vmul.f32 -1.442695, %v5082_v44 }
0x16d5   :  { %8846 = vpow2.f32 %v7362_v51 }
0x16e2   :  { %v8847_v26 = vpop.eup %8846 }
0x16e3   :  { %v5086_v54 = vadd.f32 1.0, %v8847_v26  ;;  %v5219_v26 = vld [vmem:[%s12935_s8 + $0x120] sm:$0xff] }
0x16e5   :  { %8848 = vrcp.f32 %v5086_v54 }
0x16f2   :  { %v8849_v24 = vpop.eup %8848 }
0x16f3   :  { %v5089_v62 = vmul.f32 %v8849_v24, %v5082_v44 }
0x16f5   :  { %v5100_v30 = vpack.c.bf16 %v5089_v62, %v5089_v62 }
0x16f7   :  { %8435 = vmatmul.mubr.msk.bf16.vlgmr.msra.gmra.mxu0 %vm449_vm3, %v5100_v30  ;;  %v5220_v30 = vld [vmem:[%s12935_s8 + $0x128] sm:$0xff] }
0x16f8   :  { %8456 = vmatprep.mubr.msk.bf16.mxu0 %vm4760_vm11, %v12055_v47 }
0x17b7   :  { %v5143_v8 = vpop.f32.mrf.mxu0 }
0x17b8   :  { %v5149_v34 = vpack.c.bf16 %v5143_v8, %v5143_v8 }
0x17b9   :  { %v8436_v31 = vpop.f32.mrf.mxu0 }
0x17ba   :  { %v5165_v6 = vsel %vm4767_vm12, %v5149_v34, 0  ;;  %8725 = vmatprep.subr.msk.bf16.mxu1 %vm4767_vm12, %v5149_v34 }
0x17bb   :  { %v5146_v52 = vpop.f32.mrf.mxu0  ;;  %8439 = vmatpush3.bf16.msra.mxu1 %v5165_v6  ;;  %v5222_v6 = vld [vmem:[%s12935_s8 + $0x140] sm:$0xff] }
0x17bc   :  { %v5223_v52 = vld [vmem:[%s12935_s8 + $0x148] sm:$0xff] }
0x17bd   :  { %v8437_v9 = vpop.f32.mrf.mxu0 }
0x17be   :  { %8441 = vmatmul.mubr.msk.bf16.vlgmr.msra.gmra.mxu1 %vm4966_vm13, %v12211_v36 }
0x17bf   :  { %8448 = vmatprep.mubr.msk.bf16.mxu1 %vm4760_vm11, %v12048_v21 }
0x187e   :  { %v8442_v35 = vpop.f32.mrf.mxu1 }
0x187f   :  { %v5210_v55 = vadd.f32 %v8442_v35, %v12102_v43 }
0x1880   :  { %v5201_v13 = vpop.f32.mrf.mxu1 }
0x1881   :  { %v12218_v57 = vmax.f32 %v5210_v55, 0.0  ;;  %v5202_v53 = vadd.f32 %v5201_v13, %v12116_v63  ;;  %v5218_v63 = vld [vmem:[%s12935_s8 + $0x110] sm:$0x7] }
0x1882   :  { %v8443_v49 = vpop.f32.mrf.mxu1  ;;  %v5336_v12 = vrot.slane %v5218_v63, %v13205_v2  ;;  %v5346_v18 = vrot.slane %v5218_v63, %v13206_v23 }
0x1883   :  { %v5226_v59 = vpack.c.bf16 %v12218_v57, %v12218_v57  ;;  %v12227_v43 = vmax.f32 %v5202_v53, 0.0 }
0x1884   :  { %v5204_v10 = vpop.f32.mrf.mxu1  ;;  %v5339_v3 = vmul.f32 %v5336_v12, %v12218_v57 }
0x1885   :  { %v5205_v42 = vadd.f32 %v5204_v10, %v12118_v58  ;;  %8726 = vmatprep.subr.msk.bf16.mxu1 %vm4767_vm12, %v5226_v59  ;;  %8727 = vmatprep.subr.msk.bf16.mxu0 %vm4767_vm12, %v5226_v59  ;;  %v5228_v28 = vsel %vm4767_vm12, %v5226_v59, 0  ;;  %v5329_v58 = vrot.slane %v5218_v63, %v13204_v16  ;;  %v5337_v17 = vmul.f32 %v5336_v12, %v12227_v43 }
0x1886   :  { %8445 = vmatpush3.bf16.msra.mxu1 %v5228_v28  ;;  %8453 = vmatpush3.bf16.msra.mxu0 %v5228_v28 }
0x1887   :  { %v12229_v41 = vmax.f32 %v5205_v42, 0.0 }
0x1889   :  { %v5225_v29 = vpack.c.bf16 %v12229_v41, %v12227_v43  ;;  %v5338_v51 = vmul.f32 %v5336_v12, %v12229_v41  ;;  %v5534_v12 = vld [vmem:[%s12935_s8 + $0x1c8] sm:$0xff] }
0x188b   :  { %8446 = vmatprep.subr.bf16.mxu1 %v5225_v29  ;;  %8454 = vmatprep.subr.bf16.mxu0 %v5225_v29 }
0x188c   :  { %8447 = vmatpush3.bf16.msra.mxu1 %v5225_v29  ;;  %8455 = vmatpush3.bf16.msra.mxu0 %v5225_v29 }
0x188d   :  { %8460 = vmatprep.subr.bf16.mxu1 %v13202_v22  ;;  %8468 = vmatprep.subr.bf16.mxu0 %v13202_v22 }
0x188f   :  { %8449 = vmatmul.mubr.msk.bf16.vlgmr.msra.gmra.mxu1 %vm4760_vm11, %v12070_v0  ;;  %8457 = vmatmul.mubr.msk.bf16.vlgmr.msra.gmra.mxu0 %vm4760_vm11, %v12075_v45 }
0x1890   :  { %8464 = vmatprep.mubr.msk.bf16.mxu1 %vm8901_vm4, %v13202_v22  ;;  %8470 = vmatprep.mubr.msk.bf16.mxu0 %vm8901_vm4, %v13202_v22 }
0x194f   :  { %v8450_v61 = vpop.f32.mrf.mxu1  ;;  %v8458_v20 = vpop.f32.mrf.mxu0 }
0x1950   :  { %v5332_v50 = vmul.f32 %v8450_v61, %v5329_v58  ;;  %v5349_v56 = vmul.f32 %v8458_v20, %v5346_v18  ;;  %v5532_v20 = vld [vmem:[%s12935_s8 + $0x1b8] sm:$0xff] }
0x1951   :  { %v5264_v5 = vpop.f32.mrf.mxu1  ;;  %v5312_v1 = vpop.f32.mrf.mxu0 }
0x1952   :  { %v5342_v11 = vadd.f32 %v5339_v3, %v5332_v50  ;;  %v5330_v60 = vmul.f32 %v5329_v58, %v5264_v5  ;;  %v5347_v40 = vmul.f32 %v5346_v18, %v5312_v1  ;;  %v5529_v3 = vld [vmem:[%s12935_s8 + $0x1a0] sm:$0xff]  ;;  %v5527_v1 = vld [vmem:[%s12935_s8 + $0x190] sm:$0xff] }
0x1953   :  { %v8451_v32 = vpop.f32.mrf.mxu1  ;;  %v8459_v37 = vpop.f32.mrf.mxu0 }
0x1954   :  { %v5340_v48 = vadd.f32 %v5337_v17, %v5330_v60  ;;  %v5352_v38 = vadd.f32 %v5349_v56, %v5342_v11  ;;  %v5530_v56 = vld [vmem:[%s12935_s8 + $0x1a8] sm:$0xff]  ;;  %v5528_v11 = vld [vmem:[%s12935_s8 + $0x198] sm:$0xff]  ;;  %v5525_v17 = vld [vmem:[%s12935_s8 + $0x180] sm:$0xff] }
0x1955   :  { %v5267_v25 = vpop.f32.mrf.mxu1  ;;  %v5315_v15 = vpop.f32.mrf.mxu0  ;;  %v5538_v5 = vpack.c.bf16 %v5530_v56, %v5529_v3  ;;  %v5537_v60 = vpack.c.bf16 %v5528_v11, %v5527_v1  ;;  %v5359_v37 = vld [vmem:[%s12935_s8 + $0x160] sm:$0x7]  ;;  %v5650_v56 = vld [vmem:[%s12935_s8 + $0x208] sm:$0xff]  ;;  %v5648_v11 = vld [vmem:[%s12935_s8 + $0x1f8] sm:$0xff] }
0x1956   :  { %v5355_v14 = vmul.f32 %v5352_v38, %v5221_v19  ;;  %v5350_v33 = vadd.f32 %v5347_v40, %v5340_v48  ;;  %v5331_v44 = vmul.f32 %v5329_v58, %v5267_v25  ;;  %v5348_v62 = vmul.f32 %v5346_v18, %v5315_v15  ;;  %v5533_v58 = vld [vmem:[%s12935_s8 + $0x1c0] sm:$0xff]  ;;  %v5531_v18 = vld [vmem:[%s12935_s8 + $0x1b0] sm:$0xff]  ;;  %v5526_v19 = vld [vmem:[%s12935_s8 + $0x188] sm:$0xff] }
0x1957   :  { %v5540_v61 = vpack.c.bf16 %v5534_v12, %v5533_v58  ;;  %v5539_v50 = vpack.c.bf16 %v5532_v20, %v5531_v18  ;;  %v5536_v32 = vpack.c.bf16 %v5526_v19, %v5525_v17  ;;  %v5459_v48 = vrot.slane %v5359_v37, %v13205_v2  ;;  %v5360_v25 = vld [vmem:[%s12935_s8 + $0x170] sm:$0x3]  ;;  %v5649_v3 = vld [vmem:[%s12935_s8 + $0x200] sm:$0xff]  ;;  %v5646_v19 = vld [vmem:[%s12935_s8 + $0x1e8] sm:$0xff] }
0x1958   :  { %v12261_v54 = vadd.f32 %v5355_v14, %v5224_v46  ;;  %v5341_v24 = vadd.f32 %v5338_v51, %v5331_v44  ;;  %v5353_v8 = vmul.f32 %v5350_v33, %v5219_v26  ;;  %v5454_v38 = vrot.slane %v5359_v37, %v13204_v16  ;;  %v5645_v17 = vld [vmem:[%s12935_s8 + $0x1e0] sm:$0xff] }
0x1959   :  { %v5505_v40 = vrot.slane %v5359_v37, %v13206_v23  ;;  %v5658_v1 = vpack.c.bf16 %v5650_v56, %v5649_v3  ;;  %v5656_v37 = vpack.c.bf16 %v5646_v19, %v5645_v17  ;;  %v5734_v17 = vld [vmem:[%s12935_s8 + $0x250] sm:$0xf] }
0x195a   :  { %v5351_v34 = vadd.f32 %v5348_v62, %v5341_v24  ;;  %v5362_v31 = vpack.c.bf16 %v12261_v54, %v12261_v54  ;;  %v12275_v55 = vadd.f32 %v5353_v8, %v5222_v6  ;;  %v5511_v62 = vrot.slane %v5360_v25, %v13204_v16 }
0x195c   :  { %v5354_v9 = vmul.f32 %v5351_v34, %v5220_v30  ;;  %v5364_v35 = vsel %vm4767_vm12, %v5362_v31, 0  ;;  %v5516_v31 = vrot.slane %v5360_v25, %v13205_v2 }
0x195d   :  { %8461 = vmatpush3.bf16.msra.mxu1 %v5364_v35 }
0x195e   :  { %v12277_v13 = vadd.f32 %v5354_v9, %v5223_v52  ;;  %8462 = vmatprep.subr.bf16.mxu1 %v13202_v22 }
0x1960   :  { %v5361_v49 = vpack.c.bf16 %v12277_v13, %v12275_v55 }
0x1962   :  { %8463 = vmatpush3.bf16.msra.mxu1 %v5361_v49 }
0x1963   :  { %8474 = vmatprep.subr.bf16.mxu1 %v13202_v22 }
0x1965   :  { %8465 = vmatmul.mubr.msk.bf16.vlgmr.msra.gmra.mxu1 %vm4760_vm11, %v12126_v39 }
0x1966   :  { %8476 = vmatprep.mubr.msk.bf16.mxu1 %vm8901_vm4, %v13202_v22 }
0x1a25   :  { %v5400_v59 = vpop.f32.mrf.mxu1 }
0x1a26   :  { %v5406_v53 = vmul.f32 0.2, %v5400_v59 }
0x1a27   :  { %v8466_v10 = vpop.f32.mrf.mxu1 }
0x1a28   :  { %v5407_v42 = vpack.c.bf16 %v5406_v53, %v5406_v53  ;;  %v5460_v14 = vmul.f32 %v5459_v48, %v5406_v53  ;;  %v5644_v48 = vld [vmem:[%s12935_s8 + $0x1d8] sm:$0xff] }
0x1a29   :  { %v5403_v28 = vpop.f32.mrf.mxu1 }
0x1a2a   :  { %v5409_v29 = vsel %vm4767_vm12, %v5407_v42, 0 }
0x1a2b   :  { %8469 = vmatpush3.bf16.msra.mxu0 %v5409_v29  ;;  %8475 = vmatpush3.bf16.msra.mxu1 %v5409_v29  ;;  %v8467_v63 = vpop.f32.mrf.mxu1  ;;  %v5651_v29 = vld [vmem:[%s12935_s8 + $0x210] sm:$0xff] }
0x1a2c   :  { %8480 = vmatprep.subr.bf16.mxu0 %v13202_v22  ;;  %v5652_v63 = vld [vmem:[%s12935_s8 + $0x218] sm:$0xff] }
0x1a2d   :  { %v5659_v18 = vpack.c.bf16 %v5652_v63, %v5651_v29 }
0x1a2e   :  { %8471 = vmatmul.mubr.msk.bf16.vlgmr.msra.gmra.mxu0 %vm4966_vm13, %v12137_v4  ;;  %8477 = vmatmul.mubr.msk.bf16.vlgmr.msra.gmra.mxu1 %vm4966_vm13, %v12142_v7 }
0x1a2f   :  { %8490 = vmatprep.mubr.msk.bf16.mxu0 %vm8901_vm4, %v13202_v22  ;;  %8496 = vmatprep.mubr.msk.bf16.mxu1 %vm4966_vm13, %v12202_v27 }
0x1a30   :  { %8481 = vmatpush3.bf16.msra.mxu0 %v5540_v61 }
0x1a31   :  { %8482 = vmatprep.subr.bf16.mxu0 %v13202_v22 }
0x1a34   :  { %8483 = vmatpush3.bf16.msra.mxu0 %v5539_v50 }
0x1a35   :  { %8484 = vmatprep.subr.bf16.mxu0 %v13202_v22 }
0x1a38   :  { %8485 = vmatpush3.bf16.msra.mxu0 %v5538_v5  ;;  %v5647_v5 = vld [vmem:[%s12935_s8 + $0x1f0] sm:$0xff] }
0x1a39   :  { %8486 = vmatprep.subr.bf16.mxu0 %v13202_v22 }
0x1a3c   :  { %8487 = vmatpush3.bf16.msra.mxu0 %v5537_v60  ;;  %v5657_v60 = vpack.c.bf16 %v5648_v11, %v5647_v5 }
0x1a3d   :  { %8488 = vmatprep.subr.bf16.mxu0 %v13202_v22 }
0x1a40   :  { %8489 = vmatpush3.bf16.msra.mxu0 %v5536_v32  ;;  %v5643_v32 = vld [vmem:[%s12935_s8 + $0x1d0] sm:$0xff] }
0x1aee   :  { %v5445_v46 = vpop.f32.mrf.mxu0  ;;  %v5496_v15 = vpop.f32.mrf.mxu1 }
0x1aef   :  { %v5455_v33 = vmul.f32 %v5454_v38, %v5445_v46  ;;  %v5506_v44 = vmul.f32 %v5505_v40, %v5496_v15  ;;  %v5655_v38 = vpack.c.bf16 %v5644_v48, %v5643_v32 }
0x1af0   :  { %v8472_v51 = vpop.f32.mrf.mxu0  ;;  %v8478_v26 = vpop.f32.mrf.mxu1 }
0x1af1   :  { %v5461_v24 = vadd.f32 %v5460_v14, %v5455_v33 }
0x1af2   :  { %v5448_v30 = vpop.f32.mrf.mxu0  ;;  %v5499_v8 = vpop.f32.mrf.mxu1 }
0x1af3   :  { %v5507_v34 = vadd.f32 %v5506_v44, %v5461_v24 }
0x1af4   :  { %v8473_v6 = vpop.f32.mrf.mxu0  ;;  %v8479_v52 = vpop.f32.mrf.mxu1 }
0x1af5   :  { %v5512_v9 = vmul.f32 %v5511_v62, %v5507_v34 }
0x1af7   :  { %v5517_v35 = vadd.f32 %v5516_v31, %v5512_v9 }
0x1af9   :  { %v7375_v49 = vmul.f32 -1.442695, %v5517_v35 }
0x1afb   :  { %8850 = vpow2.f32 %v7375_v49 }
0x1b08   :  { %v8851_v59 = vpop.eup %8850 }
0x1b09   :  { %v5521_v53 = vadd.f32 1.0, %v8851_v59 }
0x1b0b   :  { %8852 = vrcp.f32 %v5521_v53 }
0x1b18   :  { %v8853_v10 = vpop.eup %8852 }
0x1b19   :  { %v5524_v42 = vmul.f32 %v8853_v10, %v5517_v35 }
0x1b1b   :  { %v5535_v28 = vpack.c.bf16 %v5524_v42, %v5524_v42 }
0x1b1d   :  { %8491 = vmatmul.mubr.msk.bf16.vlgmr.msra.gmra.mxu0 %vm449_vm3, %v5535_v28 }
0x1b1e   :  { %8518 = vmatprep.mubr.msk.bf16.mxu0 %vm4760_vm11, %v12048_v21 }
0x1bdd   :  { %v5578_v58 = vpop.f32.mrf.mxu0 }
0x1bde   :  { %v5584_v12 = vpack.c.bf16 %v5578_v58, %v5578_v58 }
0x1bdf   :  { %v8492_v61 = vpop.f32.mrf.mxu0 }
0x1be0   :  { %v5586_v20 = vsel %vm4767_vm12, %v5584_v12, 0  ;;  %8728 = vmatprep.subr.msk.bf16.mxu1 %vm4767_vm12, %v5584_v12  ;;  %v5731_v12 = vld [vmem:[%s12935_s8 + $0x230] sm:$0x7] }
0x1be1   :  { %v5581_v50 = vpop.f32.mrf.mxu0  ;;  %8495 = vmatpush3.bf16.msra.mxu1 %v5586_v20 }
0x1be2   :  { %8500 = vmatprep.subr.bf16.mxu1 %v5659_v18 }
0x1be3   :  { %v8493_v21 = vpop.f32.mrf.mxu0 }
0x1be4   :  { %8497 = vmatmul.mubr.msk.bf16.vlgmr.msra.gmra.mxu1 %vm4966_vm13, %v12211_v36  ;;  %v5859_v21 = vrot.slane %v5731_v12, %v13206_v23 }
0x1be5   :  { %8501 = vmatpush3.bf16.msra.mxu1 %v5659_v18 }
0x1be6   :  { %8502 = vmatprep.subr.bf16.mxu1 %v5658_v1 }
0x1be9   :  { %8503 = vmatpush3.bf16.msra.mxu1 %v5658_v1 }
0x1bea   :  { %8504 = vmatprep.subr.bf16.mxu1 %v5657_v60 }
0x1bed   :  { %8505 = vmatpush3.bf16.msra.mxu1 %v5657_v60 }
0x1bee   :  { %8506 = vmatprep.subr.bf16.mxu1 %v5656_v37 }
0x1bf1   :  { %8507 = vmatpush3.bf16.msra.mxu1 %v5656_v37 }
0x1bf2   :  { %8508 = vmatprep.subr.bf16.mxu1 %v5655_v38 }
0x1bf5   :  { %8509 = vmatpush3.bf16.msra.mxu1 %v5655_v38 }
0x1bf6   :  { %8530 = vmatprep.subr.bf16.mxu1 %v13202_v22 }
0x1ca4   :  { %v8498_v40 = vpop.f32.mrf.mxu1 }
0x1ca5   :  { %v5631_v46 = vadd.f32 %v8498_v40, %v12218_v57  ;;  %v5642_v57 = vld [vmem:[%s12935_s8 + $0x220] sm:$0x3]  ;;  %v5737_v40 = vld [vmem:[%s12935_s8 + $0x270] sm:$0xf] }
0x1ca6   :  { %v5622_v25 = vpop.f32.mrf.mxu1 }
0x1ca7   :  { %v5623_v15 = vadd.f32 %v5622_v25, %v12227_v43  ;;  %v5638_v33 = vadd.f32 %v5631_v46, %v12261_v54  ;;  %v5717_v43 = vrot.slane %v5642_v57, %v13204_v16 }
0x1ca8   :  { %v8499_v14 = vpop.f32.mrf.mxu1 }
0x1ca9   :  { %v5636_v51 = vadd.f32 %v5623_v15, %v12275_v55  ;;  %v5641_v62 = vmax.f32 %v5638_v33, 0.0  ;;  %v5732_v33 = vld [vmem:[%s12935_s8 + $0x240] sm:$0xff] }
0x1caa   :  { %v5625_v44 = vpop.f32.mrf.mxu1 }
0x1cab   :  { %v5626_v26 = vadd.f32 %v5625_v44, %v12229_v41  ;;  %v5639_v30 = vmax.f32 %v5636_v51, 0.0  ;;  %v5654_v31 = vpack.c.bf16 %v5641_v62, %v5641_v62  ;;  %v5724_v41 = vrot.slane %v5642_v57, %v13205_v2  ;;  %v5733_v62 = vld [vmem:[%s12935_s8 + $0x248] sm:$0xff] }
0x1cac   :  { %v5736_v57 = vld [vmem:[%s12935_s8 + $0x268] sm:$0xff] }
0x1cad   :  { %v5637_v24 = vadd.f32 %v5626_v26, %v12277_v13 }
0x1caf   :  { %v5640_v8 = vmax.f32 %v5637_v24, 0.0 }
0x1cb1   :  { %v5653_v34 = vpack.c.bf16 %v5640_v8, %v5639_v30 }
0x1cb3   :  { %8510 = vmatprep.mubr.msk.bf16.mxu1 %vm449_vm3, %v5653_v34 }
0x1cb4   :  { %8511 = vmatmul.mubr.msk.bf16.vlgmr.msra.gmra.mxu1 %vm449_vm3, %v5654_v31  ;;  %v5735_v31 = vld [vmem:[%s12935_s8 + $0x260] sm:$0xff] }
0x1cb5   :  { %8534 = vmatprep.mubr.msk.bf16.mxu1 %vm8901_vm4, %v13202_v22 }
0x1d74   :  { %v8512_v54 = vpop.f32.mrf.mxu1 }
0x1d75   :  { %v5720_v55 = vmul.f32 %v8512_v54, %v5717_v43 }
0x1d76   :  { %v5700_v13 = vpop.f32.mrf.mxu1 }
0x1d77   :  { %v5727_v6 = vadd.f32 %v5724_v41, %v5720_v55  ;;  %v5718_v52 = vmul.f32 %v5717_v43, %v5700_v13 }
0x1d78   :  { %v8513_v9 = vpop.f32.mrf.mxu1 }
0x1d79   :  { %v5730_v35 = vmax.f32 %v5727_v6, 0.0  ;;  %v5725_v53 = vadd.f32 %v5724_v41, %v5718_v52 }
0x1d7a   :  { %v5703_v49 = vpop.f32.mrf.mxu1 }
0x1d7b   :  { %v5739_v59 = vpack.c.bf16 %v5730_v35, %v5730_v35  ;;  %v5719_v10 = vmul.f32 %v5717_v43, %v5703_v49  ;;  %v5728_v29 = vmax.f32 %v5725_v53, 0.0 }
0x1d7d   :  { %v5726_v42 = vadd.f32 %v5724_v41, %v5719_v10  ;;  %8729 = vmatprep.subr.msk.bf16.mxu0 %vm4767_vm12, %v5739_v59  ;;  %v5741_v28 = vsel %vm4767_vm12, %v5739_v59, 0 }
0x1d7e   :  { %8515 = vmatpush3.bf16.msra.mxu0 %v5741_v28 }
0x1d7f   :  { %v5729_v63 = vmax.f32 %v5726_v42, 0.0  ;;  %v6048_v42 = vld [vmem:[%s12935_s8 + $0x2f0] sm:$0xff] }
0x1d81   :  { %v5738_v58 = vpack.c.bf16 %v5729_v63, %v5728_v29 }
0x1d83   :  { %8516 = vmatprep.subr.bf16.mxu0 %v5738_v58 }
0x1d84   :  { %8517 = vmatpush3.bf16.msra.mxu0 %v5738_v58 }
0x1d85   :  { %8730 = vmatprep.subr.msk.bf16.mxu0 %vm4767_vm12, %v5739_v59 }
0x1d87   :  { %8519 = vmatmul.mubr.msk.bf16.vlgmr.msra.gmra.mxu0 %vm4760_vm11, %v12070_v0  ;;  %v5842_v0 = vrot.slane %v5731_v12, %v13204_v16 }
0x1d88   :  { %8523 = vmatpush3.bf16.msra.mxu0 %v5741_v28  ;;  %8526 = vmatprep.mubr.msk.bf16.mxu0 %vm4760_vm11, %v12055_v47  ;;  %v5849_v47 = vrot.slane %v5731_v12, %v13205_v2  ;;  %v6044_v12 = vld [vmem:[%s12935_s8 + $0x2d0] sm:$0xff] }
0x1d89   :  { %8524 = vmatprep.subr.bf16.mxu0 %v5738_v58 }
0x1d8a   :  { %v5852_v56 = vmul.f32 %v5849_v47, %v5730_v35  ;;  %v5850_v11 = vmul.f32 %v5849_v47, %v5728_v29  ;;  %v5851_v25 = vmul.f32 %v5849_v47, %v5729_v63  ;;  %v6046_v29 = vld [vmem:[%s12935_s8 + $0x2e0] sm:$0xff]  ;;  %v6047_v63 = vld [vmem:[%s12935_s8 + $0x2e8] sm:$0xff] }
0x1d8b   :  { %v6043_v47 = vld [vmem:[%s12935_s8 + $0x2c8] sm:$0xff] }
0x1d8c   :  { %8525 = vmatpush3.bf16.msra.mxu0 %v5738_v58  ;;  %v6056_v58 = vpack.c.bf16 %v6047_v63, %v6046_v29 }
0x1d8d   :  { %8538 = vmatprep.subr.bf16.mxu0 %v13202_v22 }
0x1d8f   :  { %8527 = vmatmul.mubr.msk.bf16.vlgmr.msra.gmra.mxu0 %vm4760_vm11, %v12075_v45 }
0x1d90   :  { %8540 = vmatprep.mubr.msk.bf16.mxu0 %vm8901_vm4, %v13202_v22 }
0x1e47   :  { %v8520_v18 = vpop.f32.mrf.mxu0 }
0x1e48   :  { %v5845_v50 = vmul.f32 %v8520_v18, %v5842_v0  ;;  %v6045_v18 = vld [vmem:[%s12935_s8 + $0x2d8] sm:$0xff] }
0x1e49   :  { %v5777_v61 = vpop.f32.mrf.mxu0 }
0x1e4a   :  { %v5843_v45 = vmul.f32 %v5842_v0, %v5777_v61  ;;  %v5855_v1 = vadd.f32 %v5852_v56, %v5845_v50  ;;  %v6042_v61 = vld [vmem:[%s12935_s8 + $0x2c0] sm:$0xff]  ;;  %v6040_v50 = vld [vmem:[%s12935_s8 + $0x2b0] sm:$0xff] }
0x1e4b   :  { %v8521_v20 = vpop.f32.mrf.mxu0  ;;  %v6038_v56 = vld [vmem:[%s12935_s8 + $0x2a0] sm:$0xff] }
0x1e4c   :  { %v5853_v32 = vadd.f32 %v5850_v11, %v5843_v45  ;;  %v6054_v20 = vpack.c.bf16 %v6043_v47, %v6042_v61  ;;  %v6039_v45 = vld [vmem:[%s12935_s8 + $0x2a8] sm:$0xff]  ;;  %v12564_v61 = vld [vmem:[%s12936_s4 + $0x30] ss:$0 sps:$4 sm:$0x33]  }
0x1e4d   :  { %v5780_v3 = vpop.f32.mrf.mxu0  ;;  %v6161_v47 = vld [vmem:[%s12935_s8 + $0x310] sm:$0x7] }
0x1e4e   :  { %v5844_v37 = vmul.f32 %v5842_v0, %v5780_v3  ;;  %v6055_v0 = vpack.c.bf16 %v6045_v18, %v6044_v12 }
0x1e4f   :  { %v8528_v5 = vpop.f32.mrf.mxu0 }
0x1e50   :  { %v5862_v60 = vmul.f32 %v8528_v5, %v5859_v21  ;;  %v5854_v51 = vadd.f32 %v5851_v25, %v5844_v37  ;;  %v6052_v5 = vpack.c.bf16 %v6039_v45, %v6038_v56 }
0x1e51   :  { %v5825_v19 = vpop.f32.mrf.mxu0 }
0x1e52   :  { %v5865_v48 = vadd.f32 %v5862_v60, %v5855_v1  ;;  %v5860_v38 = vmul.f32 %v5859_v21, %v5825_v19  ;;  %v5872_v1 = vld [vmem:[%s12935_s8 + $0x280] sm:$0x7] }
0x1e53   :  { %v8529_v46 = vpop.f32.mrf.mxu0  ;;  %v5972_v11 = vrot.slane %v5872_v1, %v13205_v2  ;;  %v5967_v60 = vrot.slane %v5872_v1, %v13204_v16 }
0x1e54   :  { %v5868_v15 = vmul.f32 %v5865_v48, %v5734_v17  ;;  %v5863_v14 = vadd.f32 %v5860_v38, %v5853_v32  ;;  %v6018_v17 = vrot.slane %v5872_v1, %v13206_v23  ;;  %v5873_v32 = vld [vmem:[%s12935_s8 + $0x290] sm:$0x3] }
0x1e55   :  { %v5828_v44 = vpop.f32.mrf.mxu0 }
0x1e56   :  { %v12422_v26 = vadd.f32 %v5868_v15, %v5737_v40  ;;  %v5861_v24 = vmul.f32 %v5859_v21, %v5828_v44  ;;  %v5866_v30 = vmul.f32 %v5863_v14, %v5732_v33  ;;  %v6041_v21 = vld [vmem:[%s12935_s8 + $0x2b8] sm:$0xff]  ;;  %v6024_v14 = vrot.slane %v5873_v32, %v13204_v16 }
0x1e57   :  { %v6053_v3 = vpack.c.bf16 %v6041_v21, %v6040_v50  ;;  %v6272_v50 = vrot.slane %v6161_v47, %v13204_v16 }
0x1e58   :  { %v5864_v8 = vadd.f32 %v5861_v24, %v5854_v51  ;;  %v5875_v34 = vpack.c.bf16 %v12422_v26, %v12422_v26  ;;  %v12436_v54 = vadd.f32 %v5866_v30, %v5735_v31  ;;  %v6029_v24 = vrot.slane %v5873_v32, %v13205_v2 }
0x1e5a   :  { %v5867_v43 = vmul.f32 %v5864_v8, %v5733_v62  ;;  %v5877_v41 = vsel %vm4767_vm12, %v5875_v34, 0 }
0x1e5b   :  { %8531 = vmatpush3.bf16.msra.mxu1 %v5877_v41 }
0x1e5c   :  { %v12438_v55 = vadd.f32 %v5867_v43, %v5736_v57  ;;  %8532 = vmatprep.subr.bf16.mxu1 %v13202_v22 }
0x1e5e   :  { %v5874_v13 = vpack.c.bf16 %v12438_v55, %v12436_v54 }
0x1e60   :  { %8533 = vmatpush3.bf16.msra.mxu1 %v5874_v13 }
0x1e61   :  { %8544 = vmatprep.subr.bf16.mxu1 %v13202_v22 }
0x1e63   :  { %8535 = vmatmul.mubr.msk.bf16.vlgmr.msra.gmra.mxu1 %vm4760_vm11, %v12126_v39  ;;  %v6050_v39 = vld [vmem:[%s12935_s8 + $0x300] sm:$0xf] }
0x1e64   :  { %8546 = vmatprep.mubr.msk.bf16.mxu1 %vm8901_vm4, %v13202_v22  ;;  %v6058_v10 = vpack.c.bf16 %v6050_v39, %v6050_v39  ;;  %v12526_v39 = vld [vmem:[%s12936_s4 + $0x18] sm:$0xff]  }
0x1f23   :  { %v5913_v6 = vpop.f32.mrf.mxu1 }
0x1f24   :  { %v5919_v52 = vmul.f32 0.2, %v5913_v6 }
0x1f25   :  { %v8536_v9 = vpop.f32.mrf.mxu1 }
0x1f26   :  { %v5920_v35 = vpack.c.bf16 %v5919_v52, %v5919_v52  ;;  %v5973_v48 = vmul.f32 %v5972_v11, %v5919_v52 }
0x1f27   :  { %v5916_v49 = vpop.f32.mrf.mxu1 }
0x1f28   :  { %v5922_v59 = vsel %vm4767_vm12, %v5920_v35, 0 }
0x1f29   :  { %8539 = vmatpush3.bf16.msra.mxu0 %v5922_v59  ;;  %8545 = vmatpush3.bf16.msra.mxu1 %v5922_v59  ;;  %v8537_v53 = vpop.f32.mrf.mxu1 }
0x1f2a   :  { %8550 = vmatprep.subr.bf16.mxu0 %v13202_v22 }
0x1f2c   :  { %8541 = vmatmul.mubr.msk.bf16.vlgmr.msra.gmra.mxu0 %vm4966_vm13, %v12137_v4  ;;  %8547 = vmatmul.mubr.msk.bf16.vlgmr.msra.gmra.mxu1 %vm4966_vm13, %v12142_v7  ;;  %v6049_v4 = vld [vmem:[%s12935_s8 + $0x2f8] sm:$0xff]  ;;  %v6064_v7 = vsel %vm4767_vm12, %v6058_v10, 0 }
0x1f2d   :  { %8564 = vmatprep.mubr.msk.bf16.mxu0 %vm8901_vm4, %v13202_v22  ;;  %8570 = vmatprep.mubr.msk.bf16.mxu1 %vm4966_vm13, %v12202_v27  ;;  %v6057_v28 = vpack.c.bf16 %v6049_v4, %v6048_v42 }
0x1f2e   :  { %8551 = vmatpush3.bf16.msra.mxu0 %v6064_v7 }
0x1f2f   :  { %8552 = vmatprep.subr.bf16.mxu0 %v13202_v22 }
0x1f32   :  { %8553 = vmatpush3.bf16.msra.mxu0 %v6057_v28 }
0x1f33   :  { %8554 = vmatprep.subr.bf16.mxu0 %v13202_v22 }
0x1f36   :  { %8555 = vmatpush3.bf16.msra.mxu0 %v6056_v58 }
0x1f37   :  { %8556 = vmatprep.subr.bf16.mxu0 %v13202_v22 }
0x1f3a   :  { %8557 = vmatpush3.bf16.msra.mxu0 %v6055_v0 }
0x1f3b   :  { %8558 = vmatprep.subr.bf16.mxu0 %v13202_v22 }
0x1f3e   :  { %8559 = vmatpush3.bf16.msra.mxu0 %v6054_v20 }
0x1f3f   :  { %8560 = vmatprep.subr.bf16.mxu0 %v13202_v22 }
0x1f42   :  { %8561 = vmatpush3.bf16.msra.mxu0 %v6053_v3  ;;  %v6279_v3 = vrot.slane %v6161_v47, %v13205_v2 }
0x1f43   :  { %8562 = vmatprep.subr.bf16.mxu0 %v13202_v22 }
0x1f46   :  { %8563 = vmatpush3.bf16.msra.mxu0 %v6052_v5  ;;  %v6289_v5 = vrot.slane %v6161_v47, %v13206_v23  ;;  %v6480_v47 = vld [vmem:[%s12935_s8 + $0x3e0] sm:$0xf] }
0x1f47   :  { %8598 = vmatprep.subr.bf16.mxu0 %v13202_v22 }
0x1fec   :  { %v5958_v19 = vpop.f32.mrf.mxu0  ;;  %v6009_v37 = vpop.f32.mrf.mxu1 }
0x1fed   :  { %v5968_v38 = vmul.f32 %v5967_v60, %v5958_v19  ;;  %v6019_v40 = vmul.f32 %v6018_v17, %v6009_v37 }
0x1fee   :  { %v8542_v46 = vpop.f32.mrf.mxu0  ;;  %v8548_v25 = vpop.f32.mrf.mxu1 }
0x1fef   :  { %v5974_v15 = vadd.f32 %v5973_v48, %v5968_v38  ;;  %v6164_v48 = vld [vmem:[%s12935_s8 + $0x330] sm:$0xf] }
0x1ff0   :  { %v5961_v33 = vpop.f32.mrf.mxu0  ;;  %v6012_v44 = vpop.f32.mrf.mxu1 }
0x1ff1   :  { %v6020_v51 = vadd.f32 %v6019_v40, %v5974_v15 }
0x1ff2   :  { %v8543_v62 = vpop.f32.mrf.mxu0  ;;  %v8549_v30 = vpop.f32.mrf.mxu1 }
0x1ff3   :  { %v6025_v8 = vmul.f32 %v6024_v14, %v6020_v51  ;;  %v6167_v14 = vld [vmem:[%s12935_s8 + $0x350] sm:$0xf]  ;;  %v6162_v62 = vld [vmem:[%s12935_s8 + $0x320] sm:$0xff] }
0x1ff5   :  { %v6030_v34 = vadd.f32 %v6029_v24, %v6025_v8 }
0x1ff7   :  { %v7388_v31 = vmul.f32 -1.442695, %v6030_v34 }
0x1ff9   :  { %8854 = vpow2.f32 %v7388_v31 }
0x2006   :  { %v8855_v57 = vpop.eup %8854 }
0x2007   :  { %v6034_v43 = vadd.f32 1.0, %v8855_v57  ;;  %v6163_v57 = vld [vmem:[%s12935_s8 + $0x328] sm:$0xff] }
0x2009   :  { %8856 = vrcp.f32 %v6034_v43 }
0x2016   :  { %v8857_v41 = vpop.eup %8856 }
0x2017   :  { %v6037_v13 = vmul.f32 %v8857_v41, %v6030_v34 }
0x2019   :  { %v6051_v6 = vpack.c.bf16 %v6037_v13, %v6037_v13 }
0x201b   :  { %8565 = vmatmul.mubr.msk.bf16.vlgmr.msra.gmra.mxu0 %vm6059_vm14, %v6051_v6  ;;  %v6165_v6 = vld [vmem:[%s12935_s8 + $0x340] sm:$0xff] }
0x201c   :  { %8600 = vmatprep.mubr.msk.bf16.mxu0 %vm8901_vm4, %v13202_v22 }
0x20db   :  { %v6100_v52 = vpop.f32.mrf.mxu0 }
0x20dc   :  { %v6106_v9 = vpack.c.bf16 %v6100_v52, %v6100_v52  ;;  %v6166_v52 = vld [vmem:[%s12935_s8 + $0x348] sm:$0xff] }
0x20dd   :  { %v8566_v35 = vpop.f32.mrf.mxu0 }
0x20de   :  { %v6108_v49 = vsel %vm4767_vm12, %v6106_v9, 0  ;;  %8731 = vmatprep.subr.msk.bf16.mxu1 %vm4767_vm12, %v6106_v9 }
0x20df   :  { %v6103_v59 = vpop.f32.mrf.mxu0  ;;  %8569 = vmatpush3.bf16.msra.mxu1 %v6108_v49 }
0x20e1   :  { %v8567_v53 = vpop.f32.mrf.mxu0 }
0x20e2   :  { %8571 = vmatmul.mubr.msk.bf16.vlgmr.msra.gmra.mxu1 %vm4966_vm13, %v12211_v36 }
0x20e3   :  { %8578 = vmatprep.mubr.msk.bf16.mxu1 %vm4760_vm11, %v12526_v39 }
0x21a2   :  { %v8572_v10 = vpop.f32.mrf.mxu1 }
0x21a3   :  { %v6153_v42 = vadd.f32 %v8572_v10, %v12422_v26  ;;  %v12613_v10 = vld [vmem:[%s12936_s4] sm:$0x3] }
0x21a4   :  { %v6144_v4 = vpop.f32.mrf.mxu1 }
0x21a5   :  { %v12531_v7 = vmax.f32 %v6153_v42, 0.0  ;;  %v6145_v36 = vadd.f32 %v6144_v4, %v12436_v54  ;;  %v12549_v54 = vld [vmem:[%s12936_s4 + $0x20] ss:$0 sps:$4 sm:$0x33]  }
0x21a6   :  { %v8573_v28 = vpop.f32.mrf.mxu1 }
0x21a7   :  { %v6169_v29 = vpack.c.bf16 %v12531_v7, %v12531_v7  ;;  %v12539_v18 = vmax.f32 %v6145_v36, 0.0  ;;  %v6282_v11 = vmul.f32 %v6279_v3, %v12531_v7 }
0x21a8   :  { %v6147_v63 = vpop.f32.mrf.mxu1 }
0x21a9   :  { %v6148_v58 = vadd.f32 %v6147_v63, %v12438_v55  ;;  %8732 = vmatprep.subr.msk.bf16.mxu1 %vm4767_vm12, %v6169_v29  ;;  %v6171_v12 = vsel %vm4767_vm12, %v6169_v29, 0  ;;  %v12556_v55 = vld [vmem:[%s12936_s4 + $0x28] sm:$0xff]   ;;  %v6280_v32 = vmul.f32 %v6279_v3, %v12539_v18 }
0x21aa   :  { %8575 = vmatpush3.bf16.msra.mxu1 %v6171_v12 }
0x21ab   :  { %v12541_v26 = vmax.f32 %v6148_v58, 0.0 }
0x21ad   :  { %v6168_v0 = vpack.c.bf16 %v12541_v26, %v12539_v18  ;;  %v6281_v44 = vmul.f32 %v6279_v3, %v12541_v26 }
0x21af   :  { %8576 = vmatprep.subr.bf16.mxu1 %v6168_v0 }
0x21b0   :  { %8577 = vmatpush3.bf16.msra.mxu1 %v6168_v0 }
0x21b1   :  { %8733 = vmatprep.subr.msk.bf16.mxu1 %vm4767_vm12, %v6169_v29 }
0x21b3   :  { %8579 = vmatmul.mubr.msk.bf16.vlgmr.msra.gmra.mxu1 %vm4760_vm11, %v12549_v54 }
0x21b4   :  { %8583 = vmatpush3.bf16.msra.mxu1 %v6171_v12  ;;  %8586 = vmatprep.mubr.msk.bf16.mxu1 %vm4760_vm11, %v12556_v55  ;;  %v12624_v12 = vld [vmem:[%s12936_s4 + $0x8] sm:$0x3] }
0x21b5   :  { %8584 = vmatprep.subr.bf16.mxu1 %v6168_v0 }
0x21b8   :  { %8585 = vmatpush3.bf16.msra.mxu1 %v6168_v0  ;;  %v12631_v0 = vld [vmem:[%s12936_s4 + $0x10] sm:$0x3] }
0x21b9   :  { %8590 = vmatprep.subr.bf16.mxu1 %v13202_v22 }
0x21bb   :  { %8587 = vmatmul.mubr.msk.bf16.vlgmr.msra.gmra.mxu1 %vm4760_vm11, %v12564_v61 }
0x21bc   :  { %8594 = vmatprep.mubr.msk.bf16.mxu1 %vm8901_vm4, %v13202_v22 }
0x2273   :  { %v8580_v20 = vpop.f32.mrf.mxu1 }
0x2274   :  { %v6275_v45 = vmul.f32 %v8580_v20, %v6272_v50  ;;  %v6488_v20 = vpack.c.bf16 %v6480_v47, %v6480_v47 }
0x2275   :  { %v6207_v21 = vpop.f32.mrf.mxu1 }
0x2276   :  { %v6273_v60 = vmul.f32 %v6272_v50, %v6207_v21  ;;  %v6285_v19 = vadd.f32 %v6282_v11, %v6275_v45  ;;  %v6479_v21 = vld [vmem:[%s12935_s8 + $0x3d8] sm:$0xff]  ;;  %v6493_v3 = vsel %vm4767_vm12, %v6488_v20, 0  ;;  %v6477_v45 = vld [vmem:[%s12935_s8 + $0x3c8] sm:$0xff] }
0x2277   :  { %v8581_v56 = vpop.f32.mrf.mxu1  ;;  %v6475_v11 = vld [vmem:[%s12935_s8 + $0x3b8] sm:$0xff] }
0x2278   :  { %v6283_v40 = vadd.f32 %v6280_v32, %v6273_v60 }
0x2279   :  { %v6210_v1 = vpop.f32.mrf.mxu1 }
0x227a   :  { %v6274_v46 = vmul.f32 %v6272_v50, %v6210_v1  ;;  %v6478_v50 = vld [vmem:[%s12935_s8 + $0x3d0] sm:$0xff] }
0x227b   :  { %v8588_v17 = vpop.f32.mrf.mxu1  ;;  %v6487_v56 = vpack.c.bf16 %v6479_v21, %v6478_v50  ;;  %v6474_v1 = vld [vmem:[%s12935_s8 + $0x3b0] sm:$0xff] }
0x227c   :  { %v6292_v37 = vmul.f32 %v8588_v17, %v6289_v5  ;;  %v6284_v8 = vadd.f32 %v6281_v44, %v6274_v46  ;;  %v6485_v60 = vpack.c.bf16 %v6475_v11, %v6474_v1  ;;  %v6472_v17 = vld [vmem:[%s12935_s8 + $0x3a0] sm:$0xff]  ;;  %v6469_v46 = vld [vmem:[%s12935_s8 + $0x388] sm:$0xff] }
0x227d   :  { %v6255_v38 = vpop.f32.mrf.mxu1 }
0x227e   :  { %v6295_v25 = vadd.f32 %v6292_v37, %v6285_v19  ;;  %v6290_v15 = vmul.f32 %v6289_v5, %v6255_v38  ;;  %v6473_v19 = vld [vmem:[%s12935_s8 + $0x3a8] sm:$0xff]  ;;  %v6470_v37 = vld [vmem:[%s12935_s8 + $0x390] sm:$0xff] }
0x227f   :  { %v8589_v33 = vpop.f32.mrf.mxu1  ;;  %v6484_v32 = vpack.c.bf16 %v6473_v19, %v6472_v17 }
0x2280   :  { %v6298_v51 = vmul.f32 %v6295_v25, %v6164_v48  ;;  %v6293_v24 = vadd.f32 %v6290_v15, %v6283_v40  ;;  %v6471_v48 = vld [vmem:[%s12935_s8 + $0x398] sm:$0xff]  ;;  %v6468_v40 = vld [vmem:[%s12935_s8 + $0x380] sm:$0xff] }
0x2281   :  { %v6258_v30 = vpop.f32.mrf.mxu1  ;;  %v6483_v38 = vpack.c.bf16 %v6471_v48, %v6470_v37  ;;  %v6482_v25 = vpack.c.bf16 %v6469_v46, %v6468_v40  ;;  %v6302_v15 = vld [vmem:[%s12935_s8 + $0x360] sm:$0x7] }
0x2282   :  { %v12588_v34 = vadd.f32 %v6298_v51, %v6167_v14  ;;  %v6291_v31 = vmul.f32 %v6289_v5, %v6258_v30  ;;  %v6296_v43 = vmul.f32 %v6293_v24, %v6162_v62  ;;  %v6402_v14 = vrot.slane %v6302_v15, %v13205_v2  ;;  %v6303_v24 = vld [vmem:[%s12935_s8 + $0x370] sm:$0x3] }
0x2283   :  { %v6397_v33 = vrot.slane %v6302_v15, %v13204_v16  ;;  %v6448_v44 = vrot.slane %v6302_v15, %v13206_v23 }
0x2284   :  { %v6294_v41 = vadd.f32 %v6291_v31, %v6284_v8  ;;  %v6305_v13 = vpack.c.bf16 %v12588_v34, %v12588_v34  ;;  %v12602_v49 = vadd.f32 %v6296_v43, %v6165_v6 }
0x2286   :  { %v6297_v9 = vmul.f32 %v6294_v41, %v6163_v57  ;;  %v6307_v35 = vsel %vm4767_vm12, %v6305_v13, 0  ;;  %v6454_v13 = vrot.slane %v6303_v24, %v13204_v16 }
0x2287   :  { %8591 = vmatpush3.bf16.msra.mxu1 %v6307_v35  ;;  %v6459_v35 = vrot.slane %v6303_v24, %v13205_v2 }
0x2288   :  { %v12604_v59 = vadd.f32 %v6297_v9, %v6166_v52  ;;  %8592 = vmatprep.subr.bf16.mxu1 %v13202_v22 }
0x228a   :  { %v6304_v53 = vpack.c.bf16 %v12604_v59, %v12602_v49 }
0x228c   :  { %8593 = vmatpush3.bf16.msra.mxu1 %v6304_v53 }
0x228d   :  { %8604 = vmatprep.subr.bf16.mxu1 %v13202_v22 }
0x228f   :  { %8595 = vmatmul.mubr.msk.bf16.vlgmr.msra.gmra.mxu1 %vm4760_vm11, %v12613_v10 }
0x2290   :  { %8606 = vmatprep.mubr.msk.bf16.mxu1 %vm8901_vm4, %v13202_v22 }
0x234f   :  { %v6343_v42 = vpop.f32.mrf.mxu1 }
0x2350   :  { %v6349_v4 = vmul.f32 0.2, %v6343_v42 }
0x2351   :  { %v8596_v28 = vpop.f32.mrf.mxu1 }
0x2352   :  { %v6350_v29 = vpack.c.bf16 %v6349_v4, %v6349_v4  ;;  %v6403_v30 = vmul.f32 %v6402_v14, %v6349_v4 }
0x2353   :  { %v6346_v36 = vpop.f32.mrf.mxu1 }
0x2354   :  { %v6352_v63 = vsel %vm4767_vm12, %v6350_v29, 0 }
0x2355   :  { %8599 = vmatpush3.bf16.msra.mxu0 %v6352_v63  ;;  %8605 = vmatpush3.bf16.msra.mxu1 %v6352_v63  ;;  %v8597_v58 = vpop.f32.mrf.mxu1 }
0x2356   :  { %8610 = vmatprep.subr.bf16.mxu0 %v13202_v22 }
0x2358   :  { %8601 = vmatmul.mubr.msk.bf16.vlgmr.msra.gmra.mxu0 %vm4966_vm13, %v12624_v12  ;;  %8607 = vmatmul.mubr.msk.bf16.vlgmr.msra.gmra.mxu1 %vm4966_vm13, %v12631_v0 }
0x2359   :  { %8624 = vmatprep.mubr.msk.bf16.mxu0 %vm8901_vm4, %v13202_v22  ;;  %8630 = vmatprep.mubr.msk.bf16.mxu1 %vm4966_vm13, %v12202_v27  ;;  %v6476_v27 = vld [vmem:[%s12935_s8 + $0x3c0] sm:$0xff] }
0x235a   :  { %8611 = vmatpush3.bf16.msra.mxu0 %v6493_v3  ;;  %v6486_v5 = vpack.c.bf16 %v6477_v45, %v6476_v27 }
0x235b   :  { %8612 = vmatprep.subr.bf16.mxu0 %v13202_v22 }
0x235e   :  { %8613 = vmatpush3.bf16.msra.mxu0 %v6487_v56 }
0x235f   :  { %8614 = vmatprep.subr.bf16.mxu0 %v13202_v22 }
0x2362   :  { %8615 = vmatpush3.bf16.msra.mxu0 %v6486_v5  ;;  %v12705_v5 = vld [vmem:[%s12932_s5 + $0xd0] ss:$0 sps:$4 sm:$0x33]  }
0x2363   :  { %8616 = vmatprep.subr.bf16.mxu0 %v13202_v22 }
0x2366   :  { %8617 = vmatpush3.bf16.msra.mxu0 %v6485_v60 }
0x2367   :  { %8618 = vmatprep.subr.bf16.mxu0 %v13202_v22 }
0x236a   :  { %8619 = vmatpush3.bf16.msra.mxu0 %v6484_v32 }
0x236b   :  { %8620 = vmatprep.subr.bf16.mxu0 %v13202_v22 }
0x236e   :  { %8621 = vmatpush3.bf16.msra.mxu0 %v6483_v38 }
0x236f   :  { %8622 = vmatprep.subr.bf16.mxu0 %v13202_v22 }
0x2372   :  { %8623 = vmatpush3.bf16.msra.mxu0 %v6482_v25 }
0x2373   :  { %8650 = vmatprep.subr.bf16.mxu0 %v13202_v22 }
0x2418   :  { %v6388_v51 = vpop.f32.mrf.mxu0  ;;  %v6439_v62 = vpop.f32.mrf.mxu1 }
0x2419   :  { %v6398_v8 = vmul.f32 %v6397_v33, %v6388_v51  ;;  %v6449_v31 = vmul.f32 %v6448_v44, %v6439_v62 }
0x241a   :  { %v8602_v57 = vpop.f32.mrf.mxu0  ;;  %v8608_v43 = vpop.f32.mrf.mxu1 }
0x241b   :  { %v6404_v41 = vadd.f32 %v6403_v30, %v6398_v8 }
0x241c   :  { %v6391_v6 = vpop.f32.mrf.mxu0  ;;  %v6442_v52 = vpop.f32.mrf.mxu1 }
0x241d   :  { %v6450_v9 = vadd.f32 %v6449_v31, %v6404_v41  ;;  %v6596_v31 = vld [vmem:[%s12935_s8 + $0x410] sm:$0xf] }
0x241e   :  { %v8603_v53 = vpop.f32.mrf.mxu0  ;;  %v8609_v42 = vpop.f32.mrf.mxu1  ;;  %v6599_v52 = vld [vmem:[%s12935_s8 + $0x430] sm:$0xf] }
0x241f   :  { %v6455_v28 = vmul.f32 %v6454_v13, %v6450_v9 }
0x2421   :  { %v6460_v29 = vadd.f32 %v6459_v35, %v6455_v28  ;;  %v6594_v28 = vld [vmem:[%s12935_s8 + $0x400] sm:$0xff] }
0x2423   :  { %v7399_v36 = vmul.f32 -1.442695, %v6460_v29 }
0x2425   :  { %8858 = vpow2.f32 %v7399_v36 }
0x2432   :  { %v8859_v63 = vpop.eup %8858 }
0x2433   :  { %v6464_v4 = vadd.f32 1.0, %v8859_v63 }
0x2435   :  { %8860 = vrcp.f32 %v6464_v4 }
0x2442   :  { %v8861_v58 = vpop.eup %8860 }
0x2443   :  { %v6467_v47 = vmul.f32 %v8861_v58, %v6460_v29  ;;  %v6595_v58 = vld [vmem:[%s12935_s8 + $0x408] sm:$0xff] }
0x2445   :  { %v6481_v20 = vpack.c.bf16 %v6467_v47, %v6467_v47 }
0x2447   :  { %8625 = vmatmul.mubr.msk.bf16.vlgmr.msra.gmra.mxu0 %vm6059_vm14, %v6481_v20 }
0x2448   :  { %8654 = vmatprep.mubr.msk.bf16.mxu0 %vm8901_vm4, %v13202_v22 }
0x2507   :  { %v6529_v50 = vpop.f32.mrf.mxu0 }
0x2508   :  { %v6535_v21 = vpack.c.bf16 %v6529_v50, %v6529_v50 }
0x2509   :  { %v8626_v3 = vpop.f32.mrf.mxu0 }
0x250a   :  { %v6537_v56 = vsel %vm4767_vm12, %v6535_v21, 0  ;;  %8734 = vmatprep.subr.msk.bf16.mxu1 %vm4767_vm12, %v6535_v21  ;;  %v6597_v21 = vld [vmem:[%s12935_s8 + $0x420] sm:$0xff]  ;;  %v6598_v3 = vld [vmem:[%s12935_s8 + $0x428] sm:$0xff] }
0x250b   :  { %v6532_v27 = vpop.f32.mrf.mxu0  ;;  %8629 = vmatpush3.bf16.msra.mxu1 %v6537_v56 }
0x250d   :  { %v8627_v45 = vpop.f32.mrf.mxu0 }
0x250e   :  { %8631 = vmatmul.mubr.msk.bf16.vlgmr.msra.gmra.mxu1 %vm4966_vm13, %v12705_v5 }
0x250f   :  { %8638 = vmatprep.mubr.msk.bf16.mxu1 %vm4760_vm11, %v12526_v39 }
0x25ce   :  { %v8632_v1 = vpop.f32.mrf.mxu1 }
0x25cf   :  { %v6582_v11 = vadd.f32 %v8632_v1, %v12531_v7 }
0x25d0   :  { %v6573_v60 = vpop.f32.mrf.mxu1 }
0x25d1   :  { %v6589_v17 = vadd.f32 %v6582_v11, %v12588_v34  ;;  %v6574_v19 = vadd.f32 %v6573_v60, %v12539_v18 }
0x25d2   :  { %v8633_v32 = vpop.f32.mrf.mxu1 }
0x25d3   :  { %v12714_v37 = vmax.f32 %v6589_v17, 0.0  ;;  %v6587_v38 = vadd.f32 %v6574_v19, %v12602_v49 }
0x25d4   :  { %v6576_v48 = vpop.f32.mrf.mxu1 }
0x25d5   :  { %v6577_v40 = vadd.f32 %v6576_v48, %v12541_v26  ;;  %v6601_v46 = vpack.c.bf16 %v12714_v37, %v12714_v37  ;;  %v12723_v34 = vmax.f32 %v6587_v38, 0.0  ;;  %v6593_v26 = vld [vmem:[%s12935_s8 + $0x3f0] sm:$0x7] }
0x25d6   :  { %v6721_v33 = vrot.slane %v6593_v26, %v13206_v23 }
0x25d7   :  { %v6588_v39 = vadd.f32 %v6577_v40, %v12604_v59  ;;  %8735 = vmatprep.subr.msk.bf16.mxu1 %vm4767_vm12, %v6601_v46  ;;  %v6603_v7 = vsel %vm4767_vm12, %v6601_v46, 0 }
0x25d8   :  { %8635 = vmatpush3.bf16.msra.mxu1 %v6603_v7 }
0x25d9   :  { %v12725_v18 = vmax.f32 %v6588_v39, 0.0 }
0x25db   :  { %v6600_v25 = vpack.c.bf16 %v12725_v18, %v12723_v34 }
0x25dd   :  { %8636 = vmatprep.subr.bf16.mxu1 %v6600_v25 }
0x25de   :  { %8637 = vmatpush3.bf16.msra.mxu1 %v6600_v25 }
0x25df   :  { %8736 = vmatprep.subr.msk.bf16.mxu1 %vm4767_vm12, %v6601_v46  ;;  %v6912_v46 = vld [vmem:[%s12935_s8 + $0x4c0] sm:$0xf] }
0x25e0   :  { %v6920_v39 = vpack.c.bf16 %v6912_v46, %v6912_v46 }
0x25e1   :  { %8639 = vmatmul.mubr.msk.bf16.vlgmr.msra.gmra.mxu1 %vm4760_vm11, %v12549_v54  ;;  %v6704_v54 = vrot.slane %v6593_v26, %v13204_v16 }
0x25e2   :  { %8643 = vmatpush3.bf16.msra.mxu1 %v6603_v7  ;;  %8646 = vmatprep.mubr.msk.bf16.mxu1 %vm4760_vm11, %v12556_v55  ;;  %v6711_v55 = vrot.slane %v6593_v26, %v13205_v2  ;;  %v6925_v7 = vsel %vm4767_vm12, %v6920_v39, 0  ;;  %v6908_v26 = vld [vmem:[%s12935_s8 + $0x4a0] sm:$0xff] }
0x25e3   :  { %8644 = vmatprep.subr.bf16.mxu1 %v6600_v25 }
0x25e4   :  { %v6712_v30 = vmul.f32 %v6711_v55, %v12723_v34  ;;  %v6713_v35 = vmul.f32 %v6711_v55, %v12725_v18 }
0x25e6   :  { %8645 = vmatpush3.bf16.msra.mxu1 %v6600_v25 }
0x25e7   :  { %8658 = vmatprep.subr.bf16.mxu1 %v13202_v22 }
0x25e9   :  { %8647 = vmatmul.mubr.msk.bf16.vlgmr.msra.gmra.mxu1 %vm4760_vm11, %v12564_v61  ;;  %v6714_v61 = vmul.f32 %v6711_v55, %v12714_v37  ;;  %v6907_v55 = vld [vmem:[%s12935_s8 + $0x498] sm:$0xff] }
0x25ea   :  { %8660 = vmatprep.mubr.msk.bf16.mxu1 %vm8901_vm4, %v13202_v22 }
0x26a1   :  { %v8640_v49 = vpop.f32.mrf.mxu1 }
0x26a2   :  { %v6707_v14 = vmul.f32 %v8640_v49, %v6704_v54  ;;  %v6909_v49 = vld [vmem:[%s12935_s8 + $0x4a8] sm:$0xff] }
0x26a3   :  { %v6639_v59 = vpop.f32.mrf.mxu1 }
0x26a4   :  { %v6705_v51 = vmul.f32 %v6704_v54, %v6639_v59  ;;  %v6717_v62 = vadd.f32 %v6714_v61, %v6707_v14  ;;  %v6906_v59 = vld [vmem:[%s12935_s8 + $0x490] sm:$0xff]  ;;  %v6904_v14 = vld [vmem:[%s12935_s8 + $0x480] sm:$0xff] }
0x26a5   :  { %v8641_v15 = vpop.f32.mrf.mxu1  ;;  %v6902_v61 = vld [vmem:[%s12935_s8 + $0x470] sm:$0xff] }
0x26a6   :  { %v6715_v43 = vadd.f32 %v6712_v30, %v6705_v51  ;;  %v6917_v15 = vpack.c.bf16 %v6907_v55, %v6906_v59  ;;  %v6903_v51 = vld [vmem:[%s12935_s8 + $0x478] sm:$0xff]  ;;  %v6901_v30 = vld [vmem:[%s12935_s8 + $0x468] sm:$0xff] }
0x26a7   :  { %v6642_v44 = vpop.f32.mrf.mxu1 }
0x26a8   :  { %v6706_v41 = vmul.f32 %v6704_v54, %v6642_v44  ;;  %v6918_v54 = vpack.c.bf16 %v6909_v49, %v6908_v26 }
0x26a9   :  { %v8648_v24 = vpop.f32.mrf.mxu1 }
0x26aa   :  { %v6724_v8 = vmul.f32 %v8648_v24, %v6721_v33  ;;  %v6716_v36 = vadd.f32 %v6713_v35, %v6706_v41  ;;  %v6915_v24 = vpack.c.bf16 %v6903_v51, %v6902_v61  ;;  %v7083_v61 = vld [vmem:[%s12935_s8 + $0x510] sm:$0xff]  ;;  %v7084_v51 = vld [vmem:[%s12935_s8 + $0x518] sm:$0xff] }
0x26ab   :  { %v6687_v57 = vpop.f32.mrf.mxu1 }
0x26ac   :  { %v6727_v13 = vadd.f32 %v6724_v8, %v6717_v62  ;;  %v6722_v6 = vmul.f32 %v6721_v33, %v6687_v57  ;;  %v6900_v62 = vld [vmem:[%s12935_s8 + $0x460] sm:$0xff] }
0x26ad   :  { %v8649_v9 = vpop.f32.mrf.mxu1  ;;  %v6914_v8 = vpack.c.bf16 %v6901_v30, %v6900_v62  ;;  %v7081_v62 = vld [vmem:[%s12935_s8 + $0x500] sm:$0xff]  ;;  %v7082_v30 = vld [vmem:[%s12935_s8 + $0x508] sm:$0xff] }
0x26ae   :  { %v6730_v53 = vmul.f32 %v6727_v13, %v6596_v31  ;;  %v6725_v42 = vadd.f32 %v6722_v6, %v6715_v43  ;;  %v6734_v31 = vld [vmem:[%s12935_s8 + $0x440] sm:$0x7]  ;;  %v6735_v6 = vld [vmem:[%s12935_s8 + $0x450] sm:$0x3] }
0x26af   :  { %v6690_v29 = vpop.f32.mrf.mxu1  ;;  %v6834_v57 = vrot.slane %v6734_v31, %v13205_v2  ;;  %v6829_v43 = vrot.slane %v6734_v31, %v13204_v16  ;;  %v6880_v41 = vrot.slane %v6734_v31, %v13206_v23  ;;  %v7079_v31 = vld [vmem:[%s12935_s8 + $0x4f0] sm:$0xff] }
0x26b0   :  { %v12757_v63 = vadd.f32 %v6730_v53, %v6599_v52  ;;  %v6723_v4 = vmul.f32 %v6721_v33, %v6690_v29  ;;  %v6728_v47 = vmul.f32 %v6725_v42, %v6594_v28  ;;  %v6905_v33 = vld [vmem:[%s12935_s8 + $0x488] sm:$0xff] }
0x26b1   :  { %v6916_v44 = vpack.c.bf16 %v6905_v33, %v6904_v14  ;;  %v7086_v33 = vld [vmem:[%s12935_s8 + $0x528] sm:$0xff] }
0x26b2   :  { %v6726_v20 = vadd.f32 %v6723_v4, %v6716_v36  ;;  %v6737_v50 = vpack.c.bf16 %v12757_v63, %v12757_v63  ;;  %v12771_v45 = vadd.f32 %v6728_v47, %v6597_v21  ;;  %v6886_v36 = vrot.slane %v6735_v6, %v13204_v16 }
0x26b4   :  { %v6729_v56 = vmul.f32 %v6726_v20, %v6595_v58  ;;  %v6739_v27 = vsel %vm4767_vm12, %v6737_v50, 0  ;;  %v6891_v20 = vrot.slane %v6735_v6, %v13205_v2 }
0x26b5   :  { %8651 = vmatpush3.bf16.msra.mxu0 %v6739_v27 }
0x26b6   :  { %v12773_v1 = vadd.f32 %v6729_v56, %v6598_v3  ;;  %8652 = vmatprep.subr.bf16.mxu0 %v13202_v22 }
0x26b8   :  { %v6736_v11 = vpack.c.bf16 %v12773_v1, %v12771_v45 }
0x26ba   :  { %8653 = vmatpush3.bf16.msra.mxu0 %v6736_v11 }
0x26bb   :  { %8664 = vmatprep.subr.bf16.mxu0 %v13202_v22 }
0x26bd   :  { %8655 = vmatmul.mubr.msk.bf16.vlgmr.msra.gmra.mxu0 %vm4760_vm11, %v12613_v10  ;;  %v8898_v10 = vld [vmem:[%s12932_s5 + $0xc8] sm:$0xff]  }
0x26be   :  { %8666 = vmatprep.mubr.msk.bf16.mxu0 %vm8901_vm4, %v13202_v22 }
0x277d   :  { %v6775_v60 = vpop.f32.mrf.mxu0 }
0x277e   :  { %v6781_v17 = vmul.f32 0.2, %v6775_v60 }
0x277f   :  { %v8656_v19 = vpop.f32.mrf.mxu0 }
0x2780   :  { %v6782_v32 = vpack.c.bf16 %v6781_v17, %v6781_v17  ;;  %v6835_v9 = vmul.f32 %v6834_v57, %v6781_v17  ;;  %v7080_v57 = vld [vmem:[%s12935_s8 + $0x4f8] sm:$0xff] }
0x2781   :  { %v6778_v48 = vpop.f32.mrf.mxu0 }
0x2782   :  { %v6784_v38 = vsel %vm4767_vm12, %v6782_v32, 0 }
0x2783   :  { %8659 = vmatpush3.bf16.msra.mxu1 %v6784_v38  ;;  %8665 = vmatpush3.bf16.msra.mxu0 %v6784_v38  ;;  %v8657_v40 = vpop.f32.mrf.mxu0 }
0x2784   :  { %8670 = vmatprep.subr.bf16.mxu1 %v13202_v22 }
0x2786   :  { %8661 = vmatmul.mubr.msk.bf16.vlgmr.msra.gmra.mxu1 %vm4966_vm13, %v12624_v12  ;;  %8667 = vmatmul.mubr.msk.bf16.vlgmr.msra.gmra.mxu0 %vm4966_vm13, %v12631_v0  ;;  %v6910_v12 = vld [vmem:[%s12935_s8 + $0x4b0] sm:$0xff]  ;;  %v6911_v0 = vld [vmem:[%s12935_s8 + $0x4b8] sm:$0xff] }
0x2787   :  { %8684 = vmatprep.mubr.msk.bf16.mxu1 %vm8901_vm4, %v13202_v22  ;;  %8690 = vmatprep.mubr.msk.bf16.mxu0 %vm4966_vm13, %v8898_v10  ;;  %v6919_v25 = vpack.c.bf16 %v6911_v0, %v6910_v12 }
0x2788   :  { %8671 = vmatpush3.bf16.msra.mxu1 %v6925_v7 }
0x2789   :  { %8672 = vmatprep.subr.bf16.mxu1 %v13202_v22 }
0x278c   :  { %8673 = vmatpush3.bf16.msra.mxu1 %v6919_v25 }
0x278d   :  { %8674 = vmatprep.subr.bf16.mxu1 %v13202_v22 }
0x2790   :  { %8675 = vmatpush3.bf16.msra.mxu1 %v6918_v54 }
0x2791   :  { %8676 = vmatprep.subr.bf16.mxu1 %v13202_v22 }
0x2794   :  { %8677 = vmatpush3.bf16.msra.mxu1 %v6917_v15 }
0x2795   :  { %8678 = vmatprep.subr.bf16.mxu1 %v13202_v22 }
0x2798   :  { %8679 = vmatpush3.bf16.msra.mxu1 %v6916_v44 }
0x2799   :  { %8680 = vmatprep.subr.bf16.mxu1 %v13202_v22 }
0x279c   :  { %8681 = vmatpush3.bf16.msra.mxu1 %v6915_v24  ;;  %v7093_v24 = vpack.c.bf16 %v7084_v51, %v7083_v61 }
0x279d   :  { %8682 = vmatprep.subr.bf16.mxu1 %v13202_v22 }
0x27a0   :  { %8683 = vmatpush3.bf16.msra.mxu1 %v6914_v8  ;;  %v7092_v8 = vpack.c.bf16 %v7082_v30, %v7081_v62 }
0x2846   :  { %v6820_v13 = vpop.f32.mrf.mxu1  ;;  %v6871_v52 = vpop.f32.mrf.mxu0 }
0x2847   :  { %v6830_v35 = vmul.f32 %v6829_v43, %v6820_v13  ;;  %v6881_v53 = vmul.f32 %v6880_v41, %v6871_v52  ;;  %v7091_v43 = vpack.c.bf16 %v7080_v57, %v7079_v31  ;;  %v7077_v41 = vld [vmem:[%s12935_s8 + $0x4e0] sm:$0xff]  ;;  %v7078_v13 = vld [vmem:[%s12935_s8 + $0x4e8] sm:$0xff]  ;;  %v7075_v52 = vld [vmem:[%s12935_s8 + $0x4d0] sm:$0xff] }
0x2848   :  { %v8662_v42 = vpop.f32.mrf.mxu1  ;;  %v8668_v28 = vpop.f32.mrf.mxu0  ;;  %v7090_v6 = vpack.c.bf16 %v7078_v13, %v7077_v41 }
0x2849   :  { %v6836_v29 = vadd.f32 %v6835_v9, %v6830_v35  ;;  %v7076_v9 = vld [vmem:[%s12935_s8 + $0x4d8] sm:$0xff] }
0x284a   :  { %v6823_v4 = vpop.f32.mrf.mxu1  ;;  %v6874_v58 = vpop.f32.mrf.mxu0  ;;  %v7089_v35 = vpack.c.bf16 %v7076_v9, %v7075_v52 }
0x284b   :  { %v6882_v47 = vadd.f32 %v6881_v53, %v6836_v29 }
0x284c   :  { %v8663_v23 = vpop.f32.mrf.mxu1  ;;  %v8669_v50 = vpop.f32.mrf.mxu0 }
0x284d   :  { %v6887_v21 = vmul.f32 %v6886_v36, %v6882_v47 }
0x284f   :  { %v6892_v3 = vadd.f32 %v6891_v20, %v6887_v21 }
0x2851   :  { %v7410_v56 = vmul.f32 -1.442695, %v6892_v3 }
0x2853   :  { %8862 = vpow2.f32 %v7410_v56 }
0x2860   :  { %v8863_v27 = vpop.eup %8862 }
0x2861   :  { %v6896_v11 = vadd.f32 1.0, %v8863_v27 }
0x2863   :  { %8864 = vrcp.f32 %v6896_v11 }
0x2870   :  { %v8865_v60 = vpop.eup %8864 }
0x2871   :  { %v6899_v17 = vmul.f32 %v8865_v60, %v6892_v3 }
0x2873   :  { %v6913_v19 = vpack.c.bf16 %v6899_v17, %v6899_v17 }
0x2875   :  { %8685 = vmatmul.mubr.msk.bf16.vlgmr.msra.gmra.mxu1 %vm6059_vm14, %v6913_v19 }
0x2935   :  { %v6961_v16 = vpop.f32.mrf.mxu1 }
0x2936   :  { %v6967_v32 = vpack.c.bf16 %v6961_v16, %v6961_v16 }
0x2937   :  { %v8686_v48 = vpop.f32.mrf.mxu1 }
0x2938   :  { %v6969_v38 = vsel %vm4767_vm12, %v6967_v32, 0  ;;  %8737 = vmatprep.subr.msk.bf16.mxu0 %vm4767_vm12, %v6967_v32 }
0x2939   :  { %v6964_v2 = vpop.f32.mrf.mxu1  ;;  %8689 = vmatpush3.bf16.msra.mxu0 %v6969_v38 }
0x293a   :  { %8694 = vmatprep.subr.bf16.mxu0 %v13202_v22 }
0x293b   :  { %v8687_v40 = vpop.f32.mrf.mxu1 }
0x293c   :  { %8691 = vmatmul.mubr.msk.bf16.vlgmr.msra.gmra.mxu0 %vm4966_vm13, %v12705_v5 }
0x293d   :  { %8698 = vmatprep.mubr.msk.bf16.mxu0 %vm8901_vm4, %v13202_v22 }
0x29fc   :  { %v8692_v10 = vpop.f32.mrf.mxu0 }
0x29fd   :  { %v7014_v46 = vadd.f32 %v8692_v10, %v12714_v37  ;;  %v7087_v37 = vld [vmem:[%s12935_s8 + $0x530] sm:$0xf] }
0x29fe   :  { %v7005_v39 = vpop.f32.mrf.mxu0 }
0x29ff   :  { %v7021_v12 = vadd.f32 %v7014_v46, %v12757_v63  ;;  %v7006_v0 = vadd.f32 %v7005_v39, %v12723_v34  ;;  %v7095_v34 = vpack.c.bf16 %v7087_v37, %v7087_v37 }
0x2a00   :  { %v8693_v7 = vpop.f32.mrf.mxu0 }
0x2a01   :  { %v7024_v25 = vmax.f32 %v7021_v12, 0.0  ;;  %v7019_v54 = vadd.f32 %v7006_v0, %v12771_v45  ;;  %v7105_v45 = vsel %vm4767_vm12, %v7095_v34, 0 }
0x2a02   :  { %v7008_v26 = vpop.f32.mrf.mxu0 }
0x2a03   :  { %v7027_v49 = vpack.c.bf16 %v7024_v25, %v7024_v25  ;;  %v7009_v59 = vadd.f32 %v7008_v26, %v12725_v18  ;;  %v7022_v63 = vmax.f32 %v7019_v54, 0.0  ;;  %v7025_v18 = vld [vmem:[%s12936_s4 + $0x38] sm:$0x1] }
0x2a05   :  { %v7020_v5 = vadd.f32 %v7009_v59, %v12773_v1  ;;  %v7032_v55 = vsel %vm4767_vm12, %v7027_v49, 0  ;;  %v7085_v1 = vld [vmem:[%s12935_s8 + $0x520] sm:$0xff] }
0x2a06   :  { %8695 = vmatpush3.bf16.msra.mxu0 %v7032_v55  ;;  %v7094_v44 = vpack.c.bf16 %v7086_v33, %v7085_v1 }
0x2a07   :  { %v7023_v15 = vmax.f32 %v7020_v5, 0.0  ;;  %8696 = vmatprep.subr.bf16.mxu0 %v13202_v22 }
0x2a09   :  { %v7026_v14 = vpack.c.bf16 %v7023_v15, %v7022_v63 }
0x2a0b   :  { %8697 = vmatpush3.bf16.msra.mxu0 %v7026_v14 }
0x2a0c   :  { %8702 = vmatprep.subr.bf16.mxu0 %v13202_v22 }
0x2a0e   :  { %8699 = vmatmul.mubr.msk.bf16.vlgmr.msra.gmra.mxu0 %vm4760_vm11, %v7025_v18 }
0x2a0f   :  { %8703 = vmatpush3.bf16.msra.mxu0 %v7105_v45  ;;  %8716 = vmatprep.mubr.msk.bf16.mxu0 %vm8901_vm4, %v13202_v22 }
0x2a10   :  { %8704 = vmatprep.subr.bf16.mxu0 %v13202_v22 }
0x2a13   :  { %8705 = vmatpush3.bf16.msra.mxu0 %v7094_v44 }
0x2a14   :  { %8706 = vmatprep.subr.bf16.mxu0 %v13202_v22 }
0x2a17   :  { %8707 = vmatpush3.bf16.msra.mxu0 %v7093_v24 }
0x2a18   :  { %8708 = vmatprep.subr.bf16.mxu0 %v13202_v22 }
0x2a1b   :  { %8709 = vmatpush3.bf16.msra.mxu0 %v7092_v8 }
0x2a1c   :  { %8710 = vmatprep.subr.bf16.mxu0 %v13202_v22 }
0x2a1f   :  { %8711 = vmatpush3.bf16.msra.mxu0 %v7091_v43 }
0x2a20   :  { %8712 = vmatprep.subr.bf16.mxu0 %v13202_v22 }
0x2a23   :  { %8713 = vmatpush3.bf16.msra.mxu0 %v7090_v6 }
0x2a24   :  { %8714 = vmatprep.subr.bf16.mxu0 %v13202_v22  ;;  %v7415_v22 = vld [vmem:[%s12935_s8 + $0x540] ss:$0 sm:$0xff] }
0x2a27   :  { %8715 = vmatpush3.bf16.msra.mxu0 %v7089_v35 }
0x2ace   :  { %v7068_v53 = vpop.f32.mrf.mxu0 }
0x2acf   :  { %v7074_v42 = vmul.f32 0.1, %v7068_v53 }
0x2ad0   :  { %v8700_v28 = vpop.f32.mrf.mxu0 }
0x2ad1   :  { %v7088_v29 = vpack.c.bf16 %v7074_v42, %v7074_v42 }
0x2ad2   :  { %v7071_v36 = vpop.f32.mrf.mxu0 }
0x2ad3   :  { %8717 = vmatmul.mubr.msk.bf16.vlgmr.msra.gmra.mxu0 %vm6059_vm14, %v7088_v29 }
0x2ad4   :  { %v8701_v4 = vpop.f32.mrf.mxu0 }
0x2b93   :  { %v7141_v58 = vpop.f32.mrf.mxu0 }
0x2b94   :  { %v7142_v47 = vadd.f32 %v7415_v22, %v7141_v58 }
0x2b95   :  { %v8718_v20 = vpop.f32.mrf.mxu0 }
0x2b96   :  { %7148 = vst.msk [vmem:[%s12937_s9] sm:$0x3] %vm7147_vm15, %v7142_v47 }
0x2b97   :  { %v7144_v23 = vpop.f32.mrf.mxu0 }
0x2b99   :  { %v8719_v50 = vpop.f32.mrf.mxu0 }

</bundles_post_ra>
